<compile_context>
chip_gen: v6e
topology: v6e:2x2x1
jax: 0.10.0
libtpu: 0.0.40
codegen_flags: <defaults>
</compile_context>

<pallas_src>
import functools

import jax
import jax.numpy as jnp
from jax.experimental import pallas as pl
from jax.experimental.pallas import tpu as pltpu


# ----------------------------------------------------------------------------
# Fused Pallas kernel (one batch element per grid step)
# ----------------------------------------------------------------------------
def _ssh_fused_kernel(x_ref,
                      w1_ref, b1_ref,
                      wc1_ref, bc1_ref,
                      w2a_ref, b2a_ref,
                      w2b_ref, b2b_ref,
                      w2c_ref, b2c_ref,
                      wh_ref, bh_ref,
                      oa_ref, ob_ref, oc_ref,
                      *, H, W, C4, Ca, Cb, Cc):
    HW = H * W

    def pad1(x):
        """Zero 'same'-conv halo: (H, W, cin) -> (H+2, W+2, cin), value-only."""
        cin = x.shape[-1]
        zr = jnp.zeros((1, W, cin), x.dtype)
        x = jnp.concatenate([zr, x, zr], axis=0)          # pad rows
        zc = jnp.zeros((H + 2, 1, cin), x.dtype)
        return jnp.concatenate([zc, x, zc], axis=1)       # pad cols

    def conv3x3(xpad, w_ref, b_ref, relu):
        """3x3 stride-1 'same' conv as a single im2col matmul (K = 9*cin)."""
        cin = xpad.shape[-1]
        taps = [xpad[dy:dy + H, dx:dx + W, :].reshape(HW, cin)
                for dy in range(3) for dx in range(3)]
        patches = jnp.concatenate(taps, axis=-1)          # (HW, 9*cin)
        y = jnp.dot(patches, w_ref[...],
                    preferred_element_type=jnp.float32) + b_ref[...]
        return jnp.maximum(y, 0.0) if relu else y         # (HW, cout)

    xpad = pad1(x_ref[0])                                 # (H+2, W+2, C)

    # conv1 (C -> C/2, relu) and ctx conv1 (C -> C/4, relu) share the padded x
    c1 = conv3x3(xpad, w1_ref, b1_ref, True)              # (HW, C/2)
    t1 = conv3x3(xpad, wc1_ref, bc1_ref, True)            # (HW, C/4)

    t1p = pad1(t1.reshape(H, W, C4))
    xa = conv3x3(t1p, w2a_ref, b2a_ref, True)             # (HW, C/4)
    xb = conv3x3(t1p, w2b_ref, b2b_ref, False)            # (HW, C/4), no relu

    xbp = pad1(xb.reshape(H, W, C4))
    xc = conv3x3(xbp, w2c_ref, b2c_ref, True)             # (HW, C/4)

    # concat + ReLU + three 1x1 heads fused into one matmul
    feats = jnp.maximum(jnp.concatenate([c1, xa, xc], axis=-1), 0.0)   # (HW, C)
    heads = jnp.dot(feats, wh_ref[...],
                    preferred_element_type=jnp.float32) + bh_ref[...]  # (HW, 32)

    # transpose -> lane-dense stores (last dim HW), directly NCHW-ordered
    headsT = heads.T                                      # (Ca+Cb+Cc, HW)
    oa_ref[...] = headsT[0:Ca, :].reshape(1, Ca, HW)
    ob_ref[...] = headsT[Ca:Ca + Cb, :].reshape(1, Cb, HW)
    oc_ref[...] = headsT[Ca + Cb:Ca + Cb + Cc, :].reshape(1, Cc, HW)


# ----------------------------------------------------------------------------
# Wrapper: parameter glue + single pallas_call
# ----------------------------------------------------------------------------
def _im2col_weight(w):
    """HWIO (3, 3, Cin, Cout) -> (9*Cin, Cout), K ordered (ky, kx, cin)."""
    k0, k1, cin, cout = w.shape
    return w.reshape(k0 * k1 * cin, cout)


@jax.jit
def ssh_landmark_forward(x_nchw, params):
    N, C, H, W = x_nchw.shape
    C4 = C // 4
    HW = H * W

    # single layout op at the input boundary (NCHW -> NHWC); everything else
    # (padding, intermediates, concat, heads, output layout) lives in-kernel.
    x = jnp.transpose(x_nchw, (0, 2, 3, 1))

    def conv_wb(name):
        w, b = params[name]
        return _im2col_weight(w), b.reshape(1, -1)

    w1, b1 = conv_wb("conv1")
    wc1, bc1 = conv_wb("ctx_conv1")
    w2a, b2a = conv_wb("ctx_conv2a")
    w2b, b2b = conv_wb("ctx_conv2b")
    w2c, b2c = conv_wb("ctx_conv2c")

    # fuse the three 1x1 heads into one weight / bias
    wh = jnp.concatenate([params["head_a"][0], params["head_b"][0],
                          params["head_c"][0]], axis=1)            # (C, Ca+Cb+Cc)
    bh = jnp.concatenate([params["head_a"][1], params["head_b"][1],
                          params["head_c"][1]]).reshape(1, -1)
    Ca = params["head_a"][0].shape[1]
    Cb = params["head_b"][0].shape[1]
    Cc = params["head_c"][0].shape[1]

    kern = functools.partial(_ssh_fused_kernel, H=H, W=W, C4=C4,
                             Ca=Ca, Cb=Cb, Cc=Cc)

    def bcast_spec(a):
        nd = a.ndim
        return pl.BlockSpec(a.shape, lambda n, _nd=nd: (0,) * _nd)

    weights = (w1, b1, wc1, bc1, w2a, b2a, w2b, b2b, w2c, b2c, wh, bh)

    oa, ob, oc = pl.pallas_call(
        kern,
        out_shape=(jax.ShapeDtypeStruct((N, Ca, HW), jnp.float32),
                   jax.ShapeDtypeStruct((N, Cb, HW), jnp.float32),
                   jax.ShapeDtypeStruct((N, Cc, HW), jnp.float32)),
        grid=(N,),
        in_specs=[pl.BlockSpec((1, H, W, C), lambda n: (n, 0, 0, 0))]
                + [bcast_spec(a) for a in weights],
        out_specs=(pl.BlockSpec((1, Ca, HW), lambda n: (n, 0, 0)),
                   pl.BlockSpec((1, Cb, HW), lambda n: (n, 0, 0)),
                   pl.BlockSpec((1, Cc, HW), lambda n: (n, 0, 0))),
        compiler_params=pltpu.CompilerParams(
            dimension_semantics=("parallel",)),
    )(x, *weights)

    # outputs are already channel-major (N, Cout, H*W): reshape to NCHW is free
    return (oa.reshape(N, Ca, H, W),
            ob.reshape(N, Cb, H, W),
            oc.reshape(N, Cc, H, W))


# ----------------------------------------------------------------------------
# Parameters (deterministic, synthetic) — BN folded into conv weight/bias
# ----------------------------------------------------------------------------
def _fold_bn(w, b, gamma, beta, mean, var, eps=1e-5):
    scale = gamma / jnp.sqrt(var + eps)        # (Cout,)
    return w * scale, (b - mean) * scale + beta


def _init_conv_bn(key, cin, cout, k=3):
    ks = jax.random.split(key, 6)
    w = 0.1 * jax.random.normal(ks[0], (k, k, cin, cout), jnp.float32)
    b = 0.1 * jax.random.normal(ks[1], (cout,), jnp.float32)
    gamma = 1.0 + 0.1 * jax.random.normal(ks[2], (cout,), jnp.float32)
    beta = 0.1 * jax.random.normal(ks[3], (cout,), jnp.float32)
    mean = 0.1 * jax.random.normal(ks[4], (cout,), jnp.float32)
    var = jnp.abs(jax.random.normal(ks[5], (cout,), jnp.float32)) + 0.5
    return _fold_bn(w, b, gamma, beta, mean, var)


def _init_1x1(key, cin, cout):
    k1, k2 = jax.random.split(key)
    w = 0.1 * jax.random.normal(k1, (cin, cout), jnp.float32)
    b = 0.1 * jax.random.normal(k2, (cout,), jnp.float32)
    return w, b


def init_params(key, in_channels, out_channels=(4, 8, 20)):
    c = in_channels
    assert c % 4 == 0
    keys = jax.random.split(key, 8)
    return {
        "conv1":      _init_conv_bn(keys[0], c, c // 2),        # relu
        "ctx_conv1":  _init_conv_bn(keys[1], c, c // 4),        # relu
        "ctx_conv2a": _init_conv_bn(keys[2], c // 4, c // 4),   # relu
        "ctx_conv2b": _init_conv_bn(keys[3], c // 4, c // 4),   # no relu
        "ctx_conv2c": _init_conv_bn(keys[4], c // 4, c // 4),   # relu
        "head_a":     _init_1x1(keys[5], c, out_channels[0]),
        "head_b":     _init_1x1(keys[6], c, out_channels[1]),
        "head_c":     _init_1x1(keys[7], c, out_channels[2]),
    }


# ----------------------------------------------------------------------------
# Pure-JAX reference (correctness check only)
# ----------------------------------------------------------------------------
def _ref_forward(x_nchw, params):
    x = jnp.transpose(x_nchw, (0, 2, 3, 1))

    def conv(x, wb, relu):
        w, b = wb
        y = jax.lax.conv_general_dilated(
            x, w, (1, 1), ((1, 1), (1, 1)),
            dimension_numbers=("NHWC", "HWIO", "NHWC")) + b
        return jnp.maximum(y, 0.0) if relu else y

    c1 = conv(x, params["conv1"], True)
    t1 = conv(x, params["ctx_conv1"], True)
    xa = conv(t1, params["ctx_conv2a"], True)
    xb = conv(t1, params["ctx_conv2b"], False)
    xc = conv(xb, params["ctx_conv2c"], True)
    cat = jnp.maximum(jnp.concatenate([c1, xa, xc], axis=-1), 0.0)

    def c1x1(x, wb):
        w, b = wb
        return jnp.einsum("nhwc,cd->nhwd", x, w) + b

    outs = (c1x1(cat, params["head_a"]),
            c1x1(cat, params["head_b"]),
            c1x1(cat, params["head_c"]))
    return tuple(jnp.transpose(o, (0, 3, 1, 2)) for o in outs)


if __name__ == "__main__":
    import numpy as np

    key = jax.random.PRNGKey(0)
    kx, kp = jax.random.split(key)

    # small shapes consistent with the module: N=2, C=16 (divisible by 4), 16x16
    N, C, H, W = 2, 16, 16, 16
    x = jax.random.normal(kx, (N, C, H, W), jnp.float32)   # NCHW, like PyTorch
    params = init_params(kp, C, out_channels=(4, 8, 20))

    outs = jax.block_until_ready(ssh_landmark_forward(x, params))
    refs = jax.block_until_ready(_ref_forward(x, params))

    expected = [(N, 4, H, W), (N, 8, H, W), (N, 20, H, W)]
    for o, r, s in zip(outs, refs, expected):
        assert o.shape == s, (o.shape, s)
        np.testing.assert_allclose(np.asarray(o), np.asarray(r),
                                   rtol=1e-3, atol=1e-3)

    print("KERNEL_OK")
</pallas_src>

<mosaic_0001>
module attributes {stable_mosaic.version = 11 : i64} {
  func.func @_ssh_fused_kernel(%arg0: i32, %arg1: memref<1x16x16x16xf32, #tpu.memory_space<vmem>>, %arg2: memref<144x8xf32, #tpu.memory_space<vmem>>, %arg3: memref<1x8xf32, #tpu.memory_space<vmem>>, %arg4: memref<144x4xf32, #tpu.memory_space<vmem>>, %arg5: memref<1x4xf32, #tpu.memory_space<vmem>>, %arg6: memref<36x4xf32, #tpu.memory_space<vmem>>, %arg7: memref<1x4xf32, #tpu.memory_space<vmem>>, %arg8: memref<36x4xf32, #tpu.memory_space<vmem>>, %arg9: memref<1x4xf32, #tpu.memory_space<vmem>>, %arg10: memref<36x4xf32, #tpu.memory_space<vmem>>, %arg11: memref<1x4xf32, #tpu.memory_space<vmem>>, %arg12: memref<16x32xf32, #tpu.memory_space<vmem>>, %arg13: memref<1x32xf32, #tpu.memory_space<vmem>>, %arg14: memref<1x4x256xf32, #tpu.memory_space<vmem>>, %arg15: memref<1x8x256xf32, #tpu.memory_space<vmem>>, %arg16: memref<1x20x256xf32, #tpu.memory_space<vmem>>) attributes {dimension_semantics = [#tpu.dimension_semantics<parallel>], iteration_bounds = array<i64: 2>, scalar_prefetch = 0 : i64, scratch_operands = 0 : i64, tpu.core_type = #tpu.core_type<tc>, window_params = [{transform_indices = @transform_0, window_bounds = array<i64: 1, 16, 16, 16>}, {pipeline_mode = #tpu.pipeline_mode<synchronous>, transform_indices = @transform_1, window_bounds = array<i64: 144, 8>}, {pipeline_mode = #tpu.pipeline_mode<synchronous>, transform_indices = @transform_2, window_bounds = array<i64: 1, 8>}, {pipeline_mode = #tpu.pipeline_mode<synchronous>, transform_indices = @transform_3, window_bounds = array<i64: 144, 4>}, {pipeline_mode = #tpu.pipeline_mode<synchronous>, transform_indices = @transform_4, window_bounds = array<i64: 1, 4>}, {pipeline_mode = #tpu.pipeline_mode<synchronous>, transform_indices = @transform_5, window_bounds = array<i64: 36, 4>}, {pipeline_mode = #tpu.pipeline_mode<synchronous>, transform_indices = @transform_6, window_bounds = array<i64: 1, 4>}, {pipeline_mode = #tpu.pipeline_mode<synchronous>, transform_indices = @transform_7, window_bounds = array<i64: 36, 4>}, {pipeline_mode = #tpu.pipeline_mode<synchronous>, transform_indices = @transform_8, window_bounds = array<i64: 1, 4>}, {pipeline_mode = #tpu.pipeline_mode<synchronous>, transform_indices = @transform_9, window_bounds = array<i64: 36, 4>}, {pipeline_mode = #tpu.pipeline_mode<synchronous>, transform_indices = @transform_10, window_bounds = array<i64: 1, 4>}, {pipeline_mode = #tpu.pipeline_mode<synchronous>, transform_indices = @transform_11, window_bounds = array<i64: 16, 32>}, {pipeline_mode = #tpu.pipeline_mode<synchronous>, transform_indices = @transform_12, window_bounds = array<i64: 1, 32>}, {transform_indices = @transform_13, window_bounds = array<i64: 1, 4, 256>}, {transform_indices = @transform_14, window_bounds = array<i64: 1, 8, 256>}, {transform_indices = @transform_15, window_bounds = array<i64: 1, 20, 256>}]} {
    %c0 = arith.constant 0 : index
    %c0_0 = arith.constant 0 : index
    %c0_1 = arith.constant 0 : index
    %c0_2 = arith.constant 0 : index
    %0 = vector.load %arg1[%c0, %c0_0, %c0_1, %c0_2] : memref<1x16x16x16xf32, #tpu.memory_space<vmem>>, vector<1x16x16x16xf32>
    %1 = vector.shape_cast %0 : vector<1x16x16x16xf32> to vector<16x16x16xf32>
    %cst = arith.constant 0.000000e+00 : f32
    %2 = vector.broadcast %cst : f32 to vector<1x16x16xf32>
    %3 = tpu.concatenate %2, %1, %2 in 0 : vector<1x16x16xf32>, vector<16x16x16xf32>, vector<1x16x16xf32> -> vector<18x16x16xf32>
    %cst_3 = arith.constant 0.000000e+00 : f32
    %4 = vector.broadcast %cst_3 : f32 to vector<18x1x16xf32>
    %5 = tpu.concatenate %4, %3, %4 in 1 : vector<18x1x16xf32>, vector<18x16x16xf32>, vector<18x1x16xf32> -> vector<18x18x16xf32>
    %6 = vector.extract_strided_slice %5 {offsets = [0, 0, 0], sizes = [16, 16, 16], strides = [1, 1, 1]} : vector<18x18x16xf32> to vector<16x16x16xf32>
    %7 = vector.shape_cast %6 : vector<16x16x16xf32> to vector<256x16xf32>
    %8 = vector.extract_strided_slice %5 {offsets = [0, 1, 0], sizes = [16, 16, 16], strides = [1, 1, 1]} : vector<18x18x16xf32> to vector<16x16x16xf32>
    %9 = vector.shape_cast %8 : vector<16x16x16xf32> to vector<256x16xf32>
    %10 = vector.extract_strided_slice %5 {offsets = [0, 2, 0], sizes = [16, 16, 16], strides = [1, 1, 1]} : vector<18x18x16xf32> to vector<16x16x16xf32>
    %11 = vector.shape_cast %10 : vector<16x16x16xf32> to vector<256x16xf32>
    %12 = vector.extract_strided_slice %5 {offsets = [1, 0, 0], sizes = [16, 16, 16], strides = [1, 1, 1]} : vector<18x18x16xf32> to vector<16x16x16xf32>
    %13 = vector.shape_cast %12 : vector<16x16x16xf32> to vector<256x16xf32>
    %14 = vector.extract_strided_slice %5 {offsets = [1, 1, 0], sizes = [16, 16, 16], strides = [1, 1, 1]} : vector<18x18x16xf32> to vector<16x16x16xf32>
    %15 = vector.shape_cast %14 : vector<16x16x16xf32> to vector<256x16xf32>
    %16 = vector.extract_strided_slice %5 {offsets = [1, 2, 0], sizes = [16, 16, 16], strides = [1, 1, 1]} : vector<18x18x16xf32> to vector<16x16x16xf32>
    %17 = vector.shape_cast %16 : vector<16x16x16xf32> to vector<256x16xf32>
    %18 = vector.extract_strided_slice %5 {offsets = [2, 0, 0], sizes = [16, 16, 16], strides = [1, 1, 1]} : vector<18x18x16xf32> to vector<16x16x16xf32>
    %19 = vector.shape_cast %18 : vector<16x16x16xf32> to vector<256x16xf32>
    %20 = vector.extract_strided_slice %5 {offsets = [2, 1, 0], sizes = [16, 16, 16], strides = [1, 1, 1]} : vector<18x18x16xf32> to vector<16x16x16xf32>
    %21 = vector.shape_cast %20 : vector<16x16x16xf32> to vector<256x16xf32>
    %22 = vector.extract_strided_slice %5 {offsets = [2, 2, 0], sizes = [16, 16, 16], strides = [1, 1, 1]} : vector<18x18x16xf32> to vector<16x16x16xf32>
    %23 = vector.shape_cast %22 : vector<16x16x16xf32> to vector<256x16xf32>
    %24 = tpu.concatenate %7, %9, %11, %13, %15, %17, %19, %21, %23 in 1 : vector<256x16xf32>, vector<256x16xf32>, vector<256x16xf32>, vector<256x16xf32>, vector<256x16xf32>, vector<256x16xf32>, vector<256x16xf32>, vector<256x16xf32>, vector<256x16xf32> -> vector<256x144xf32>
    %c0_4 = arith.constant 0 : index
    %c0_5 = arith.constant 0 : index
    %25 = vector.load %arg2[%c0_4, %c0_5] : memref<144x8xf32, #tpu.memory_space<vmem>>, vector<144x8xf32>
    %cst_6 = arith.constant dense<0.000000e+00> : vector<256x8xf32>
    %26 = tpu.matmul %24, %25, %cst_6 {dimension_numbers = #tpu.dot_dimension_numbers<[1], [0], [0], [1], [0, 0, 1, 1], [], []>} : vector<256x144xf32>, vector<144x8xf32>, vector<256x8xf32> -> vector<256x8xf32>
    %c0_7 = arith.constant 0 : index
    %c0_8 = arith.constant 0 : index
    %27 = vector.load %arg3[%c0_7, %c0_8] : memref<1x8xf32, #tpu.memory_space<vmem>>, vector<1x8xf32>
    %28 = vector.broadcast %27 : vector<1x8xf32> to vector<256x8xf32>
    %29 = arith.addf %26, %28 : vector<256x8xf32>
    %cst_9 = arith.constant 0.000000e+00 : f32
    %30 = vector.broadcast %cst_9 : f32 to vector<256x8xf32>
    %31 = arith.maximumf %29, %30 : vector<256x8xf32>
    %32 = vector.extract_strided_slice %5 {offsets = [0, 0, 0], sizes = [16, 16, 16], strides = [1, 1, 1]} : vector<18x18x16xf32> to vector<16x16x16xf32>
    %33 = vector.shape_cast %32 : vector<16x16x16xf32> to vector<256x16xf32>
    %34 = vector.extract_strided_slice %5 {offsets = [0, 1, 0], sizes = [16, 16, 16], strides = [1, 1, 1]} : vector<18x18x16xf32> to vector<16x16x16xf32>
    %35 = vector.shape_cast %34 : vector<16x16x16xf32> to vector<256x16xf32>
    %36 = vector.extract_strided_slice %5 {offsets = [0, 2, 0], sizes = [16, 16, 16], strides = [1, 1, 1]} : vector<18x18x16xf32> to vector<16x16x16xf32>
    %37 = vector.shape_cast %36 : vector<16x16x16xf32> to vector<256x16xf32>
    %38 = vector.extract_strided_slice %5 {offsets = [1, 0, 0], sizes = [16, 16, 16], strides = [1, 1, 1]} : vector<18x18x16xf32> to vector<16x16x16xf32>
    %39 = vector.shape_cast %38 : vector<16x16x16xf32> to vector<256x16xf32>
    %40 = vector.extract_strided_slice %5 {offsets = [1, 1, 0], sizes = [16, 16, 16], strides = [1, 1, 1]} : vector<18x18x16xf32> to vector<16x16x16xf32>
    %41 = vector.shape_cast %40 : vector<16x16x16xf32> to vector<256x16xf32>
    %42 = vector.extract_strided_slice %5 {offsets = [1, 2, 0], sizes = [16, 16, 16], strides = [1, 1, 1]} : vector<18x18x16xf32> to vector<16x16x16xf32>
    %43 = vector.shape_cast %42 : vector<16x16x16xf32> to vector<256x16xf32>
    %44 = vector.extract_strided_slice %5 {offsets = [2, 0, 0], sizes = [16, 16, 16], strides = [1, 1, 1]} : vector<18x18x16xf32> to vector<16x16x16xf32>
    %45 = vector.shape_cast %44 : vector<16x16x16xf32> to vector<256x16xf32>
    %46 = vector.extract_strided_slice %5 {offsets = [2, 1, 0], sizes = [16, 16, 16], strides = [1, 1, 1]} : vector<18x18x16xf32> to vector<16x16x16xf32>
    %47 = vector.shape_cast %46 : vector<16x16x16xf32> to vector<256x16xf32>
    %48 = vector.extract_strided_slice %5 {offsets = [2, 2, 0], sizes = [16, 16, 16], strides = [1, 1, 1]} : vector<18x18x16xf32> to vector<16x16x16xf32>
    %49 = vector.shape_cast %48 : vector<16x16x16xf32> to vector<256x16xf32>
    %50 = tpu.concatenate %33, %35, %37, %39, %41, %43, %45, %47, %49 in 1 : vector<256x16xf32>, vector<256x16xf32>, vector<256x16xf32>, vector<256x16xf32>, vector<256x16xf32>, vector<256x16xf32>, vector<256x16xf32>, vector<256x16xf32>, vector<256x16xf32> -> vector<256x144xf32>
    %c0_10 = arith.constant 0 : index
    %c0_11 = arith.constant 0 : index
    %51 = vector.load %arg4[%c0_10, %c0_11] : memref<144x4xf32, #tpu.memory_space<vmem>>, vector<144x4xf32>
    %cst_12 = arith.constant dense<0.000000e+00> : vector<256x4xf32>
    %52 = tpu.matmul %50, %51, %cst_12 {dimension_numbers = #tpu.dot_dimension_numbers<[1], [0], [0], [1], [0, 0, 1, 1], [], []>} : vector<256x144xf32>, vector<144x4xf32>, vector<256x4xf32> -> vector<256x4xf32>
    %c0_13 = arith.constant 0 : index
    %c0_14 = arith.constant 0 : index
    %53 = vector.load %arg5[%c0_13, %c0_14] : memref<1x4xf32, #tpu.memory_space<vmem>>, vector<1x4xf32>
    %54 = vector.broadcast %53 : vector<1x4xf32> to vector<256x4xf32>
    %55 = arith.addf %52, %54 : vector<256x4xf32>
    %cst_15 = arith.constant 0.000000e+00 : f32
    %56 = vector.broadcast %cst_15 : f32 to vector<256x4xf32>
    %57 = arith.maximumf %55, %56 : vector<256x4xf32>
    %58 = vector.shape_cast %57 : vector<256x4xf32> to vector<16x16x4xf32>
    %cst_16 = arith.constant 0.000000e+00 : f32
    %59 = vector.broadcast %cst_16 : f32 to vector<1x16x4xf32>
    %60 = tpu.concatenate %59, %58, %59 in 0 : vector<1x16x4xf32>, vector<16x16x4xf32>, vector<1x16x4xf32> -> vector<18x16x4xf32>
    %cst_17 = arith.constant 0.000000e+00 : f32
    %61 = vector.broadcast %cst_17 : f32 to vector<18x1x4xf32>
    %62 = tpu.concatenate %61, %60, %61 in 1 : vector<18x1x4xf32>, vector<18x16x4xf32>, vector<18x1x4xf32> -> vector<18x18x4xf32>
    %63 = vector.extract_strided_slice %62 {offsets = [0, 0, 0], sizes = [16, 16, 4], strides = [1, 1, 1]} : vector<18x18x4xf32> to vector<16x16x4xf32>
    %64 = vector.shape_cast %63 : vector<16x16x4xf32> to vector<256x4xf32>
    %65 = vector.extract_strided_slice %62 {offsets = [0, 1, 0], sizes = [16, 16, 4], strides = [1, 1, 1]} : vector<18x18x4xf32> to vector<16x16x4xf32>
    %66 = vector.shape_cast %65 : vector<16x16x4xf32> to vector<256x4xf32>
    %67 = vector.extract_strided_slice %62 {offsets = [0, 2, 0], sizes = [16, 16, 4], strides = [1, 1, 1]} : vector<18x18x4xf32> to vector<16x16x4xf32>
    %68 = vector.shape_cast %67 : vector<16x16x4xf32> to vector<256x4xf32>
    %69 = vector.extract_strided_slice %62 {offsets = [1, 0, 0], sizes = [16, 16, 4], strides = [1, 1, 1]} : vector<18x18x4xf32> to vector<16x16x4xf32>
    %70 = vector.shape_cast %69 : vector<16x16x4xf32> to vector<256x4xf32>
    %71 = vector.extract_strided_slice %62 {offsets = [1, 1, 0], sizes = [16, 16, 4], strides = [1, 1, 1]} : vector<18x18x4xf32> to vector<16x16x4xf32>
    %72 = vector.shape_cast %71 : vector<16x16x4xf32> to vector<256x4xf32>
    %73 = vector.extract_strided_slice %62 {offsets = [1, 2, 0], sizes = [16, 16, 4], strides = [1, 1, 1]} : vector<18x18x4xf32> to vector<16x16x4xf32>
    %74 = vector.shape_cast %73 : vector<16x16x4xf32> to vector<256x4xf32>
    %75 = vector.extract_strided_slice %62 {offsets = [2, 0, 0], sizes = [16, 16, 4], strides = [1, 1, 1]} : vector<18x18x4xf32> to vector<16x16x4xf32>
    %76 = vector.shape_cast %75 : vector<16x16x4xf32> to vector<256x4xf32>
    %77 = vector.extract_strided_slice %62 {offsets = [2, 1, 0], sizes = [16, 16, 4], strides = [1, 1, 1]} : vector<18x18x4xf32> to vector<16x16x4xf32>
    %78 = vector.shape_cast %77 : vector<16x16x4xf32> to vector<256x4xf32>
    %79 = vector.extract_strided_slice %62 {offsets = [2, 2, 0], sizes = [16, 16, 4], strides = [1, 1, 1]} : vector<18x18x4xf32> to vector<16x16x4xf32>
    %80 = vector.shape_cast %79 : vector<16x16x4xf32> to vector<256x4xf32>
    %81 = tpu.concatenate %64, %66, %68, %70, %72, %74, %76, %78, %80 in 1 : vector<256x4xf32>, vector<256x4xf32>, vector<256x4xf32>, vector<256x4xf32>, vector<256x4xf32>, vector<256x4xf32>, vector<256x4xf32>, vector<256x4xf32>, vector<256x4xf32> -> vector<256x36xf32>
    %c0_18 = arith.constant 0 : index
    %c0_19 = arith.constant 0 : index
    %82 = vector.load %arg6[%c0_18, %c0_19] : memref<36x4xf32, #tpu.memory_space<vmem>>, vector<36x4xf32>
    %cst_20 = arith.constant dense<0.000000e+00> : vector<256x4xf32>
    %83 = tpu.matmul %81, %82, %cst_20 {dimension_numbers = #tpu.dot_dimension_numbers<[1], [0], [0], [1], [0, 0, 1, 1], [], []>} : vector<256x36xf32>, vector<36x4xf32>, vector<256x4xf32> -> vector<256x4xf32>
    %c0_21 = arith.constant 0 : index
    %c0_22 = arith.constant 0 : index
    %84 = vector.load %arg7[%c0_21, %c0_22] : memref<1x4xf32, #tpu.memory_space<vmem>>, vector<1x4xf32>
    %85 = vector.broadcast %84 : vector<1x4xf32> to vector<256x4xf32>
    %86 = arith.addf %83, %85 : vector<256x4xf32>
    %cst_23 = arith.constant 0.000000e+00 : f32
    %87 = vector.broadcast %cst_23 : f32 to vector<256x4xf32>
    %88 = arith.maximumf %86, %87 : vector<256x4xf32>
    %89 = vector.extract_strided_slice %62 {offsets = [0, 0, 0], sizes = [16, 16, 4], strides = [1, 1, 1]} : vector<18x18x4xf32> to vector<16x16x4xf32>
    %90 = vector.shape_cast %89 : vector<16x16x4xf32> to vector<256x4xf32>
    %91 = vector.extract_strided_slice %62 {offsets = [0, 1, 0], sizes = [16, 16, 4], strides = [1, 1, 1]} : vector<18x18x4xf32> to vector<16x16x4xf32>
    %92 = vector.shape_cast %91 : vector<16x16x4xf32> to vector<256x4xf32>
    %93 = vector.extract_strided_slice %62 {offsets = [0, 2, 0], sizes = [16, 16, 4], strides = [1, 1, 1]} : vector<18x18x4xf32> to vector<16x16x4xf32>
    %94 = vector.shape_cast %93 : vector<16x16x4xf32> to vector<256x4xf32>
    %95 = vector.extract_strided_slice %62 {offsets = [1, 0, 0], sizes = [16, 16, 4], strides = [1, 1, 1]} : vector<18x18x4xf32> to vector<16x16x4xf32>
    %96 = vector.shape_cast %95 : vector<16x16x4xf32> to vector<256x4xf32>
    %97 = vector.extract_strided_slice %62 {offsets = [1, 1, 0], sizes = [16, 16, 4], strides = [1, 1, 1]} : vector<18x18x4xf32> to vector<16x16x4xf32>
    %98 = vector.shape_cast %97 : vector<16x16x4xf32> to vector<256x4xf32>
    %99 = vector.extract_strided_slice %62 {offsets = [1, 2, 0], sizes = [16, 16, 4], strides = [1, 1, 1]} : vector<18x18x4xf32> to vector<16x16x4xf32>
    %100 = vector.shape_cast %99 : vector<16x16x4xf32> to vector<256x4xf32>
    %101 = vector.extract_strided_slice %62 {offsets = [2, 0, 0], sizes = [16, 16, 4], strides = [1, 1, 1]} : vector<18x18x4xf32> to vector<16x16x4xf32>
    %102 = vector.shape_cast %101 : vector<16x16x4xf32> to vector<256x4xf32>
    %103 = vector.extract_strided_slice %62 {offsets = [2, 1, 0], sizes = [16, 16, 4], strides = [1, 1, 1]} : vector<18x18x4xf32> to vector<16x16x4xf32>
    %104 = vector.shape_cast %103 : vector<16x16x4xf32> to vector<256x4xf32>
    %105 = vector.extract_strided_slice %62 {offsets = [2, 2, 0], sizes = [16, 16, 4], strides = [1, 1, 1]} : vector<18x18x4xf32> to vector<16x16x4xf32>
    %106 = vector.shape_cast %105 : vector<16x16x4xf32> to vector<256x4xf32>
    %107 = tpu.concatenate %90, %92, %94, %96, %98, %100, %102, %104, %106 in 1 : vector<256x4xf32>, vector<256x4xf32>, vector<256x4xf32>, vector<256x4xf32>, vector<256x4xf32>, vector<256x4xf32>, vector<256x4xf32>, vector<256x4xf32>, vector<256x4xf32> -> vector<256x36xf32>
    %c0_24 = arith.constant 0 : index
    %c0_25 = arith.constant 0 : index
    %108 = vector.load %arg8[%c0_24, %c0_25] : memref<36x4xf32, #tpu.memory_space<vmem>>, vector<36x4xf32>
    %cst_26 = arith.constant dense<0.000000e+00> : vector<256x4xf32>
    %109 = tpu.matmul %107, %108, %cst_26 {dimension_numbers = #tpu.dot_dimension_numbers<[1], [0], [0], [1], [0, 0, 1, 1], [], []>} : vector<256x36xf32>, vector<36x4xf32>, vector<256x4xf32> -> vector<256x4xf32>
    %c0_27 = arith.constant 0 : index
    %c0_28 = arith.constant 0 : index
    %110 = vector.load %arg9[%c0_27, %c0_28] : memref<1x4xf32, #tpu.memory_space<vmem>>, vector<1x4xf32>
    %111 = vector.broadcast %110 : vector<1x4xf32> to vector<256x4xf32>
    %112 = arith.addf %109, %111 : vector<256x4xf32>
    %113 = vector.shape_cast %112 : vector<256x4xf32> to vector<16x16x4xf32>
    %cst_29 = arith.constant 0.000000e+00 : f32
    %114 = vector.broadcast %cst_29 : f32 to vector<1x16x4xf32>
    %115 = tpu.concatenate %114, %113, %114 in 0 : vector<1x16x4xf32>, vector<16x16x4xf32>, vector<1x16x4xf32> -> vector<18x16x4xf32>
    %cst_30 = arith.constant 0.000000e+00 : f32
    %116 = vector.broadcast %cst_30 : f32 to vector<18x1x4xf32>
    %117 = tpu.concatenate %116, %115, %116 in 1 : vector<18x1x4xf32>, vector<18x16x4xf32>, vector<18x1x4xf32> -> vector<18x18x4xf32>
    %118 = vector.extract_strided_slice %117 {offsets = [0, 0, 0], sizes = [16, 16, 4], strides = [1, 1, 1]} : vector<18x18x4xf32> to vector<16x16x4xf32>
    %119 = vector.shape_cast %118 : vector<16x16x4xf32> to vector<256x4xf32>
    %120 = vector.extract_strided_slice %117 {offsets = [0, 1, 0], sizes = [16, 16, 4], strides = [1, 1, 1]} : vector<18x18x4xf32> to vector<16x16x4xf32>
    %121 = vector.shape_cast %120 : vector<16x16x4xf32> to vector<256x4xf32>
    %122 = vector.extract_strided_slice %117 {offsets = [0, 2, 0], sizes = [16, 16, 4], strides = [1, 1, 1]} : vector<18x18x4xf32> to vector<16x16x4xf32>
    %123 = vector.shape_cast %122 : vector<16x16x4xf32> to vector<256x4xf32>
    %124 = vector.extract_strided_slice %117 {offsets = [1, 0, 0], sizes = [16, 16, 4], strides = [1, 1, 1]} : vector<18x18x4xf32> to vector<16x16x4xf32>
    %125 = vector.shape_cast %124 : vector<16x16x4xf32> to vector<256x4xf32>
    %126 = vector.extract_strided_slice %117 {offsets = [1, 1, 0], sizes = [16, 16, 4], strides = [1, 1, 1]} : vector<18x18x4xf32> to vector<16x16x4xf32>
    %127 = vector.shape_cast %126 : vector<16x16x4xf32> to vector<256x4xf32>
    %128 = vector.extract_strided_slice %117 {offsets = [1, 2, 0], sizes = [16, 16, 4], strides = [1, 1, 1]} : vector<18x18x4xf32> to vector<16x16x4xf32>
    %129 = vector.shape_cast %128 : vector<16x16x4xf32> to vector<256x4xf32>
    %130 = vector.extract_strided_slice %117 {offsets = [2, 0, 0], sizes = [16, 16, 4], strides = [1, 1, 1]} : vector<18x18x4xf32> to vector<16x16x4xf32>
    %131 = vector.shape_cast %130 : vector<16x16x4xf32> to vector<256x4xf32>
    %132 = vector.extract_strided_slice %117 {offsets = [2, 1, 0], sizes = [16, 16, 4], strides = [1, 1, 1]} : vector<18x18x4xf32> to vector<16x16x4xf32>
    %133 = vector.shape_cast %132 : vector<16x16x4xf32> to vector<256x4xf32>
    %134 = vector.extract_strided_slice %117 {offsets = [2, 2, 0], sizes = [16, 16, 4], strides = [1, 1, 1]} : vector<18x18x4xf32> to vector<16x16x4xf32>
    %135 = vector.shape_cast %134 : vector<16x16x4xf32> to vector<256x4xf32>
    %136 = tpu.concatenate %119, %121, %123, %125, %127, %129, %131, %133, %135 in 1 : vector<256x4xf32>, vector<256x4xf32>, vector<256x4xf32>, vector<256x4xf32>, vector<256x4xf32>, vector<256x4xf32>, vector<256x4xf32>, vector<256x4xf32>, vector<256x4xf32> -> vector<256x36xf32>
    %c0_31 = arith.constant 0 : index
    %c0_32 = arith.constant 0 : index
    %137 = vector.load %arg10[%c0_31, %c0_32] : memref<36x4xf32, #tpu.memory_space<vmem>>, vector<36x4xf32>
    %cst_33 = arith.constant dense<0.000000e+00> : vector<256x4xf32>
    %138 = tpu.matmul %136, %137, %cst_33 {dimension_numbers = #tpu.dot_dimension_numbers<[1], [0], [0], [1], [0, 0, 1, 1], [], []>} : vector<256x36xf32>, vector<36x4xf32>, vector<256x4xf32> -> vector<256x4xf32>
    %c0_34 = arith.constant 0 : index
    %c0_35 = arith.constant 0 : index
    %139 = vector.load %arg11[%c0_34, %c0_35] : memref<1x4xf32, #tpu.memory_space<vmem>>, vector<1x4xf32>
    %140 = vector.broadcast %139 : vector<1x4xf32> to vector<256x4xf32>
    %141 = arith.addf %138, %140 : vector<256x4xf32>
    %cst_36 = arith.constant 0.000000e+00 : f32
    %142 = vector.broadcast %cst_36 : f32 to vector<256x4xf32>
    %143 = arith.maximumf %141, %142 : vector<256x4xf32>
    %144 = tpu.concatenate %31, %88, %143 in 1 : vector<256x8xf32>, vector<256x4xf32>, vector<256x4xf32> -> vector<256x16xf32>
    %cst_37 = arith.constant 0.000000e+00 : f32
    %145 = vector.broadcast %cst_37 : f32 to vector<256x16xf32>
    %146 = arith.maximumf %144, %145 : vector<256x16xf32>
    %c0_38 = arith.constant 0 : index
    %c0_39 = arith.constant 0 : index
    %147 = vector.load %arg12[%c0_38, %c0_39] : memref<16x32xf32, #tpu.memory_space<vmem>>, vector<16x32xf32>
    %cst_40 = arith.constant dense<0.000000e+00> : vector<256x32xf32>
    %148 = tpu.matmul %146, %147, %cst_40 {dimension_numbers = #tpu.dot_dimension_numbers<[1], [0], [0], [1], [0, 0, 1, 1], [], []>} : vector<256x16xf32>, vector<16x32xf32>, vector<256x32xf32> -> vector<256x32xf32>
    %c0_41 = arith.constant 0 : index
    %c0_42 = arith.constant 0 : index
    %149 = vector.load %arg13[%c0_41, %c0_42] : memref<1x32xf32, #tpu.memory_space<vmem>>, vector<1x32xf32>
    %150 = vector.broadcast %149 : vector<1x32xf32> to vector<256x32xf32>
    %151 = arith.addf %148, %150 : vector<256x32xf32>
    %152 = tpu.transpose %151, [1, 0] : vector<256x32xf32> -> vector<32x256xf32>
    %153 = vector.extract_strided_slice %152 {offsets = [0, 0], sizes = [4, 256], strides = [1, 1]} : vector<32x256xf32> to vector<4x256xf32>
    %154 = vector.shape_cast %153 : vector<4x256xf32> to vector<1x4x256xf32>
    %c0_43 = arith.constant 0 : index
    %c0_44 = arith.constant 0 : index
    %c0_45 = arith.constant 0 : index
    %155 = vector.load %arg14[%c0_43, %c0_44, %c0_45] : memref<1x4x256xf32, #tpu.memory_space<vmem>>, vector<1x4x256xf32>
    tpu.vector_store %arg14[%c0_43, %c0_44, %c0_45], %154 {strides = array<i32>} : memref<1x4x256xf32, #tpu.memory_space<vmem>>, vector<1x4x256xf32>,
    %156 = vector.extract_strided_slice %152 {offsets = [4, 0], sizes = [8, 256], strides = [1, 1]} : vector<32x256xf32> to vector<8x256xf32>
    %157 = vector.shape_cast %156 : vector<8x256xf32> to vector<1x8x256xf32>
    %c0_46 = arith.constant 0 : index
    %c0_47 = arith.constant 0 : index
    %c0_48 = arith.constant 0 : index
    %158 = vector.load %arg15[%c0_46, %c0_47, %c0_48] : memref<1x8x256xf32, #tpu.memory_space<vmem>>, vector<1x8x256xf32>
    tpu.vector_store %arg15[%c0_46, %c0_47, %c0_48], %157 {strides = array<i32>} : memref<1x8x256xf32, #tpu.memory_space<vmem>>, vector<1x8x256xf32>,
    %159 = vector.extract_strided_slice %152 {offsets = [12, 0], sizes = [20, 256], strides = [1, 1]} : vector<32x256xf32> to vector<20x256xf32>
    %160 = vector.shape_cast %159 : vector<20x256xf32> to vector<1x20x256xf32>
    %c0_49 = arith.constant 0 : index
    %c0_50 = arith.constant 0 : index
    %c0_51 = arith.constant 0 : index
    %161 = vector.load %arg16[%c0_49, %c0_50, %c0_51] : memref<1x20x256xf32, #tpu.memory_space<vmem>>, vector<1x20x256xf32>
    tpu.vector_store %arg16[%c0_49, %c0_50, %c0_51], %160 {strides = array<i32>} : memref<1x20x256xf32, #tpu.memory_space<vmem>>, vector<1x20x256xf32>,
    return
  }
  func.func @transform_0(%arg0: i32) -> (i32, i32, i32, i32) {
    %c0_i32 = arith.constant 0 : i32
    %c0_i32_0 = arith.constant 0 : i32
    %c0_i32_1 = arith.constant 0 : i32
    %c0_i32_2 = arith.constant 0 : i32
    return %arg0, %c0_i32, %c0_i32_0, %c0_i32_1 : i32, i32, i32, i32
  }
  func.func @transform_1(%arg0: i32) -> (i32, i32) {
    %c0_i32 = arith.constant 0 : i32
    %c0_i32_0 = arith.constant 0 : i32
    %c0_i32_1 = arith.constant 0 : i32
    return %c0_i32, %c0_i32_0 : i32, i32
  }
  func.func @transform_2(%arg0: i32) -> (i32, i32) {
    %c0_i32 = arith.constant 0 : i32
    %c0_i32_0 = arith.constant 0 : i32
    %c0_i32_1 = arith.constant 0 : i32
    return %c0_i32, %c0_i32_0 : i32, i32
  }
  func.func @transform_3(%arg0: i32) -> (i32, i32) {
    %c0_i32 = arith.constant 0 : i32
    %c0_i32_0 = arith.constant 0 : i32
    %c0_i32_1 = arith.constant 0 : i32
    return %c0_i32, %c0_i32_0 : i32, i32
  }
  func.func @transform_4(%arg0: i32) -> (i32, i32) {
    %c0_i32 = arith.constant 0 : i32
    %c0_i32_0 = arith.constant 0 : i32
    %c0_i32_1 = arith.constant 0 : i32
    return %c0_i32, %c0_i32_0 : i32, i32
  }
  func.func @transform_5(%arg0: i32) -> (i32, i32) {
    %c0_i32 = arith.constant 0 : i32
    %c0_i32_0 = arith.constant 0 : i32
    %c0_i32_1 = arith.constant 0 : i32
    return %c0_i32, %c0_i32_0 : i32, i32
  }
  func.func @transform_6(%arg0: i32) -> (i32, i32) {
    %c0_i32 = arith.constant 0 : i32
    %c0_i32_0 = arith.constant 0 : i32
    %c0_i32_1 = arith.constant 0 : i32
    return %c0_i32, %c0_i32_0 : i32, i32
  }
  func.func @transform_7(%arg0: i32) -> (i32, i32) {
    %c0_i32 = arith.constant 0 : i32
    %c0_i32_0 = arith.constant 0 : i32
    %c0_i32_1 = arith.constant 0 : i32
    return %c0_i32, %c0_i32_0 : i32, i32
  }
  func.func @transform_8(%arg0: i32) -> (i32, i32) {
    %c0_i32 = arith.constant 0 : i32
    %c0_i32_0 = arith.constant 0 : i32
    %c0_i32_1 = arith.constant 0 : i32
    return %c0_i32, %c0_i32_0 : i32, i32
  }
  func.func @transform_9(%arg0: i32) -> (i32, i32) {
    %c0_i32 = arith.constant 0 : i32
    %c0_i32_0 = arith.constant 0 : i32
    %c0_i32_1 = arith.constant 0 : i32
    return %c0_i32, %c0_i32_0 : i32, i32
  }
  func.func @transform_10(%arg0: i32) -> (i32, i32) {
    %c0_i32 = arith.constant 0 : i32
    %c0_i32_0 = arith.constant 0 : i32
    %c0_i32_1 = arith.constant 0 : i32
    return %c0_i32, %c0_i32_0 : i32, i32
  }
  func.func @transform_11(%arg0: i32) -> (i32, i32) {
    %c0_i32 = arith.constant 0 : i32
    %c0_i32_0 = arith.constant 0 : i32
    %c0_i32_1 = arith.constant 0 : i32
    return %c0_i32, %c0_i32_0 : i32, i32
  }
  func.func @transform_12(%arg0: i32) -> (i32, i32) {
    %c0_i32 = arith.constant 0 : i32
    %c0_i32_0 = arith.constant 0 : i32
    %c0_i32_1 = arith.constant 0 : i32
    return %c0_i32, %c0_i32_0 : i32, i32
  }
  func.func @transform_13(%arg0: i32) -> (i32, i32, i32) {
    %c0_i32 = arith.constant 0 : i32
    %c0_i32_0 = arith.constant 0 : i32
    %c0_i32_1 = arith.constant 0 : i32
    return %arg0, %c0_i32, %c0_i32_0 : i32, i32, i32
  }
  func.func @transform_14(%arg0: i32) -> (i32, i32, i32) {
    %c0_i32 = arith.constant 0 : i32
    %c0_i32_0 = arith.constant 0 : i32
    %c0_i32_1 = arith.constant 0 : i32
    return %arg0, %c0_i32, %c0_i32_0 : i32, i32, i32
  }
  func.func @transform_15(%arg0: i32) -> (i32, i32, i32) {
    %c0_i32 = arith.constant 0 : i32
    %c0_i32_0 = arith.constant 0 : i32
    %c0_i32_1 = arith.constant 0 : i32
    return %arg0, %c0_i32, %c0_i32_0 : i32, i32, i32
  }
}

</mosaic_0001>

<bundles_post_ra>
// kernel: ssh_landmark_forward.1
= control target key start
LH: loop header
LB: loop body
LE: loop exit
PB: predicated region body
PF: predicated region fallthrough
CT: control target
= control target key end

     0   :  { %s8355_s18 = smov 0   ;;  %s14011_s0 = inlined_call_operand.vmem [shape: f32[2,16,16,16], index: 0, kind: input, shape index: {}]   ;;  %s14012_s1 = inlined_call_operand.vmem [shape: f32[144,8], index: 1, kind: input, shape index: {}]   ;;  %s14013_s2 = inlined_call_operand.vmem [shape: f32[1,8], index: 2, kind: input, shape index: {}]   ;;  %s14014_s3 = inlined_call_operand.vmem [shape: f32[144,4], index: 3, kind: input, shape index: {}]   ;;  %s14015_s4 = inlined_call_operand.vmem [shape: f32[1,4], index: 4, kind: input, shape index: {}]   ;;  %s14016_s5 = inlined_call_operand.vmem [shape: f32[36,4], index: 5, kind: input, shape index: {}]   ;;  %s14017_s6 = inlined_call_operand.vmem [shape: f32[1,4], index: 6, kind: input, shape index: {}]   ;;  %s14018_s7 = inlined_call_operand.vmem [shape: f32[36,4], index: 7, kind: input, shape index: {}]   ;;  %s14019_s8 = inlined_call_operand.vmem [shape: f32[1,4], index: 8, kind: input, shape index: {}]   ;;  %s14020_s9 = inlined_call_operand.vmem [shape: f32[36,4], index: 9, kind: input, shape index: {}]   ;;  %s14021_s10 = inlined_call_operand.vmem [shape: f32[1,4], index: 10, kind: input, shape index: {}]   ;;  %s14022_s11 = inlined_call_operand.vmem [shape: f32[16,32], index: 11, kind: input, shape index: {}]   ;;  %s14023_s12 = inlined_call_operand.vmem [shape: f32[1,32], index: 12, kind: input, shape index: {}]   ;;  %s14024_s13 = inlined_call_operand.vmem [shape: f32[2,4,256], index: 13, kind: output, shape index: {0}]   ;;  %s14025_s14 = inlined_call_operand.vmem [shape: f32[2,8,256], index: 14, kind: output, shape index: {1}]   ;;  %s14026_s15 = inlined_call_operand.vmem [shape: f32[2,20,256], index: 15, kind: output, shape index: {2}]  }
   0x1 LB: > { %s7058_s19 = sadd.s32 4294967295, %s8259_s18   ;;  %p7062_p0 = scmp.ge.s32.totalorder %s8259_s18, 1  ;;  %s8259_s18 = sphi %s8355_s18, %s26_s18  }
   0x2   : > { %p442_p1 = scmp.lt.s32.totalorder %s8259_s18, 3 }
   0x4   : > { %p443_p2 = pnand %p7062_p0, %p442_p1 }
   0x6   : > { %446 = sbr.rel (%p443_p2) target bundleno = 2508 (0x9cc), region = 72 }
   0xb   : > { %vm585_vm0 = vcmask 1040384   ;;  %p500_p3 = scmp.lt.s32.totalorder %s7058_s19, 1  ;;  %v14027_v0 = vmov 0.0   ;;  %vm751_vm1 = vcmask 1046528   ;;  %vm832_vm2 = vcmask 1045504   ;;  %s14234_s24 = smov 16  }
   0xc   : > { %v8364_v1 = vrot.slane %v14027_v0, 7  ;;  %1917 = vmatprep.subr.mxu0 %v14027_v0  ;;  %2199 = vmatprep.subr.mxu1 %v14027_v0  ;;  %s8263_s25 = smov 32   ;;  %vm1597_vm3 = vcmask 130048   ;;  %s8264_s26 = smov 48   ;;  %vm1630_vm4 = vcmask 261120   ;;  %vm1663_vm5 = vcmask 392192  }
   0xd   : > { %s15065_s19 = smov (!%p500_p3, %s7058_s19), 1  ;;  %s8265_s27 = smov 64   ;;  %vm1696_vm6 = vcmask 523264   ;;  %vm1729_vm7 = vcmask 654336   ;;  %vm1762_vm8 = vcmask 785408   ;;  %vm1795_vm9 = vcmask 916480  }
   0xe   : > { %14298 = vst [vmem:[#allocation2_spill] sm:$0xff] %v8364_v1  ;;  %v8372_v2 = vsel %vm585_vm0, 0.0, %v8364_v1  ;;  %v702_v3 = vsel %vm585_vm0, %v8364_v1, 0.0  ;;  %v753_v4 = vrot.slane %v8364_v1, 1  ;;  %v834_v5 = vrot.slane %v8364_v1, 2  ;;  %s7273_s20 = sshll.u32 %s15065_s19, 8 }
   0xf   : > { %14299 = vst [vmem:[#allocation3_spill] sm:$0xff] %v8372_v2  ;;  %v752_v6 = vrot.slane %v8372_v2, 1  ;;  %v755_v7 = vrot.slane %v702_v3, 1  ;;  %v836_v8 = vrot.slane %v702_v3, 2  ;;  %v833_v9 = vrot.slane %v8372_v2, 2  ;;  %s8384_s23 = scalar_lea.vmem %s14011_s0, %s7273_s20  ;;  %s8266_s28 = smov 80  }
  0x10   : > { %v522_v12 = vld [vmem:[%s8384_s23 + $0x10] sm:$0xff]  ;;  %v523_v13 = vld [vmem:[%s8384_s23 + $0x18] sm:$0xff]  ;;  %v520_v14 = vld [vmem:[%s8384_s23] sm:$0xff]  ;;  %s8267_s20 = smov 96   ;;  %s8268_s16 = smov 112   ;;  %vm3940_vm10 = vcmask 1043456  }
  0x11   : > { %v754_v10 = vsel %vm751_vm1, %v752_v6, %v753_v4  ;;  %v756_v11 = vsel %vm751_vm1, %v753_v4, %v755_v7  ;;  %v8392_v15 = vsel %vm832_vm2, %v833_v9, %v834_v5  ;;  %v591_v17 = vrot.slane %v522_v12, 7  ;;  %v521_v19 = vld [vmem:[%s8384_s23 + $0x8] sm:$0xff]  ;;  %v524_v21 = vld [vmem:[%s8384_s23 + $0x20] sm:$0xff]  ;;  %v526_v43 = vld [vmem:[%s8384_s23 + $0x30] sm:$0xff]  ;;  %s8270_s17 = smov 8   ;;  %s8274_s21 = smov 28  }
  0x12   : > { %14300 = vst [vmem:[#allocation4_spill] sm:$0xff] %v8392_v15  ;;  %v8394_v16 = vpack.i.bf16 %v756_v11, %v754_v10  ;;  %v592_v18 = vrot.slane %v523_v13, 7  ;;  %v588_v20 = vrot.slane %v520_v14, 7  ;;  %v525_v22 = vld [vmem:[%s8384_s23 + $0x28] sm:$0xff]  ;;  %v589_v23 = vrot.slane %v521_v19, 7  ;;  %v527_v44 = vld [vmem:[%s8384_s23 + $0x38] sm:$0xff] }
  0x13   : > { %v594_v24 = vrot.slane %v524_v21, 7  ;;  %v595_v25 = vrot.slane %v525_v22, 7  ;;  %v8400_v26 = vsel %vm832_vm2, %v834_v5, %v836_v8  ;;  %v8408_v28 = vsel %vm585_vm0, 0.0, %v591_v17  ;;  %v528_v45 = vld [vmem:[%s8384_s23 + $0x40] sm:$0xff]  ;;  %v529_v50 = vld [vmem:[%s8384_s23 + $0x48] sm:$0xff]  ;;  %v530_v51 = vld [vmem:[%s8384_s23 + $0x50] sm:$0xff] }
  0x14   : > { %14301 = vst [vmem:[#allocation5_spill] sm:$0xff] %v8394_v16  ;;  %14302 = vst [vmem:[#allocation6_spill] sm:$0xff] %v8400_v26  ;;  %7671 = vrot.lane.b32.xlu0 %v8394_v16, %s14234_s24  ;;  %v8405_v27 = vsel %vm585_vm0, %v591_v17, %v592_v18  ;;  %v8411_v29 = vsel %vm585_vm0, %v592_v18, 0.0  ;;  %v8414_v30 = vsel %vm585_vm0, 0.0, %v588_v20  ;;  %v762_v31 = vrot.slane %v8408_v28, 1  ;;  %v531_v63 = vld [vmem:[%s8384_s23 + $0x58] sm:$0xff] }
  0x15   : > { %14303 = vst [vmem:[#allocation7_spill] sm:$0xff] %v8405_v27  ;;  %14304 = vst [vmem:[#allocation8_spill] sm:$0xff] %v8408_v28  ;;  %v763_v32 = vrot.slane %v8405_v27, 1  ;;  %v765_v33 = vrot.slane %v8411_v29, 1  ;;  %v8421_v35 = vsel %vm585_vm0, %v588_v20, %v589_v23  ;;  %v8424_v36 = vsel %vm585_vm0, %v589_v23, 0.0  ;;  %v532_v22 = vld [vmem:[%s8384_s23 + $0x60] sm:$0xff] }
  0x16   : > { %14305 = vst [vmem:[#allocation9_spill] sm:$0xff] %v8414_v30  ;;  %14306 = vst [vmem:[#allocation10_spill] sm:$0xff] %v8421_v35  ;;  %v757_v37 = vrot.slane %v8414_v30, 1  ;;  %v8428_v38 = vsel %vm585_vm0, %v594_v24, %v595_v25  ;;  %v758_v41 = vrot.slane %v8421_v35, 1  ;;  %v760_v42 = vrot.slane %v8424_v36, 1  ;;  %v533_v23 = vld [vmem:[%s8384_s23 + $0x68] sm:$0xff] }
  0x17   : > { %14307 = vst [vmem:[#allocation11_spill] sm:$0xff] %v8428_v38  ;;  %v764_v39 = vsel %vm751_vm1, %v762_v31, %v763_v32  ;;  %v766_v40 = vsel %vm751_vm1, %v763_v32, %v765_v33  ;;  %v8440_v47 = vsel %vm585_vm0, 0.0, %v594_v24  ;;  %v8443_v48 = vsel %vm585_vm0, %v595_v25, 0.0  ;;  %v534_v33 = vld [vmem:[%s8384_s23 + $0x70] sm:$0xff]  ;;  %s7275_s29 = sshll.u32 %s15065_s19, 4  ;;  %s7647_s22 = smul.u32 48, %s15065_s19 }
  0x18   : > { %v8437_v46 = vpack.i.bf16 %v766_v40, %v764_v39  ;;  %14308 = vst [vmem:[#allocation12_spill] sm:$0xff] %v8440_v47  ;;  %v768_v49 = vrot.slane %v8428_v38, 1  ;;  %v759_v52 = vsel %vm751_vm1, %v757_v37, %v758_v41  ;;  %v761_v53 = vsel %vm751_vm1, %v758_v41, %v760_v42  ;;  %v535_v37 = vld [vmem:[%s8384_s23 + $0x78] sm:$0xff]  ;;  %v536_v39 = vld [vmem:[%s8384_s23 + $0x80] sm:$0xff] }
  0x19   : > { %v767_v54 = vrot.slane %v8440_v47, 1  ;;  %v770_v55 = vrot.slane %v8443_v48, 1  ;;  %v8454_v56 = vpack.i.bf16 %v761_v53, %v759_v52  ;;  %v597_v57 = vrot.slane %v526_v43, 7 }
  0x1a   : > { %7681 = vrot.lane.b32.xlu1 %v8437_v46, %s14234_s24  ;;  %v598_v58 = vrot.slane %v527_v44, 7  ;;  %v600_v59 = vrot.slane %v528_v45, 7  ;;  %v601_v62 = vrot.slane %v529_v50, 7  ;;  %v603_v3 = vrot.slane %v530_v51, 7 }
  0x1b   : > { %v769_v60 = vsel %vm751_vm1, %v767_v54, %v768_v49  ;;  %v771_v61 = vsel %vm751_vm1, %v768_v49, %v770_v55  ;;  %7676 = vrot.lane.b32.xlu0 %v8454_v56, %s14234_s24  ;;  %v8467_v6 = vsel %vm585_vm0, 0.0, %v597_v57  ;;  %v604_v17 = vrot.slane %v531_v63, 7  ;;  %v537_v54 = vld [vmem:[%s8384_s23 + $0x88] sm:$0xff] }
  0x1c   : > { %v8461_v4 = vpack.i.bf16 %v771_v61, %v769_v60  ;;  %v8464_v5 = vsel %vm585_vm0, %v597_v57, %v598_v58  ;;  %14311 = vst [vmem:[#allocation15_spill] sm:$0xff] %v8467_v6  ;;  %v8470_v7 = vsel %vm585_vm0, %v598_v58, 0.0  ;;  %v772_v8 = vrot.slane %v8467_v6, 1 }
  0x1d   : > { %14310 = vst [vmem:[#allocation14_spill] sm:$0xff] %v8464_v5  ;;  %v773_v9 = vrot.slane %v8464_v5, 1  ;;  %v775_v10 = vrot.slane %v8470_v7, 1  ;;  %v8476_v11 = vsel %vm585_vm0, %v600_v59, %v601_v62  ;;  %v8481_v12 = vsel %vm585_vm0, 0.0, %v600_v59 }
  0x1e   : > { %14309 = vst [vmem:[#allocation13_spill] sm:$0xff] %v8461_v4  ;;  %14312 = vst [vmem:[#allocation16_spill] sm:$0xff] %v8476_v11  ;;  %7686 = vrot.lane.b32.xlu1 %v8461_v4, %s14234_s24  ;;  %v8484_v13 = vsel %vm585_vm0, %v601_v62, 0.0  ;;  %v778_v14 = vrot.slane %v8476_v11, 1  ;;  %v777_v20 = vrot.slane %v8481_v12, 1  ;;  %v8496_v25 = vsel %vm585_vm0, %v603_v3, %v604_v17 }
  0x1f   : > { %14313 = vst [vmem:[#allocation17_spill] sm:$0xff] %v8481_v12  ;;  %v774_v18 = vsel %vm751_vm1, %v772_v8, %v773_v9  ;;  %v776_v19 = vsel %vm751_vm1, %v773_v9, %v775_v10  ;;  %v780_v21 = vrot.slane %v8484_v13, 1  ;;  %14315 = vst [vmem:[#allocation19_spill] sm:$0xff] %v8496_v25  ;;  %v8499_v31 = vsel %vm585_vm0, 0.0, %v603_v3 }
  0x20   : > { %v8493_v24 = vpack.i.bf16 %v776_v19, %v774_v18  ;;  %14316 = vst [vmem:[#allocation20_spill] sm:$0xff] %v8499_v31  ;;  %v8502_v32 = vsel %vm585_vm0, %v604_v17, 0.0  ;;  %v779_v40 = vsel %vm751_vm1, %v777_v20, %v778_v14  ;;  %v782_v42 = vrot.slane %v8499_v31, 1 }
  0x21   : > { %v781_v41 = vsel %vm751_vm1, %v778_v14, %v780_v21  ;;  %v783_v43 = vrot.slane %v8496_v25, 1  ;;  %v785_v45 = vrot.slane %v8502_v32, 1  ;;  %v606_v49 = vrot.slane %v532_v22, 7  ;;  %v538_v21 = vld [vmem:[%s8384_s23 + $0x90] sm:$0xff]  ;;  %v539_v22 = vld [vmem:[%s8384_s23 + $0x98] sm:$0xff] }
  0x22   : > { %14314 = vst [vmem:[#allocation18_spill] sm:$0xff] %v8493_v24  ;;  %7691 = vrot.lane.b32.xlu0 %v8493_v24, %s14234_s24  ;;  %v8513_v44 = vpack.i.bf16 %v781_v41, %v779_v40  ;;  %v607_v50 = vrot.slane %v533_v23, 7  ;;  %v609_v52 = vrot.slane %v534_v33, 7  ;;  %v610_v53 = vrot.slane %v535_v37, 7  ;;  %v540_v40 = vld [vmem:[%s8384_s23 + $0xa0] sm:$0xff]  ;;  %v541_v41 = vld [vmem:[%s8384_s23 + $0xa8] sm:$0xff] }
  0x23   : > { %v784_v51 = vsel %vm751_vm1, %v782_v42, %v783_v43  ;;  %v612_v55 = vrot.slane %v536_v39, 7  ;;  %v786_v57 = vsel %vm751_vm1, %v783_v43, %v785_v45  ;;  %v8525_v59 = vsel %vm585_vm0, 0.0, %v606_v49 }
  0x24   : > { %14317 = vst [vmem:[#allocation21_spill] sm:$0xff] %v8513_v44  ;;  %7696 = vrot.lane.b32.xlu1 %v8513_v44, %s14234_s24  ;;  %v8522_v58 = vsel %vm585_vm0, %v606_v49, %v607_v50  ;;  %14319 = vst [vmem:[#allocation23_spill] sm:$0xff] %v8525_v59  ;;  %v8528_v60 = vsel %vm585_vm0, %v607_v50, 0.0  ;;  %v8530_v61 = vpack.i.bf16 %v786_v57, %v784_v51  ;;  %v787_v62 = vrot.slane %v8525_v59, 1 }
  0x25   : > { %14318 = vst [vmem:[#allocation22_spill] sm:$0xff] %v8522_v58  ;;  %v788_v63 = vrot.slane %v8522_v58, 1  ;;  %v790_v3 = vrot.slane %v8528_v60, 1  ;;  %v8536_v8 = vsel %vm585_vm0, %v609_v52, %v610_v53  ;;  %v8539_v9 = vsel %vm585_vm0, 0.0, %v609_v52 }
  0x26   : > { %14320 = vst [vmem:[#allocation24_spill] sm:$0xff] %v8530_v61  ;;  %v8542_v10 = vsel %vm585_vm0, %v610_v53, 0.0  ;;  %v613_v14 = vrot.slane %v537_v54, 7  ;;  %7701 = vrot.lane.b32.xlu0 %v8530_v61, %s14234_s24  ;;  %v792_v19 = vrot.slane %v8539_v9, 1  ;;  %v793_v20 = vrot.slane %v8536_v8, 1 }
  0x27   : > { %v789_v17 = vsel %vm751_vm1, %v787_v62, %v788_v63  ;;  %v791_v18 = vsel %vm751_vm1, %v788_v63, %v790_v3  ;;  %v795_v33 = vrot.slane %v8542_v10, 1  ;;  %v8559_v39 = vsel %vm585_vm0, 0.0, %v612_v55  ;;  %v542_v63 = vld [vmem:[%s8384_s23 + $0xb0] sm:$0xff] }
  0x28   : > { %v8552_v23 = vpack.i.bf16 %v791_v18, %v789_v17  ;;  %v8556_v37 = vsel %vm585_vm0, %v612_v55, %v613_v14  ;;  %v794_v42 = vsel %vm751_vm1, %v792_v19, %v793_v20  ;;  %v8565_v43 = vsel %vm585_vm0, %v613_v14, 0.0 }
  0x29   : > { %v797_v45 = vrot.slane %v8559_v39, 1  ;;  %v798_v49 = vrot.slane %v8556_v37, 1  ;;  %v796_v50 = vsel %vm751_vm1, %v793_v20, %v795_v33  ;;  %v800_v51 = vrot.slane %v8565_v43, 1  ;;  %v543_v33 = vld [vmem:[%s8384_s23 + $0xb8] sm:$0xff] }
  0x2a   : > { %14321 = vst [vmem:[#allocation25_spill] sm:$0xff] %v8552_v23  ;;  %7706 = vrot.lane.b32.xlu1 %v8552_v23, %s14234_s24  ;;  %v615_v52 = vrot.slane %v538_v21, 7  ;;  %v616_v53 = vrot.slane %v539_v22, 7  ;;  %v8573_v54 = vpack.i.bf16 %v796_v50, %v794_v42  ;;  %v618_v57 = vrot.slane %v540_v40, 7  ;;  %v545_v50 = vld [vmem:[%s8384_s23 + $0xc8] sm:$0xff] }
  0x2b   : > { %v799_v55 = vsel %vm751_vm1, %v797_v45, %v798_v49  ;;  %v619_v62 = vrot.slane %v541_v41, 7  ;;  %v801_v3 = vsel %vm751_vm1, %v798_v49, %v800_v51  ;;  %v621_v45 = vrot.slane %v542_v63, 7  ;;  %v544_v49 = vld [vmem:[%s8384_s23 + $0xc0] sm:$0xff] }
  0x2c   : > { %14322 = vst [vmem:[#allocation26_spill] sm:$0xff] %v8573_v54  ;;  %v8579_v14 = vsel %vm585_vm0, %v615_v52, %v616_v53  ;;  %v8582_v17 = vsel %vm585_vm0, 0.0, %v615_v52  ;;  %v8585_v18 = vsel %vm585_vm0, %v616_v53, 0.0  ;;  %7711 = vrot.lane.b32.xlu0 %v8573_v54, %s14234_s24  ;;  %v8589_v19 = vpack.i.bf16 %v801_v3, %v799_v55 }
  0x2d   : > { %v802_v20 = vrot.slane %v8582_v17, 1  ;;  %v803_v21 = vrot.slane %v8579_v14, 1  ;;  %v805_v22 = vrot.slane %v8585_v18, 1  ;;  %v8596_v40 = vsel %vm585_vm0, %v618_v57, %v619_v62 }
  0x2e   : > { %14323 = vst [vmem:[#allocation27_spill] sm:$0xff] %v8589_v19  ;;  %v8599_v41 = vsel %vm585_vm0, 0.0, %v618_v57  ;;  %v8602_v42 = vsel %vm585_vm0, %v619_v62, 0.0  ;;  %7716 = vrot.lane.b32.xlu1 %v8589_v19, %s14234_s24  ;;  %v808_v55 = vrot.slane %v8596_v40, 1  ;;  %v546_v57 = vld [vmem:[%s8384_s23 + $0xd0] sm:$0xff]  ;;  %v622_v63 = vrot.slane %v543_v33, 7 }
  0x2f   : > { %v804_v51 = vsel %vm751_vm1, %v802_v20, %v803_v21  ;;  %v806_v52 = vsel %vm751_vm1, %v803_v21, %v805_v22  ;;  %v807_v53 = vrot.slane %v8599_v41, 1  ;;  %v810_v62 = vrot.slane %v8602_v42, 1  ;;  %v547_v21 = vld [vmem:[%s8384_s23 + $0xd8] sm:$0xff]  ;;  %v548_v19 = vld [vmem:[%s8384_s23 + $0xe0] sm:$0xff] }
  0x30   : > { %v8613_v3 = vpack.i.bf16 %v806_v52, %v804_v51  ;;  %v8617_v0 = vsel %vm585_vm0, 0.0, %v621_v45  ;;  %v624_v20 = vrot.slane %v544_v49, 7  ;;  %v625_v1 = vrot.slane %v545_v50, 7 }
  0x31   : > { %v809_v34 = vsel %vm751_vm1, %v807_v53, %v808_v55  ;;  %v812_v16 = vrot.slane %v8617_v0, 1  ;;  %v811_v22 = vsel %vm751_vm1, %v808_v55, %v810_v62  ;;  %v8626_v51 = vsel %vm585_vm0, %v621_v45, %v622_v63 }
  0x32   : > { %14324 = vst [vmem:[#allocation28_spill] sm:$0xff] %v8613_v3  ;;  %7721 = vrot.lane.b32.xlu0 %v8613_v3, %s14234_s24  ;;  %v8629_v33 = vsel %vm585_vm0, %v622_v63, 0.0  ;;  %v627_v52 = vrot.slane %v546_v57, 7  ;;  %v8631_v53 = vpack.i.bf16 %v811_v22, %v809_v34  ;;  %v813_v49 = vrot.slane %v8626_v51, 1 }
  0x33   : > { %v815_v50 = vrot.slane %v8629_v33, 1  ;;  %v8636_v2 = vsel %vm585_vm0, %v624_v20, %v625_v1  ;;  %v8639_v55 = vsel %vm585_vm0, 0.0, %v624_v20  ;;  %v8642_v45 = vsel %vm585_vm0, %v625_v1, 0.0  ;;  %v549_v20 = vld [vmem:[%s8384_s23 + $0xe8] sm:$0xff] }
  0x34   : > { %14325 = vst [vmem:[#allocation29_spill] sm:$0xff] %v8631_v53  ;;  %14326 = vst [vmem:[#allocation30_spill] sm:$0xff] %v8639_v55  ;;  %v818_v62 = vrot.slane %v8636_v2, 1  ;;  %v628_v63 = vrot.slane %v547_v21, 7  ;;  %7726 = vrot.lane.b32.xlu1 %v8631_v53, %s14234_s24  ;;  %v814_v34 = vsel %vm751_vm1, %v812_v16, %v813_v49  ;;  %v817_v22 = vrot.slane %v8639_v55, 1 }
  0x35   : > { %v816_v57 = vsel %vm751_vm1, %v813_v49, %v815_v50  ;;  %v820_v3 = vrot.slane %v8642_v45, 1  ;;  %v8659_v21 = vsel %vm585_vm0, 0.0, %v627_v52  ;;  %v631_v61 = vrot.slane %v549_v20, 7 }
  0x36   : > { %v8653_v54 = vpack.i.bf16 %v816_v57, %v814_v34  ;;  %v8656_v1 = vsel %vm585_vm0, %v627_v52, %v628_v63  ;;  %14329 = vst [vmem:[#allocation33_spill] sm:$0xff] %v8659_v21  ;;  %v8662_v53 = vsel %vm585_vm0, %v628_v63, 0.0  ;;  %v819_v16 = vsel %vm751_vm1, %v817_v22, %v818_v62 }
  0x37   : > { %14328 = vst [vmem:[#allocation32_spill] sm:$0xff] %v8656_v1  ;;  %v821_v49 = vsel %vm751_vm1, %v818_v62, %v820_v3  ;;  %v822_v50 = vrot.slane %v8659_v21, 1  ;;  %v823_v23 = vrot.slane %v8656_v1, 1  ;;  %v825_v57 = vrot.slane %v8662_v53, 1 }
  0x38   : > { %14327 = vst [vmem:[#allocation31_spill] sm:$0xff] %v8653_v54  ;;  %7731 = vrot.lane.b32.xlu0 %v8653_v54, %s14234_s24  ;;  %v8670_v34 = vpack.i.bf16 %v821_v49, %v819_v16  ;;  %v630_v52 = vrot.slane %v548_v19, 7  ;;  %v838_v44 = vrot.slane %v8414_v30, 2  ;;  %v839_v22 = vrot.slane %v8421_v35, 2 }
  0x39   : > { %v824_v63 = vsel %vm751_vm1, %v822_v50, %v823_v23  ;;  %v841_v3 = vrot.slane %v8424_v36, 2  ;;  %v826_v62 = vsel %vm751_vm1, %v823_v23, %v825_v57  ;;  %v8687_v19 = vsel %vm585_vm0, %v631_v61, 0.0 }
  0x3a   : > { %14330 = vst [vmem:[#allocation34_spill] sm:$0xff] %v8670_v34  ;;  %7736 = vrot.lane.b32.xlu1 %v8670_v34, %s14234_s24  ;;  %v8681_v16 = vsel %vm585_vm0, %v630_v52, %v631_v61  ;;  %v8684_v49 = vsel %vm585_vm0, 0.0, %v630_v52  ;;  %v8689_v20 = vpack.i.bf16 %v826_v62, %v824_v63  ;;  %v830_v54 = vrot.slane %v8687_v19, 1 }
  0x3b   : > { %14331 = vst [vmem:[#allocation35_spill] sm:$0xff] %v8681_v16  ;;  %14332 = vst [vmem:[#allocation36_spill] sm:$0xff] %v8684_v49  ;;  %v827_v50 = vrot.slane %v8684_v49, 1  ;;  %v828_v36 = vrot.slane %v8681_v16, 1  ;;  %v840_v34 = vsel %vm832_vm2, %v838_v44, %v839_v22  ;;  %v842_v23 = vsel %vm832_vm2, %v839_v22, %v841_v3 }
  0x3c   : > { %14333 = vst [vmem:[#allocation37_spill] sm:$0xff] %v8689_v20  ;;  %v843_v57 = vrot.slane %v8408_v28, 2  ;;  %v844_v52 = vrot.slane %v8405_v27, 2  ;;  %7741 = vrot.lane.b32.xlu0 %v8689_v20, %s14234_s24  ;;  %v8704_v62 = vpack.i.bf16 %v8400_v26, %v8392_v15  ;;  %v848_v24 = vrot.slane %v8440_v47, 2 }
  0x3d   : > { %v829_v61 = vsel %vm751_vm1, %v827_v50, %v828_v36  ;;  %v831_v63 = vsel %vm751_vm1, %v828_v36, %v830_v54  ;;  %v14335_v3 = vrot.slane %v8411_v29, 2  ;;  %v849_v50 = vrot.slane %v8428_v38, 2 }
  0x3e   : > { %14334 = vst [vmem:[#allocation38_spill] sm:$0xff] %v8704_v62  ;;  %v8707_v44 = vpack.i.bf16 %v831_v63, %v829_v61  ;;  %v8710_v22 = vsel %vm832_vm2, %v843_v57, %v844_v52  ;;  %v8718_v20 = vpack.i.bf16 %v842_v23, %v840_v34  ;;  %v851_v54 = vrot.slane %v8443_v48, 2 }
  0x3f   : > { %v8715_v4 = vsel %vm832_vm2, %v844_v52, %v14335_v3  ;;  %v853_v36 = vrot.slane %v8467_v6, 2  ;;  %v854_v26 = vrot.slane %v8464_v5, 2  ;;  %v8726_v57 = vsel %vm832_vm2, %v848_v24, %v849_v50  ;;  %7071 = vmatprep.mubr.msk.f32.mxu0 %vm1597_vm3, %v8710_v22  ;;  %7104 = vmatprep.mubr.msk.f32.mxu1 %vm1597_vm3, %v8710_v22 }
  0x40   : > { %14336 = vst [vmem:[#allocation39_spill] sm:$0xff] %v8715_v4  ;;  %7746 = vrot.lane.b32.xlu1 %v8707_v44, %s14234_s24  ;;  %14337 = vst [vmem:[#allocation40_spill] sm:$0xff] %v8726_v57  ;;  %v856_v29 = vrot.slane %v8470_v7, 2  ;;  %v858_v52 = vrot.slane %v8481_v12, 2  ;;  %v859_v61 = vrot.slane %v8476_v11, 2  ;;  %7751 = vrot.lane.b32.xlu0 %v8704_v62, %s8263_s25  ;;  %v8735_v48 = vpack.i.bf16 %v8715_v4, %v8710_v22 }
  0x41   : > { %v8738_v34 = vsel %vm832_vm2, %v849_v50, %v851_v54  ;;  %v861_v24 = vrot.slane %v8484_v13, 2  ;;  %v863_v23 = vrot.slane %v8499_v31, 2  ;;  %v8743_v7 = vsel %vm832_vm2, %v853_v36, %v854_v26 }
  0x42   : > { %14338 = vst [vmem:[#allocation41_spill] sm:$0xff] %v8738_v34  ;;  %14339 = vst [vmem:[#allocation42_spill] sm:$0xff] %v8743_v7  ;;  %v8746_v63 = vsel %vm832_vm2, %v854_v26, %v856_v29  ;;  %v864_v3 = vrot.slane %v8496_v25, 2  ;;  %v8751_v15 = vpack.i.bf16 %v8738_v34, %v8726_v57  ;;  %v8754_v62 = vsel %vm832_vm2, %v858_v52, %v859_v61 }
  0x43   : > { %14340 = vst [vmem:[#allocation43_spill] sm:$0xff] %v8746_v63  ;;  %14341 = vst [vmem:[#allocation44_spill] sm:$0xff] %v8754_v62  ;;  %v866_v50 = vrot.slane %v8502_v32, 2  ;;  %v8760_v13 = vsel %vm832_vm2, %v859_v61, %v861_v24  ;;  %v868_v26 = vrot.slane %v8525_v59, 2  ;;  %v869_v54 = vrot.slane %v8522_v58, 2 }
  0x44   : > { %7756 = vrot.lane.b32.xlu1 %v8718_v20, %s8263_s25  ;;  %14342 = vst [vmem:[#allocation45_spill] sm:$0xff] %v8760_v13  ;;  %v871_v36 = vrot.slane %v8528_v60, 2  ;;  %7761 = vrot.lane.b32.xlu0 %v8735_v48, %s8263_s25  ;;  %v8769_v29 = vpack.i.bf16 %v8746_v63, %v8743_v7  ;;  %v8772_v32 = vsel %vm832_vm2, %v863_v23, %v864_v3  ;;  %v873_v61 = vrot.slane %v8539_v9, 2 }
  0x45   : > { %14343 = vst [vmem:[#allocation46_spill] sm:$0xff] %v8772_v32  ;;  %v8775_v52 = vsel %vm832_vm2, %v864_v3, %v866_v50  ;;  %v874_v24 = vrot.slane %v8536_v8, 2  ;;  %v876_v34 = vrot.slane %v8542_v10, 2  ;;  %v8782_v60 = vpack.i.bf16 %v8760_v13, %v8754_v62 }
  0x46   : > { %14344 = vst [vmem:[#allocation47_spill] sm:$0xff] %v8775_v52  ;;  %v8788_v23 = vpack.i.bf16 %v8775_v52, %v8772_v32  ;;  %v8791_v3 = vsel %vm832_vm2, %v868_v26, %v869_v54  ;;  %v8794_v50 = vsel %vm832_vm2, %v869_v54, %v871_v36  ;;  %v878_v63 = vrot.slane %v8559_v39, 2 }
  0x47   : > { %14345 = vst [vmem:[#allocation48_spill] sm:$0xff] %v8791_v3  ;;  %14346 = vst [vmem:[#allocation49_spill] sm:$0xff] %v8794_v50  ;;  %v879_v10 = vrot.slane %v8556_v37, 2  ;;  %v881_v13 = vrot.slane %v8565_v43, 2  ;;  %v883_v62 = vrot.slane %v8582_v17, 2  ;;  %v884_v52 = vrot.slane %v8579_v14, 2 }
  0x48   : > { %7766 = vrot.lane.b32.xlu1 %v8751_v15, %s8263_s25  ;;  %7771 = vrot.lane.b32.xlu0 %v8769_v29, %s8263_s25  ;;  %v8804_v32 = vsel %vm832_vm2, %v873_v61, %v874_v24  ;;  %v8807_v26 = vsel %vm832_vm2, %v874_v24, %v876_v34  ;;  %v886_v54 = vrot.slane %v8585_v18, 2  ;;  %v8814_v36 = vpack.i.bf16 %v8794_v50, %v8791_v3 }
  0x49   : > { %14347 = vst [vmem:[#allocation50_spill] sm:$0xff] %v8804_v32  ;;  %14348 = vst [vmem:[#allocation51_spill] sm:$0xff] %v8807_v26  ;;  %v888_v43 = vrot.slane %v8599_v41, 2  ;;  %v889_v7 = vrot.slane %v8596_v40, 2  ;;  %v891_v57 = vrot.slane %v8602_v42, 2  ;;  %v8823_v34 = vpack.i.bf16 %v8807_v26, %v8804_v32 }
  0x4a   : > { %v8826_v18 = vsel %vm832_vm2, %v878_v63, %v879_v10  ;;  %v8829_v61 = vsel %vm832_vm2, %v879_v10, %v881_v13  ;;  %v8832_v24 = vsel %vm832_vm2, %v883_v62, %v884_v52  ;;  %v8835_v50 = vsel %vm832_vm2, %v884_v52, %v886_v54 }
  0x4b   : > { %14349 = vst [vmem:[#allocation52_spill] sm:$0xff] %v8826_v18  ;;  %14350 = vst [vmem:[#allocation53_spill] sm:$0xff] %v8829_v61  ;;  %v893_v42 = vrot.slane %v8617_v0, 2  ;;  %v894_v3 = vrot.slane %v8626_v51, 2  ;;  %v896_v4 = vrot.slane %v8629_v33, 2  ;;  %v898_v26 = vrot.slane %v8639_v55, 2 }
  0x4c   : > { %7776 = vrot.lane.b32.xlu1 %v8782_v60, %s8263_s25  ;;  %7781 = vrot.lane.b32.xlu0 %v8788_v23, %s8263_s25  ;;  %14351 = vst [vmem:[#allocation54_spill] sm:$0xff] %v8832_v24  ;;  %14352 = vst [vmem:[#allocation55_spill] sm:$0xff] %v8835_v50  ;;  %v899_v63 = vrot.slane %v8636_v2, 2  ;;  %v8846_v62 = vpack.i.bf16 %v8829_v61, %v8826_v18  ;;  %v8849_v13 = vsel %vm832_vm2, %v888_v43, %v889_v7  ;;  %vm3569_vm11 = vcmask 31744  }
  0x4d   : > { %14353 = vst [vmem:[#allocation56_spill] sm:$0xff] %v8849_v13  ;;  %v8852_v52 = vsel %vm832_vm2, %v889_v7, %v891_v57  ;;  %v901_v33 = vrot.slane %v8642_v45, 2  ;;  %v8859_v10 = vpack.i.bf16 %v8835_v50, %v8832_v24  ;;  %v903_v54 = vrot.slane %v8659_v21, 2  ;;  %v550_v50 = vld [vmem:[%s8384_s23 + $0xf0] sm:$0xff]  ;;  %v551_v24 = vld [vmem:[%s8384_s23 + $0xf8] sm:$0xff]  ;;  %s8271_s23 = smov 12  }
  0x4e   : > { %14354 = vst [vmem:[#allocation57_spill] sm:$0xff] %v8852_v52  ;;  %v904_v61 = vrot.slane %v8656_v1, 2  ;;  %v906_v18 = vrot.slane %v8662_v53, 2  ;;  %v8865_v43 = vsel %vm832_vm2, %v893_v42, %v894_v3  ;;  %v8868_v57 = vsel %vm832_vm2, %v894_v3, %v896_v4 }
  0x4f   : > { %14355 = vst [vmem:[#allocation58_spill] sm:$0xff] %v8865_v43  ;;  %14356 = vst [vmem:[#allocation59_spill] sm:$0xff] %v8868_v57  ;;  %v8872_v45 = vpack.i.bf16 %v8852_v52, %v8849_v13  ;;  %v8875_v7 = vsel %vm832_vm2, %v898_v26, %v899_v63  ;;  %v8882_v53 = vsel %vm832_vm2, %v899_v63, %v901_v33  ;;  %v908_v42 = vrot.slane %v8684_v49, 2 }
  0x50   : > { %7786 = vrot.lane.b32.xlu1 %v8814_v36, %s8263_s25  ;;  %7791 = vrot.lane.b32.xlu0 %v8823_v34, %s8263_s25  ;;  %14357 = vst [vmem:[#allocation60_spill] sm:$0xff] %v8875_v7  ;;  %14358 = vst [vmem:[#allocation61_spill] sm:$0xff] %v8882_v53  ;;  %v909_v4 = vrot.slane %v8681_v16, 2  ;;  %v911_v3 = vrot.slane %v8687_v19, 2  ;;  %v8891_v26 = vpack.i.bf16 %v8868_v57, %v8865_v43  ;;  %v633_v63 = vrot.slane %v550_v50, 7 }
  0x51   : > { %v8894_v52 = vsel %vm832_vm2, %v903_v54, %v904_v61  ;;  %v8897_v13 = vsel %vm832_vm2, %v904_v61, %v906_v18  ;;  %v634_v33 = vrot.slane %v551_v24, 7  ;;  %v8901_v32 = vpack.i.bf16 %v8882_v53, %v8875_v7 }
  0x52   : > { %14359 = vst [vmem:[#allocation62_spill] sm:$0xff] %v8894_v52  ;;  %14360 = vst [vmem:[#allocation63_spill] sm:$0xff] %v8897_v13  ;;  %v8907_v19 = vpack.i.bf16 %v8897_v13, %v8894_v52  ;;  %v8910_v57 = vsel %vm832_vm2, %v908_v42, %v909_v4  ;;  %v8913_v54 = vsel %vm832_vm2, %v909_v4, %v911_v3  ;;  %v8921_v18 = vsel %vm585_vm0, 0.0, %v633_v63 }
  0x53   : > { %14361 = vst [vmem:[#allocation64_spill] sm:$0xff] %v8910_v57  ;;  %14362 = vst [vmem:[#allocation65_spill] sm:$0xff] %v8913_v54  ;;  %v8918_v50 = vsel %vm585_vm0, %v633_v63, %v634_v33  ;;  %v8926_v61 = vsel %vm585_vm0, %v634_v33, 0.0  ;;  %v915_v24 = vrot.slane %v8921_v18, 1  ;;  %v8936_v4 = vpack.i.bf16 %v8913_v54, %v8910_v57 }
  0x54   : > { %7796 = vrot.lane.b32.xlu1 %v8846_v62, %s8263_s25  ;;  %7801 = vrot.lane.b32.xlu0 %v8859_v10, %s8263_s25  ;;  %v916_v42 = vrot.slane %v8918_v50, 1  ;;  %v918_v3 = vrot.slane %v8926_v61, 1  ;;  %v7830_v63 = vpack.i.bf16 %v8421_v35, %v8414_v30  ;;  %v8951_v54 = vpack.i.bf16 %v8405_v27, %v8408_v28  ;;  %v14372_v35 = vld [vmem:[#allocation26_spill] sm:$0xff]  ;;  %v14374_v28 = vld [vmem:[#allocation27_spill] sm:$0xff]  ;;  %v14375_v27 = vld [vmem:[#allocation28_spill] sm:$0xff] }
  0x55   : > { %v8955_v57 = vpack.i.bf16 %v8428_v38, %v8440_v47  ;;  %v8989_v52 = vpack.i.bf16 %v8556_v37, %v8559_v39  ;;  %v8994_v53 = vpack.i.bf16 %v8579_v14, %v8582_v17  ;;  %v8999_v7 = vpack.i.bf16 %v8596_v40, %v8599_v41  ;;  %v14370_v38 = vld [vmem:[#allocation25_spill] sm:$0xff] }
  0x56   : > { %v917_v33 = vsel %vm751_vm1, %v915_v24, %v916_v42  ;;  %v919_v13 = vsel %vm751_vm1, %v916_v42, %v918_v3  ;;  %v8960_v24 = vpack.i.bf16 %v8464_v5, %v8467_v6  ;;  %v8969_v42 = vpack.i.bf16 %v8918_v50, %v8921_v18  ;;  %v14367_v6 = vld [vmem:[#allocation21_spill] sm:$0xff]  ;;  %v14368_v5 = vld [vmem:[#allocation24_spill] sm:$0xff] }
  0x57   : > { %v8945_v22 = vpack.i.bf16 %v919_v13, %v917_v33  ;;  %v8965_v13 = vpack.i.bf16 %v8476_v11, %v8481_v12  ;;  %v8974_v3 = vpack.i.bf16 %v8496_v25, %v8499_v31  ;;  %v8984_v33 = vpack.i.bf16 %v8536_v8, %v8539_v9  ;;  %v14364_v31 = vld [vmem:[#allocation13_spill] sm:$0xff]  ;;  %v14365_v11 = vld [vmem:[#allocation18_spill] sm:$0xff] }
  0x58   : > { %7806 = vrot.lane.b32.xlu1 %v8872_v45, %s8263_s25  ;;  %7811 = vrot.lane.b32.xlu0 %v8891_v26, %s8263_s25  ;;  %v9004_v43 = vpack.i.bf16 %v8626_v51, %v8617_v0  ;;  %v9019_v25 = vpack.i.bf16 %v8681_v16, %v8684_v49  ;;  %vm3602_vm12 = vcmask 64512   ;;  %vm3635_vm13 = vcmask 97280  }
  0x59   : > { %14363 = vst [vmem:[#allocation66_spill] sm:$0xff] %v8945_v22  ;;  %vm3700_vm14 = vcmask 162816   ;;  %vm3733_vm15 = vcmask 195584  }
  0x5c   : > { %7816 = vrot.lane.b32.xlu1 %v8901_v32, %s8263_s25  ;;  %7821 = vrot.lane.b32.xlu0 %v8907_v19, %s8263_s25 }
  0x60   : > { %7826 = vrot.lane.b32.xlu1 %v8936_v4, %s8263_s25  ;;  %7831 = vrot.lane.b32.xlu0 %v7830_v63, %s8264_s26  ;;  %v8979_v63 = vpack.i.bf16 %v8522_v58, %v8525_v59  ;;  %v9009_v58 = vpack.i.bf16 %v8636_v2, %v8639_v55  ;;  %v9014_v59 = vpack.i.bf16 %v8656_v1, %v8659_v21  ;;  %v14379_v21 = vld [vmem:[#allocation31_spill] sm:$0xff] }
  0x64   : > { %7836 = vrot.lane.b32.xlu1 %v8951_v54, %s8264_s26  ;;  %7841 = vrot.lane.b32.xlu0 %v8955_v57, %s8264_s26 }
  0x68   : > { %7846 = vrot.lane.b32.xlu1 %v8960_v24, %s8264_s26  ;;  %7851 = vrot.lane.b32.xlu0 %v8965_v13, %s8264_s26 }
  0x6c   : > { %7856 = vrot.lane.b32.xlu1 %v8974_v3, %s8264_s26  ;;  %7861 = vrot.lane.b32.xlu0 %v8979_v63, %s8264_s26 }
  0x70   : > { %7866 = vrot.lane.b32.xlu1 %v8984_v33, %s8264_s26  ;;  %7871 = vrot.lane.b32.xlu0 %v8989_v52, %s8264_s26 }
  0x74   : > { %7876 = vrot.lane.b32.xlu1 %v8994_v53, %s8264_s26  ;;  %7881 = vrot.lane.b32.xlu0 %v8999_v7, %s8264_s26 }
  0x78   : > { %7886 = vrot.lane.b32.xlu1 %v9004_v43, %s8264_s26  ;;  %7891 = vrot.lane.b32.xlu0 %v9009_v58, %s8264_s26 }
  0x7c   : > { %7896 = vrot.lane.b32.xlu1 %v9014_v59, %s8264_s26  ;;  %7901 = vrot.lane.b32.xlu0 %v9019_v25, %s8264_s26 }
  0x80   : > { %7906 = vrot.lane.b32.xlu1 %v8969_v42, %s8264_s26  ;;  %7911 = vrot.lane.b32.xlu0 %v8454_v56, %s8265_s27  ;;  %s8272_s26 = smov 20  }
  0x84   : > { %7916 = vrot.lane.b32.xlu1 %v8437_v46, %s8265_s27  ;;  %7921 = vrot.lane.b32.xlu0 %v14364_v31, %s8265_s27 }
  0x86   : > { %v9028_v12 = vpop.permute.xlu0 %7671 }
  0x87   : > { %14366 = vst [vmem:[#allocation13_spill] sm:$0xff] %v9028_v12  ;;  %v14377_v12 = vld [vmem:[#allocation29_spill] sm:$0xff] }
  0x88   : > { %7926 = vrot.lane.b32.xlu1 %v14365_v11, %s8265_s27  ;;  %7931 = vrot.lane.b32.xlu0 %v14367_v6, %s8265_s27 }
  0x8c   : > { %7936 = vrot.lane.b32.xlu1 %v14368_v5, %s8265_s27  ;;  %v9032_v47 = vpop.permute.xlu1 %7681  ;;  %7941 = vrot.lane.b32.xlu0 %v14370_v38, %s8265_s27 }
  0x8d   : > { %14369 = vst [vmem:[#allocation18_spill] sm:$0xff] %v9032_v47  ;;  %v9035_v30 = vpop.permute.xlu0 %7676  ;;  %v14380_v47 = vld [vmem:[#allocation34_spill] sm:$0xff] }
  0x8e   : > { %14371 = vst [vmem:[#allocation21_spill] sm:$0xff] %v9035_v30  ;;  %v14382_v30 = vld [vmem:[#allocation37_spill] sm:$0xff] }
  0x90   : > { %7946 = vrot.lane.b32.xlu1 %v14372_v35, %s8265_s27  ;;  %v9038_v56 = vpop.permute.xlu1 %7686  ;;  %7951 = vrot.lane.b32.xlu0 %v14374_v28, %s8265_s27 }
  0x91   : > { %14373 = vst [vmem:[#allocation24_spill] sm:$0xff] %v9038_v56 }
  0x94   : > { %7956 = vrot.lane.b32.xlu1 %v14375_v27, %s8265_s27  ;;  %v9042_v49 = vpop.permute.xlu0 %7691  ;;  %7961 = vrot.lane.b32.xlu0 %v14377_v12, %s8265_s27 }
  0x95   : > { %14376 = vst [vmem:[#allocation25_spill] sm:$0xff] %v9042_v49 }
  0x96   : > { %v9045_v16 = vpop.permute.xlu1 %7696 }
  0x97   : > { %14378 = vst [vmem:[#allocation26_spill] sm:$0xff] %v9045_v16 }
  0x98   : > { %7966 = vrot.lane.b32.xlu1 %v14379_v21, %s8265_s27  ;;  %7971 = vrot.lane.b32.xlu0 %v14380_v47, %s8265_s27  ;;  %v9049_v1 = vpop.permute.xlu0 %7701 }
  0x99   : > { %14381 = vst [vmem:[#allocation27_spill] sm:$0xff] %v9049_v1 }
  0x9c   : > { %7976 = vrot.lane.b32.xlu1 %v14382_v30, %s8265_s27  ;;  %v9052_v55 = vpop.permute.xlu1 %7706  ;;  %7981 = vrot.lane.b32.xlu0 %v8707_v44, %s8265_s27 }
  0x9d   : > { %14383 = vst [vmem:[#allocation28_spill] sm:$0xff] %v9052_v55 }
  0x9e   : > { %v9055_v56 = vpop.permute.xlu0 %7711 }
  0xa0   : > { %7986 = vrot.lane.b32.xlu1 %v8945_v22, %s8265_s27  ;;  %7991 = vrot.lane.b32.xlu0 %v8718_v20, %s8266_s28  ;;  %v9060_v16 = vpop.permute.xlu1 %7716  ;;  %v923_v22 = vrot.slane %v8926_v61, 2 }
  0xa4   : > { %7996 = vrot.lane.b32.xlu1 %v8735_v48, %s8266_s28  ;;  %v9064_v1 = vpop.permute.xlu0 %7721  ;;  %8001 = vrot.lane.b32.xlu0 %v8751_v15, %s8266_s28 }
  0xa6   : > { %v9068_v55 = vpop.permute.xlu1 %7726 }
  0xa8   : > { %8006 = vrot.lane.b32.xlu1 %v8769_v29, %s8266_s28  ;;  %8011 = vrot.lane.b32.xlu0 %v8782_v60, %s8266_s28  ;;  %v1843_v60 = vld [vmem:[%s14012_s1 + $0x78] sm:$0xff] }
  0xa9   : > { %1918 = vmatpush1.msra.mxu0 %v1843_v60  ;;  %v14386_v60 = vmov 0.0  }
  0xaa   : > { %v9074_v49 = vpop.permute.xlu0 %7731  ;;  %1919 = vmatprep.subr.mxu0 %v14386_v60 }
  0xac   : > { %8016 = vrot.lane.b32.xlu1 %v8788_v23, %s8266_s28  ;;  %v9078_v20 = vpop.permute.xlu1 %7736  ;;  %8021 = vrot.lane.b32.xlu0 %v8814_v36, %s8266_s28  ;;  %v2189_v23 = vld [vmem:[%s14014_s3 + $0x78] sm:$0xff]  ;;  %v1842_v36 = vld [vmem:[%s14012_s1 + $0x70] sm:$0xff] }
  0xad   : > { %2200 = vmatpush1.msra.mxu1 %v2189_v23  ;;  %1920 = vmatpush1.msra.mxu0 %v1842_v36  ;;  %v1840_v23 = vld [vmem:[%s14012_s1 + $0x60] sm:$0xff] }
  0xae   : > { %v9082_v48 = vpop.permute.xlu0 %7741  ;;  %2201 = vmatprep.subr.mxu1 %v14386_v60  ;;  %1921 = vmatprep.subr.mxu0 %v14386_v60 }
  0xb0   : > { %8026 = vrot.lane.b32.xlu1 %v8823_v34, %s8266_s28  ;;  %8031 = vrot.lane.b32.xlu0 %v8846_v62, %s8266_s28  ;;  %v2188_v34 = vld [vmem:[%s14014_s3 + $0x70] sm:$0xff]  ;;  %v920_v62 = vrot.slane %v8921_v18, 2 }
  0xb1   : > { %2202 = vmatpush1.msra.mxu1 %v2188_v34  ;;  %v2185_v34 = vld [vmem:[%s14014_s3 + $0x58] sm:$0xff] }
  0xb2   : > { %v9088_v15 = vpop.permute.xlu1 %7746  ;;  %v9090_v29 = vpop.permute.xlu0 %7751  ;;  %2203 = vmatprep.subr.mxu1 %v14386_v60 }
  0xb3   : > { %14384 = vst [vmem:[#allocation29_spill] sm:$0xff] %v9088_v15  ;;  %14385 = vst [vmem:[#allocation31_spill] sm:$0xff] %v9090_v29  ;;  %v921_v29 = vrot.slane %v8918_v50, 2  ;;  %v2187_v50 = vld [vmem:[%s14014_s3 + $0x68] sm:$0xff] }
  0xb4   : > { %8036 = vrot.lane.b32.xlu1 %v8859_v10, %s8266_s28  ;;  %8041 = vrot.lane.b32.xlu0 %v8872_v45, %s8266_s28  ;;  %v1841_v45 = vld [vmem:[%s14012_s1 + $0x68] sm:$0xff] }
  0xb5   : > { %v9129_v18 = vsel %vm832_vm2, %v920_v62, %v921_v29  ;;  %v9132_v61 = vsel %vm832_vm2, %v921_v29, %v923_v22  ;;  %1922 = vmatpush1.msra.mxu0 %v1841_v45  ;;  %2204 = vmatpush1.msra.mxu1 %v2187_v50  ;;  %v1839_v29 = vld [vmem:[%s14012_s1 + $0x58] sm:$0xff]  ;;  %v1838_v45 = vld [vmem:[%s14012_s1 + $0x50] sm:$0xff] }
  0xb6   : > { %v9111_v10 = vpop.permute.xlu1 %7756  ;;  %v9115_v15 = vpop.permute.xlu0 %7761  ;;  %14387 = vst [vmem:[#allocation34_spill] sm:$0xff] %v9129_v18  ;;  %14388 = vst [vmem:[#allocation37_spill] sm:$0xff] %v9132_v61  ;;  %1923 = vmatprep.subr.mxu0 %v14386_v60  ;;  %2205 = vmatprep.subr.mxu1 %v14386_v60  ;;  %v8065_v22 = vpack.i.bf16 %v9132_v61, %v9129_v18  ;;  %v2184_v50 = vld [vmem:[%s14014_s3 + $0x50] sm:$0xff]  ;;  %v2190_v18 = vld [vmem:[%s14014_s3 + $0x80] sm:$0xff] }
  0xb7   : > { %1924 = vmatpush1.msra.mxu0 %v1840_v23 }
  0xb8   : > { %8046 = vrot.lane.b32.xlu1 %v8891_v26, %s8266_s28  ;;  %8051 = vrot.lane.b32.xlu0 %v8901_v32, %s8266_s28  ;;  %v2186_v32 = vld [vmem:[%s14014_s3 + $0x60] sm:$0xff] }
  0xb9   : > { %2206 = vmatpush1.msra.mxu1 %v2186_v32  ;;  %1925 = vmatprep.subr.mxu0 %v14386_v60  ;;  %v2183_v32 = vld [vmem:[%s14014_s3 + $0x48] sm:$0xff] }
  0xba   : > { %v9138_v36 = vpop.permute.xlu1 %7766  ;;  %v9143_v26 = vpop.permute.xlu0 %7771  ;;  %2207 = vmatprep.subr.mxu1 %v14386_v60  ;;  %1926 = vmatpush1.msra.mxu0 %v1839_v29  ;;  %v2182_v29 = vld [vmem:[%s14014_s3 + $0x40] sm:$0xff] }
  0xbb   : > { %2208 = vmatpush1.msra.mxu1 %v2185_v34  ;;  %1927 = vmatprep.subr.mxu0 %v14386_v60 }
  0xbc   : > { %8056 = vrot.lane.b32.xlu1 %v8907_v19, %s8266_s28  ;;  %8061 = vrot.lane.b32.xlu0 %v8936_v4, %s8266_s28  ;;  %v1837_v4 = vld [vmem:[%s14012_s1 + $0x48] sm:$0xff] }
  0xbd   : > { %2209 = vmatprep.subr.mxu1 %v14386_v60  ;;  %1928 = vmatpush1.msra.mxu0 %v1838_v45  ;;  %v1835_v45 = vld [vmem:[%s14012_s1 + $0x38] sm:$0xff] }
  0xbe   : > { %v9159_v62 = vpop.permute.xlu1 %7776  ;;  %v9163_v19 = vpop.permute.xlu0 %7781  ;;  %2210 = vmatpush1.msra.mxu1 %v2184_v50  ;;  %1929 = vmatprep.subr.mxu0 %v14386_v60  ;;  %v2181_v50 = vld [vmem:[%s14014_s3 + $0x38] sm:$0xff] }
  0xbf   : > { %14389 = vst [vmem:[#allocation67_spill] sm:$0xff] %v9159_v62  ;;  %14390 = vst [vmem:[#allocation68_spill] sm:$0xff] %v9163_v19  ;;  %2211 = vmatprep.subr.mxu1 %v14386_v60  ;;  %1930 = vmatpush1.msra.mxu0 %v1837_v4 }
  0xc0   : > { %8066 = vrot.lane.b32.xlu1 %v8065_v22, %s8266_s28  ;;  %8071 = vrot.lane.b32.xlu0 %v8951_v54, %s8267_s20  ;;  %v1836_v54 = vld [vmem:[%s14012_s1 + $0x40] sm:$0xff]  ;;  %s13984_s28 = scalar_lea.vmem %s14026_s15, %s7647_s22 }
  0xc1   : > { %2212 = vmatpush1.msra.mxu1 %v2183_v32  ;;  %1931 = vmatprep.subr.mxu0 %v14386_v60  ;;  %v2180_v32 = vld [vmem:[%s14014_s3 + $0x30] sm:$0xff] }
  0xc2   : > { %v9179_v23 = vpop.permute.xlu1 %7786  ;;  %v9184_v22 = vpop.permute.xlu0 %7791  ;;  %2213 = vmatprep.subr.mxu1 %v14386_v60  ;;  %1932 = vmatpush1.msra.mxu0 %v1836_v54  ;;  %v2179_v54 = vld [vmem:[%s14014_s3 + $0x28] sm:$0xff] }
  0xc3   : > { %14391 = vst [vmem:[#allocation69_spill] sm:$0xff] %v9179_v23  ;;  %2214 = vmatpush1.msra.mxu1 %v2182_v29  ;;  %1933 = vmatprep.subr.mxu0 %v14386_v60  ;;  %v7733_v23 = vunpack.i.l.bf16 %v9074_v49 }
  0xc4   : > { %8076 = vrot.lane.b32.xlu1 %v8955_v57, %s8267_s20  ;;  %8081 = vrot.lane.b32.xlu0 %v8960_v24, %s8267_s20  ;;  %v1834_v24 = vld [vmem:[%s14012_s1 + $0x30] sm:$0xff] }
  0xc5   : > { %2215 = vmatprep.subr.mxu1 %v14386_v60  ;;  %1934 = vmatpush1.msra.mxu0 %v1835_v45  ;;  %v1832_v45 = vld [vmem:[%s14012_s1 + $0x20] sm:$0xff] }
  0xc6   : > { %v9198_v34 = vpop.permute.xlu1 %7796  ;;  %v9202_v57 = vpop.permute.xlu0 %7801  ;;  %2216 = vmatpush1.msra.mxu1 %v2181_v50  ;;  %1935 = vmatprep.subr.mxu0 %v14386_v60  ;;  %v2178_v50 = vld [vmem:[%s14014_s3 + $0x20] sm:$0xff] }
  0xc7   : > { %2217 = vmatprep.subr.mxu1 %v14386_v60  ;;  %1936 = vmatpush1.msra.mxu0 %v1834_v24 }
  0xc8   : > { %8086 = vrot.lane.b32.xlu1 %v8965_v13, %s8267_s20  ;;  %8091 = vrot.lane.b32.xlu0 %v8974_v3, %s8267_s20  ;;  %v1833_v3 = vld [vmem:[%s14012_s1 + $0x28] sm:$0xff] }
  0xc9   : > { %2218 = vmatpush1.msra.mxu1 %v2180_v32  ;;  %1937 = vmatprep.subr.mxu0 %v14386_v60  ;;  %v2177_v32 = vld [vmem:[%s14014_s3 + $0x18] sm:$0xff] }
  0xca   : > { %v9219_v4 = vpop.permute.xlu1 %7806  ;;  %v9224_v13 = vpop.permute.xlu0 %7811  ;;  %2219 = vmatprep.subr.mxu1 %v14386_v60  ;;  %1938 = vmatpush1.msra.mxu0 %v1833_v3  ;;  %v2176_v3 = vld [vmem:[%s14014_s3 + $0x10] sm:$0xff] }
  0xcb   : > { %2220 = vmatpush1.msra.mxu1 %v2179_v54  ;;  %1939 = vmatprep.subr.mxu0 %v14386_v60 }
  0xcc   : > { %8096 = vrot.lane.b32.xlu1 %v8979_v63, %s8267_s20  ;;  %8101 = vrot.lane.b32.xlu0 %v8984_v33, %s8267_s20  ;;  %v1831_v33 = vld [vmem:[%s14012_s1 + $0x18] sm:$0xff] }
  0xcd   : > { %2221 = vmatprep.subr.mxu1 %v14386_v60  ;;  %1940 = vmatpush1.msra.mxu0 %v1832_v45  ;;  %v1829_v45 = vld [vmem:[%s14012_s1 + $0x8] sm:$0xff] }
  0xce   : > { %v9238_v29 = vpop.permute.xlu1 %7816  ;;  %v9242_v63 = vpop.permute.xlu0 %7821  ;;  %2222 = vmatpush1.msra.mxu1 %v2178_v50  ;;  %1941 = vmatprep.subr.mxu0 %v14386_v60  ;;  %v2175_v50 = vld [vmem:[%s14014_s3 + $0x8] sm:$0xff] }
  0xcf   : > { %2223 = vmatprep.subr.mxu1 %v14386_v60  ;;  %1942 = vmatpush1.msra.mxu0 %v1831_v33 }
  0xd0   : > { %8106 = vrot.lane.b32.xlu1 %v8989_v52, %s8267_s20  ;;  %8111 = vrot.lane.b32.xlu0 %v8994_v53, %s8267_s20  ;;  %v1830_v53 = vld [vmem:[%s14012_s1 + $0x10] sm:$0xff] }
  0xd1   : > { %2224 = vmatpush1.msra.mxu1 %v2177_v32  ;;  %1943 = vmatprep.subr.mxu0 %v14386_v60  ;;  %v2174_v32 = vld [vmem:[%s14014_s3] sm:$0xff] }
  0xd2   : > { %v9259_v24 = vpop.permute.xlu1 %7826  ;;  %v9264_v52 = vpop.permute.xlu0 %7831  ;;  %2225 = vmatprep.subr.mxu1 %v14386_v60  ;;  %1944 = vmatpush1.msra.mxu0 %v1830_v53  ;;  %v14393_v53 = vld [vmem:[#allocation2_spill] sm:$0xff] }
  0xd3   : > { %2226 = vmatpush1.msra.mxu1 %v2176_v3  ;;  %1945 = vmatprep.subr.mxu0 %v14386_v60 }
  0xd4   : > { %8116 = vrot.lane.b32.xlu1 %v8999_v7, %s8267_s20  ;;  %8121 = vrot.lane.b32.xlu0 %v9004_v43, %s8267_s20  ;;  %v1828_v43 = vld [vmem:[%s14012_s1] sm:$0xff] }
  0xd5   : > { %2227 = vmatprep.subr.mxu1 %v14386_v60  ;;  %1946 = vmatpush1.msra.mxu0 %v1829_v45  ;;  %v1845_v45 = vld [vmem:[%s14012_s1 + $0x88] sm:$0xff] }
  0xd6   : > { %v9278_v54 = vpop.permute.xlu1 %7836  ;;  %v9282_v7 = vpop.permute.xlu0 %7841  ;;  %2228 = vmatpush1.msra.mxu1 %v2175_v50  ;;  %1947 = vmatprep.subr.mxu0 %v14386_v60  ;;  %v2191_v50 = vld [vmem:[%s14014_s3 + $0x88] sm:$0xff] }
  0xd7   : > { %2229 = vmatprep.subr.mxu1 %v14386_v60  ;;  %1948 = vmatpush1.msra.mxu0 %v1828_v43  ;;  %v1844_v43 = vld [vmem:[%s14012_s1 + $0x80] sm:$0xff] }
  0xd8   : > { %8126 = vrot.lane.b32.xlu1 %v9009_v58, %s8267_s20  ;;  %8131 = vrot.lane.b32.xlu0 %v9014_v59, %s8267_s20  ;;  %v14392_v59 = vld [vmem:[#allocation3_spill] sm:$0xff] }
  0xd9   : > { %v9312_v3 = vpack.i.bf16 %v14393_v53, %v14392_v59  ;;  %2230 = vmatpush1.msra.mxu1 %v2174_v32  ;;  %1977 = vmatprep.subr.mxu0 %v14386_v60 }
  0xda   : > { %v9299_v33 = vpop.permute.xlu1 %7846  ;;  %v9304_v58 = vpop.permute.xlu0 %7851  ;;  %2259 = vmatprep.subr.mxu1 %v14386_v60  ;;  %1978 = vmatpush2.msra.mxu0 %v1845_v45 }
  0xdb   : > { %14394 = vst [vmem:[#allocation70_spill] sm:$0xff] %v9312_v3  ;;  %2260 = vmatpush2.msra.mxu1 %v2191_v50  ;;  %1979 = vmatprep.subr.mxu0 %v14386_v60 }
  0xdc   : > { %8136 = vrot.lane.b32.xlu1 %v9019_v25, %s8267_s20  ;;  %8141 = vrot.lane.b32.xlu0 %v8969_v42, %s8267_s20 }
  0xdd   : > { %2261 = vmatprep.subr.mxu1 %v14386_v60  ;;  %1980 = vmatpush2.msra.mxu0 %v1844_v43  ;;  %v7718_v43 = vunpack.i.l.bf16 %v9060_v16 }
  0xde   : > { %v9322_v61 = vpop.permute.xlu1 %7856  ;;  %v9326_v25 = vpop.permute.xlu0 %7861  ;;  %2262 = vmatpush2.msra.mxu1 %v2190_v18  ;;  %v7714_v18 = vunpack.i.h.bf16 %v9055_v56 }
  0xdf   : > { %14395 = vst [vmem:[#allocation71_spill] sm:$0xff] %v9322_v61  ;;  %14396 = vst [vmem:[#allocation72_spill] sm:$0xff] %v9326_v25  ;;  %v7739_v25 = vunpack.i.h.bf16 %v9078_v20  ;;  %v7743_v61 = vunpack.i.l.bf16 %v9082_v48 }
  0xe0   : > { %8146 = vrot.lane.b32.xlu1 %v9312_v3, %s8267_s20  ;;  %8151 = vrot.lane.b32.xlu0 %v8437_v46, %s8268_s16  ;;  %v7723_v3 = vunpack.i.l.bf16 %v9064_v1  ;;  %s8269_s20 = smov 4  }
  0xe2   : > { %v9340_v42 = vpop.permute.xlu1 %7866  ;;  %v9342_v32 = vpop.permute.xlu0 %7871 }
  0xe3   : > { %14397 = vst [vmem:[#allocation73_spill] sm:$0xff] %v9340_v42  ;;  %v7728_v42 = vunpack.i.l.bf16 %v9068_v55 }
  0xe4   : > { %8156 = vrot.lane.b32.xlu1 %v14364_v31, %s8268_s16  ;;  %8161 = vrot.lane.b32.xlu0 %v14365_v11, %s8268_s16 }
  0xe6   : > { %v9348_v45 = vpop.permute.xlu1 %7876  ;;  %v9350_v50 = vpop.permute.xlu0 %7881 }
  0xe8   : > { %8166 = vrot.lane.b32.xlu1 %v14367_v6, %s8268_s16  ;;  %8171 = vrot.lane.b32.xlu0 %v14368_v5, %s8268_s16 }
  0xea   : > { %v9356_v46 = vpop.permute.xlu1 %7886  ;;  %v9358_v60 = vpop.permute.xlu0 %7891 }
  0xec   : > { %8176 = vrot.lane.b32.xlu1 %v14370_v38, %s8268_s16  ;;  %8181 = vrot.lane.b32.xlu0 %v14372_v35, %s8268_s16  ;;  %v7713_v38 = vunpack.i.l.bf16 %v9055_v56  ;;  %v7719_v35 = vunpack.i.h.bf16 %v9060_v16  ;;  %v7734_v56 = vunpack.i.h.bf16 %v9074_v49  ;;  %v7738_v16 = vunpack.i.l.bf16 %v9078_v20 }
  0xed   : > { %v1616_v20 = vsel %vm1597_vm3, %v8559_v39, %v7718_v43  ;;  %v1622_v39 = vsel %vm1597_vm3, %v8617_v0, %v7733_v23  ;;  %v7799_v23 = vunpack.i.h.bf16 %v9198_v34  ;;  %v7803_v43 = vunpack.i.l.bf16 %v9202_v57 }
  0xee   : > { %v9364_v11 = vpop.permute.xlu1 %7896  ;;  %v9366_v31 = vpop.permute.xlu0 %7901  ;;  %v1617_v49 = vsel %vm1597_vm3, %v8556_v37, %v7719_v35  ;;  %v1623_v37 = vsel %vm1597_vm3, %v8626_v51, %v7734_v56  ;;  %v7804_v35 = vunpack.i.h.bf16 %v9202_v57  ;;  %v7819_v57 = vunpack.i.h.bf16 %v9238_v29 }
  0xf0   : > { %8186 = vrot.lane.b32.xlu1 %v14374_v28, %s8268_s16  ;;  %8191 = vrot.lane.b32.xlu0 %v14375_v27, %s8268_s16  ;;  %v7724_v28 = vunpack.i.h.bf16 %v9064_v1  ;;  %v7729_v27 = vunpack.i.h.bf16 %v9068_v55  ;;  %v1615_v1 = vsel %vm1597_vm3, %v8536_v8, %v7714_v18  ;;  %v7744_v55 = vunpack.i.h.bf16 %v9082_v48 }
  0xf1   : > { %v1618_v8 = vsel %vm1597_vm3, %v8582_v17, %v7723_v3  ;;  %v14398_v17 = vld [vmem:[#allocation30_spill] sm:$0xff]  ;;  %v7794_v3 = vunpack.i.h.bf16 %v9184_v22 }
  0xf2   : > { %v9372_v5 = vpop.permute.xlu1 %7906  ;;  %v9374_v6 = vpop.permute.xlu0 %7911  ;;  %v1619_v62 = vsel %vm1597_vm3, %v8579_v14, %v7724_v28  ;;  %v1625_v14 = vsel %vm1597_vm3, %v8636_v2, %v7739_v25  ;;  %v14402_v2 = vld [vmem:[#allocation29_spill] sm:$0xff]  ;;  %v14403_v28 = vld [vmem:[#allocation66_spill] sm:$0xff] }
  0xf3   : > { %v7749_v25 = vunpack.i.h.bf16 %v14402_v2 }
  0xf4   : > { %8196 = vrot.lane.b32.xlu1 %v14377_v12, %s8268_s16  ;;  %8201 = vrot.lane.b32.xlu0 %v14379_v21, %s8268_s16  ;;  %v1614_v21 = vsel %vm1597_vm3, %v8539_v9, %v7713_v38  ;;  %v1621_v9 = vsel %vm1597_vm3, %v8596_v40, %v7729_v27  ;;  %v7793_v40 = vunpack.i.l.bf16 %v9184_v22  ;;  %v7798_v38 = vunpack.i.l.bf16 %v9198_v34  ;;  %v14406_v22 = vld [vmem:[#allocation5_spill] sm:$0xff] }
  0xf5   : > { %v7808_v34 = vunpack.i.l.bf16 %v9219_v4  ;;  %v7814_v27 = vunpack.i.h.bf16 %v9224_v13 }
  0xf6   : > { %v9390_v12 = vpop.permute.xlu1 %7916  ;;  %v9394_v19 = vpop.permute.xlu0 %7921 }
  0xf8   : > { %8206 = vrot.lane.b32.xlu1 %v14380_v47, %s8268_s16  ;;  %8211 = vrot.lane.b32.xlu0 %v14382_v30, %s8268_s16  ;;  %v1620_v47 = vsel %vm1597_vm3, %v8599_v41, %v7728_v42  ;;  %v1624_v30 = vsel %vm1597_vm3, %v14398_v17, %v7738_v16  ;;  %v14400_v41 = vld [vmem:[#allocation32_spill] sm:$0xff]  ;;  %v14401_v42 = vld [vmem:[#allocation33_spill] sm:$0xff]  ;;  %v1647_v16 = vsel %vm1630_vm4, %v1614_v21, %v7793_v40  ;;  %v7818_v17 = vunpack.i.l.bf16 %v9238_v29 }
  0xf9   : > { %v1627_v51 = vsel %vm1597_vm3, %v14400_v41, %v7744_v55  ;;  %v1626_v0 = vsel %vm1597_vm3, %v14401_v42, %v7743_v61  ;;  %v7809_v61 = vunpack.i.h.bf16 %v9219_v4  ;;  %v1648_v55 = vsel %vm1630_vm4, %v1615_v1, %v7794_v3 }
  0xfa   : > { %v9422_v48 = vpop.permute.xlu1 %7926  ;;  %v9430_v18 = vpop.permute.xlu0 %7931  ;;  %v1650_v42 = vsel %vm1630_vm4, %v1617_v49, %v7799_v23  ;;  %v1649_v4 = vsel %vm1630_vm4, %v1616_v20, %v7798_v38  ;;  %v1651_v21 = vsel %vm1630_vm4, %v1618_v8, %v7803_v43  ;;  %v1652_v1 = vsel %vm1630_vm4, %v1619_v62, %v7804_v35 }
  0xfb   : > { %14399 = vst [vmem:[#allocation30_spill] sm:$0xff] %v9430_v18  ;;  %v7874_v3 = vunpack.i.h.bf16 %v9342_v32  ;;  %v7873_v29 = vunpack.i.l.bf16 %v9342_v32  ;;  %v1654_v40 = vsel %vm1630_vm4, %v1621_v9, %v7809_v61  ;;  %v1653_v49 = vsel %vm1630_vm4, %v1620_v47, %v7808_v34 }
  0xfc   : > { %8216 = vrot.lane.b32.xlu1 %v8707_v44, %s8268_s16  ;;  %8221 = vrot.lane.b32.xlu0 %v14403_v28, %s8268_s16  ;;  %v7813_v44 = vunpack.i.l.bf16 %v9224_v13  ;;  %v7824_v28 = vunpack.i.h.bf16 %v9242_v63  ;;  %v7823_v13 = vunpack.i.l.bf16 %v9242_v63  ;;  %v1656_v23 = vsel %vm1630_vm4, %v1623_v37, %v7814_v27 }
  0xfd   : > { %v1658_v38 = vsel %vm1630_vm4, %v1625_v14, %v7819_v57  ;;  %v1657_v8 = vsel %vm1630_vm4, %v1624_v30, %v7818_v17  ;;  %v7879_v62 = vunpack.i.h.bf16 %v9348_v45  ;;  %v7878_v35 = vunpack.i.l.bf16 %v9348_v45 }
  0xfe   : > { %v9450_v56 = vpop.permute.xlu1 %7936  ;;  %v9456_v41 = vpop.permute.xlu0 %7941  ;;  %v1655_v20 = vsel %vm1630_vm4, %v1622_v39, %v7813_v44  ;;  %v1659_v32 = vsel %vm1630_vm4, %v1626_v0, %v7823_v13  ;;  %v1660_v9 = vsel %vm1630_vm4, %v1627_v51, %v7824_v28  ;;  %v1680_v39 = vsel %vm1663_vm5, %v1647_v16, %v7873_v29 }
  0xff   : > { %14404 = vst [vmem:[#allocation32_spill] sm:$0xff] %v9450_v56  ;;  %14405 = vst [vmem:[#allocation33_spill] sm:$0xff] %v9456_v41  ;;  %v1681_v37 = vsel %vm1663_vm5, %v1648_v55, %v7874_v3  ;;  %v7884_v34 = vunpack.i.h.bf16 %v9350_v50  ;;  %v7883_v14 = vunpack.i.l.bf16 %v9350_v50  ;;  %v7889_v30 = vunpack.i.h.bf16 %v9356_v46 }
 0x100   : > { %8226 = vrot.lane.b32.xlu1 %v14406_v22, %s8268_s16  ;;  %v7888_v27 = vunpack.i.l.bf16 %v9356_v46  ;;  %v1682_v44 = vsel %vm1663_vm5, %v1649_v4, %v7878_v35  ;;  %v1683_v16 = vsel %vm1663_vm5, %v1650_v42, %v7879_v62  ;;  %v7894_v50 = vunpack.i.h.bf16 %v9358_v60  ;;  %s8273_s16 = smov 24  }
 0x101   : > { %v7893_v28 = vunpack.i.l.bf16 %v9358_v60  ;;  %v1684_v3 = vsel %vm1663_vm5, %v1651_v21, %v7883_v14  ;;  %v1685_v29 = vsel %vm1663_vm5, %v1652_v1, %v7884_v34  ;;  %v1687_v62 = vsel %vm1663_vm5, %v1654_v40, %v7889_v30 }
 0x102   : > { %v9472_v63 = vpop.permute.xlu1 %7946  ;;  %v7952_v43 = vpop.permute.xlu0 %7951  ;;  %v1686_v42 = vsel %vm1663_vm5, %v1653_v49, %v7888_v27  ;;  %v7899_v21 = vunpack.i.h.bf16 %v9364_v11  ;;  %v7898_v1 = vunpack.i.l.bf16 %v9364_v11  ;;  %v1689_v49 = vsel %vm1663_vm5, %v1656_v23, %v7894_v50 }
 0x103   : > { %14407 = vst [vmem:[#allocation29_spill] sm:$0xff] %v9472_v63  ;;  %v7954_v47 = vunpack.i.h.bf16 %v7952_v43  ;;  %v7953_v61 = vunpack.i.l.bf16 %v7952_v43  ;;  %v1688_v34 = vsel %vm1663_vm5, %v1655_v20, %v7893_v28  ;;  %v7904_v30 = vunpack.i.h.bf16 %v9366_v31 }
 0x104   : > { %v7903_v27 = vunpack.i.l.bf16 %v9366_v31  ;;  %v7829_v11 = vunpack.i.h.bf16 %v9259_v24  ;;  %v1691_v31 = vsel %vm1663_vm5, %v1658_v38, %v7899_v21  ;;  %v14408_v38 = vld [vmem:[#allocation35_spill] sm:$0xff]  ;;  %v14409_v21 = vunpack.i.l.bf16 %v14402_v2 }
 0x105   : > { %v9487_v45 = vsel %vm1696_vm6, %v1680_v39, %v7953_v61  ;;  %v9490_v0 = vsel %vm1696_vm6, %v1681_v37, %v7954_v47 }
 0x106   : > { %v7957_v51 = vpop.permute.xlu1 %7956  ;;  %v7962_v17 = vpop.permute.xlu0 %7961 }
 0x107   : > { %v7959_v55 = vunpack.i.h.bf16 %v7957_v51  ;;  %v7958_v57 = vunpack.i.l.bf16 %v7957_v51  ;;  %v7964_v13 = vunpack.i.h.bf16 %v7962_v17  ;;  %v7963_v46 = vunpack.i.l.bf16 %v7962_v17 }
 0x109   : > { %v9499_v43 = vsel %vm1696_vm6, %v1682_v44, %v7958_v57  ;;  %v9502_v4 = vsel %vm1696_vm6, %v1683_v16, %v7959_v55  ;;  %v9507_v35 = vsel %vm1696_vm6, %v1684_v3, %v7963_v46  ;;  %v9510_v60 = vsel %vm1696_vm6, %v1685_v29, %v7964_v13 }
 0x10a   : > { %v7967_v47 = vpop.permute.xlu1 %7966  ;;  %v7972_v37 = vpop.permute.xlu0 %7971  ;;  %v7828_v16 = vunpack.i.l.bf16 %v9259_v24  ;;  %v1690_v57 = vsel %vm1663_vm5, %v1657_v8, %v7898_v1  ;;  %v7909_v13 = vunpack.i.h.bf16 %v9372_v5  ;;  %v7908_v46 = vunpack.i.l.bf16 %v9372_v5  ;;  %v14410_v1 = vld [vmem:[#allocation36_spill] sm:$0xff] }
 0x10b   : > { %v7969_v61 = vunpack.i.h.bf16 %v7967_v47  ;;  %v7968_v39 = vunpack.i.l.bf16 %v7967_v47  ;;  %v7974_v14 = vunpack.i.h.bf16 %v7972_v37  ;;  %v7973_v40 = vunpack.i.l.bf16 %v7972_v37 }
 0x10c   : > { %v1692_v29 = vsel %vm1663_vm5, %v1659_v32, %v7903_v27  ;;  %v1629_v8 = vsel %vm1597_vm3, %v14408_v38, %v7749_v25  ;;  %v1628_v5 = vsel %vm1597_vm3, %v14410_v1, %v14409_v21 }
 0x10d   : > { %v9519_v51 = vsel %vm1696_vm6, %v1686_v42, %v7968_v39  ;;  %v9522_v44 = vsel %vm1696_vm6, %v1687_v62, %v7969_v61  ;;  %v9527_v20 = vsel %vm1696_vm6, %v1688_v34, %v7973_v40  ;;  %v9530_v23 = vsel %vm1696_vm6, %v1689_v49, %v7974_v14 }
 0x10e   : > { %v7977_v55 = vpop.permute.xlu1 %7976  ;;  %v7982_v28 = vpop.permute.xlu0 %7981  ;;  %v1693_v42 = vsel %vm1663_vm5, %v1660_v9, %v7904_v30  ;;  %v1662_v9 = vsel %vm1630_vm4, %v1629_v8, %v7829_v11  ;;  %v1661_v37 = vsel %vm1630_vm4, %v1628_v5, %v7828_v16 }
 0x10f   : > { %v7979_v17 = vunpack.i.h.bf16 %v7977_v55  ;;  %v7978_v50 = vunpack.i.l.bf16 %v7977_v55  ;;  %v7984_v3 = vunpack.i.h.bf16 %v7982_v28  ;;  %v7983_v24 = vunpack.i.l.bf16 %v7982_v28 }
 0x110   : > { %v1694_v25 = vsel %vm1663_vm5, %v1661_v37, %v7908_v46  ;;  %v1695_v2 = vsel %vm1663_vm5, %v1662_v9, %v7909_v13 }
 0x111   : > { %v1723_v62 = vsel %vm1696_vm6, %v1690_v57, %v7978_v50  ;;  %v1724_v47 = vsel %vm1696_vm6, %v1691_v31, %v7979_v17  ;;  %v1725_v61 = vsel %vm1696_vm6, %v1692_v29, %v7983_v24  ;;  %v1726_v32 = vsel %vm1696_vm6, %v1693_v42, %v7984_v3 }
 0x112   : > { %v7987_v39 = vpop.permute.xlu1 %7986  ;;  %v9552_v14 = vpop.permute.xlu0 %7991 }
 0x113   : > { %v7989_v34 = vunpack.i.h.bf16 %v7987_v39  ;;  %v7988_v49 = vunpack.i.l.bf16 %v7987_v39 }
 0x115   : > { %v1727_v40 = vsel %vm1696_vm6, %v1694_v25, %v7988_v49  ;;  %v1728_v30 = vsel %vm1696_vm6, %v1695_v2, %v7989_v34 }
 0x116   : > { %v9558_v27 = vpop.permute.xlu1 %7996  ;;  %v9560_v55 = vpop.permute.xlu0 %8001 }
 0x11a   : > { %v9562_v57 = vpop.permute.xlu1 %8006  ;;  %v9564_v11 = vpop.permute.xlu0 %8011 }
 0x11b   : > { %14411 = vst [vmem:[#allocation66_spill] sm:$0xff] %v9564_v11 }
 0x11e   : > { %v9566_v16 = vpop.permute.xlu1 %8016  ;;  %v9568_v31 = vpop.permute.xlu0 %8021 }
 0x11f   : > { %14412 = vst [vmem:[#allocation35_spill] sm:$0xff] %v9566_v16  ;;  %14413 = vst [vmem:[#allocation36_spill] sm:$0xff] %v9568_v31  ;;  %v14424_v31 = vld [vmem:[#allocation8_spill] sm:$0xff]  ;;  %v14426_v16 = vld [vmem:[#allocation31_spill] sm:$0xff] }
 0x122   : > { %v9570_v17 = vpop.permute.xlu1 %8026  ;;  %v8032_v50 = vpop.permute.xlu0 %8031 }
 0x123   : > { %14414 = vst [vmem:[#allocation74_spill] sm:$0xff] %v9570_v17  ;;  %v8034_v28 = vunpack.i.h.bf16 %v8032_v50  ;;  %v8033_v13 = vunpack.i.l.bf16 %v8032_v50 }
 0x125   : > { %v1746_v3 = vsel %vm1729_vm7, %v9487_v45, %v8033_v13  ;;  %v1747_v24 = vsel %vm1729_vm7, %v9490_v0, %v8034_v28 }
 0x126   : > { %v8037_v46 = vpop.permute.xlu1 %8036  ;;  %v8042_v38 = vpop.permute.xlu0 %8041 }
 0x127   : > { %v8039_v29 = vunpack.i.h.bf16 %v8037_v46  ;;  %v8038_v42 = vunpack.i.l.bf16 %v8037_v46  ;;  %v8044_v8 = vunpack.i.h.bf16 %v8042_v38  ;;  %v8043_v21 = vunpack.i.l.bf16 %v8042_v38 }
 0x129   : > { %v9578_v1 = vsel %vm1729_vm7, %v9499_v43, %v8038_v42  ;;  %v9582_v5 = vsel %vm1729_vm7, %v9502_v4, %v8039_v29  ;;  %v9586_v45 = vsel %vm1729_vm7, %v9507_v35, %v8043_v21  ;;  %v9590_v0 = vsel %vm1729_vm7, %v9510_v60, %v8044_v8 }
 0x12a   : > { %v8047_v39 = vpop.permute.xlu1 %8046  ;;  %v8052_v34 = vpop.permute.xlu0 %8051 }
 0x12b   : > { %v8049_v9 = vunpack.i.h.bf16 %v8047_v39  ;;  %v8048_v37 = vunpack.i.l.bf16 %v8047_v39  ;;  %v8054_v49 = vunpack.i.h.bf16 %v8052_v34  ;;  %v8053_v25 = vunpack.i.l.bf16 %v8052_v34 }
 0x12d   : > { %v9594_v43 = vsel %vm1729_vm7, %v9519_v51, %v8048_v37  ;;  %v9598_v4 = vsel %vm1729_vm7, %v9522_v44, %v8049_v9  ;;  %v9602_v35 = vsel %vm1729_vm7, %v9527_v20, %v8053_v25  ;;  %v9606_v60 = vsel %vm1729_vm7, %v9530_v23, %v8054_v49  ;;  %v14418_v49 = vld [vmem:[#allocation13_spill] sm:$0xff] }
 0x12e   : > { %v8057_v2 = vpop.permute.xlu1 %8056  ;;  %v8062_v13 = vpop.permute.xlu0 %8061  ;;  %v7674_v25 = vunpack.i.h.bf16 %v14418_v49 }
 0x12f   : > { %v8059_v50 = vunpack.i.h.bf16 %v8057_v2  ;;  %v8058_v28 = vunpack.i.l.bf16 %v8057_v2  ;;  %v8064_v46 = vunpack.i.h.bf16 %v8062_v13  ;;  %v8063_v29 = vunpack.i.l.bf16 %v8062_v13  ;;  %v14419_v2 = vld [vmem:[#allocation18_spill] sm:$0xff] }
 0x130   : > { %v7683_v13 = vunpack.i.l.bf16 %v14419_v2 }
 0x131   : > { %v9609_v51 = vsel %vm1729_vm7, %v1723_v62, %v8058_v28  ;;  %v9612_v44 = vsel %vm1729_vm7, %v1724_v47, %v8059_v50  ;;  %v9615_v38 = vsel %vm1729_vm7, %v1725_v61, %v8063_v29  ;;  %v9618_v20 = vsel %vm1729_vm7, %v1726_v32, %v8064_v46 }
 0x132   : > { %v8067_v42 = vpop.permute.xlu1 %8066  ;;  %v9620_v21 = vpop.permute.xlu0 %8071  ;;  %v7684_v50 = vunpack.i.h.bf16 %v14419_v2 }
 0x133   : > { %v8069_v23 = vunpack.i.h.bf16 %v8067_v42  ;;  %v8068_v8 = vunpack.i.l.bf16 %v8067_v42  ;;  %v1599_v42 = vsel %vm1597_vm3, %v14393_v53, %v7674_v25  ;;  %v14423_v25 = vld [vmem:[#allocation24_spill] sm:$0xff] }
 0x134   : > { %v7689_v53 = vunpack.i.h.bf16 %v14423_v25 }
 0x135   : > { %v9623_v39 = vsel %vm1729_vm7, %v1727_v40, %v8068_v8  ;;  %v9626_v62 = vsel %vm1729_vm7, %v1728_v30, %v8069_v23  ;;  %v7673_v40 = vunpack.i.l.bf16 %v14418_v49  ;;  %v14421_v8 = vld [vmem:[#allocation7_spill] sm:$0xff]  ;;  %v14422_v49 = vld [vmem:[#allocation21_spill] sm:$0xff] }
 0x136   : > { %v9628_v9 = vpop.permute.xlu1 %8076  ;;  %v9630_v47 = vpop.permute.xlu0 %8081  ;;  %v9652_v22 = vsel %vm1597_vm3, %v14421_v8, %v7684_v50  ;;  %v7679_v17 = vunpack.i.h.bf16 %v14422_v49  ;;  %v9665_v50 = vsel %vm1597_vm3, %v14424_v31, %v7683_v13  ;;  %v7688_v8 = vunpack.i.l.bf16 %v14423_v25 }
 0x137   : > { %v1598_v23 = vsel %vm1597_vm3, %v14392_v59, %v7673_v40  ;;  %v9685_v13 = vunpack.i.l.bf16 %v14426_v16 }
 0x139   : > { %14429 = vst [vmem:[#allocation7_spill] sm:$0xff] %v9685_v13 }
 0x13a   : > { %v9632_v37 = vpop.permute.xlu1 %8086  ;;  %v9634_v61 = vpop.permute.xlu0 %8091 }
 0x13b   : > { %14415 = vst [vmem:[#allocation75_spill] sm:$0xff] %v9634_v61  ;;  %v14432_v61 = vld [vmem:[#allocation12_spill] sm:$0xff] }
 0x13c   : > { %v9705_v11 = vsel %vm1597_vm3, %v14432_v61, %v7688_v8  ;;  %v1631_v61 = vsel %vm1630_vm4, %v1598_v23, %v9685_v13  ;;  %v7758_v23 = vunpack.i.l.bf16 %v9111_v10 }
 0x13e   : > { %v9636_v32 = vpop.permute.xlu1 %8096  ;;  %v9638_v34 = vpop.permute.xlu0 %8101 }
 0x13f   : > { %14416 = vst [vmem:[#allocation76_spill] sm:$0xff] %v9636_v32  ;;  %14417 = vst [vmem:[#allocation77_spill] sm:$0xff] %v9638_v34 }
 0x142   : > { %v9643_v30 = vpop.permute.xlu1 %8106  ;;  %v8112_v28 = vpop.permute.xlu0 %8111 }
 0x143   : > { %14420 = vst [vmem:[#allocation13_spill] sm:$0xff] %v9643_v30  ;;  %v8114_v46 = vunpack.i.h.bf16 %v8112_v28  ;;  %v8113_v29 = vunpack.i.l.bf16 %v8112_v28  ;;  %v7678_v28 = vunpack.i.l.bf16 %v14422_v49  ;;  %v14428_v49 = vld [vmem:[#allocation10_spill] sm:$0xff] }
 0x144   : > { %v9682_v31 = vsel %vm1597_vm3, %v14428_v49, %v7679_v17 }
 0x145   : > { %v9656_v30 = vsel %vm1762_vm8, %v1746_v3, %v8113_v29  ;;  %v9659_v2 = vsel %vm1762_vm8, %v1747_v24, %v8114_v46  ;;  %v14425_v3 = vld [vmem:[#allocation25_spill] sm:$0xff]  ;;  %v9670_v24 = vunpack.i.h.bf16 %v14426_v16 }
 0x146   : > { %v8117_v63 = vpop.permute.xlu1 %8116  ;;  %v8122_v59 = vpop.permute.xlu0 %8121  ;;  %v7694_v29 = vunpack.i.h.bf16 %v14425_v3 }
 0x147   : > { %v8119_v34 = vunpack.i.h.bf16 %v8117_v63  ;;  %v8118_v40 = vunpack.i.l.bf16 %v8117_v63  ;;  %v8124_v41 = vunpack.i.h.bf16 %v8122_v59  ;;  %v8123_v32 = vunpack.i.l.bf16 %v8122_v59  ;;  %14427 = vst [vmem:[#allocation18_spill] sm:$0xff] %v9670_v24 }
 0x149   : > { %v9674_v46 = vsel %vm1762_vm8, %v9578_v1, %v8118_v40  ;;  %v9678_v63 = vsel %vm1762_vm8, %v9582_v5, %v8119_v34  ;;  %v9689_v25 = vsel %vm1762_vm8, %v9586_v45, %v8123_v32  ;;  %v9693_v1 = vsel %vm1762_vm8, %v9590_v0, %v8124_v41  ;;  %v14430_v40 = vld [vmem:[#allocation9_spill] sm:$0xff]  ;;  %v14431_v34 = vld [vmem:[#allocation11_spill] sm:$0xff]  ;;  %v14433_v0 = vld [vmem:[#allocation14_spill] sm:$0xff] }
 0x14a   : > { %v8127_v59 = vpop.permute.xlu1 %8126  ;;  %v9697_v5 = vsel %vm1597_vm3, %v14430_v40, %v7678_v28  ;;  %v9701_v17 = vsel %vm1597_vm3, %v14431_v34, %v7689_v53  ;;  %v8132_v56 = vpop.permute.xlu0 %8131  ;;  %v7693_v45 = vunpack.i.l.bf16 %v14425_v3  ;;  %v9710_v18 = vsel %vm1597_vm3, %v14433_v0, %v7694_v29 }
 0x14b   : > { %v8129_v49 = vunpack.i.h.bf16 %v8127_v59  ;;  %v8128_v16 = vunpack.i.l.bf16 %v8127_v59  ;;  %v8134_v32 = vunpack.i.h.bf16 %v8132_v56  ;;  %v8133_v41 = vunpack.i.l.bf16 %v8132_v56  ;;  %14434 = vst [vmem:[#allocation21_spill] sm:$0xff] %v9710_v18 }
 0x14c   : > { %v1632_v28 = vsel %vm1630_vm4, %v1599_v42, %v9670_v24  ;;  %v7833_v56 = vunpack.i.l.bf16 %v9264_v52  ;;  %v7913_v29 = vunpack.i.l.bf16 %v9374_v6 }
 0x14d   : > { %v9716_v53 = vsel %vm1762_vm8, %v9594_v43, %v8128_v16  ;;  %v9720_v59 = vsel %vm1762_vm8, %v9598_v4, %v8129_v49  ;;  %v9727_v3 = vsel %vm1762_vm8, %v9602_v35, %v8133_v41  ;;  %v9731_v42 = vsel %vm1762_vm8, %v9606_v60, %v8134_v32 }
 0x14e   : > { %v8137_v8 = vpop.permute.xlu1 %8136  ;;  %v7759_v43 = vunpack.i.h.bf16 %v9111_v10  ;;  %v8142_v34 = vpop.permute.xlu0 %8141  ;;  %v7993_v49 = vunpack.i.l.bf16 %v9552_v14  ;;  %v7834_v35 = vunpack.i.h.bf16 %v9264_v52  ;;  %v8073_v41 = vunpack.i.l.bf16 %v9620_v21 }
 0x14f   : > { %v8139_v4 = vunpack.i.h.bf16 %v8137_v8  ;;  %v8138_v40 = vunpack.i.l.bf16 %v8137_v8  ;;  %v8144_v16 = vunpack.i.h.bf16 %v8142_v34  ;;  %v8143_v0 = vunpack.i.l.bf16 %v8142_v34 }
 0x150   : > { %v1664_v8 = vsel %vm1663_vm5, %v1631_v61, %v7833_v56  ;;  %v7914_v34 = vunpack.i.h.bf16 %v9374_v6  ;;  %v7994_v61 = vunpack.i.h.bf16 %v9552_v14 }
 0x151   : > { %v9741_v60 = vsel %vm1762_vm8, %v9609_v51, %v8138_v40  ;;  %v9745_v32 = vsel %vm1762_vm8, %v9612_v44, %v8139_v4  ;;  %v9750_v10 = vsel %vm1762_vm8, %v9615_v38, %v8143_v0  ;;  %v9754_v52 = vsel %vm1762_vm8, %v9618_v20, %v8144_v16 }
 0x152   : > { %v8147_v24 = vpop.permute.xlu1 %8146  ;;  %v1697_v51 = vsel %vm1696_vm6, %v1664_v8, %v7913_v29  ;;  %v8152_v44 = vpop.permute.xlu0 %8151  ;;  %v7764_v4 = vunpack.i.h.bf16 %v9115_v15  ;;  %v8074_v38 = vunpack.i.h.bf16 %v9620_v21  ;;  %v7838_v29 = vunpack.i.l.bf16 %v9278_v54  ;;  %v14435_v21 = vld [vmem:[#allocation15_spill] sm:$0xff] }
 0x153   : > { %v8149_v40 = vunpack.i.h.bf16 %v8147_v24  ;;  %v8148_v13 = vunpack.i.l.bf16 %v8147_v24  ;;  %v8153_v56 = vunpack.i.l.bf16 %v8152_v44  ;;  %v1730_v18 = vsel %vm1729_vm7, %v1697_v51, %v7993_v49 }
 0x154   : > { %v1763_v0 = vsel %vm1762_vm8, %v1730_v18, %v8073_v41  ;;  %v1665_v24 = vsel %vm1663_vm5, %v1632_v28, %v7834_v35  ;;  %v8154_v14 = vunpack.i.h.bf16 %v8152_v44  ;;  %v1606_v18 = vsel %vm1597_vm3, %v14435_v21, %v7693_v45  ;;  %v14436_v28 = vld [vmem:[#allocation26_spill] sm:$0xff] }
 0x155   : > { %v9765_v20 = vsel %vm1762_vm8, %v9623_v39, %v8148_v13  ;;  %v9769_v6 = vsel %vm1762_vm8, %v9626_v62, %v8149_v40  ;;  %v1796_v49 = vsel %vm1795_vm9, %v1763_v0, %v8153_v56  ;;  %v7763_v41 = vunpack.i.l.bf16 %v9115_v15  ;;  %v14437_v40 = vld [vmem:[#allocation39_spill] sm:$0xff] }
 0x156   : > { %v9773_v16 = vpop.permute.xlu1 %8156  ;;  %v1698_v39 = vsel %vm1696_vm6, %v1665_v24, %v7914_v34  ;;  %v7918_v13 = vunpack.i.l.bf16 %v9390_v12  ;;  %v9781_v62 = vpop.permute.xlu0 %8161  ;;  %1982 = vmatmul.mubr.f32.vlgmr.msra.gmra.mxu0 %v1796_v49  ;;  %2264 = vmatmul.mubr.f32.vlgmr.msra.gmra.mxu1 %v1796_v49  ;;  %v7698_v35 = vunpack.i.l.bf16 %v14436_v28  ;;  %v1633_v8 = vsel %vm1630_vm4, %v9697_v5, %v7758_v23 }
 0x157   : > { %v7998_v51 = vunpack.i.l.bf16 %v9558_v27  ;;  %7072 = vmatprep.mubr.msk.f32.mxu0 %vm1597_vm3, %v14437_v40  ;;  %7105 = vmatprep.mubr.msk.f32.mxu1 %vm1597_vm3, %v14437_v40  ;;  %v1731_v15 = vsel %vm1729_vm7, %v1698_v39, %v7994_v61  ;;  %v1634_v45 = vsel %vm1630_vm4, %v9682_v31, %v7759_v43  ;;  %v1636_v34 = vsel %vm1630_vm4, %v9652_v22, %v7764_v4 }
 0x158   : > { %v8078_v44 = vunpack.i.l.bf16 %v9628_v9  ;;  %v1764_v5 = vsel %vm1762_vm8, %v1731_v15, %v8074_v38  ;;  %v7839_v23 = vunpack.i.h.bf16 %v9278_v54  ;;  %v1666_v56 = vsel %vm1663_vm5, %v1633_v8, %v7838_v29 }
 0x159   : > { %v8158_v0 = vunpack.i.l.bf16 %v9773_v16  ;;  %v1797_v61 = vsel %vm1795_vm9, %v1764_v5, %v8154_v14  ;;  %v1635_v31 = vsel %vm1630_vm4, %v9665_v50, %v7763_v41  ;;  %v7769_v43 = vunpack.i.h.bf16 %v9138_v36  ;;  %v14438_v14 = vld [vmem:[#allocation40_spill] sm:$0xff] }
 0x15a   : > { %v9801_v24 = vpop.permute.xlu1 %8166  ;;  %v7919_v22 = vunpack.i.h.bf16 %v9390_v12  ;;  %v1699_v4 = vsel %vm1696_vm6, %v1666_v56, %v7918_v13  ;;  %v9809_v38 = vpop.permute.xlu0 %8171  ;;  %1987 = vmatmul.mubr.f32.gmra.mxu0 %v1797_v61  ;;  %2269 = vmatmul.mubr.f32.gmra.mxu1 %v1797_v61  ;;  %v7768_v54 = vunpack.i.l.bf16 %v9138_v36  ;;  %v7773_v29 = vunpack.i.l.bf16 %v9143_v26 }
 0x15b   : > { %v7999_v49 = vunpack.i.h.bf16 %v9558_v27  ;;  %7073 = vmatprep.mubr.msk.f32.mxu0 %vm1597_vm3, %v14438_v14  ;;  %7106 = vmatprep.mubr.msk.f32.mxu1 %vm1597_vm3, %v14438_v14  ;;  %v1732_v12 = vsel %vm1729_vm7, %v1699_v4, %v7998_v51  ;;  %v7774_v50 = vunpack.i.h.bf16 %v9143_v26  ;;  %v7844_v21 = vunpack.i.h.bf16 %v9282_v7 }
 0x15c   : > { %v8079_v41 = vunpack.i.h.bf16 %v9628_v9  ;;  %v1765_v36 = vsel %vm1762_vm8, %v1732_v12, %v8078_v44  ;;  %v1667_v39 = vsel %vm1663_vm5, %v1634_v45, %v7839_v23  ;;  %v7843_v27 = vunpack.i.l.bf16 %v9282_v7  ;;  %v14439_v23 = vld [vmem:[#allocation41_spill] sm:$0xff] }
 0x15d   : > { %v8159_v13 = vunpack.i.h.bf16 %v9773_v16  ;;  %v1798_v40 = vsel %vm1795_vm9, %v1765_v36, %v8158_v0  ;;  %v1638_v51 = vsel %vm1630_vm4, %v9701_v17, %v7769_v43  ;;  %v7848_v15 = vunpack.i.l.bf16 %v9299_v33 }
 0x15e   : > { %v9826_v8 = vpop.permute.xlu1 %8176  ;;  %v1700_v5 = vsel %vm1696_vm6, %v1667_v39, %v7919_v22  ;;  %v7923_v9 = vunpack.i.l.bf16 %v9394_v19  ;;  %v9834_v44 = vpop.permute.xlu0 %8181  ;;  %1992 = vmatmul.mubr.f32.gmra.mxu0 %v1798_v40  ;;  %2274 = vmatmul.mubr.f32.gmra.mxu1 %v1798_v40  ;;  %v1637_v7 = vsel %vm1630_vm4, %v9705_v11, %v7768_v54  ;;  %v1639_v16 = vsel %vm1630_vm4, %v1606_v18, %v7773_v29 }
 0x15f   : > { %v8003_v45 = vunpack.i.l.bf16 %v9560_v55  ;;  %7074 = vmatprep.mubr.msk.f32.mxu0 %vm1597_vm3, %v14439_v23  ;;  %7107 = vmatprep.mubr.msk.f32.mxu1 %vm1597_vm3, %v14439_v23  ;;  %v1733_v17 = vsel %vm1729_vm7, %v1700_v5, %v7999_v49  ;;  %v7849_v56 = vunpack.i.h.bf16 %v9299_v33  ;;  %v7853_v0 = vunpack.i.l.bf16 %v9304_v58 }
 0x160   : > { %v8083_v61 = vunpack.i.l.bf16 %v9630_v47  ;;  %v1766_v11 = vsel %vm1762_vm8, %v1733_v17, %v8079_v41  ;;  %v1668_v18 = vsel %vm1663_vm5, %v1635_v31, %v7843_v27  ;;  %v1669_v43 = vsel %vm1663_vm5, %v1636_v34, %v7844_v21  ;;  %v14440_v41 = vld [vmem:[#allocation42_spill] sm:$0xff] }
 0x161   : > { %v8163_v22 = vunpack.i.l.bf16 %v9781_v62  ;;  %v1799_v54 = vsel %vm1795_vm9, %v1766_v11, %v8159_v13  ;;  %v1670_v29 = vsel %vm1663_vm5, %v1637_v7, %v7848_v15  ;;  %v7854_v33 = vunpack.i.h.bf16 %v9304_v58 }
 0x162   : > { %v9852_v4 = vpop.permute.xlu1 %8186  ;;  %v7924_v49 = vunpack.i.h.bf16 %v9394_v19  ;;  %v1701_v14 = vsel %vm1696_vm6, %v1668_v18, %v7923_v9  ;;  %v8192_v12 = vpop.permute.xlu0 %8191  ;;  %1997 = vmatmul.mubr.f32.gmra.mxu0 %v1799_v54  ;;  %2279 = vmatmul.mubr.f32.gmra.mxu1 %v1799_v54  ;;  %v8004_v31 = vunpack.i.h.bf16 %v9560_v55  ;;  %v1671_v39 = vsel %vm1663_vm5, %v1638_v51, %v7849_v56  ;;  %v14441_v56 = vld [vmem:[#allocation43_spill] sm:$0xff] }
 0x163   : > { %v8194_v34 = vunpack.i.h.bf16 %v8192_v12  ;;  %v8193_v21 = vunpack.i.l.bf16 %v8192_v12  ;;  %7075 = vmatprep.mubr.msk.f32.mxu0 %vm1597_vm3, %v14440_v41  ;;  %7108 = vmatprep.mubr.msk.f32.mxu1 %vm1597_vm3, %v14440_v41  ;;  %v1734_v36 = vsel %vm1729_vm7, %v1701_v14, %v8003_v45  ;;  %v9867_v19 = vsel %vm1663_vm5, %v1639_v16, %v7853_v0 }
 0x164   : > { %v8084_v27 = vunpack.i.h.bf16 %v9630_v47  ;;  %v1767_v13 = vsel %vm1762_vm8, %v1734_v36, %v8083_v61  ;;  %v8164_v55 = vunpack.i.h.bf16 %v9781_v62  ;;  %v1702_v51 = vsel %vm1696_vm6, %v1669_v43, %v7924_v49  ;;  %v14442_v36 = vld [vmem:[#allocation44_spill] sm:$0xff] }
 0x165   : > { %v1800_v15 = vsel %vm1795_vm9, %v1767_v13, %v8163_v22  ;;  %v9875_v5 = vsel %vm1795_vm9, %v9656_v30, %v8193_v21  ;;  %v9879_v9 = vsel %vm1795_vm9, %v9659_v2, %v8194_v34  ;;  %v7928_v7 = vunpack.i.l.bf16 %v9422_v48 }
 0x166   : > { %v8197_v40 = vpop.permute.xlu1 %8196  ;;  %v8202_v45 = vpop.permute.xlu0 %8201  ;;  %2002 = vmatmul.mubr.f32.gmra.mxu0 %v1800_v15  ;;  %2284 = vmatmul.mubr.f32.gmra.mxu1 %v1800_v15  ;;  %v8008_v62 = vunpack.i.l.bf16 %v9562_v57  ;;  %v1735_v30 = vsel %vm1729_vm7, %v1702_v51, %v8004_v31  ;;  %v8088_v2 = vunpack.i.l.bf16 %v9632_v37  ;;  %v8168_v18 = vunpack.i.l.bf16 %v9801_v24  ;;  %v14443_v15 = vld [vmem:[#allocation30_spill] sm:$0xff] }
 0x167   : > { %v8199_v47 = vunpack.i.h.bf16 %v8197_v40  ;;  %v8198_v16 = vunpack.i.l.bf16 %v8197_v40  ;;  %v8204_v23 = vunpack.i.h.bf16 %v8202_v45  ;;  %v8203_v17 = vunpack.i.l.bf16 %v8202_v45  ;;  %7076 = vmatprep.mubr.msk.f32.mxu0 %vm1597_vm3, %v14441_v56  ;;  %7109 = vmatprep.mubr.msk.f32.mxu1 %vm1597_vm3, %v14441_v56 }
 0x168   : > { %v1768_v0 = vsel %vm1762_vm8, %v1735_v30, %v8084_v27  ;;  %v1703_v14 = vsel %vm1696_vm6, %v1670_v29, %v7928_v7  ;;  %v8009_v34 = vunpack.i.h.bf16 %v9562_v57  ;;  %v8169_v27 = vunpack.i.h.bf16 %v9801_v24  ;;  %v14444_v24 = vld [vmem:[#allocation66_spill] sm:$0xff] }
 0x169   : > { %v9893_v61 = vsel %vm1795_vm9, %v9674_v46, %v8198_v16  ;;  %v9897_v11 = vsel %vm1795_vm9, %v9678_v63, %v8199_v47  ;;  %v1801_v22 = vsel %vm1795_vm9, %v1768_v0, %v8164_v55  ;;  %v9903_v54 = vsel %vm1795_vm9, %v9689_v25, %v8203_v17 }
 0x16a   : > { %v8207_v43 = vpop.permute.xlu1 %8206  ;;  %v9907_v49 = vsel %vm1795_vm9, %v9693_v1, %v8204_v23  ;;  %v7929_v46 = vunpack.i.h.bf16 %v9422_v48  ;;  %v8212_v31 = vpop.permute.xlu0 %8211  ;;  %2007 = vmatmul.mubr.f32.gmra.mxu0 %v1801_v22  ;;  %2289 = vmatmul.mubr.f32.gmra.mxu1 %v1801_v22  ;;  %v1736_v25 = vsel %vm1729_vm7, %v1703_v14, %v8008_v62  ;;  %v8089_v48 = vunpack.i.h.bf16 %v9632_v37  ;;  %v14445_v23 = vld [vmem:[#allocation45_spill] sm:$0xff] }
 0x16b   : > { %v8209_v12 = vunpack.i.h.bf16 %v8207_v43  ;;  %v8208_v63 = vunpack.i.l.bf16 %v8207_v43  ;;  %v8214_v21 = vunpack.i.h.bf16 %v8212_v31  ;;  %v8213_v41 = vunpack.i.l.bf16 %v8212_v31  ;;  %7077 = vmatprep.mubr.msk.f32.mxu0 %vm1597_vm3, %v14442_v36  ;;  %7110 = vmatprep.mubr.msk.f32.mxu1 %vm1597_vm3, %v14442_v36 }
 0x16c   : > { %v1769_v1 = vsel %vm1762_vm8, %v1736_v25, %v8088_v2  ;;  %v7933_v51 = vunpack.i.l.bf16 %v14443_v15  ;;  %v8013_v16 = vunpack.i.l.bf16 %v14444_v24  ;;  %v8173_v2 = vunpack.i.l.bf16 %v9809_v38  ;;  %v14450_v25 = vld [vmem:[#allocation71_spill] sm:$0xff] }
 0x16d   : > { %v9921_v29 = vsel %vm1795_vm9, %v9716_v53, %v8208_v63  ;;  %v9925_v57 = vsel %vm1795_vm9, %v9720_v59, %v8209_v12  ;;  %v1802_v55 = vsel %vm1795_vm9, %v1769_v1, %v8168_v18  ;;  %v9931_v40 = vsel %vm1795_vm9, %v9727_v3, %v8213_v41  ;;  %v14447_v12 = vld [vmem:[#allocation21_spill] sm:$0xff] }
 0x16e   : > { %v8217_v13 = vpop.permute.xlu1 %8216  ;;  %v9935_v37 = vsel %vm1795_vm9, %v9731_v42, %v8214_v21  ;;  %v1704_v53 = vsel %vm1696_vm6, %v1671_v39, %v7929_v46  ;;  %v8222_v47 = vpop.permute.xlu0 %8221  ;;  %2012 = vmatmul.mubr.f32.gmra.mxu0 %v1802_v55  ;;  %2294 = vmatmul.mubr.f32.gmra.mxu1 %v1802_v55  ;;  %v14446_v42 = vld [vmem:[#allocation75_spill] sm:$0xff]  ;;  %v1705_v46 = vsel %vm1696_vm6, %v9867_v19, %v7933_v51  ;;  %v8174_v1 = vunpack.i.h.bf16 %v9809_v38  ;;  %v14451_v55 = vld [vmem:[#allocation32_spill] sm:$0xff] }
 0x16f   : > { %v8219_v7 = vunpack.i.h.bf16 %v8217_v13  ;;  %v8218_v59 = vunpack.i.l.bf16 %v8217_v13  ;;  %v8224_v45 = vunpack.i.h.bf16 %v8222_v47  ;;  %v8223_v62 = vunpack.i.l.bf16 %v8222_v47  ;;  %7078 = vmatprep.mubr.msk.f32.mxu0 %vm1597_vm3, %v14445_v23  ;;  %7111 = vmatprep.mubr.msk.f32.mxu1 %vm1597_vm3, %v14445_v23  ;;  %v14454_v51 = vld [vmem:[#allocation47_spill] sm:$0xff]  ;;  %v14455_v47 = vld [vmem:[#allocation76_spill] sm:$0xff] }
 0x170   : > { %v1737_v3 = vsel %vm1729_vm7, %v1704_v53, %v8009_v34  ;;  %v8093_v39 = vunpack.i.l.bf16 %v14446_v42  ;;  %v1640_v63 = vsel %vm1630_vm4, %v14447_v12, %v7774_v50  ;;  %v8014_v34 = vunpack.i.h.bf16 %v14444_v24 }
 0x171   : > { %v1770_v17 = vsel %vm1762_vm8, %v1737_v3, %v8089_v48  ;;  %v9949_v56 = vsel %vm1795_vm9, %v9741_v60, %v8218_v59  ;;  %v9953_v30 = vsel %vm1795_vm9, %v9745_v32, %v8219_v7  ;;  %v9959_v43 = vsel %vm1795_vm9, %v9750_v10, %v8223_v62  ;;  %v14448_v10 = vld [vmem:[#allocation67_spill] sm:$0xff] }
 0x172   : > { %v8227_v0 = vpop.permute.xlu1 %8226  ;;  %v1803_v18 = vsel %vm1795_vm9, %v1770_v17, %v8169_v27  ;;  %v9963_v22 = vsel %vm1795_vm9, %v9754_v52, %v8224_v45  ;;  %v7934_v60 = vunpack.i.h.bf16 %v14443_v15  ;;  %v7778_v31 = vunpack.i.l.bf16 %v14448_v10  ;;  %v14449_v52 = vld [vmem:[#allocation46_spill] sm:$0xff]  ;;  %v14457_v17 = vld [vmem:[#allocation27_spill] sm:$0xff] }
 0x173   : > { %v8229_v32 = vunpack.i.h.bf16 %v8227_v0  ;;  %v8228_v14 = vunpack.i.l.bf16 %v8227_v0  ;;  %2017 = vmatmul.mubr.f32.gmra.mxu0 %v1803_v18  ;;  %2299 = vmatmul.mubr.f32.gmra.mxu1 %v1803_v18  ;;  %v1738_v19 = vsel %vm1729_vm7, %v1705_v46, %v8013_v16  ;;  %v8094_v21 = vunpack.i.h.bf16 %v14446_v42  ;;  %v14456_v42 = vld [vmem:[#allocation16_spill] sm:$0xff] }
 0x174   : > { %7079 = vmatprep.mubr.msk.f32.mxu0 %vm1597_vm3, %v14449_v52  ;;  %7112 = vmatprep.mubr.msk.f32.mxu1 %vm1597_vm3, %v14449_v52  ;;  %v1771_v41 = vsel %vm1762_vm8, %v1738_v19, %v8093_v39  ;;  %v1673_v36 = vsel %vm1663_vm5, %v1640_v63, %v7854_v33  ;;  %v7858_v48 = vunpack.i.l.bf16 %v14450_v25  ;;  %v7938_v53 = vunpack.i.l.bf16 %v14451_v55  ;;  %v14453_v33 = vld [vmem:[#allocation35_spill] sm:$0xff]  ;;  %v14458_v18 = vld [vmem:[#allocation48_spill] sm:$0xff] }
 0x175   : > { %v9983_v26 = vsel %vm1795_vm9, %v9765_v20, %v8228_v14  ;;  %v9987_v50 = vsel %vm1795_vm9, %v9769_v6, %v8229_v32  ;;  %v1804_v27 = vsel %vm1795_vm9, %v1771_v41, %v8173_v2  ;;  %v1706_v13 = vsel %vm1696_vm6, %v1673_v36, %v7934_v60  ;;  %v14452_v6 = vld [vmem:[#allocation17_spill] sm:$0xff]  ;;  %v14459_v32 = vld [vmem:[#allocation68_spill] sm:$0xff] }
 0x176   : > { %v7699_v20 = vunpack.i.h.bf16 %v14436_v28  ;;  %v1608_v58 = vsel %vm1597_vm3, %v14452_v6, %v7698_v35  ;;  %v8018_v15 = vunpack.i.l.bf16 %v14453_v33  ;;  %v1739_v38 = vsel %vm1729_vm7, %v1706_v13, %v8014_v34  ;;  %v14461_v41 = vld [vmem:[#allocation33_spill] sm:$0xff] }
 0x177   : > { %2022 = vmatmul.mubr.f32.gmra.mxu0 %v1804_v27  ;;  %2304 = vmatmul.mubr.f32.gmra.mxu1 %v1804_v27  ;;  %v7779_v7 = vunpack.i.h.bf16 %v14448_v10  ;;  %v1641_v59 = vsel %vm1630_vm4, %v1608_v58, %v7778_v31  ;;  %v8098_v24 = vunpack.i.l.bf16 %v14455_v47  ;;  %v1772_v28 = vsel %vm1762_vm8, %v1739_v38, %v8094_v21  ;;  %v14460_v31 = vld [vmem:[#allocation72_spill] sm:$0xff]  ;;  %v14465_v6 = vld [vmem:[#allocation77_spill] sm:$0xff] }
 0x178   : > { %7080 = vmatprep.mubr.msk.f32.mxu0 %vm1597_vm3, %v14454_v51  ;;  %7113 = vmatprep.mubr.msk.f32.mxu1 %vm1597_vm3, %v14454_v51  ;;  %v7859_v35 = vunpack.i.h.bf16 %v14450_v25  ;;  %v1674_v16 = vsel %vm1663_vm5, %v1641_v59, %v7858_v48  ;;  %v8178_v45 = vunpack.i.l.bf16 %v9826_v8  ;;  %v1805_v62 = vsel %vm1795_vm9, %v1772_v28, %v8174_v1  ;;  %v14462_v48 = vld [vmem:[#allocation20_spill] sm:$0xff] }
 0x179   : > { %v7939_v23 = vunpack.i.h.bf16 %v14451_v55  ;;  %v1707_v3 = vsel %vm1696_vm6, %v1674_v16, %v7938_v53  ;;  %v1609_v39 = vsel %vm1597_vm3, %v14456_v42, %v7699_v20  ;;  %v7703_v2 = vunpack.i.l.bf16 %v14457_v17  ;;  %v14463_v27 = vld [vmem:[#allocation36_spill] sm:$0xff]  ;;  %v14464_v55 = vld [vmem:[#allocation49_spill] sm:$0xff] }
 0x17a   : > { %v8019_v0 = vunpack.i.h.bf16 %v14453_v33  ;;  %v1740_v60 = vsel %vm1729_vm7, %v1707_v3, %v8018_v15  ;;  %v1642_v46 = vsel %vm1630_vm4, %v1609_v39, %v7779_v7  ;;  %v7783_v14 = vunpack.i.l.bf16 %v14459_v32  ;;  %v14469_v42 = vld [vmem:[#allocation69_spill] sm:$0xff] }
 0x17b   : > { %2027 = vmatmul.mubr.f32.gmra.mxu0 %v1805_v62  ;;  %2309 = vmatmul.mubr.f32.gmra.mxu1 %v1805_v62  ;;  %v8099_v12 = vunpack.i.h.bf16 %v14455_v47  ;;  %v1773_v63 = vsel %vm1762_vm8, %v1740_v60, %v8098_v24  ;;  %v1675_v10 = vsel %vm1663_vm5, %v1642_v46, %v7859_v35  ;;  %v7863_v34 = vunpack.i.l.bf16 %v14460_v31  ;;  %v14466_v24 = vld [vmem:[#allocation19_spill] sm:$0xff]  ;;  %v14467_v35 = vld [vmem:[#allocation28_spill] sm:$0xff]  ;;  %v14468_v62 = vld [vmem:[#allocation50_spill] sm:$0xff] }
 0x17c   : > { %7081 = vmatprep.mubr.msk.f32.mxu0 %vm1597_vm3, %v14458_v18  ;;  %7114 = vmatprep.mubr.msk.f32.mxu1 %vm1597_vm3, %v14458_v18  ;;  %v8179_v52 = vunpack.i.h.bf16 %v9826_v8  ;;  %v1806_v19 = vsel %vm1795_vm9, %v1773_v63, %v8178_v45  ;;  %v1708_v21 = vsel %vm1696_vm6, %v1675_v10, %v7939_v23  ;;  %v7943_v36 = vunpack.i.l.bf16 %v14461_v41  ;;  %v14470_v18 = vld [vmem:[#allocation73_spill] sm:$0xff] }
 0x17d   : > { %v7704_v25 = vunpack.i.h.bf16 %v14457_v17  ;;  %v1610_v1 = vsel %vm1597_vm3, %v14462_v48, %v7703_v2  ;;  %v8023_v13 = vunpack.i.l.bf16 %v14463_v27  ;;  %v1741_v8 = vsel %vm1729_vm7, %v1708_v21, %v8019_v0  ;;  %v14474_v21 = vld [vmem:[#allocation51_spill] sm:$0xff] }
 0x17e   : > { %v7784_v53 = vunpack.i.h.bf16 %v14459_v32  ;;  %v1643_v20 = vsel %vm1630_vm4, %v1610_v1, %v7783_v14  ;;  %v8103_v58 = vunpack.i.l.bf16 %v14465_v6  ;;  %v1774_v33 = vsel %vm1762_vm8, %v1741_v8, %v8099_v12  ;;  %v14471_v12 = vld [vmem:[#allocation29_spill] sm:$0xff] }
 0x17f   : > { %2032 = vmatmul.mubr.f32.gmra.mxu0 %v1806_v19  ;;  %2314 = vmatmul.mubr.f32.gmra.mxu1 %v1806_v19  ;;  %v7864_v15 = vunpack.i.h.bf16 %v14460_v31  ;;  %v1676_v51 = vsel %vm1663_vm5, %v1643_v20, %v7863_v34  ;;  %v8183_v38 = vunpack.i.l.bf16 %v9834_v44  ;;  %v1807_v7 = vsel %vm1795_vm9, %v1774_v33, %v8179_v52  ;;  %v14472_v31 = vld [vmem:[#allocation23_spill] sm:$0xff]  ;;  %v14473_v52 = vld [vmem:[#allocation74_spill] sm:$0xff] }
 0x180   : > { %7082 = vmatprep.mubr.msk.f32.mxu0 %vm1597_vm3, %v14464_v55  ;;  %7115 = vmatprep.mubr.msk.f32.mxu1 %vm1597_vm3, %v14464_v55  ;;  %v7944_v59 = vunpack.i.h.bf16 %v14461_v41  ;;  %v1709_v47 = vsel %vm1696_vm6, %v1676_v51, %v7943_v36  ;;  %v1611_v28 = vsel %vm1597_vm3, %v14466_v24, %v7704_v25  ;;  %v7708_v16 = vunpack.i.l.bf16 %v14467_v35  ;;  %v14475_v25 = vld [vmem:[#allocation13_spill] sm:$0xff] }
 0x181   : > { %v8024_v45 = vunpack.i.h.bf16 %v14463_v27  ;;  %v1742_v23 = vsel %vm1729_vm7, %v1709_v47, %v8023_v13  ;;  %v1644_v3 = vsel %vm1630_vm4, %v1611_v28, %v7784_v53  ;;  %v7788_v39 = vunpack.i.l.bf16 %v14469_v42 }
 0x182   : > { %v8104_v17 = vunpack.i.h.bf16 %v14465_v6  ;;  %v1775_v2 = vsel %vm1762_vm8, %v1742_v23, %v8103_v58  ;;  %v1677_v0 = vsel %vm1663_vm5, %v1644_v3, %v7864_v15  ;;  %v7868_v60 = vunpack.i.l.bf16 %v14470_v18  ;;  %v14476_v6 = vld [vmem:[#allocation22_spill] sm:$0xff]  ;;  %v14477_v15 = vld [vmem:[#allocation52_spill] sm:$0xff]  ;;  %v14480_v3 = vld [vmem:[#allocation55_spill] sm:$0xff] }
 0x183   : > { %2037 = vmatmul.mubr.f32.gmra.mxu0 %v1807_v7  ;;  %2319 = vmatmul.mubr.f32.gmra.mxu1 %v1807_v7  ;;  %v8184_v46 = vunpack.i.h.bf16 %v9834_v44  ;;  %v1808_v32 = vsel %vm1795_vm9, %v1775_v2, %v8183_v38  ;;  %v1710_v14 = vsel %vm1696_vm6, %v1677_v0, %v7944_v59  ;;  %v7948_v63 = vunpack.i.l.bf16 %v14471_v12 }
 0x184   : > { %7083 = vmatprep.mubr.msk.f32.mxu0 %vm1597_vm3, %v14468_v62  ;;  %7116 = vmatprep.mubr.msk.f32.mxu1 %vm1597_vm3, %v14468_v62  ;;  %v7709_v10 = vunpack.i.h.bf16 %v14467_v35  ;;  %v1612_v34 = vsel %vm1597_vm3, %v14472_v31, %v7708_v16  ;;  %v8028_v19 = vunpack.i.l.bf16 %v14473_v52  ;;  %v1743_v44 = vsel %vm1729_vm7, %v1710_v14, %v8024_v45  ;;  %v14478_v16 = vld [vmem:[#allocation53_spill] sm:$0xff] }
 0x185   : > { %v7789_v41 = vunpack.i.h.bf16 %v14469_v42  ;;  %v1645_v36 = vsel %vm1630_vm4, %v1612_v34, %v7788_v39  ;;  %v8108_v48 = vunpack.i.l.bf16 %v14475_v25  ;;  %v1776_v1 = vsel %vm1762_vm8, %v1743_v44, %v8104_v17  ;;  %v14481_v42 = vld [vmem:[#allocation56_spill] sm:$0xff]  ;;  %v14482_v39 = vld [vmem:[#allocation5_spill] sm:$0xff] }
 0x186   : > { %v7869_v27 = vunpack.i.h.bf16 %v14470_v18  ;;  %v1678_v13 = vsel %vm1663_vm5, %v1645_v36, %v7868_v60  ;;  %v8188_v55 = vunpack.i.l.bf16 %v9852_v4  ;;  %v1809_v8 = vsel %vm1795_vm9, %v1776_v1, %v8184_v46  ;;  %8231 = vrot.lane.b32.xlu0 %v14482_v39, %s8269_s20  ;;  %v14484_v17 = vld [vmem:[#allocation57_spill] sm:$0xff] }
 0x187   : > { %2042 = vmatmul.mubr.f32.gmra.mxu0 %v1808_v32  ;;  %2324 = vmatmul.mubr.f32.gmra.mxu1 %v1808_v32  ;;  %v7949_v53 = vunpack.i.h.bf16 %v14471_v12  ;;  %v1711_v20 = vsel %vm1696_vm6, %v1678_v13, %v7948_v63  ;;  %v1613_v58 = vsel %vm1597_vm3, %v14476_v6, %v7709_v10  ;;  %v8029_v33 = vunpack.i.h.bf16 %v14473_v52 }
 0x188   : > { %7084 = vmatprep.mubr.msk.f32.mxu0 %vm1597_vm3, %v14474_v21  ;;  %7117 = vmatprep.mubr.msk.f32.mxu1 %vm1597_vm3, %v14474_v21  ;;  %v1744_v51 = vsel %vm1729_vm7, %v1711_v20, %v8028_v19  ;;  %v1646_v38 = vsel %vm1630_vm4, %v1613_v58, %v7789_v41  ;;  %v8109_v7 = vunpack.i.h.bf16 %v14475_v25  ;;  %v8189_v24 = vunpack.i.h.bf16 %v9852_v4  ;;  %v14479_v4 = vld [vmem:[#allocation54_spill] sm:$0xff] }
 0x189   : > { %v1777_v59 = vsel %vm1762_vm8, %v1744_v51, %v8108_v48  ;;  %v1679_v47 = vsel %vm1663_vm5, %v1646_v38, %v7869_v27  ;;  %vm3766_vm5 = vcmask 228352  }
 0x18a   : > { %v1810_v28 = vsel %vm1795_vm9, %v1777_v59, %v8188_v55  ;;  %v1712_v35 = vsel %vm1696_vm6, %v1679_v47, %v7949_v53  ;;  %vm3843_vm6 = vcmask 293888  }
 0x18b   : > { %2047 = vmatmul.mubr.f32.gmra.mxu0 %v1809_v8  ;;  %2329 = vmatmul.mubr.f32.gmra.mxu1 %v1809_v8  ;;  %v1745_v45 = vsel %vm1729_vm7, %v1712_v35, %v8029_v33 }
 0x18c   : > { %7085 = vmatprep.mubr.msk.f32.mxu0 %vm1597_vm3, %v14477_v15  ;;  %7118 = vmatprep.mubr.msk.f32.mxu1 %vm1597_vm3, %v14477_v15  ;;  %v1778_v62 = vsel %vm1762_vm8, %v1745_v45, %v8109_v7 }
 0x18d   : > { %v1811_v23 = vsel %vm1795_vm9, %v1778_v62, %v8189_v24 }
 0x18f   : > { %2052 = vmatmul.mubr.f32.gmra.mxu0 %v1810_v28  ;;  %2334 = vmatmul.mubr.f32.gmra.mxu1 %v1810_v28 }
 0x190   : > { %7086 = vmatprep.mubr.msk.f32.mxu0 %vm1597_vm3, %v14478_v16  ;;  %7119 = vmatprep.mubr.msk.f32.mxu1 %vm1597_vm3, %v14478_v16 }
 0x193   : > { %2057 = vmatmul.mubr.f32.gmra.mxu0 %v1811_v23  ;;  %2339 = vmatmul.mubr.f32.gmra.mxu1 %v1811_v23 }
 0x194   : > { %7087 = vmatprep.mubr.msk.f32.mxu0 %vm1597_vm3, %v14479_v4  ;;  %7120 = vmatprep.mubr.msk.f32.mxu1 %vm1597_vm3, %v14479_v4 }
 0x197   : > { %2062 = vmatmul.mubr.f32.gmra.mxu0 %v9875_v5  ;;  %2344 = vmatmul.mubr.f32.gmra.mxu1 %v9875_v5  ;;  %v14483_v5 = vld [vmem:[#allocation38_spill] sm:$0xff] }
 0x198   : > { %7088 = vmatprep.mubr.msk.f32.mxu0 %vm1597_vm3, %v14480_v3  ;;  %7121 = vmatprep.mubr.msk.f32.mxu1 %vm1597_vm3, %v14480_v3 }
 0x199   : > { %8236 = vrot.lane.b32.xlu1 %v14483_v5, %s8270_s17 }
 0x19b   : > { %2067 = vmatmul.mubr.f32.gmra.mxu0 %v9879_v9  ;;  %2349 = vmatmul.mubr.f32.gmra.mxu1 %v9879_v9  ;;  %v14485_v9 = vld [vmem:[#allocation58_spill] sm:$0xff] }
 0x19c   : > { %7089 = vmatprep.mubr.msk.f32.mxu0 %vm1597_vm3, %v14481_v42  ;;  %7122 = vmatprep.mubr.msk.f32.mxu1 %vm1597_vm3, %v14481_v42 }
 0x19f   : > { %2072 = vmatmul.mubr.f32.gmra.mxu0 %v9893_v61  ;;  %2354 = vmatmul.mubr.f32.gmra.mxu1 %v9893_v61  ;;  %v14486_v61 = vld [vmem:[#allocation59_spill] sm:$0xff] }
 0x1a0   : > { %7090 = vmatprep.mubr.msk.f32.mxu0 %vm1597_vm3, %v14484_v17  ;;  %7123 = vmatprep.mubr.msk.f32.mxu1 %vm1597_vm3, %v14484_v17 }
 0x1a3   : > { %2077 = vmatmul.mubr.f32.gmra.mxu0 %v9897_v11  ;;  %2359 = vmatmul.mubr.f32.gmra.mxu1 %v9897_v11  ;;  %v14487_v11 = vld [vmem:[#allocation60_spill] sm:$0xff] }
 0x1a4   : > { %7091 = vmatprep.mubr.msk.f32.mxu0 %vm1597_vm3, %v14485_v9  ;;  %7124 = vmatprep.mubr.msk.f32.mxu1 %vm1597_vm3, %v14485_v9 }
 0x1a7   : > { %2082 = vmatmul.mubr.f32.gmra.mxu0 %v9903_v54  ;;  %2364 = vmatmul.mubr.f32.gmra.mxu1 %v9903_v54  ;;  %v14488_v54 = vld [vmem:[#allocation61_spill] sm:$0xff] }
 0x1a8   : > { %7092 = vmatprep.mubr.msk.f32.mxu0 %vm1597_vm3, %v14486_v61  ;;  %7125 = vmatprep.mubr.msk.f32.mxu1 %vm1597_vm3, %v14486_v61 }
 0x1ab   : > { %2087 = vmatmul.mubr.f32.gmra.mxu0 %v9907_v49  ;;  %2369 = vmatmul.mubr.f32.gmra.mxu1 %v9907_v49  ;;  %v14489_v49 = vld [vmem:[#allocation62_spill] sm:$0xff] }
 0x1ac   : > { %7093 = vmatprep.mubr.msk.f32.mxu0 %vm1597_vm3, %v14487_v11  ;;  %7126 = vmatprep.mubr.msk.f32.mxu1 %vm1597_vm3, %v14487_v11 }
 0x1af   : > { %2092 = vmatmul.mubr.f32.gmra.mxu0 %v9921_v29  ;;  %2374 = vmatmul.mubr.f32.gmra.mxu1 %v9921_v29  ;;  %v14490_v29 = vld [vmem:[#allocation63_spill] sm:$0xff] }
 0x1b0   : > { %7094 = vmatprep.mubr.msk.f32.mxu0 %vm1597_vm3, %v14488_v54  ;;  %7127 = vmatprep.mubr.msk.f32.mxu1 %vm1597_vm3, %v14488_v54 }
 0x1b3   : > { %2097 = vmatmul.mubr.f32.gmra.mxu0 %v9925_v57  ;;  %2379 = vmatmul.mubr.f32.gmra.mxu1 %v9925_v57  ;;  %v14491_v57 = vld [vmem:[#allocation64_spill] sm:$0xff] }
 0x1b4   : > { %7095 = vmatprep.mubr.msk.f32.mxu0 %vm1597_vm3, %v14489_v49  ;;  %7128 = vmatprep.mubr.msk.f32.mxu1 %vm1597_vm3, %v14489_v49 }
 0x1b7   : > { %2102 = vmatmul.mubr.f32.gmra.mxu0 %v9931_v40  ;;  %2384 = vmatmul.mubr.f32.gmra.mxu1 %v9931_v40  ;;  %v14492_v40 = vld [vmem:[#allocation65_spill] sm:$0xff] }
 0x1b8   : > { %7096 = vmatprep.mubr.msk.f32.mxu0 %vm1597_vm3, %v14490_v29  ;;  %7129 = vmatprep.mubr.msk.f32.mxu1 %vm1597_vm3, %v14490_v29 }
 0x1bb   : > { %2107 = vmatmul.mubr.f32.gmra.mxu0 %v9935_v37  ;;  %2389 = vmatmul.mubr.f32.gmra.mxu1 %v9935_v37  ;;  %v14493_v37 = vld [vmem:[#allocation34_spill] sm:$0xff] }
 0x1bc   : > { %7097 = vmatprep.mubr.msk.f32.mxu0 %vm1597_vm3, %v14491_v57  ;;  %7130 = vmatprep.mubr.msk.f32.mxu1 %vm1597_vm3, %v14491_v57 }
 0x1bf   : > { %2112 = vmatmul.mubr.f32.gmra.mxu0 %v9949_v56  ;;  %2394 = vmatmul.mubr.f32.gmra.mxu1 %v9949_v56  ;;  %v14494_v56 = vld [vmem:[#allocation37_spill] sm:$0xff] }
 0x1c0   : > { %7098 = vmatprep.mubr.msk.f32.mxu0 %vm1597_vm3, %v14492_v40  ;;  %7131 = vmatprep.mubr.msk.f32.mxu1 %vm1597_vm3, %v14492_v40 }
 0x1c3   : > { %2117 = vmatmul.mubr.f32.gmra.mxu0 %v9953_v30  ;;  %2399 = vmatmul.mubr.f32.gmra.mxu1 %v9953_v30  ;;  %v14495_v30 = vld [vmem:[#allocation4_spill] sm:$0xff] }
 0x1c4   : > { %7099 = vmatprep.mubr.msk.f32.mxu0 %vm1597_vm3, %v14493_v37  ;;  %7132 = vmatprep.mubr.msk.f32.mxu1 %vm1597_vm3, %v14493_v37 }
 0x1c7   : > { %2122 = vmatmul.mubr.f32.gmra.mxu0 %v9959_v43  ;;  %2404 = vmatmul.mubr.f32.gmra.mxu1 %v9959_v43  ;;  %v14496_v43 = vld [vmem:[#allocation6_spill] sm:$0xff] }
 0x1c8   : > { %7100 = vmatprep.mubr.msk.f32.mxu0 %vm1597_vm3, %v14494_v56  ;;  %7133 = vmatprep.mubr.msk.f32.mxu1 %vm1597_vm3, %v14494_v56 }
 0x1cb   : > { %2127 = vmatmul.mubr.f32.gmra.mxu0 %v9963_v22  ;;  %2409 = vmatmul.mubr.f32.gmra.mxu1 %v9963_v22  ;;  %v10219_v22 = vld [vmem:[%s14015_s4] ss:$0 sm:$0xff] }
 0x1cc   : > { %7101 = vmatprep.mubr.msk.f32.mxu0 %vm1597_vm3, %v14495_v30  ;;  %7134 = vmatprep.mubr.msk.f32.mxu1 %vm1597_vm3, %v14495_v30 }
 0x1cf   : > { %2132 = vmatmul.mubr.f32.gmra.mxu0 %v9983_v26  ;;  %2414 = vmatmul.mubr.f32.gmra.mxu1 %v9983_v26 }
 0x1d0   : > { %7102 = vmatprep.mubr.msk.f32.mxu0 %vm1597_vm3, %v14496_v43  ;;  %7135 = vmatprep.mubr.msk.f32.mxu1 %vm1597_vm3, %v14496_v43 }
 0x1d3   : > { %2137 = vmatmul.mubr.f32.gmra.mxu0 %v9987_v50  ;;  %2419 = vmatmul.mubr.f32.gmra.mxu1 %v9987_v50 }
 0x216   : > { %v10221_v2 = vpop.f32.mrf.mxu0  ;;  %v2265_v0 = vpop.f32.mrf.mxu1 }
 0x217   : > { %14497 = vst [vmem:[#allocation24_spill] sm:$0xff] %v10221_v2  ;;  %v2266_v26 = vadd.f32 %v10219_v22, %v2265_v0 }
 0x218   : > { %v1985_v18 = vpop.f32.mrf.mxu0  ;;  %v2267_v60 = vpop.f32.mrf.mxu1 }
 0x219   : > { %v2424_v46 = vmax.f32 %v2266_v26, 0.0 }
 0x21a   : > { %v10224_v32 = vpop.f32.mrf.mxu0  ;;  %v2270_v14 = vpop.f32.mrf.mxu1 }
 0x21b   : > { %14498 = vst [vmem:[#allocation8_spill] sm:$0xff] %v10224_v32  ;;  %v2488_v12 = vrot.slane %v2424_v46, 7  ;;  %v2271_v63 = vadd.f32 %v10219_v22, %v2270_v14 }
 0x21c   : > { %v1990_v50 = vpop.f32.mrf.mxu0  ;;  %v2272_v10 = vpop.f32.mrf.mxu1 }
 0x21d   : > { %v2425_v31 = vmax.f32 %v2271_v63, 0.0  ;;  %v10228_v34 = vsel %vm585_vm0, 0.0, %v2488_v12 }
 0x21e   : > { %14499 = vst [vmem:[#allocation25_spill] sm:$0xff] %v10228_v34  ;;  %2999 = vrot.lane.b32.xlu0 %v10228_v34, %s8271_s23  ;;  %v10232_v52 = vpop.f32.mrf.mxu0  ;;  %v2275_v19 = vpop.f32.mrf.mxu1  ;;  %v2645_v1 = vrot.slane %v10228_v34, 1  ;;  %v2720_v7 = vrot.slane %v10228_v34, 2 }
 0x21f   : > { %14500 = vst [vmem:[#allocation31_spill] sm:$0xff] %v10232_v52  ;;  %v2489_v21 = vrot.slane %v2425_v31, 7  ;;  %v2276_v8 = vadd.f32 %v10219_v22, %v2275_v19 }
 0x220   : > { %v1995_v44 = vpop.f32.mrf.mxu0  ;;  %v2277_v41 = vpop.f32.mrf.mxu1 }
 0x221   : > { %v2599_v36 = vsel %vm585_vm0, %v2489_v21, 0.0  ;;  %v10236_v25 = vsel %vm585_vm0, %v2488_v12, %v2489_v21  ;;  %v2426_v24 = vmax.f32 %v2276_v8, 0.0 }
 0x222   : > { %14501 = vst [vmem:[#allocation10_spill] sm:$0xff] %v10236_v25  ;;  %v2648_v48 = vrot.slane %v2599_v36, 1  ;;  %3001 = vrot.lane.b32.xlu1 %v10236_v25, %s8271_s23  ;;  %v2646_v27 = vrot.slane %v10236_v25, 1  ;;  %v10242_v13 = vpop.f32.mrf.mxu0  ;;  %v2280_v55 = vpop.f32.mrf.mxu1  ;;  %v2721_v20 = vrot.slane %v10236_v25, 2  ;;  %v2723_v51 = vrot.slane %v2599_v36, 2 }
 0x223   : > { %14502 = vst [vmem:[#allocation9_spill] sm:$0xff] %v10242_v13  ;;  %v2281_v53 = vadd.f32 %v10219_v22, %v2280_v55  ;;  %v2491_v3 = vrot.slane %v2426_v24, 7 }
 0x224   : > { %v2000_v6 = vpop.f32.mrf.mxu0  ;;  %v2282_v58 = vpop.f32.mrf.mxu1  ;;  %v2649_v33 = vsel %vm751_vm1, %v2646_v27, %v2648_v48  ;;  %v2647_v15 = vsel %vm751_vm1, %v2645_v1, %v2646_v27  ;;  %v10255_v16 = vsel %vm832_vm2, %v2720_v7, %v2721_v20  ;;  %v10260_v62 = vsel %vm832_vm2, %v2721_v20, %v2723_v51 }
 0x225   : > { %v2427_v38 = vmax.f32 %v2281_v53, 0.0  ;;  %2813 = vrot.lane.b32.xlu0 %v2649_v33, %s8269_s20  ;;  %v10275_v54 = vsel %vm585_vm0, 0.0, %v2491_v3 }
 0x226   : > { %2811 = vrot.lane.b32.xlu1 %v2647_v15, %s8269_s20  ;;  %v10252_v59 = vpop.f32.mrf.mxu0  ;;  %v2285_v47 = vpop.f32.mrf.mxu1  ;;  %v2650_v0 = vrot.slane %v10275_v54, 1  ;;  %v2725_v31 = vrot.slane %v10275_v54, 2 }
 0x227   : > { %14503 = vst [vmem:[#allocation11_spill] sm:$0xff] %v10252_v59  ;;  %v2492_v45 = vrot.slane %v2427_v38, 7  ;;  %v2286_v43 = vadd.f32 %v10219_v22, %v2285_v47 }
 0x228   : > { %v2005_v28 = vpop.f32.mrf.mxu0  ;;  %v2287_v35 = vpop.f32.mrf.mxu1 }
 0x229   : > { %2907 = vrot.lane.b32.xlu0 %v10255_v16, %s8270_s17  ;;  %v2600_v17 = vsel %vm585_vm0, %v2492_v45, 0.0  ;;  %v10269_v9 = vsel %vm585_vm0, %v2491_v3, %v2492_v45  ;;  %v2428_v19 = vmax.f32 %v2286_v43, 0.0 }
 0x22a   : > { %2909 = vrot.lane.b32.xlu1 %v10260_v62, %s8270_s17  ;;  %v10264_v23 = vpop.f32.mrf.mxu0  ;;  %v2290_v4 = vpop.f32.mrf.mxu1  ;;  %v2653_v49 = vrot.slane %v2600_v17, 1  ;;  %v2651_v40 = vrot.slane %v10269_v9, 1  ;;  %v2726_v46 = vrot.slane %v10269_v9, 2  ;;  %v2728_v14 = vrot.slane %v2600_v17, 2 }
 0x22b   : > { %14504 = vst [vmem:[#allocation12_spill] sm:$0xff] %v10264_v23  ;;  %v2291_v37 = vadd.f32 %v10219_v22, %v2290_v4  ;;  %v2494_v55 = vrot.slane %v2428_v19, 7 }
 0x22c   : > { %v2010_v42 = vpop.f32.mrf.mxu0  ;;  %v2292_v5 = vpop.f32.mrf.mxu1  ;;  %v10288_v60 = vsel %vm751_vm1, %v2651_v40, %v2653_v49  ;;  %v10294_v63 = vsel %vm751_vm1, %v2650_v0, %v2651_v40  ;;  %v10304_v41 = vsel %vm832_vm2, %v2725_v31, %v2726_v46  ;;  %v10309_v48 = vsel %vm832_vm2, %v2726_v46, %v2728_v14 }
 0x22d   : > { %3095 = vrot.lane.b32.xlu0 %v2647_v15, %s14234_s24  ;;  %v2429_v12 = vmax.f32 %v2291_v37, 0.0  ;;  %v10328_v15 = vsel %vm585_vm0, 0.0, %v2494_v55 }
 0x22e   : > { %3097 = vrot.lane.b32.xlu1 %v2649_v33, %s14234_s24  ;;  %v10272_v61 = vpop.f32.mrf.mxu0  ;;  %v2295_v11 = vpop.f32.mrf.mxu1  ;;  %v2655_v4 = vrot.slane %v10328_v15, 1  ;;  %v2730_v37 = vrot.slane %v10328_v15, 2 }
 0x22f   : > { %14505 = vst [vmem:[#allocation14_spill] sm:$0xff] %v10272_v61  ;;  %v2495_v36 = vrot.slane %v2429_v12, 7  ;;  %v2296_v45 = vadd.f32 %v10219_v22, %v2295_v11 }
 0x230   : > { %v2015_v29 = vpop.f32.mrf.mxu0  ;;  %v2297_v57 = vpop.f32.mrf.mxu1 }
 0x231   : > { %3003 = vrot.lane.b32.xlu0 %v10275_v54, %s8271_s23  ;;  %v2601_v20 = vsel %vm585_vm0, %v2495_v36, 0.0  ;;  %v10319_v6 = vsel %vm585_vm0, %v2494_v55, %v2495_v36 }
 0x232   : > { %3005 = vrot.lane.b32.xlu1 %v10269_v9, %s8271_s23  ;;  %v2658_v51 = vrot.slane %v2601_v20, 1  ;;  %v2656_v47 = vrot.slane %v10319_v6, 1  ;;  %v2731_v17 = vrot.slane %v10319_v6, 2  ;;  %v2733_v49 = vrot.slane %v2601_v20, 2 }
 0x233   : > { %v2300_v56 = vpop.f32.mrf.mxu1  ;;  %v10283_v30 = vpop.f32.mrf.mxu0 }
 0x234   : > { %14506 = vst [vmem:[#allocation15_spill] sm:$0xff] %v10283_v30  ;;  %v2301_v24 = vadd.f32 %v10219_v22, %v2300_v56  ;;  %v10343_v5 = vsel %vm751_vm1, %v2656_v47, %v2658_v51  ;;  %v10349_v57 = vsel %vm751_vm1, %v2655_v4, %v2656_v47  ;;  %v2430_v56 = vmax.f32 %v2296_v45, 0.0 }
 0x235   : > { %v2020_v26 = vpop.f32.mrf.mxu0  ;;  %v2302_v18 = vpop.f32.mrf.mxu1  ;;  %2817 = vrot.lane.b32.xlu0 %v10288_v60, %s8269_s20  ;;  %v10364_v46 = vsel %vm832_vm2, %v2731_v17, %v2733_v49 }
 0x236   : > { %2815 = vrot.lane.b32.xlu1 %v10294_v63, %s8269_s20  ;;  %v2431_v29 = vmax.f32 %v2301_v24, 0.0  ;;  %v10359_v26 = vsel %vm832_vm2, %v2730_v37, %v2731_v17  ;;  %v2497_v31 = vrot.slane %v2430_v56, 7 }
 0x237   : > { %v10296_v50 = vpop.f32.mrf.mxu1  ;;  %v10300_v10 = vpop.f32.mrf.mxu0 }
 0x238   : > { %14507 = vst [vmem:[#allocation26_spill] sm:$0xff] %v10300_v10  ;;  %v2498_v18 = vrot.slane %v2431_v29, 7  ;;  %v2306_v4 = vadd.f32 %v10219_v22, %v10296_v50 }
 0x239   : > { %v2025_v21 = vpop.f32.mrf.mxu0  ;;  %v2307_v44 = vpop.f32.mrf.mxu1  ;;  %2911 = vrot.lane.b32.xlu0 %v10304_v41, %s8270_s17 }
 0x23a   : > { %2913 = vrot.lane.b32.xlu1 %v10309_v48, %s8270_s17  ;;  %v2602_v44 = vsel %vm585_vm0, %v2498_v18, 0.0  ;;  %v10376_v36 = vsel %vm585_vm0, %v2497_v31, %v2498_v18  ;;  %v2432_v18 = vmax.f32 %v2306_v4, 0.0 }
 0x23b   : > { %v2310_v1 = vpop.f32.mrf.mxu1  ;;  %v10313_v27 = vpop.f32.mrf.mxu0  ;;  %v2663_v20 = vrot.slane %v2602_v44, 1  ;;  %v2738_v29 = vrot.slane %v2602_v44, 2 }
 0x23c   : > { %14508 = vst [vmem:[#allocation39_spill] sm:$0xff] %v10313_v27  ;;  %v2311_v47 = vadd.f32 %v10219_v22, %v2310_v1  ;;  %v2736_v1 = vrot.slane %v10376_v36, 2 }
 0x23d   : > { %v2030_v8 = vpop.f32.mrf.mxu0  ;;  %v2312_v53 = vpop.f32.mrf.mxu1  ;;  %3099 = vrot.lane.b32.xlu0 %v10294_v63, %s14234_s24 }
 0x23e   : > { %3101 = vrot.lane.b32.xlu1 %v10288_v60, %s14234_s24  ;;  %v10385_v53 = vsel %vm585_vm0, 0.0, %v2497_v31  ;;  %v2433_v37 = vmax.f32 %v2311_v47, 0.0  ;;  %v2500_v47 = vrot.slane %v2432_v18, 7 }
 0x23f   : > { %v10321_v58 = vpop.f32.mrf.mxu1  ;;  %v10325_v33 = vpop.f32.mrf.mxu0 }
 0x240   : > { %14509 = vst [vmem:[#allocation40_spill] sm:$0xff] %v10325_v33 }
 0x241   : > { %v2035_v38 = vpop.f32.mrf.mxu0  ;;  %v2317_v7 = vpop.f32.mrf.mxu1  ;;  %3007 = vrot.lane.b32.xlu0 %v10328_v15, %s8271_s23 }
 0x242   : > { %3009 = vrot.lane.b32.xlu1 %v10319_v6, %s8271_s23  ;;  %v2661_v7 = vrot.slane %v10376_v36, 1 }
 0x243   : > { %v10334_v28 = vpop.f32.mrf.mxu1  ;;  %v10338_v35 = vpop.f32.mrf.mxu0 }
 0x244   : > { %14510 = vst [vmem:[#allocation41_spill] sm:$0xff] %v10338_v35  ;;  %v10401_v49 = vsel %vm751_vm1, %v2661_v7, %v2663_v20  ;;  %v2501_v20 = vrot.slane %v2433_v37, 7 }
 0x245   : > { %v2040_v3 = vpop.f32.mrf.mxu0  ;;  %v2322_v42 = vpop.f32.mrf.mxu1  ;;  %2821 = vrot.lane.b32.xlu0 %v10343_v5, %s8269_s20  ;;  %14515 = vst [vmem:[#allocation66_spill] sm:$0xff] %v10401_v49 }
 0x246   : > { %2819 = vrot.lane.b32.xlu1 %v10349_v57, %s8269_s20  ;;  %v2660_v3 = vrot.slane %v10385_v53, 1  ;;  %v2603_v37 = vsel %vm585_vm0, %v2501_v20, 0.0 }
 0x247   : > { %v10351_v40 = vpop.f32.mrf.mxu1  ;;  %v10355_v11 = vpop.f32.mrf.mxu0 }
 0x248   : > { %14511 = vst [vmem:[#allocation42_spill] sm:$0xff] %v10355_v11  ;;  %v10407_v56 = vsel %vm751_vm1, %v2660_v3, %v2661_v7 }
 0x249   : > { %v2045_v43 = vpop.f32.mrf.mxu0  ;;  %v2327_v0 = vpop.f32.mrf.mxu1  ;;  %2915 = vrot.lane.b32.xlu0 %v10359_v26, %s8270_s17  ;;  %14516 = vst [vmem:[#allocation45_spill] sm:$0xff] %v10407_v56 }
 0x24a   : > { %2917 = vrot.lane.b32.xlu1 %v10364_v46, %s8270_s17  ;;  %v2735_v0 = vrot.slane %v10385_v53, 2 }
 0x24b   : > { %v10366_v14 = vpop.f32.mrf.mxu1  ;;  %v10370_v12 = vpop.f32.mrf.mxu0 }
 0x24c   : > { %14512 = vst [vmem:[#allocation43_spill] sm:$0xff] %v10370_v12  ;;  %v10416_v44 = vsel %vm832_vm2, %v2735_v0, %v2736_v1  ;;  %v2331_v27 = vadd.f32 %v10219_v22, %v10366_v14 }
 0x24d   : > { %v2050_v19 = vpop.f32.mrf.mxu0  ;;  %v2332_v21 = vpop.f32.mrf.mxu1  ;;  %3103 = vrot.lane.b32.xlu0 %v10349_v57, %s14234_s24 }
 0x24e   : > { %3105 = vrot.lane.b32.xlu1 %v10343_v5, %s14234_s24  ;;  %v2437_v52 = vmax.f32 %v2331_v27, 0.0 }
 0x24f   : > { %v10378_v55 = vpop.f32.mrf.mxu1  ;;  %v10382_v8 = vpop.f32.mrf.mxu0 }
 0x250   : > { %14513 = vst [vmem:[#allocation44_spill] sm:$0xff] %v10382_v8 }
 0x251   : > { %v2055_v51 = vpop.f32.mrf.mxu0  ;;  %v2337_v38 = vpop.f32.mrf.mxu1  ;;  %3011 = vrot.lane.b32.xlu0 %v10385_v53, %s8271_s23 }
 0x252   : > { %3013 = vrot.lane.b32.xlu1 %v10376_v36, %s8271_s23  ;;  %v10421_v51 = vsel %vm832_vm2, %v2736_v1, %v2738_v29  ;;  %v10432_v1 = vsel %vm585_vm0, %v2500_v47, %v2501_v20 }
 0x253   : > { %v10391_v24 = vpop.f32.mrf.mxu1  ;;  %v10395_v45 = vpop.f32.mrf.mxu0  ;;  %14519 = vst [vmem:[#allocation67_spill] sm:$0xff] %v10432_v1  ;;  %v2666_v20 = vrot.slane %v10432_v1, 1  ;;  %v2741_v8 = vrot.slane %v10432_v1, 2 }
 0x254   : > { %14514 = vst [vmem:[#allocation30_spill] sm:$0xff] %v10395_v45  ;;  %v2743_v45 = vrot.slane %v2603_v37, 2  ;;  %v2341_v25 = vadd.f32 %v10219_v22, %v10391_v24 }
 0x255   : > { %v2060_v42 = vpop.f32.mrf.mxu0  ;;  %v2342_v17 = vpop.f32.mrf.mxu1  ;;  %2825 = vrot.lane.b32.xlu0 %v10401_v49, %s8269_s20 }
 0x256   : > { %2823 = vrot.lane.b32.xlu1 %v10407_v56, %s8269_s20 }
 0x257   : > { %v2345_v43 = vpop.f32.mrf.mxu1  ;;  %v10411_v50 = vpop.f32.mrf.mxu0 }
 0x258   : > { %14517 = vst [vmem:[#allocation75_spill] sm:$0xff] %v10411_v50  ;;  %v2346_v31 = vadd.f32 %v10219_v22, %v2345_v43 }
 0x259   : > { %v2065_v19 = vpop.f32.mrf.mxu0  ;;  %v2347_v21 = vpop.f32.mrf.mxu1  ;;  %2919 = vrot.lane.b32.xlu0 %v10416_v44, %s8270_s17 }
 0x25a   : > { %2921 = vrot.lane.b32.xlu1 %v10421_v51, %s8270_s17  ;;  %v2440_v4 = vmax.f32 %v2346_v31, 0.0  ;;  %v10444_v21 = vsel %vm585_vm0, 0.0, %v2500_v47 }
 0x25b   : > { %v2350_v38 = vpop.f32.mrf.mxu1  ;;  %v10425_v7 = vpop.f32.mrf.mxu0  ;;  %14521 = vst [vmem:[#allocation71_spill] sm:$0xff] %v10444_v21 }
 0x25c   : > { %14518 = vst [vmem:[#allocation21_spill] sm:$0xff] %v10425_v7  ;;  %v2351_v3 = vadd.f32 %v10219_v22, %v2350_v38  ;;  %v10438_v18 = vrot.slane %v2440_v4, 7  ;;  %v2668_v38 = vrot.slane %v2603_v37, 1 }
 0x25d   : > { %v2070_v42 = vpop.f32.mrf.mxu0  ;;  %v2352_v17 = vpop.f32.mrf.mxu1  ;;  %3107 = vrot.lane.b32.xlu0 %v10407_v56, %s14234_s24 }
 0x25e   : > { %v2441_v43 = vmax.f32 %v2351_v3, 0.0  ;;  %3109 = vrot.lane.b32.xlu1 %v10401_v49, %s14234_s24  ;;  %v2321_v17 = vadd.f32 %v10219_v22, %v10334_v28  ;;  %v10465_v7 = vsel %vm751_vm1, %v2666_v20, %v2668_v38 }
 0x25f   : > { %v2355_v29 = vpop.f32.mrf.mxu1  ;;  %v10436_v0 = vpop.f32.mrf.mxu0  ;;  %14524 = vst [vmem:[#allocation35_spill] sm:$0xff] %v10465_v7 }
 0x260   : > { %14520 = vst [vmem:[#allocation46_spill] sm:$0xff] %v10436_v0  ;;  %v10440_v31 = vrot.slane %v2441_v43, 7  ;;  %v2356_v19 = vadd.f32 %v10219_v22, %v2355_v29  ;;  %v2316_v29 = vadd.f32 %v10219_v22, %v10321_v58  ;;  %v2435_v11 = vmax.f32 %v2321_v17, 0.0 }
 0x261   : > { %v2075_v3 = vpop.f32.mrf.mxu0  ;;  %v2357_v42 = vpop.f32.mrf.mxu1  ;;  %3015 = vrot.lane.b32.xlu0 %v10444_v21, %s8271_s23 }
 0x262   : > { %v10454_v4 = vsel %vm585_vm0, %v10438_v18, %v10440_v31  ;;  %3017 = vrot.lane.b32.xlu1 %v10432_v1, %s8271_s23  ;;  %v2442_v3 = vmax.f32 %v2356_v19, 0.0  ;;  %v2665_v42 = vrot.slane %v10444_v21, 1  ;;  %v2434_v38 = vmax.f32 %v2316_v29, 0.0 }
 0x263   : > { %14522 = vst [vmem:[#allocation32_spill] sm:$0xff] %v10454_v4  ;;  %v2360_v43 = vpop.f32.mrf.mxu1  ;;  %v10458_v47 = vpop.f32.mrf.mxu0 }
 0x264   : > { %14523 = vst [vmem:[#allocation17_spill] sm:$0xff] %v10458_v47  ;;  %v2361_v28 = vadd.f32 %v10219_v22, %v2360_v43  ;;  %v10471_v58 = vsel %vm751_vm1, %v2665_v42, %v2666_v20  ;;  %v10478_v43 = vrot.slane %v2442_v3, 7  ;;  %v2504_v42 = vrot.slane %v2435_v11, 7 }
 0x265   : > { %v2080_v0 = vpop.f32.mrf.mxu0  ;;  %v2362_v50 = vpop.f32.mrf.mxu1  ;;  %2829 = vrot.lane.b32.xlu0 %v10465_v7, %s8269_s20  ;;  %14525 = vst [vmem:[#allocation47_spill] sm:$0xff] %v10471_v58  ;;  %v2503_v3 = vrot.slane %v2434_v38, 7 }
 0x266   : > { %v2443_v12 = vmax.f32 %v2361_v28, 0.0  ;;  %2827 = vrot.lane.b32.xlu1 %v10471_v58, %s8269_s20  ;;  %v2740_v50 = vrot.slane %v10444_v21, 2 }
 0x267   : > { %v2365_v19 = vpop.f32.mrf.mxu1  ;;  %v10475_v0 = vpop.f32.mrf.mxu0  ;;  %v10505_v33 = vsel %vm585_vm0, %v2503_v3, %v2504_v42 }
 0x268   : > { %14526 = vst [vmem:[#allocation76_spill] sm:$0xff] %v10475_v0  ;;  %v10480_v37 = vrot.slane %v2443_v12, 7  ;;  %v2366_v17 = vadd.f32 %v10219_v22, %v2365_v19  ;;  %v10484_v20 = vsel %vm832_vm2, %v2740_v50, %v2741_v8  ;;  %v10489_v0 = vsel %vm832_vm2, %v2741_v8, %v2743_v45  ;;  %14529 = vst [vmem:[#allocation48_spill] sm:$0xff] %v10505_v33 }
 0x269   : > { %v2085_v28 = vpop.f32.mrf.mxu0  ;;  %v2367_v47 = vpop.f32.mrf.mxu1  ;;  %2923 = vrot.lane.b32.xlu0 %v10484_v20, %s8270_s17  ;;  %v2604_v8 = vsel %vm585_vm0, %v2504_v42, 0.0  ;;  %v2671_v42 = vrot.slane %v10505_v33, 1  ;;  %v2746_v59 = vrot.slane %v10505_v33, 2 }
 0x26a   : > { %v10494_v29 = vsel %vm585_vm0, %v10478_v43, %v10480_v37  ;;  %2925 = vrot.lane.b32.xlu1 %v10489_v0, %s8270_s17  ;;  %v2444_v19 = vmax.f32 %v2366_v17, 0.0  ;;  %v2748_v23 = vrot.slane %v2604_v8, 2 }
 0x26b   : > { %14527 = vst [vmem:[#allocation16_spill] sm:$0xff] %v10494_v29  ;;  %v2370_v12 = vpop.f32.mrf.mxu1  ;;  %v10498_v47 = vpop.f32.mrf.mxu0 }
 0x26c   : > { %14528 = vst [vmem:[#allocation27_spill] sm:$0xff] %v10498_v47  ;;  %v2371_v11 = vadd.f32 %v10219_v22, %v2370_v12  ;;  %v10511_v38 = vrot.slane %v2444_v19, 7 }
 0x26d   : > { %v2090_v50 = vpop.f32.mrf.mxu0  ;;  %v2372_v28 = vpop.f32.mrf.mxu1  ;;  %3111 = vrot.lane.b32.xlu0 %v10471_v58, %s14234_s24 }
 0x26e   : > { %v2445_v45 = vmax.f32 %v2371_v11, 0.0  ;;  %3113 = vrot.lane.b32.xlu1 %v10465_v7, %s14234_s24  ;;  %v10517_v11 = vsel %vm585_vm0, 0.0, %v2503_v3  ;;  %v2673_v50 = vrot.slane %v2604_v8, 1 }
 0x26f   : > { %v2375_v35 = vpop.f32.mrf.mxu1  ;;  %v10509_v47 = vpop.f32.mrf.mxu0  ;;  %14531 = vst [vmem:[#allocation72_spill] sm:$0xff] %v10517_v11 }
 0x270   : > { %14530 = vst [vmem:[#allocation68_spill] sm:$0xff] %v10509_v47  ;;  %v10513_v17 = vrot.slane %v2445_v45, 7  ;;  %v2376_v12 = vadd.f32 %v10219_v22, %v2375_v35  ;;  %v10538_v30 = vsel %vm751_vm1, %v2671_v42, %v2673_v50 }
 0x271   : > { %v2095_v28 = vpop.f32.mrf.mxu0  ;;  %v2377_v10 = vpop.f32.mrf.mxu1  ;;  %3019 = vrot.lane.b32.xlu0 %v10517_v11, %s8271_s23  ;;  %14534 = vst [vmem:[#allocation36_spill] sm:$0xff] %v10538_v30 }
 0x272   : > { %v10527_v19 = vsel %vm585_vm0, %v10511_v38, %v10513_v17  ;;  %3021 = vrot.lane.b32.xlu1 %v10505_v33, %s8271_s23  ;;  %v2326_v10 = vadd.f32 %v10219_v22, %v10351_v40  ;;  %v2446_v45 = vmax.f32 %v2376_v12, 0.0  ;;  %v2670_v28 = vrot.slane %v10517_v11, 1 }
 0x273   : > { %14532 = vst [vmem:[#allocation33_spill] sm:$0xff] %v10527_v19  ;;  %v2380_v35 = vpop.f32.mrf.mxu1  ;;  %v10531_v3 = vpop.f32.mrf.mxu0 }
 0x274   : > { %14533 = vst [vmem:[#allocation20_spill] sm:$0xff] %v10531_v3  ;;  %v2381_v14 = vadd.f32 %v10219_v22, %v2380_v35  ;;  %v10544_v40 = vsel %vm751_vm1, %v2670_v28, %v2671_v42  ;;  %v2436_v50 = vmax.f32 %v2326_v10, 0.0  ;;  %v10551_v35 = vrot.slane %v2446_v45, 7 }
 0x275   : > { %v2100_v47 = vpop.f32.mrf.mxu0  ;;  %v2382_v61 = vpop.f32.mrf.mxu1  ;;  %2833 = vrot.lane.b32.xlu0 %v10538_v30, %s8269_s20  ;;  %14535 = vst [vmem:[#allocation49_spill] sm:$0xff] %v10544_v40  ;;  %v2507_v28 = vrot.slane %v2437_v52, 7 }
 0x276   : > { %v2447_v13 = vmax.f32 %v2381_v14, 0.0  ;;  %2831 = vrot.lane.b32.xlu1 %v10544_v40, %s8269_s20  ;;  %v2745_v61 = vrot.slane %v10517_v11, 2  ;;  %v2506_v45 = vrot.slane %v2436_v50, 7  ;;  %v2439_v11 = vmax.f32 %v2341_v25, 0.0 }
 0x277   : > { %v2385_v12 = vpop.f32.mrf.mxu1  ;;  %v10548_v47 = vpop.f32.mrf.mxu0 }
 0x278   : > { %14536 = vst [vmem:[#allocation77_spill] sm:$0xff] %v10548_v47  ;;  %v10553_v8 = vrot.slane %v2447_v13, 7  ;;  %v2386_v27 = vadd.f32 %v10219_v22, %v2385_v12  ;;  %v10557_v42 = vsel %vm832_vm2, %v2745_v61, %v2746_v59  ;;  %v10562_v47 = vsel %vm832_vm2, %v2746_v59, %v2748_v23 }
 0x279   : > { %v2105_v14 = vpop.f32.mrf.mxu0  ;;  %v2387_v3 = vpop.f32.mrf.mxu1  ;;  %2927 = vrot.lane.b32.xlu0 %v10557_v42, %s8270_s17  ;;  %v2605_v59 = vsel %vm585_vm0, %v2507_v28, 0.0  ;;  %v10578_v2 = vsel %vm585_vm0, %v2506_v45, %v2507_v28 }
 0x27a   : > { %v10567_v10 = vsel %vm585_vm0, %v10551_v35, %v10553_v8  ;;  %2929 = vrot.lane.b32.xlu1 %v10562_v47, %s8270_s17  ;;  %v2448_v12 = vmax.f32 %v2386_v27, 0.0  ;;  %14539 = vst [vmem:[#allocation50_spill] sm:$0xff] %v10578_v2  ;;  %v2676_v28 = vrot.slane %v10578_v2, 1  ;;  %v2753_v33 = vrot.slane %v2605_v59, 2 }
 0x27b   : > { %14537 = vst [vmem:[#allocation19_spill] sm:$0xff] %v10567_v10  ;;  %v2390_v13 = vpop.f32.mrf.mxu1  ;;  %v10571_v3 = vpop.f32.mrf.mxu0 }
 0x27c   : > { %14538 = vst [vmem:[#allocation28_spill] sm:$0xff] %v10571_v3  ;;  %v2391_v52 = vadd.f32 %v10219_v22, %v2390_v13  ;;  %v10584_v50 = vrot.slane %v2448_v12, 7 }
 0x27d   : > { %v2110_v61 = vpop.f32.mrf.mxu0  ;;  %v2392_v14 = vpop.f32.mrf.mxu1  ;;  %3115 = vrot.lane.b32.xlu0 %v10544_v40, %s14234_s24  ;;  %v2751_v40 = vrot.slane %v10578_v2, 2 }
 0x27e   : > { %v2449_v23 = vmax.f32 %v2391_v52, 0.0  ;;  %3117 = vrot.lane.b32.xlu1 %v10538_v30, %s14234_s24  ;;  %v10590_v52 = vsel %vm585_vm0, 0.0, %v2506_v45  ;;  %v2678_v61 = vrot.slane %v2605_v59, 1 }
 0x27f   : > { %v2395_v32 = vpop.f32.mrf.mxu1  ;;  %v10582_v3 = vpop.f32.mrf.mxu0  ;;  %14541 = vst [vmem:[#allocation73_spill] sm:$0xff] %v10590_v52 }
 0x280   : > { %14540 = vst [vmem:[#allocation69_spill] sm:$0xff] %v10582_v3  ;;  %v10586_v27 = vrot.slane %v2449_v23, 7  ;;  %v2396_v13 = vadd.f32 %v10219_v22, %v2395_v32  ;;  %v10611_v30 = vsel %vm751_vm1, %v2676_v28, %v2678_v61 }
 0x281   : > { %v2115_v14 = vpop.f32.mrf.mxu0  ;;  %v2397_v39 = vpop.f32.mrf.mxu1  ;;  %3023 = vrot.lane.b32.xlu0 %v10590_v52, %s8271_s23  ;;  %14544 = vst [vmem:[#allocation74_spill] sm:$0xff] %v10611_v30 }
 0x282   : > { %v10600_v12 = vsel %vm585_vm0, %v10584_v50, %v10586_v27  ;;  %3025 = vrot.lane.b32.xlu1 %v10578_v2, %s8271_s23  ;;  %v2336_v39 = vadd.f32 %v10219_v22, %v10378_v55  ;;  %v2450_v23 = vmax.f32 %v2396_v13, 0.0  ;;  %v2675_v14 = vrot.slane %v10590_v52, 1  ;;  %v10648_v2 = vpop.permute.xlu0 %8231 }
 0x283   : > { %14542 = vst [vmem:[#allocation29_spill] sm:$0xff] %v10600_v12  ;;  %v2400_v32 = vpop.f32.mrf.mxu1  ;;  %v10604_v45 = vpop.f32.mrf.mxu0  ;;  %14549 = vst [vmem:[#allocation53_spill] sm:$0xff] %v10648_v2 }
 0x284   : > { %14543 = vst [vmem:[#allocation23_spill] sm:$0xff] %v10604_v45  ;;  %v2401_v24 = vadd.f32 %v10219_v22, %v2400_v32  ;;  %v10617_v55 = vsel %vm751_vm1, %v2675_v14, %v2676_v28  ;;  %v2438_v61 = vmax.f32 %v2336_v39, 0.0  ;;  %v10624_v32 = vrot.slane %v2450_v23, 7 }
 0x285   : > { %v2120_v3 = vpop.f32.mrf.mxu0  ;;  %v2402_v34 = vpop.f32.mrf.mxu1  ;;  %2837 = vrot.lane.b32.xlu0 %v10611_v30, %s8269_s20  ;;  %14545 = vst [vmem:[#allocation51_spill] sm:$0xff] %v10617_v55  ;;  %v2510_v14 = vrot.slane %v2439_v11, 7 }
 0x286   : > { %v2451_v7 = vmax.f32 %v2401_v24, 0.0  ;;  %2835 = vrot.lane.b32.xlu1 %v10617_v55, %s8269_s20  ;;  %v2750_v34 = vrot.slane %v10590_v52, 2  ;;  %v2509_v23 = vrot.slane %v2438_v61, 7 }
 0x287   : > { %v2405_v13 = vpop.f32.mrf.mxu1  ;;  %v10621_v3 = vpop.f32.mrf.mxu0 }
 0x288   : > { %14546 = vst [vmem:[#allocation13_spill] sm:$0xff] %v10621_v3  ;;  %v10626_v59 = vrot.slane %v2451_v7, 7  ;;  %v2406_v25 = vadd.f32 %v10219_v22, %v2405_v13  ;;  %v10630_v28 = vsel %vm832_vm2, %v2750_v34, %v2751_v40  ;;  %v10635_v3 = vsel %vm832_vm2, %v2751_v40, %v2753_v33 }
 0x289   : > { %v2125_v24 = vpop.f32.mrf.mxu0  ;;  %v2407_v45 = vpop.f32.mrf.mxu1  ;;  %2931 = vrot.lane.b32.xlu0 %v10630_v28, %s8270_s17  ;;  %v2606_v33 = vsel %vm585_vm0, %v2510_v14, 0.0  ;;  %v10653_v52 = vsel %vm585_vm0, %v2509_v23, %v2510_v14 }
 0x28a   : > { %v10640_v39 = vsel %vm585_vm0, %v10624_v32, %v10626_v59  ;;  %2933 = vrot.lane.b32.xlu1 %v10635_v3, %s8270_s17  ;;  %v2452_v13 = vmax.f32 %v2406_v25, 0.0  ;;  %14550 = vst [vmem:[#allocation54_spill] sm:$0xff] %v10653_v52  ;;  %v10660_v25 = vsel %vm585_vm0, 0.0, %v2509_v23  ;;  %v2681_v2 = vrot.slane %v10653_v52, 1 }
 0x28b   : > { %14547 = vst [vmem:[#allocation22_spill] sm:$0xff] %v10640_v39  ;;  %v2410_v7 = vpop.f32.mrf.mxu1  ;;  %v10644_v45 = vpop.f32.mrf.mxu0  ;;  %14552 = vst [vmem:[#allocation56_spill] sm:$0xff] %v10660_v25  ;;  %v2758_v21 = vrot.slane %v2606_v33, 2 }
 0x28c   : > { %14548 = vst [vmem:[#allocation52_spill] sm:$0xff] %v10644_v45  ;;  %v2411_v11 = vadd.f32 %v10219_v22, %v2410_v7 }
 0x28d   : > { %v2130_v34 = vpop.f32.mrf.mxu0  ;;  %v2412_v24 = vpop.f32.mrf.mxu1  ;;  %3119 = vrot.lane.b32.xlu0 %v10617_v55, %s14234_s24 }
 0x28e   : > { %v2453_v40 = vmax.f32 %v2411_v11, 0.0  ;;  %3121 = vrot.lane.b32.xlu1 %v10611_v30, %s14234_s24  ;;  %v2683_v11 = vrot.slane %v2606_v33, 1  ;;  %v10664_v34 = vrot.slane %v2452_v13, 7  ;;  %v10666_v24 = vpop.permute.xlu1 %8236 }
 0x28f   : > { %v2415_v58 = vpop.f32.mrf.mxu1  ;;  %v10657_v61 = vpop.f32.mrf.mxu0  ;;  %14553 = vst [vmem:[#allocation38_spill] sm:$0xff] %v10666_v24 }
 0x290   : > { %14551 = vst [vmem:[#allocation55_spill] sm:$0xff] %v10657_v61  ;;  %v10662_v7 = vrot.slane %v2453_v40, 7  ;;  %v2416_v45 = vadd.f32 %v10219_v22, %v2415_v58  ;;  %v10681_v40 = vpop.permute.xlu0 %2999  ;;  %v10688_v1 = vsel %vm751_vm1, %v2681_v2, %v2683_v11 }
 0x291   : > { %v2135_v14 = vpop.f32.mrf.mxu0  ;;  %v2417_v55 = vpop.f32.mrf.mxu1  ;;  %3027 = vrot.lane.b32.xlu0 %v10660_v25, %s8271_s23  ;;  %14555 = vst [vmem:[#allocation58_spill] sm:$0xff] %v10681_v40 }
 0x292   : > { %3029 = vrot.lane.b32.xlu1 %v10653_v52, %s8271_s23  ;;  %v10679_v13 = vsel %vm585_vm0, %v10664_v34, %v10662_v7  ;;  %v2680_v14 = vrot.slane %v10660_v25, 1  ;;  %v2454_v61 = vmax.f32 %v2416_v45, 0.0 }
 0x293   : > { %v10674_v23 = vpop.f32.mrf.mxu0  ;;  %v2420_v58 = vpop.f32.mrf.mxu1 }
 0x294   : > { %14554 = vst [vmem:[#allocation57_spill] sm:$0xff] %v10674_v23  ;;  %v2421_v55 = vadd.f32 %v10219_v22, %v2420_v58  ;;  %v10685_v24 = vpop.permute.xlu1 %3001  ;;  %v2756_v23 = vrot.slane %v10653_v52, 2  ;;  %v10694_v40 = vsel %vm751_vm1, %v2680_v14, %v2681_v2  ;;  %v2755_v22 = vrot.slane %v10660_v25, 2 }
 0x295   : > { %14556 = vst [vmem:[#allocation59_spill] sm:$0xff] %v10685_v24  ;;  %v2140_v30 = vpop.f32.mrf.mxu0  ;;  %v2422_v49 = vpop.f32.mrf.mxu1  ;;  %2841 = vrot.lane.b32.xlu0 %v10688_v1, %s8269_s20  ;;  %v10701_v45 = vrot.slane %v2454_v61, 7  ;;  %v2607_v14 = vsel %vm585_vm0, %v10440_v31, 0.0 }
 0x296   : > { %v2455_v56 = vmax.f32 %v2421_v55, 0.0  ;;  %2839 = vrot.lane.b32.xlu1 %v10694_v40, %s8269_s20  ;;  %v10708_v49 = vsel %vm832_vm2, %v2755_v22, %v2756_v23  ;;  %v10713_v2 = vsel %vm832_vm2, %v2756_v23, %v2758_v21  ;;  %v10736_v23 = vsel %vm585_vm0, 0.0, %v10438_v18 }
 0x297   : > { %v10699_v30 = vpop.permute.xlu0 %2813  ;;  %14563 = vst [vmem:[#allocation34_spill] sm:$0xff] %v10736_v23  ;;  %v2688_v55 = vrot.slane %v2607_v14, 1 }
 0x298   : > { %14557 = vst [vmem:[#allocation60_spill] sm:$0xff] %v10699_v30  ;;  %v10703_v11 = vrot.slane %v2455_v56, 7  ;;  %v10705_v33 = vpop.permute.xlu1 %2811  ;;  %v2685_v30 = vrot.slane %v10736_v23, 1 }
 0x299   : > { %14558 = vst [vmem:[#allocation61_spill] sm:$0xff] %v10705_v33  ;;  %2935 = vrot.lane.b32.xlu0 %v10708_v49, %s8270_s17  ;;  %v2761_v33 = vrot.slane %v10454_v4, 2 }
 0x29a   : > { %2937 = vrot.lane.b32.xlu1 %v10713_v2, %s8270_s17  ;;  %v10720_v61 = vsel %vm585_vm0, %v10701_v45, %v10703_v11 }
 0x29b   : > { %14559 = vst [vmem:[#allocation62_spill] sm:$0xff] %v10720_v61  ;;  %v10722_v56 = vpop.permute.xlu0 %2907 }
 0x29c   : > { %14560 = vst [vmem:[#allocation63_spill] sm:$0xff] %v10722_v56  ;;  %v10724_v58 = vpop.permute.xlu1 %2909 }
 0x29d   : > { %14561 = vst [vmem:[#allocation64_spill] sm:$0xff] %v10724_v58  ;;  %3123 = vrot.lane.b32.xlu0 %v10694_v40, %s14234_s24  ;;  %v2686_v58 = vrot.slane %v10454_v4, 1 }
 0x29e   : > { %3125 = vrot.lane.b32.xlu1 %v10688_v1, %s14234_s24 }
 0x29f   : > { %v10732_v21 = vpop.permute.xlu0 %3095  ;;  %v10751_v18 = vsel %vm751_vm1, %v2686_v58, %v2688_v55  ;;  %v10757_v24 = vsel %vm751_vm1, %v2685_v30, %v2686_v58 }
 0x2a0   : > { %14562 = vst [vmem:[#allocation65_spill] sm:$0xff] %v10732_v21  ;;  %v10738_v22 = vpop.permute.xlu1 %3097  ;;  %14567 = vst [vmem:[#allocation78_spill] sm:$0xff] %v10751_v18 }
 0x2a1   : > { %14564 = vst [vmem:[#allocation37_spill] sm:$0xff] %v10738_v22  ;;  %3031 = vrot.lane.b32.xlu0 %v10736_v23, %s8271_s23  ;;  %v2763_v22 = vrot.slane %v2607_v14, 2  ;;  %14568 = vst [vmem:[#allocation79_spill] sm:$0xff] %v10757_v24 }
 0x2a2   : > { %3033 = vrot.lane.b32.xlu1 %v10454_v4, %s8271_s23 }
 0x2a3   : > { %v10745_v31 = vpop.permute.xlu0 %3003  ;;  %v10772_v14 = vsel %vm832_vm2, %v2761_v33, %v2763_v22 }
 0x2a4   : > { %14565 = vst [vmem:[#allocation4_spill] sm:$0xff] %v10745_v31  ;;  %v10748_v56 = vpop.permute.xlu1 %3005  ;;  %v2760_v31 = vrot.slane %v10736_v23, 2 }
 0x2a5   : > { %14566 = vst [vmem:[#allocation6_spill] sm:$0xff] %v10748_v56  ;;  %2845 = vrot.lane.b32.xlu0 %v10751_v18, %s8269_s20 }
 0x2a6   : > { %2843 = vrot.lane.b32.xlu1 %v10757_v24, %s8269_s20  ;;  %v10767_v55 = vsel %vm832_vm2, %v2760_v31, %v2761_v33  ;;  %v10790_v33 = vsel %vm585_vm0, 0.0, %v10478_v43 }
 0x2a7   : > { %v10762_v21 = vpop.permute.xlu0 %2817  ;;  %14574 = vst [vmem:[#allocation85_spill] sm:$0xff] %v10790_v33 }
 0x2a8   : > { %14569 = vst [vmem:[#allocation80_spill] sm:$0xff] %v10762_v21  ;;  %v10764_v56 = vpop.permute.xlu1 %2815  ;;  %v2608_v21 = vsel %vm585_vm0, %v10480_v37, 0.0 }
 0x2a9   : > { %14570 = vst [vmem:[#allocation81_spill] sm:$0xff] %v10764_v56  ;;  %2939 = vrot.lane.b32.xlu0 %v10767_v55, %s8270_s17  ;;  %v2693_v22 = vrot.slane %v2608_v21, 1 }
 0x2aa   : > { %2941 = vrot.lane.b32.xlu1 %v10772_v14, %s8270_s17 }
 0x2ab   : > { %v10776_v30 = vpop.permute.xlu0 %2911 }
 0x2ac   : > { %14571 = vst [vmem:[#allocation82_spill] sm:$0xff] %v10776_v30  ;;  %v10778_v58 = vpop.permute.xlu1 %2913  ;;  %v2690_v30 = vrot.slane %v10790_v33, 1 }
 0x2ad   : > { %14572 = vst [vmem:[#allocation83_spill] sm:$0xff] %v10778_v58  ;;  %3127 = vrot.lane.b32.xlu0 %v10757_v24, %s14234_s24  ;;  %v2691_v58 = vrot.slane %v10494_v29, 1 }
 0x2ae   : > { %3129 = vrot.lane.b32.xlu1 %v10751_v18, %s14234_s24  ;;  %v2766_v18 = vrot.slane %v10494_v29, 2 }
 0x2af   : > { %v10786_v31 = vpop.permute.xlu0 %3099  ;;  %v10805_v43 = vsel %vm751_vm1, %v2691_v58, %v2693_v22  ;;  %v10811_v24 = vsel %vm751_vm1, %v2690_v30, %v2691_v58 }
 0x2b0   : > { %14573 = vst [vmem:[#allocation84_spill] sm:$0xff] %v10786_v31  ;;  %v10792_v56 = vpop.permute.xlu1 %3101  ;;  %14578 = vst [vmem:[#allocation89_spill] sm:$0xff] %v10805_v43 }
 0x2b1   : > { %14575 = vst [vmem:[#allocation86_spill] sm:$0xff] %v10792_v56  ;;  %3035 = vrot.lane.b32.xlu0 %v10790_v33, %s8271_s23  ;;  %v2768_v56 = vrot.slane %v2608_v21, 2  ;;  %14579 = vst [vmem:[#allocation90_spill] sm:$0xff] %v10811_v24 }
 0x2b2   : > { %3037 = vrot.lane.b32.xlu1 %v10494_v29, %s8271_s23 }
 0x2b3   : > { %v10799_v37 = vpop.permute.xlu0 %3007  ;;  %v10826_v21 = vsel %vm832_vm2, %v2766_v18, %v2768_v56  ;;  %v10844_v56 = vsel %vm585_vm0, 0.0, %v10511_v38 }
 0x2b4   : > { %14576 = vst [vmem:[#allocation87_spill] sm:$0xff] %v10799_v37  ;;  %v10802_v31 = vpop.permute.xlu1 %3009  ;;  %v2765_v37 = vrot.slane %v10790_v33, 2  ;;  %14585 = vst [vmem:[#allocation96_spill] sm:$0xff] %v10844_v56 }
 0x2b5   : > { %14577 = vst [vmem:[#allocation88_spill] sm:$0xff] %v10802_v31  ;;  %2849 = vrot.lane.b32.xlu0 %v10805_v43, %s8269_s20 }
 0x2b6   : > { %2847 = vrot.lane.b32.xlu1 %v10811_v24, %s8269_s20  ;;  %v10821_v22 = vsel %vm832_vm2, %v2765_v37, %v2766_v18 }
 0x2b7   : > { %v10816_v4 = vpop.permute.xlu0 %2821 }
 0x2b8   : > { %14580 = vst [vmem:[#allocation91_spill] sm:$0xff] %v10816_v4  ;;  %v10818_v31 = vpop.permute.xlu1 %2819  ;;  %v2609_v4 = vsel %vm585_vm0, %v10513_v17, 0.0 }
 0x2b9   : > { %14581 = vst [vmem:[#allocation92_spill] sm:$0xff] %v10818_v31  ;;  %2943 = vrot.lane.b32.xlu0 %v10821_v22, %s8270_s17  ;;  %v2698_v18 = vrot.slane %v2609_v4, 1 }
 0x2ba   : > { %2945 = vrot.lane.b32.xlu1 %v10826_v21, %s8270_s17 }
 0x2bb   : > { %v10830_v30 = vpop.permute.xlu0 %2915 }
 0x2bc   : > { %14582 = vst [vmem:[#allocation93_spill] sm:$0xff] %v10830_v30  ;;  %v10832_v58 = vpop.permute.xlu1 %2917  ;;  %v2695_v30 = vrot.slane %v10844_v56, 1 }
 0x2bd   : > { %14583 = vst [vmem:[#allocation94_spill] sm:$0xff] %v10832_v58  ;;  %3131 = vrot.lane.b32.xlu0 %v10811_v24, %s14234_s24  ;;  %v2696_v58 = vrot.slane %v10527_v19, 1 }
 0x2be   : > { %3133 = vrot.lane.b32.xlu1 %v10805_v43, %s14234_s24  ;;  %v2771_v43 = vrot.slane %v10527_v19, 2 }
 0x2bf   : > { %v10840_v37 = vpop.permute.xlu0 %3103  ;;  %v10859_v38 = vsel %vm751_vm1, %v2696_v58, %v2698_v18  ;;  %v10865_v24 = vsel %vm751_vm1, %v2695_v30, %v2696_v58 }
 0x2c0   : > { %14584 = vst [vmem:[#allocation95_spill] sm:$0xff] %v10840_v37  ;;  %v10846_v31 = vpop.permute.xlu1 %3105  ;;  %14589 = vst [vmem:[#allocation100_spill] sm:$0xff] %v10859_v38 }
 0x2c1   : > { %14586 = vst [vmem:[#allocation97_spill] sm:$0xff] %v10846_v31  ;;  %3039 = vrot.lane.b32.xlu0 %v10844_v56, %s8271_s23  ;;  %v2773_v31 = vrot.slane %v2609_v4, 2  ;;  %14590 = vst [vmem:[#allocation101_spill] sm:$0xff] %v10865_v24 }
 0x2c2   : > { %3041 = vrot.lane.b32.xlu1 %v10527_v19, %s8271_s23 }
 0x2c3   : > { %v10853_v17 = vpop.permute.xlu0 %3011  ;;  %v10880_v4 = vsel %vm832_vm2, %v2771_v43, %v2773_v31  ;;  %v10898_v31 = vsel %vm585_vm0, 0.0, %v10551_v35 }
 0x2c4   : > { %14587 = vst [vmem:[#allocation98_spill] sm:$0xff] %v10853_v17  ;;  %v10856_v37 = vpop.permute.xlu1 %3013  ;;  %v2770_v17 = vrot.slane %v10844_v56, 2  ;;  %14596 = vst [vmem:[#allocation107_spill] sm:$0xff] %v10898_v31 }
 0x2c5   : > { %14588 = vst [vmem:[#allocation99_spill] sm:$0xff] %v10856_v37  ;;  %2853 = vrot.lane.b32.xlu0 %v10859_v38, %s8269_s20 }
 0x2c6   : > { %2851 = vrot.lane.b32.xlu1 %v10865_v24, %s8269_s20  ;;  %v10875_v18 = vsel %vm832_vm2, %v2770_v17, %v2771_v43 }
 0x2c7   : > { %v10870_v29 = vpop.permute.xlu0 %2825 }
 0x2c8   : > { %14591 = vst [vmem:[#allocation102_spill] sm:$0xff] %v10870_v29  ;;  %v10872_v37 = vpop.permute.xlu1 %2823  ;;  %v2610_v29 = vsel %vm585_vm0, %v10553_v8, 0.0 }
 0x2c9   : > { %14592 = vst [vmem:[#allocation103_spill] sm:$0xff] %v10872_v37  ;;  %2947 = vrot.lane.b32.xlu0 %v10875_v18, %s8270_s17  ;;  %v2703_v43 = vrot.slane %v2610_v29, 1 }
 0x2ca   : > { %2949 = vrot.lane.b32.xlu1 %v10880_v4, %s8270_s17 }
 0x2cb   : > { %v10884_v30 = vpop.permute.xlu0 %2919 }
 0x2cc   : > { %14593 = vst [vmem:[#allocation104_spill] sm:$0xff] %v10884_v30  ;;  %v10886_v58 = vpop.permute.xlu1 %2921  ;;  %v2700_v30 = vrot.slane %v10898_v31, 1 }
 0x2cd   : > { %14594 = vst [vmem:[#allocation105_spill] sm:$0xff] %v10886_v58  ;;  %3135 = vrot.lane.b32.xlu0 %v10865_v24, %s14234_s24  ;;  %v2701_v58 = vrot.slane %v10567_v10, 1 }
 0x2ce   : > { %3137 = vrot.lane.b32.xlu1 %v10859_v38, %s14234_s24  ;;  %v2776_v38 = vrot.slane %v10567_v10, 2 }
 0x2cf   : > { %v10894_v17 = vpop.permute.xlu0 %3107  ;;  %v10913_v35 = vsel %vm751_vm1, %v2701_v58, %v2703_v43  ;;  %v10919_v24 = vsel %vm751_vm1, %v2700_v30, %v2701_v58 }
 0x2d0   : > { %14595 = vst [vmem:[#allocation106_spill] sm:$0xff] %v10894_v17  ;;  %v10900_v37 = vpop.permute.xlu1 %3109 }
 0x2d1   : > { %14597 = vst [vmem:[#allocation108_spill] sm:$0xff] %v10900_v37  ;;  %3043 = vrot.lane.b32.xlu0 %v10898_v31, %s8271_s23  ;;  %v2778_v37 = vrot.slane %v2610_v29, 2  ;;  %v2611_v29 = vsel %vm585_vm0, %v10586_v27, 0.0  ;;  %v2706_v27 = vrot.slane %v10600_v12, 1 }
 0x2d2   : > { %3045 = vrot.lane.b32.xlu1 %v10567_v10, %s8271_s23  ;;  %v2781_v10 = vrot.slane %v10600_v12, 2 }
 0x2d3   : > { %v10907_v8 = vpop.permute.xlu0 %3015  ;;  %v10936_v30 = vsel %vm832_vm2, %v2776_v38, %v2778_v37 }
 0x2d4   : > { %14598 = vst [vmem:[#allocation109_spill] sm:$0xff] %v10907_v8  ;;  %v10910_v17 = vpop.permute.xlu1 %3017  ;;  %v2775_v8 = vrot.slane %v10898_v31, 2 }
 0x2d5   : > { %14599 = vst [vmem:[#allocation110_spill] sm:$0xff] %v10910_v17  ;;  %2857 = vrot.lane.b32.xlu0 %v10913_v35, %s8269_s20 }
 0x2d6   : > { %2855 = vrot.lane.b32.xlu1 %v10919_v24, %s8269_s20  ;;  %v10929_v43 = vsel %vm832_vm2, %v2775_v8, %v2776_v38  ;;  %v2708_v8 = vrot.slane %v2611_v29, 1 }
 0x2d7   : > { %v10924_v19 = vpop.permute.xlu0 %2829 }
 0x2d8   : > { %14600 = vst [vmem:[#allocation111_spill] sm:$0xff] %v10924_v19  ;;  %v10926_v17 = vpop.permute.xlu1 %2827  ;;  %v10944_v19 = vsel %vm585_vm0, 0.0, %v10584_v50  ;;  %v10959_v50 = vsel %vm751_vm1, %v2706_v27, %v2708_v8 }
 0x2d9   : > { %14601 = vst [vmem:[#allocation112_spill] sm:$0xff] %v10926_v17  ;;  %2951 = vrot.lane.b32.xlu0 %v10929_v43, %s8270_s17  ;;  %14603 = vst [vmem:[#allocation114_spill] sm:$0xff] %v10944_v19  ;;  %v2705_v38 = vrot.slane %v10944_v19, 1 }
 0x2da   : > { %2953 = vrot.lane.b32.xlu1 %v10936_v30, %s8270_s17 }
 0x2db   : > { %v10940_v58 = vpop.permute.xlu0 %2923  ;;  %v10965_v31 = vsel %vm751_vm1, %v2705_v38, %v2706_v27 }
 0x2dc   : > { %14602 = vst [vmem:[#allocation113_spill] sm:$0xff] %v10940_v58  ;;  %v10946_v17 = vpop.permute.xlu1 %2925 }
 0x2dd   : > { %14604 = vst [vmem:[#allocation115_spill] sm:$0xff] %v10946_v17  ;;  %3047 = vrot.lane.b32.xlu0 %v10944_v19, %s8271_s23  ;;  %v2783_v17 = vrot.slane %v2611_v29, 2  ;;  %v2612_v29 = vsel %vm585_vm0, %v10626_v59, 0.0  ;;  %v2711_v59 = vrot.slane %v10640_v39, 1 }
 0x2de   : > { %3049 = vrot.lane.b32.xlu1 %v10600_v12, %s8271_s23  ;;  %v2786_v12 = vrot.slane %v10640_v39, 2 }
 0x2df   : > { %v10953_v37 = vpop.permute.xlu0 %3111  ;;  %v10982_v27 = vsel %vm832_vm2, %v2781_v10, %v2783_v17 }
 0x2e0   : > { %14605 = vst [vmem:[#allocation116_spill] sm:$0xff] %v10953_v37  ;;  %v10956_v58 = vpop.permute.xlu1 %3113  ;;  %v2780_v37 = vrot.slane %v10944_v19, 2 }
 0x2e1   : > { %14606 = vst [vmem:[#allocation117_spill] sm:$0xff] %v10956_v58  ;;  %2861 = vrot.lane.b32.xlu0 %v10959_v50, %s8269_s20 }
 0x2e2   : > { %2859 = vrot.lane.b32.xlu1 %v10965_v31, %s8269_s20  ;;  %v10975_v8 = vsel %vm832_vm2, %v2780_v37, %v2781_v10  ;;  %v2713_v37 = vrot.slane %v2612_v29, 1 }
 0x2e3   : > { %v10970_v56 = vpop.permute.xlu0 %3019 }
 0x2e4   : > { %14607 = vst [vmem:[#allocation118_spill] sm:$0xff] %v10970_v56  ;;  %v10972_v58 = vpop.permute.xlu1 %3021 }
 0x2e5   : > { %14608 = vst [vmem:[#allocation119_spill] sm:$0xff] %v10972_v58  ;;  %2955 = vrot.lane.b32.xlu0 %v10975_v8, %s8270_s17  ;;  %v10990_v58 = vsel %vm585_vm0, 0.0, %v10624_v32  ;;  %v11005_v32 = vsel %vm751_vm1, %v2711_v59, %v2713_v37 }
 0x2e6   : > { %2957 = vrot.lane.b32.xlu1 %v10982_v27, %s8270_s17  ;;  %14610 = vst [vmem:[#allocation121_spill] sm:$0xff] %v10990_v58  ;;  %v2710_v17 = vrot.slane %v10990_v58, 1 }
 0x2e7   : > { %v10986_v38 = vpop.permute.xlu0 %2833 }
 0x2e8   : > { %14609 = vst [vmem:[#allocation120_spill] sm:$0xff] %v10986_v38  ;;  %v10992_v56 = vpop.permute.xlu1 %2831  ;;  %v11011_v19 = vsel %vm751_vm1, %v2710_v17, %v2711_v59 }
 0x2e9   : > { %14611 = vst [vmem:[#allocation122_spill] sm:$0xff] %v10992_v56  ;;  %3051 = vrot.lane.b32.xlu0 %v10990_v58, %s8271_s23  ;;  %v2788_v56 = vrot.slane %v2612_v29, 2  ;;  %v2613_v29 = vsel %vm585_vm0, %v10662_v7, 0.0  ;;  %v2716_v7 = vrot.slane %v10679_v13, 1 }
 0x2ea   : > { %3053 = vrot.lane.b32.xlu1 %v10640_v39, %s8271_s23  ;;  %v2791_v39 = vrot.slane %v10679_v13, 2 }
 0x2eb   : > { %v10999_v10 = vpop.permute.xlu0 %2927  ;;  %v11028_v59 = vsel %vm832_vm2, %v2786_v12, %v2788_v56 }
 0x2ec   : > { %14612 = vst [vmem:[#allocation123_spill] sm:$0xff] %v10999_v10  ;;  %v11002_v38 = vpop.permute.xlu1 %2929  ;;  %v2785_v10 = vrot.slane %v10990_v58, 2 }
 0x2ed   : > { %14613 = vst [vmem:[#allocation124_spill] sm:$0xff] %v11002_v38  ;;  %2865 = vrot.lane.b32.xlu0 %v11005_v32, %s8269_s20 }
 0x2ee   : > { %2863 = vrot.lane.b32.xlu1 %v11011_v19, %s8269_s20  ;;  %v11021_v37 = vsel %vm832_vm2, %v2785_v10, %v2786_v12  ;;  %v2718_v10 = vrot.slane %v2613_v29, 1 }
 0x2ef   : > { %v11016_v33 = vpop.permute.xlu0 %3115 }
 0x2f0   : > { %14614 = vst [vmem:[#allocation125_spill] sm:$0xff] %v11016_v33  ;;  %v11018_v38 = vpop.permute.xlu1 %3117 }
 0x2f1   : > { %14615 = vst [vmem:[#allocation126_spill] sm:$0xff] %v11018_v38  ;;  %2959 = vrot.lane.b32.xlu0 %v11021_v37, %s8270_s17  ;;  %v11036_v38 = vsel %vm585_vm0, 0.0, %v10664_v34  ;;  %v11051_v34 = vsel %vm751_vm1, %v2716_v7, %v2718_v10 }
 0x2f2   : > { %2961 = vrot.lane.b32.xlu1 %v11028_v59, %s8270_s17  ;;  %v2715_v56 = vrot.slane %v11036_v38, 1 }
 0x2f3   : > { %v11032_v17 = vpop.permute.xlu0 %3023 }
 0x2f4   : > { %14616 = vst [vmem:[#allocation127_spill] sm:$0xff] %v11032_v17  ;;  %v11038_v33 = vpop.permute.xlu1 %3025  ;;  %v11057_v58 = vsel %vm751_vm1, %v2715_v56, %v2716_v7 }
 0x2f5   : > { %14617 = vst [vmem:[#allocation128_spill] sm:$0xff] %v11038_v33  ;;  %3055 = vrot.lane.b32.xlu0 %v11036_v38, %s8271_s23  ;;  %v2793_v33 = vrot.slane %v2613_v29, 2 }
 0x2f6   : > { %3057 = vrot.lane.b32.xlu1 %v10679_v13, %s8271_s23 }
 0x2f7   : > { %v11045_v12 = vpop.permute.xlu0 %2837  ;;  %v11072_v29 = vsel %vm832_vm2, %v2791_v39, %v2793_v33 }
 0x2f8   : > { %14618 = vst [vmem:[#allocation129_spill] sm:$0xff] %v11045_v12  ;;  %v11048_v17 = vpop.permute.xlu1 %2835  ;;  %v2790_v12 = vrot.slane %v11036_v38, 2 }
 0x2f9   : > { %14619 = vst [vmem:[#allocation130_spill] sm:$0xff] %v11048_v17  ;;  %2869 = vrot.lane.b32.xlu0 %v11051_v34, %s8269_s20 }
 0x2fa   : > { %2867 = vrot.lane.b32.xlu1 %v11057_v58, %s8269_s20  ;;  %v11067_v10 = vsel %vm832_vm2, %v2790_v12, %v2791_v39 }
 0x2fb   : > { %v11062_v23 = vpop.permute.xlu0 %2931 }
 0x2fc   : > { %14620 = vst [vmem:[#allocation131_spill] sm:$0xff] %v11062_v23  ;;  %v11064_v17 = vpop.permute.xlu1 %2933  ;;  %v11082_v23 = vsel %vm585_vm0, 0.0, %v10701_v45 }
 0x2fd   : > { %14621 = vst [vmem:[#allocation132_spill] sm:$0xff] %v11064_v17  ;;  %2963 = vrot.lane.b32.xlu0 %v11067_v10, %s8270_s17 }
 0x2fe   : > { %2965 = vrot.lane.b32.xlu1 %v11072_v29, %s8270_s17 }
 0x2ff   : > { %v11076_v7 = vpop.permute.xlu0 %3119 }
 0x300   : > { %14622 = vst [vmem:[#allocation133_spill] sm:$0xff] %v11076_v7  ;;  %v11078_v56 = vpop.permute.xlu1 %3121 }
 0x301   : > { %14623 = vst [vmem:[#allocation134_spill] sm:$0xff] %v11078_v56  ;;  %3059 = vrot.lane.b32.xlu0 %v11082_v23, %s8271_s23 }
 0x302   : > { %3141 = vrot.lane.b32.xlu1 %v10913_v35, %s14234_s24 }
 0x303   : > { %v11088_v12 = vpop.permute.xlu0 %3027 }
 0x304   : > { %14624 = vst [vmem:[#allocation135_spill] sm:$0xff] %v11088_v12  ;;  %v11090_v39 = vpop.permute.xlu1 %3029 }
 0x305   : > { %14625 = vst [vmem:[#allocation136_spill] sm:$0xff] %v11090_v39  ;;  %3139 = vrot.lane.b32.xlu0 %v10919_v24, %s14234_s24  ;;  %v11112_v39 = vsel %vm585_vm0, %v10703_v11, 0.0 }
 0x306   : > { %3061 = vrot.lane.b32.xlu1 %v10720_v61, %s8271_s23  ;;  %14630 = vst [vmem:[#allocation141_spill] sm:$0xff] %v11112_v39 }
 0x307   : > { %v11096_v33 = vpop.permute.xlu0 %2841 }
 0x308   : > { %14626 = vst [vmem:[#allocation137_spill] sm:$0xff] %v11096_v33  ;;  %v11098_v45 = vpop.permute.xlu1 %2839 }
 0x309   : > { %14627 = vst [vmem:[#allocation138_spill] sm:$0xff] %v11098_v45  ;;  %3143 = vrot.lane.b32.xlu0 %v10965_v31, %s14234_s24  ;;  %v2798_v45 = vrot.slane %v10720_v61, 1 }
 0x30a   : > { %3145 = vrot.lane.b32.xlu1 %v10959_v50, %s14234_s24 }
 0x30b   : > { %v11104_v17 = vpop.permute.xlu0 %2935 }
 0x30c   : > { %14628 = vst [vmem:[#allocation139_spill] sm:$0xff] %v11104_v17  ;;  %v11106_v12 = vpop.permute.xlu1 %2937  ;;  %v2800_v17 = vrot.slane %v11112_v39, 1 }
 0x30d   : > { %14629 = vst [vmem:[#allocation140_spill] sm:$0xff] %v11106_v12  ;;  %3147 = vrot.lane.b32.xlu0 %v11011_v19, %s14234_s24  ;;  %v2797_v12 = vrot.slane %v11082_v23, 1 }
 0x30e   : > { %3149 = vrot.lane.b32.xlu1 %v11005_v32, %s14234_s24 }
 0x30f   : > { %v11116_v33 = vpop.permute.xlu0 %3123 }
 0x310   : > { %14631 = vst [vmem:[#allocation142_spill] sm:$0xff] %v11116_v33  ;;  %v11119_v56 = vpop.permute.xlu1 %3125  ;;  %v11132_v33 = vsel %vm751_vm1, %v2797_v12, %v2798_v45 }
 0x311   : > { %14632 = vst [vmem:[#allocation143_spill] sm:$0xff] %v11119_v56  ;;  %3151 = vrot.lane.b32.xlu0 %v11057_v58, %s14234_s24  ;;  %v11137_v56 = vsel %vm751_vm1, %v2798_v45, %v2800_v17 }
 0x312   : > { %3153 = vrot.lane.b32.xlu1 %v11051_v34, %s14234_s24 }
 0x313   : > { %v11127_v11 = vpop.permute.xlu0 %3031 }
 0x314   : > { %14633 = vst [vmem:[#allocation144_spill] sm:$0xff] %v11127_v11  ;;  %v11129_v7 = vpop.permute.xlu1 %3033  ;;  %v14733_v11 = vld [vmem:[#allocation101_spill] sm:$0xff] }
 0x315   : > { %14634 = vst [vmem:[#allocation145_spill] sm:$0xff] %v11129_v7  ;;  %3155 = vrot.lane.b32.xlu0 %v11132_v33, %s14234_s24 }
 0x316   : > { %3157 = vrot.lane.b32.xlu1 %v11137_v56, %s14234_s24 }
 0x317   : > { %v11141_v39 = vpop.permute.xlu0 %2845 }
 0x318   : > { %14635 = vst [vmem:[#allocation146_spill] sm:$0xff] %v11141_v39  ;;  %v11143_v61 = vpop.permute.xlu1 %2843 }
 0x319   : > { %14636 = vst [vmem:[#allocation147_spill] sm:$0xff] %v11143_v61  ;;  %3191 = vrot.lane.b32.xlu0 %v10255_v16, %s8272_s26 }
 0x31a   : > { %3193 = vrot.lane.b32.xlu1 %v10260_v62, %s8272_s26 }
 0x31b   : > { %v11149_v12 = vpop.permute.xlu0 %2939 }
 0x31c   : > { %14637 = vst [vmem:[#allocation148_spill] sm:$0xff] %v11149_v12  ;;  %v11151_v7 = vpop.permute.xlu1 %2941 }
 0x31d   : > { %14638 = vst [vmem:[#allocation149_spill] sm:$0xff] %v11151_v7  ;;  %3195 = vrot.lane.b32.xlu0 %v10304_v41, %s8272_s26 }
 0x31e   : > { %3197 = vrot.lane.b32.xlu1 %v10309_v48, %s8272_s26 }
 0x31f   : > { %v11157_v17 = vpop.permute.xlu0 %3127 }
 0x320   : > { %14639 = vst [vmem:[#allocation150_spill] sm:$0xff] %v11157_v17  ;;  %v11159_v45 = vpop.permute.xlu1 %3129  ;;  %v4202_v17 = vld [vmem:[%s14018_s7 + $0x8] sm:$0xff] }
 0x321   : > { %14640 = vst [vmem:[#allocation151_spill] sm:$0xff] %v11159_v45  ;;  %3199 = vrot.lane.b32.xlu0 %v10359_v26, %s8272_s26  ;;  %v3832_v45 = vld [vmem:[%s14016_s5 + $0x8] sm:$0xff] }
 0x322   : > { %3201 = vrot.lane.b32.xlu1 %v10364_v46, %s8272_s26 }
 0x323   : > { %v11165_v16 = vpop.permute.xlu0 %3035 }
 0x324   : > { %14641 = vst [vmem:[#allocation152_spill] sm:$0xff] %v11165_v16  ;;  %v11167_v62 = vpop.permute.xlu1 %3037 }
 0x325   : > { %14642 = vst [vmem:[#allocation153_spill] sm:$0xff] %v11167_v62  ;;  %3203 = vrot.lane.b32.xlu0 %v10416_v44, %s8272_s26 }
 0x326   : > { %3205 = vrot.lane.b32.xlu1 %v10421_v51, %s8272_s26 }
 0x327   : > { %v11173_v7 = vpop.permute.xlu0 %2849 }
 0x328   : > { %14643 = vst [vmem:[#allocation154_spill] sm:$0xff] %v11173_v7  ;;  %v11175_v39 = vpop.permute.xlu1 %2847 }
 0x329   : > { %14644 = vst [vmem:[#allocation155_spill] sm:$0xff] %v11175_v39  ;;  %3207 = vrot.lane.b32.xlu0 %v10484_v20, %s8272_s26 }
 0x32a   : > { %3209 = vrot.lane.b32.xlu1 %v10489_v0, %s8272_s26 }
 0x32b   : > { %v11181_v12 = vpop.permute.xlu0 %2943 }
 0x32c   : > { %14645 = vst [vmem:[#allocation156_spill] sm:$0xff] %v11181_v12  ;;  %v11183_v16 = vpop.permute.xlu1 %2945 }
 0x32d   : > { %14646 = vst [vmem:[#allocation157_spill] sm:$0xff] %v11183_v16  ;;  %3211 = vrot.lane.b32.xlu0 %v10557_v42, %s8272_s26 }
 0x32e   : > { %3213 = vrot.lane.b32.xlu1 %v10562_v47, %s8272_s26 }
 0x32f   : > { %v11189_v62 = vpop.permute.xlu0 %3131 }
 0x330   : > { %14647 = vst [vmem:[#allocation158_spill] sm:$0xff] %v11189_v62  ;;  %v11191_v7 = vpop.permute.xlu1 %3133 }
 0x331   : > { %14648 = vst [vmem:[#allocation159_spill] sm:$0xff] %v11191_v7  ;;  %3215 = vrot.lane.b32.xlu0 %v10630_v28, %s8272_s26 }
 0x332   : > { %3217 = vrot.lane.b32.xlu1 %v10635_v3, %s8272_s26 }
 0x333   : > { %v11197_v39 = vpop.permute.xlu0 %3039 }
 0x334   : > { %14649 = vst [vmem:[#allocation160_spill] sm:$0xff] %v11197_v39  ;;  %v11199_v12 = vpop.permute.xlu1 %3041 }
 0x335   : > { %14650 = vst [vmem:[#allocation161_spill] sm:$0xff] %v11199_v12  ;;  %3219 = vrot.lane.b32.xlu0 %v10708_v49, %s8272_s26 }
 0x336   : > { %3221 = vrot.lane.b32.xlu1 %v10713_v2, %s8272_s26 }
 0x337   : > { %v11205_v16 = vpop.permute.xlu0 %2853 }
 0x338   : > { %14651 = vst [vmem:[#allocation162_spill] sm:$0xff] %v11205_v16  ;;  %v11207_v62 = vpop.permute.xlu1 %2851 }
 0x339   : > { %14652 = vst [vmem:[#allocation163_spill] sm:$0xff] %v11207_v62  ;;  %3223 = vrot.lane.b32.xlu0 %v10767_v55, %s8272_s26 }
 0x33a   : > { %3225 = vrot.lane.b32.xlu1 %v10772_v14, %s8272_s26 }
 0x33b   : > { %v11213_v7 = vpop.permute.xlu0 %2947 }
 0x33c   : > { %14653 = vst [vmem:[#allocation164_spill] sm:$0xff] %v11213_v7  ;;  %v11215_v39 = vpop.permute.xlu1 %2949 }
 0x33d   : > { %14654 = vst [vmem:[#allocation165_spill] sm:$0xff] %v11215_v39  ;;  %3227 = vrot.lane.b32.xlu0 %v10821_v22, %s8272_s26  ;;  %v4205_v39 = vld [vmem:[%s14018_s7 + $0x20] sm:$0xf] }
 0x33e   : > { %3229 = vrot.lane.b32.xlu1 %v10826_v21, %s8272_s26  ;;  %7479 = vmatprep.subr.msk.mxu1 %vm3940_vm10, %v4205_v39 }
 0x33f   : > { %v11221_v12 = vpop.permute.xlu0 %3135  ;;  %7480 = vmatpush3.msk.msra.mxu1 %vm3940_vm10, %v4205_v39  ;;  %v4204_v39 = vld [vmem:[%s14018_s7 + $0x18] sm:$0xff] }
 0x340   : > { %14655 = vst [vmem:[#allocation166_spill] sm:$0xff] %v11221_v12  ;;  %v11223_v16 = vpop.permute.xlu1 %3137  ;;  %v3834_v12 = vld [vmem:[%s14016_s5 + $0x18] sm:$0xff]  ;;  %7481 = vmatprep.subr.mxu1 %v4204_v39 }
 0x341   : > { %14656 = vst [vmem:[#allocation167_spill] sm:$0xff] %v11223_v16  ;;  %3231 = vrot.lane.b32.xlu0 %v10875_v18, %s8272_s26  ;;  %7482 = vmatpush3.msra.mxu1 %v4204_v39  ;;  %v3831_v39 = vld [vmem:[%s14016_s5] sm:$0xff] }
 0x342   : > { %3233 = vrot.lane.b32.xlu1 %v10880_v4, %s8272_s26 }
 0x343   : > { %v11229_v62 = vpop.permute.xlu0 %3043 }
 0x344   : > { %14657 = vst [vmem:[#allocation168_spill] sm:$0xff] %v11229_v62  ;;  %v11231_v7 = vpop.permute.xlu1 %3045  ;;  %v3835_v62 = vld [vmem:[%s14016_s5 + $0x20] sm:$0xf] }
 0x345   : > { %14658 = vst [vmem:[#allocation169_spill] sm:$0xff] %v11231_v7  ;;  %3235 = vrot.lane.b32.xlu0 %v10929_v43, %s8272_s26  ;;  %7421 = vmatprep.subr.msk.mxu0 %vm3940_vm10, %v3835_v62 }
 0x346   : > { %3237 = vrot.lane.b32.xlu1 %v10936_v30, %s8272_s26  ;;  %7422 = vmatpush3.msk.msra.mxu0 %vm3940_vm10, %v3835_v62  ;;  %v4203_v62 = vld [vmem:[%s14018_s7 + $0x10] sm:$0xff] }
 0x347   : > { %v11245_v7 = vpop.permute.xlu0 %2857  ;;  %7423 = vmatprep.subr.mxu0 %v3834_v12  ;;  %7483 = vmatprep.subr.mxu1 %v4203_v62 }
 0x348   : > { %14659 = vst [vmem:[#allocation170_spill] sm:$0xff] %v11245_v7  ;;  %v11248_v16 = vpop.permute.xlu1 %2855  ;;  %v3833_v7 = vld [vmem:[%s14016_s5 + $0x10] sm:$0xff]  ;;  %7424 = vmatpush3.msra.mxu0 %v3834_v12  ;;  %7484 = vmatpush3.msra.mxu1 %v4203_v62 }
 0x349   : > { %14660 = vst [vmem:[#allocation171_spill] sm:$0xff] %v11248_v16  ;;  %3239 = vrot.lane.b32.xlu0 %v10975_v8, %s8272_s26  ;;  %7425 = vmatprep.subr.mxu0 %v3833_v7 }
 0x34a   : > { %3241 = vrot.lane.b32.xlu1 %v10982_v27, %s8272_s26  ;;  %7426 = vmatpush3.msra.mxu0 %v3833_v7 }
 0x34b   : > { %v11267_v16 = vpop.permute.xlu0 %2951  ;;  %7427 = vmatprep.subr.mxu0 %v3832_v45  ;;  %7485 = vmatprep.subr.mxu1 %v4202_v17 }
 0x34c   : > { %14661 = vst [vmem:[#allocation172_spill] sm:$0xff] %v11267_v16  ;;  %v11269_v61 = vpop.permute.xlu1 %2953  ;;  %7428 = vmatpush3.msra.mxu0 %v3832_v45  ;;  %v4201_v16 = vld [vmem:[%s14018_s7] sm:$0xff]  ;;  %7486 = vmatpush3.msra.mxu1 %v4202_v17 }
 0x34d   : > { %14662 = vst [vmem:[#allocation173_spill] sm:$0xff] %v11269_v61  ;;  %3243 = vrot.lane.b32.xlu0 %v11021_v37, %s8272_s26  ;;  %7429 = vmatprep.subr.mxu0 %v3831_v39 }
 0x34e   : > { %3245 = vrot.lane.b32.xlu1 %v11028_v59, %s8272_s26  ;;  %7487 = vmatprep.subr.mxu1 %v4201_v16 }
 0x34f   : > { %v11281_v12 = vpop.permute.xlu0 %3047  ;;  %7430 = vmatpush3.msra.mxu0 %v3831_v39  ;;  %7488 = vmatpush3.msra.mxu1 %v4201_v16 }
 0x350   : > { %14663 = vst [vmem:[#allocation174_spill] sm:$0xff] %v11281_v12  ;;  %v11286_v61 = vpop.permute.xlu1 %3049 }
 0x351   : > { %14664 = vst [vmem:[#allocation175_spill] sm:$0xff] %v11286_v61  ;;  %3247 = vrot.lane.b32.xlu0 %v11067_v10, %s8272_s26 }
 0x352   : > { %3287 = vrot.lane.b32.xlu1 %v10275_v54, %s8273_s16 }
 0x353   : > { %v11295_v7 = vpop.permute.xlu0 %2861 }
 0x354   : > { %14665 = vst [vmem:[#allocation176_spill] sm:$0xff] %v11295_v7  ;;  %v11297_v62 = vpop.permute.xlu1 %2859 }
 0x355   : > { %14666 = vst [vmem:[#allocation177_spill] sm:$0xff] %v11297_v62  ;;  %3289 = vrot.lane.b32.xlu0 %v10269_v9, %s8273_s16 }
 0x356   : > { %3383 = vrot.lane.b32.xlu1 %v10294_v63, %s8274_s21 }
 0x357   : > { %v11303_v17 = vpop.permute.xlu0 %2955 }
 0x358   : > { %14667 = vst [vmem:[#allocation178_spill] sm:$0xff] %v11303_v17  ;;  %v11305_v45 = vpop.permute.xlu1 %2957  ;;  %v14706_v17 = vld [vmem:[#allocation74_spill] sm:$0xff] }
 0x359   : > { %14668 = vst [vmem:[#allocation179_spill] sm:$0xff] %v11305_v45  ;;  %3385 = vrot.lane.b32.xlu0 %v10288_v60, %s8274_s21  ;;  %v14698_v45 = vld [vmem:[#allocation48_spill] sm:$0xff] }
 0x35a   : > { %3479 = vrot.lane.b32.xlu1 %v10304_v41, %s8263_s25 }
 0x35b   : > { %v11311_v39 = vpop.permute.xlu0 %3051 }
 0x35c   : > { %14669 = vst [vmem:[#allocation180_spill] sm:$0xff] %v11311_v39  ;;  %v11313_v16 = vpop.permute.xlu1 %3053 }
 0x35d   : > { %14670 = vst [vmem:[#allocation181_spill] sm:$0xff] %v11313_v16  ;;  %3481 = vrot.lane.b32.xlu0 %v10309_v48, %s8263_s25 }
 0x35e   : > { %3291 = vrot.lane.b32.xlu1 %v10328_v15, %s8273_s16 }
 0x35f   : > { %v11319_v63 = vpop.permute.xlu0 %2865 }
 0x360   : > { %14671 = vst [vmem:[#allocation182_spill] sm:$0xff] %v11319_v63  ;;  %v11321_v7 = vpop.permute.xlu1 %2863 }
 0x361   : > { %14672 = vst [vmem:[#allocation183_spill] sm:$0xff] %v11321_v7  ;;  %3293 = vrot.lane.b32.xlu0 %v10319_v6, %s8273_s16 }
 0x362   : > { %3387 = vrot.lane.b32.xlu1 %v10349_v57, %s8274_s21 }
 0x363   : > { %v11327_v60 = vpop.permute.xlu0 %2959 }
 0x364   : > { %14673 = vst [vmem:[#allocation184_spill] sm:$0xff] %v11327_v60  ;;  %v11329_v41 = vpop.permute.xlu1 %2961 }
 0x365   : > { %14674 = vst [vmem:[#allocation185_spill] sm:$0xff] %v11329_v41  ;;  %3389 = vrot.lane.b32.xlu0 %v10343_v5, %s8274_s21  ;;  %v14679_v5 = vld [vmem:[#allocation45_spill] sm:$0xff] }
 0x366   : > { %3483 = vrot.lane.b32.xlu1 %v10359_v26, %s8263_s25 }
 0x367   : > { %v11335_v48 = vpop.permute.xlu0 %3055 }
 0x368   : > { %14675 = vst [vmem:[#allocation186_spill] sm:$0xff] %v11335_v48  ;;  %v11337_v63 = vpop.permute.xlu1 %3057  ;;  %v14692_v48 = vld [vmem:[#allocation35_spill] sm:$0xff] }
 0x369   : > { %14676 = vst [vmem:[#allocation187_spill] sm:$0xff] %v11337_v63  ;;  %3485 = vrot.lane.b32.xlu0 %v10364_v46, %s8263_s25  ;;  %v14682_v63 = vld [vmem:[#allocation66_spill] sm:$0xff] }
 0x36a   : > { %3295 = vrot.lane.b32.xlu1 %v10385_v53, %s8273_s16 }
 0x36b   : > { %v11343_v57 = vpop.permute.xlu0 %2869 }
 0x36c   : > { %14677 = vst [vmem:[#allocation188_spill] sm:$0xff] %v11343_v57  ;;  %v11345_v60 = vpop.permute.xlu1 %2867 }
 0x36d   : > { %14678 = vst [vmem:[#allocation189_spill] sm:$0xff] %v11345_v60  ;;  %3297 = vrot.lane.b32.xlu0 %v10376_v36, %s8273_s16  ;;  %v14685_v60 = vld [vmem:[#allocation71_spill] sm:$0xff] }
 0x36e   : > { %3391 = vrot.lane.b32.xlu1 %v14679_v5, %s8274_s21 }
 0x36f   : > { %v11351_v26 = vpop.permute.xlu0 %2963 }
 0x370   : > { %14680 = vst [vmem:[#allocation45_spill] sm:$0xff] %v11351_v26  ;;  %v11353_v41 = vpop.permute.xlu1 %2965 }
 0x371   : > { %14681 = vst [vmem:[#allocation190_spill] sm:$0xff] %v11353_v41  ;;  %3393 = vrot.lane.b32.xlu0 %v14682_v63, %s8274_s21  ;;  %v14688_v41 = vld [vmem:[#allocation67_spill] sm:$0xff] }
 0x372   : > { %3487 = vrot.lane.b32.xlu1 %v10416_v44, %s8263_s25  ;;  %v14689_v63 = vld [vmem:[#allocation47_spill] sm:$0xff] }
 0x373   : > { %v11359_v46 = vpop.permute.xlu0 %3059 }
 0x374   : > { %14683 = vst [vmem:[#allocation66_spill] sm:$0xff] %v11359_v46  ;;  %v11361_v57 = vpop.permute.xlu1 %3141 }
 0x375   : > { %14684 = vst [vmem:[#allocation191_spill] sm:$0xff] %v11361_v57  ;;  %3489 = vrot.lane.b32.xlu0 %v10421_v51, %s8263_s25  ;;  %v14709_v57 = vld [vmem:[#allocation32_spill] sm:$0xff] }
 0x376   : > { %3299 = vrot.lane.b32.xlu1 %v14685_v60, %s8273_s16 }
 0x377   : > { %v11367_v5 = vpop.permute.xlu0 %3139 }
 0x378   : > { %14686 = vst [vmem:[#allocation71_spill] sm:$0xff] %v11367_v5  ;;  %v11369_v26 = vpop.permute.xlu1 %3061 }
 0x379   : > { %14687 = vst [vmem:[#allocation192_spill] sm:$0xff] %v11369_v26  ;;  %3301 = vrot.lane.b32.xlu0 %v14688_v41, %s8273_s16  ;;  %v14695_v26 = vld [vmem:[#allocation72_spill] sm:$0xff] }
 0x37a   : > { %3395 = vrot.lane.b32.xlu1 %v14689_v63, %s8274_s21 }
 0x37b   : > { %v11375_v44 = vpop.permute.xlu0 %3143 }
 0x37c   : > { %14690 = vst [vmem:[#allocation67_spill] sm:$0xff] %v11375_v44  ;;  %v11377_v46 = vpop.permute.xlu1 %3145  ;;  %v14707_v44 = vld [vmem:[#allocation34_spill] sm:$0xff] }
 0x37d   : > { %14691 = vst [vmem:[#allocation47_spill] sm:$0xff] %v11377_v46  ;;  %3397 = vrot.lane.b32.xlu0 %v14692_v48, %s8274_s21  ;;  %v14699_v48 = vld [vmem:[#allocation49_spill] sm:$0xff] }
 0x37e   : > { %3491 = vrot.lane.b32.xlu1 %v10484_v20, %s8263_s25 }
 0x37f   : > { %v11383_v51 = vpop.permute.xlu0 %3147 }
 0x380   : > { %14693 = vst [vmem:[#allocation35_spill] sm:$0xff] %v11383_v51  ;;  %v11385_v7 = vpop.permute.xlu1 %3149 }
 0x381   : > { %14694 = vst [vmem:[#allocation193_spill] sm:$0xff] %v11385_v7  ;;  %3493 = vrot.lane.b32.xlu0 %v10489_v0, %s8263_s25  ;;  %v14702_v7 = vld [vmem:[#allocation36_spill] sm:$0xff] }
 0x382   : > { %3303 = vrot.lane.b32.xlu1 %v14695_v26, %s8273_s16 }
 0x383   : > { %v11391_v63 = vpop.permute.xlu0 %3151 }
 0x384   : > { %14696 = vst [vmem:[#allocation72_spill] sm:$0xff] %v11391_v63  ;;  %v11393_v16 = vpop.permute.xlu1 %3153 }
 0x385   : > { %14697 = vst [vmem:[#allocation194_spill] sm:$0xff] %v11393_v16  ;;  %3305 = vrot.lane.b32.xlu0 %v14698_v45, %s8273_s16  ;;  %v14703_v16 = vld [vmem:[#allocation73_spill] sm:$0xff] }
 0x386   : > { %3399 = vrot.lane.b32.xlu1 %v14699_v48, %s8274_s21 }
 0x387   : > { %v11399_v20 = vpop.permute.xlu0 %3155 }
 0x388   : > { %14700 = vst [vmem:[#allocation48_spill] sm:$0xff] %v11399_v20  ;;  %v11401_v51 = vpop.permute.xlu1 %3157 }
 0x389   : > { %14701 = vst [vmem:[#allocation49_spill] sm:$0xff] %v11401_v51  ;;  %3401 = vrot.lane.b32.xlu0 %v14702_v7, %s8274_s21  ;;  %v14704_v51 = vld [vmem:[#allocation50_spill] sm:$0xff]  ;;  %v14705_v7 = vld [vmem:[#allocation51_spill] sm:$0xff] }
 0x38a   : > { %3495 = vrot.lane.b32.xlu1 %v10557_v42, %s8263_s25 }
 0x38b   : > { %v11407_v0 = vpop.permute.xlu0 %3191 }
 0x38c   : > { %v11409_v63 = vpop.permute.xlu1 %3193 }
 0x38d   : > { %3497 = vrot.lane.b32.xlu0 %v10562_v47, %s8263_s25 }
 0x38e   : > { %3307 = vrot.lane.b32.xlu1 %v14703_v16, %s8273_s16 }
 0x38f   : > { %v11415_v48 = vpop.permute.xlu0 %3195 }
 0x390   : > { %v11417_v20 = vpop.permute.xlu1 %3197 }
 0x391   : > { %3309 = vrot.lane.b32.xlu0 %v14704_v51, %s8273_s16 }
 0x392   : > { %3403 = vrot.lane.b32.xlu1 %v14705_v7, %s8274_s21 }
 0x393   : > { %v11423_v42 = vpop.permute.xlu0 %3199 }
 0x394   : > { %v11425_v39 = vpop.permute.xlu1 %3201 }
 0x395   : > { %3405 = vrot.lane.b32.xlu0 %v14706_v17, %s8274_s21 }
 0x396   : > { %3499 = vrot.lane.b32.xlu1 %v10630_v28, %s8263_s25 }
 0x397   : > { %v11431_v47 = vpop.permute.xlu0 %3203 }
 0x398   : > { %v11433_v62 = vpop.permute.xlu1 %3205 }
 0x399   : > { %3501 = vrot.lane.b32.xlu0 %v10635_v3, %s8263_s25 }
 0x39a   : > { %3311 = vrot.lane.b32.xlu1 %v10660_v25, %s8273_s16 }
 0x39b   : > { %v11439_v7 = vpop.permute.xlu0 %3207 }
 0x39c   : > { %v11441_v46 = vpop.permute.xlu1 %3209 }
 0x39d   : > { %3313 = vrot.lane.b32.xlu0 %v10653_v52, %s8273_s16  ;;  %v14713_v52 = vld [vmem:[#allocation78_spill] sm:$0xff] }
 0x39e   : > { %3407 = vrot.lane.b32.xlu1 %v10694_v40, %s8274_s21 }
 0x39f   : > { %v11447_v28 = vpop.permute.xlu0 %3211 }
 0x3a0   : > { %v11449_v17 = vpop.permute.xlu1 %3213 }
 0x3a1   : > { %3409 = vrot.lane.b32.xlu0 %v10688_v1, %s8274_s21  ;;  %v14710_v1 = vld [vmem:[#allocation79_spill] sm:$0xff] }
 0x3a2   : > { %3503 = vrot.lane.b32.xlu1 %v10708_v49, %s8263_s25 }
 0x3a3   : > { %v11455_v3 = vpop.permute.xlu0 %3215 }
 0x3a4   : > { %v11457_v61 = vpop.permute.xlu1 %3217 }
 0x3a5   : > { %3505 = vrot.lane.b32.xlu0 %v10713_v2, %s8263_s25 }
 0x3a6   : > { %3315 = vrot.lane.b32.xlu1 %v14707_v44, %s8273_s16 }
 0x3a7   : > { %v11463_v40 = vpop.permute.xlu0 %3219 }
 0x3a8   : > { %v11465_v12 = vpop.permute.xlu1 %3221 }
 0x3a9   : > { %14708 = vst [vmem:[#allocation36_spill] sm:$0xff] %v11465_v12  ;;  %3317 = vrot.lane.b32.xlu0 %v14709_v57, %s8273_s16  ;;  %v14716_v57 = vld [vmem:[#allocation85_spill] sm:$0xff] }
 0x3aa   : > { %3411 = vrot.lane.b32.xlu1 %v14710_v1, %s8274_s21 }
 0x3ab   : > { %v11471_v49 = vpop.permute.xlu0 %3223 }
 0x3ac   : > { %14711 = vst [vmem:[#allocation73_spill] sm:$0xff] %v11471_v49  ;;  %v11473_v5 = vpop.permute.xlu1 %3225 }
 0x3ad   : > { %14712 = vst [vmem:[#allocation50_spill] sm:$0xff] %v11473_v5  ;;  %3413 = vrot.lane.b32.xlu0 %v14713_v52, %s8274_s21  ;;  %v14719_v5 = vld [vmem:[#allocation16_spill] sm:$0xff]  ;;  %v14720_v52 = vld [vmem:[#allocation90_spill] sm:$0xff] }
 0x3ae   : > { %3507 = vrot.lane.b32.xlu1 %v10767_v55, %s8263_s25 }
 0x3af   : > { %v11479_v2 = vpop.permute.xlu0 %3227 }
 0x3b0   : > { %14714 = vst [vmem:[#allocation51_spill] sm:$0xff] %v11479_v2  ;;  %v11481_v44 = vpop.permute.xlu1 %3229 }
 0x3b1   : > { %14715 = vst [vmem:[#allocation74_spill] sm:$0xff] %v11481_v44  ;;  %3509 = vrot.lane.b32.xlu0 %v10772_v14, %s8263_s25  ;;  %v14723_v44 = vld [vmem:[#allocation89_spill] sm:$0xff] }
 0x3b2   : > { %3319 = vrot.lane.b32.xlu1 %v14716_v57, %s8273_s16 }
 0x3b3   : > { %v11487_v1 = vpop.permute.xlu0 %3231 }
 0x3b4   : > { %14717 = vst [vmem:[#allocation79_spill] sm:$0xff] %v11487_v1  ;;  %v11489_v49 = vpop.permute.xlu1 %3233 }
 0x3b5   : > { %14718 = vst [vmem:[#allocation78_spill] sm:$0xff] %v11489_v49  ;;  %3321 = vrot.lane.b32.xlu0 %v14719_v5, %s8273_s16  ;;  %v14726_v49 = vld [vmem:[#allocation53_spill] sm:$0xff] }
 0x3b6   : > { %3415 = vrot.lane.b32.xlu1 %v14720_v52, %s8274_s21  ;;  %v8233_v5 = vunpack.i.l.bf16 %v14726_v49  ;;  %v14727_v52 = vld [vmem:[#allocation96_spill] sm:$0xff] }
 0x3b7   : > { %v11495_v55 = vpop.permute.xlu0 %3235 }
 0x3b8   : > { %14721 = vst [vmem:[#allocation90_spill] sm:$0xff] %v11495_v55  ;;  %v11497_v2 = vpop.permute.xlu1 %3237 }
 0x3b9   : > { %14722 = vst [vmem:[#allocation195_spill] sm:$0xff] %v11497_v2  ;;  %3417 = vrot.lane.b32.xlu0 %v14723_v44, %s8274_s21  ;;  %v8234_v44 = vunpack.i.h.bf16 %v14726_v49  ;;  %v14736_v49 = vld [vmem:[#allocation2_spill] sm:$0xff] }
 0x3ba   : > { %3511 = vrot.lane.b32.xlu1 %v10821_v22, %s8263_s25  ;;  %v14730_v22 = vld [vmem:[#allocation38_spill] sm:$0xff] }
 0x3bb   : > { %v11503_v14 = vpop.permute.xlu0 %3239  ;;  %v8238_v57 = vunpack.i.l.bf16 %v14730_v22  ;;  %v3571_v12 = vsel %vm3569_vm11, %v14736_v49, %v8234_v44  ;;  %v14741_v49 = vld [vmem:[#allocation59_spill] sm:$0xff] }
 0x3bc   : > { %14724 = vst [vmem:[#allocation89_spill] sm:$0xff] %v11503_v14  ;;  %v11505_v1 = vpop.permute.xlu1 %3241  ;;  %v14731_v14 = vld [vmem:[#allocation33_spill] sm:$0xff] }
 0x3bd   : > { %14725 = vst [vmem:[#allocation196_spill] sm:$0xff] %v11505_v1  ;;  %3513 = vrot.lane.b32.xlu0 %v10826_v21, %s8263_s25  ;;  %v14732_v1 = vld [vmem:[#allocation3_spill] sm:$0xff] }
 0x3be   : > { %3323 = vrot.lane.b32.xlu1 %v14727_v52, %s8273_s16  ;;  %v3570_v21 = vsel %vm3569_vm11, %v14732_v1, %v8233_v5  ;;  %v14738_v5 = vld [vmem:[#allocation58_spill] sm:$0xff] }
 0x3bf   : > { %v11512_v2 = vpop.permute.xlu0 %3243 }
 0x3c0   : > { %14728 = vst [vmem:[#allocation53_spill] sm:$0xff] %v11512_v2  ;;  %v11514_v55 = vpop.permute.xlu1 %3245  ;;  %v8239_v2 = vunpack.i.h.bf16 %v14730_v22 }
 0x3c1   : > { %14729 = vst [vmem:[#allocation197_spill] sm:$0xff] %v11514_v55  ;;  %3325 = vrot.lane.b32.xlu0 %v14731_v14, %s8273_s16  ;;  %v11528_v55 = vsel %vm3602_vm12, %v3570_v21, %v8238_v57  ;;  %v14737_v14 = vld [vmem:[#allocation100_spill] sm:$0xff]  ;;  %v14739_v21 = vld [vmem:[#allocation65_spill] sm:$0xff] }
 0x3c2   : > { %3419 = vrot.lane.b32.xlu1 %v14733_v11, %s8274_s21  ;;  %14735 = vst [vmem:[#allocation3_spill] sm:$0xff] %v11528_v55  ;;  %v3636_v1 = vsel %vm3635_vm13, %v11528_v55, %v14738_v5  ;;  %v11540_v22 = vsel %vm3602_vm12, %v3571_v12, %v8239_v2  ;;  %v14742_v55 = vld [vmem:[#allocation37_spill] sm:$0xff] }
 0x3c3   : > { %v11524_v52 = vpop.permute.xlu0 %3247  ;;  %v3668_v44 = vsel %vm1597_vm3, %v3636_v1, %v14739_v21  ;;  %v3637_v12 = vsel %vm3635_vm13, %v11540_v22, %v14741_v49 }
 0x3c4   : > { %14734 = vst [vmem:[#allocation38_spill] sm:$0xff] %v11524_v52  ;;  %v3288_v25 = vpop.permute.xlu1 %3287  ;;  %v3669_v1 = vsel %vm1597_vm3, %v3637_v12, %v14742_v55  ;;  %v14743_v52 = vld [vmem:[#allocation19_spill] sm:$0xff] }
 0x3c5   : > { %3421 = vrot.lane.b32.xlu0 %v14737_v14, %s8274_s21  ;;  %v14740_v14 = vld [vmem:[#allocation107_spill] sm:$0xff] }
 0x3c6   : > { %3515 = vrot.lane.b32.xlu1 %v10875_v18, %s8263_s25  ;;  %v3701_v18 = vsel %vm3700_vm14, %v3668_v44, %v11407_v0  ;;  %v3702_v0 = vsel %vm3700_vm14, %v3669_v1, %v11409_v63  ;;  %v14747_v1 = vld [vmem:[#allocation4_spill] sm:$0xff] }
 0x3c7   : > { %v3290_v11 = vpop.permute.xlu0 %3289  ;;  %v3734_v2 = vsel %vm3733_vm15, %v3701_v18, %v3288_v25  ;;  %v14744_v18 = vld [vmem:[#allocation61_spill] sm:$0xff] }
 0x3c8   : > { %v3384_v57 = vpop.permute.xlu1 %3383  ;;  %v3735_v49 = vsel %vm3733_vm15, %v3702_v0, %v3290_v11  ;;  %v14745_v11 = vld [vmem:[#allocation25_spill] sm:$0xff]  ;;  %v14749_v0 = vld [vmem:[#allocation10_spill] sm:$0xff] }
 0x3c9   : > { %3517 = vrot.lane.b32.xlu0 %v10880_v4, %s8263_s25  ;;  %v3767_v21 = vsel %vm3766_vm5, %v3734_v2, %v3384_v57  ;;  %v3572_v12 = vsel %vm3569_vm11, %v14745_v11, %v14744_v18  ;;  %v14752_v18 = vld [vmem:[#allocation114_spill] sm:$0xff] }
 0x3ca   : > { %3327 = vrot.lane.b32.xlu1 %v14740_v14, %s8273_s16  ;;  %v14753_v11 = vld [vmem:[#allocation6_spill] sm:$0xff] }
 0x3cb   : > { %v3386_v5 = vpop.permute.xlu0 %3385 }
 0x3cc   : > { %v3480_v4 = vpop.permute.xlu1 %3479  ;;  %v3768_v25 = vsel %vm3766_vm5, %v3735_v49, %v3386_v5  ;;  %v14750_v49 = vld [vmem:[#allocation84_spill] sm:$0xff] }
 0x3cd   : > { %v3799_v44 = vsel %vm1630_vm4, %v3767_v21, %v3480_v4  ;;  %3329 = vrot.lane.b32.xlu0 %v14743_v52, %s8273_s16 }
 0x3ce   : > { %3423 = vrot.lane.b32.xlu1 %v10919_v24, %s8274_s21  ;;  %7431 = vmatprep.mubr.msk.f32.mxu0 %vm3843_vm6, %v3799_v44  ;;  %v14746_v24 = vld [vmem:[#allocation63_spill] sm:$0xff] }
 0x3cf   : > { %7489 = vmatprep.mubr.msk.f32.mxu1 %vm3843_vm6, %v3799_v44  ;;  %v3482_v55 = vpop.permute.xlu0 %3481  ;;  %v3605_v2 = vsel %vm3602_vm12, %v3572_v12, %v14746_v24 }
 0x3d0   : > { %v3800_v57 = vsel %vm1630_vm4, %v3768_v25, %v3482_v55  ;;  %v3292_v63 = vpop.permute.xlu1 %3291  ;;  %v3638_v21 = vsel %vm3635_vm13, %v3605_v2, %v14747_v1  ;;  %v14751_v55 = vld [vmem:[#allocation64_spill] sm:$0xff]  ;;  %v14754_v1 = vld [vmem:[#allocation86_spill] sm:$0xff] }
 0x3d1   : > { %3425 = vrot.lane.b32.xlu0 %v10913_v35, %s8274_s21  ;;  %7432 = vmatmul.mubr.msk.f32.vlgmr.msra.gmra.mxu0 %vm3843_vm6, %v3800_v57  ;;  %v14748_v35 = vld [vmem:[#allocation60_spill] sm:$0xff]  ;;  %v3670_v25 = vsel %vm1597_vm3, %v3638_v21, %v14750_v49 }
 0x3d2   : > { %7490 = vmatmul.mubr.msk.f32.vlgmr.msra.gmra.mxu1 %vm3843_vm6, %v3800_v57  ;;  %3519 = vrot.lane.b32.xlu1 %v10929_v43, %s8263_s25  ;;  %v3573_v44 = vsel %vm3569_vm11, %v14749_v0, %v14748_v35  ;;  %v3703_v57 = vsel %vm3700_vm14, %v3670_v25, %v11415_v48 }
 0x3d3   : > { %v3294_v5 = vpop.permute.xlu0 %3293  ;;  %v3606_v43 = vsel %vm3602_vm12, %v3573_v44, %v14751_v55  ;;  %v3736_v24 = vsel %vm3733_vm15, %v3703_v57, %v3292_v63  ;;  %v14755_v44 = vld [vmem:[#allocation29_spill] sm:$0xff] }
 0x3d4   : > { %v3388_v4 = vpop.permute.xlu1 %3387  ;;  %v3639_v12 = vsel %vm3635_vm13, %v3606_v43, %v14753_v11  ;;  %v14756_v55 = vld [vmem:[#allocation81_spill] sm:$0xff]  ;;  %v14758_v11 = vld [vmem:[#allocation87_spill] sm:$0xff] }
 0x3d5   : > { %3521 = vrot.lane.b32.xlu0 %v10936_v30, %s8263_s25  ;;  %v3671_v21 = vsel %vm1597_vm3, %v3639_v12, %v14754_v1  ;;  %v3769_v30 = vsel %vm3766_vm5, %v3736_v24, %v3388_v4  ;;  %v14760_v1 = vld [vmem:[#allocation95_spill] sm:$0xff] }
 0x3d6   : > { %3331 = vrot.lane.b32.xlu1 %v14752_v18, %s8273_s16  ;;  %v3704_v0 = vsel %vm3700_vm14, %v3671_v21, %v11417_v20  ;;  %v14761_v21 = vld [vmem:[#allocation83_spill] sm:$0xff] }
 0x3d7   : > { %v3390_v2 = vpop.permute.xlu0 %3389  ;;  %v3737_v49 = vsel %vm3733_vm15, %v3704_v0, %v3294_v5  ;;  %v3574_v5 = vsel %vm3569_vm11, %v10275_v54, %v14756_v55  ;;  %v14763_v0 = vld [vmem:[#allocation88_spill] sm:$0xff] }
 0x3d8   : > { %v3484_v35 = vpop.permute.xlu1 %3483  ;;  %v3770_v63 = vsel %vm3766_vm5, %v3737_v49, %v3390_v2 }
 0x3d9   : > { %v3801_v48 = vsel %vm1630_vm4, %v3769_v30, %v3484_v35  ;;  %3333 = vrot.lane.b32.xlu0 %v14755_v44, %s8273_s16  ;;  %v14762_v35 = vld [vmem:[#allocation121_spill] sm:$0xff] }
 0x3da   : > { %3427 = vrot.lane.b32.xlu1 %v10965_v31, %s8274_s21  ;;  %7434 = vmatprep.mubr.msk.f32.mxu0 %vm3843_vm6, %v3801_v48  ;;  %v14757_v31 = vld [vmem:[#allocation82_spill] sm:$0xff] }
 0x3db   : > { %7492 = vmatprep.mubr.msk.f32.mxu1 %vm3843_vm6, %v3801_v48  ;;  %v3486_v4 = vpop.permute.xlu0 %3485  ;;  %v3607_v43 = vsel %vm3602_vm12, %v3574_v5, %v14757_v31  ;;  %v14765_v5 = vld [vmem:[#allocation22_spill] sm:$0xff] }
 0x3dc   : > { %v3802_v25 = vsel %vm1630_vm4, %v3770_v63, %v3486_v4  ;;  %v3296_v20 = vpop.permute.xlu1 %3295  ;;  %v3640_v12 = vsel %vm3635_vm13, %v3607_v43, %v14758_v11  ;;  %v14764_v63 = vld [vmem:[#allocation97_spill] sm:$0xff] }
 0x3dd   : > { %3429 = vrot.lane.b32.xlu0 %v10959_v50, %s8274_s21  ;;  %7435 = vmatmul.mubr.msk.f32.gmra.mxu0 %vm3843_vm6, %v3802_v25  ;;  %v14759_v50 = vld [vmem:[#allocation80_spill] sm:$0xff]  ;;  %v3672_v54 = vsel %vm1597_vm3, %v3640_v12, %v14760_v1 }
 0x3de   : > { %7493 = vmatmul.mubr.msk.f32.gmra.mxu1 %vm3843_vm6, %v3802_v25  ;;  %3523 = vrot.lane.b32.xlu1 %v10975_v8, %s8263_s25  ;;  %v3575_v2 = vsel %vm3569_vm11, %v10269_v9, %v14759_v50  ;;  %v3705_v30 = vsel %vm3700_vm14, %v3672_v54, %v11423_v42  ;;  %v14766_v12 = vld [vmem:[#allocation92_spill] sm:$0xff] }
 0x3df   : > { %v3298_v57 = vpop.permute.xlu0 %3297  ;;  %v3608_v8 = vsel %vm3602_vm12, %v3575_v2, %v14761_v21  ;;  %v3738_v9 = vsel %vm3733_vm15, %v3705_v30, %v3296_v20  ;;  %v14768_v2 = vld [vmem:[#allocation98_spill] sm:$0xff] }
 0x3e0   : > { %v3392_v24 = vpop.permute.xlu1 %3391  ;;  %v3641_v48 = vsel %vm3635_vm13, %v3608_v8, %v14763_v0  ;;  %v14770_v8 = vld [vmem:[#allocation106_spill] sm:$0xff] }
 0x3e1   : > { %3525 = vrot.lane.b32.xlu0 %v10982_v27, %s8263_s25  ;;  %v3673_v4 = vsel %vm1597_vm3, %v3641_v48, %v14764_v63  ;;  %v3771_v27 = vsel %vm3766_vm5, %v3738_v9, %v3392_v24  ;;  %v14771_v30 = vld [vmem:[#allocation94_spill] sm:$0xff]  ;;  %v14772_v48 = vld [vmem:[#allocation99_spill] sm:$0xff]  ;;  %v14773_v63 = vld [vmem:[#allocation108_spill] sm:$0xff] }
 0x3e2   : > { %3335 = vrot.lane.b32.xlu1 %v14762_v35, %s8273_s16  ;;  %v3706_v55 = vsel %vm3700_vm14, %v3673_v4, %v11425_v39 }
 0x3e3   : > { %v3394_v49 = vpop.permute.xlu0 %3393  ;;  %v3739_v31 = vsel %vm3733_vm15, %v3706_v55, %v3298_v57  ;;  %v3576_v57 = vsel %vm3569_vm11, %v10328_v15, %v14766_v12 }
 0x3e4   : > { %v3488_v25 = vpop.permute.xlu1 %3487  ;;  %v3772_v20 = vsel %vm3766_vm5, %v3739_v31, %v3394_v49 }
 0x3e5   : > { %v3803_v42 = vsel %vm1630_vm4, %v3771_v27, %v3488_v25  ;;  %3337 = vrot.lane.b32.xlu0 %v14765_v5, %s8273_s16 }
 0x3e6   : > { %3431 = vrot.lane.b32.xlu1 %v11011_v19, %s8274_s21  ;;  %7437 = vmatprep.mubr.msk.f32.mxu0 %vm3843_vm6, %v3803_v42  ;;  %v14767_v19 = vld [vmem:[#allocation93_spill] sm:$0xff] }
 0x3e7   : > { %7495 = vmatprep.mubr.msk.f32.mxu1 %vm3843_vm6, %v3803_v42  ;;  %v3490_v43 = vpop.permute.xlu0 %3489  ;;  %v3609_v24 = vsel %vm3602_vm12, %v3576_v57, %v14767_v19  ;;  %v14776_v57 = vld [vmem:[#allocation109_spill] sm:$0xff] }
 0x3e8   : > { %v3804_v11 = vsel %vm1630_vm4, %v3772_v20, %v3490_v43  ;;  %v3300_v39 = vpop.permute.xlu1 %3299  ;;  %v3642_v1 = vsel %vm3635_vm13, %v3609_v24, %v14768_v2  ;;  %v14774_v43 = vld [vmem:[#allocation103_spill] sm:$0xff]  ;;  %v14778_v2 = vld [vmem:[#allocation116_spill] sm:$0xff] }
 0x3e9   : > { %3433 = vrot.lane.b32.xlu0 %v11005_v32, %s8274_s21  ;;  %7438 = vmatmul.mubr.msk.f32.gmra.mxu0 %vm3843_vm6, %v3804_v11  ;;  %v14769_v32 = vld [vmem:[#allocation91_spill] sm:$0xff]  ;;  %v3674_v15 = vsel %vm1597_vm3, %v3642_v1, %v14770_v8  ;;  %v14779_v1 = vld [vmem:[#allocation105_spill] sm:$0xff] }
 0x3ea   : > { %7496 = vmatmul.mubr.msk.f32.gmra.mxu1 %vm3843_vm6, %v3804_v11  ;;  %3527 = vrot.lane.b32.xlu1 %v11021_v37, %s8263_s25  ;;  %v3577_v21 = vsel %vm3569_vm11, %v10319_v6, %v14769_v32  ;;  %v3707_v0 = vsel %vm3700_vm14, %v3674_v15, %v11431_v47  ;;  %v3578_v11 = vsel %vm3569_vm11, %v10385_v53, %v14774_v43  ;;  %v14780_v32 = vld [vmem:[#allocation110_spill] sm:$0xff]  ;;  %v14781_v15 = vld [vmem:[#allocation117_spill] sm:$0xff] }
 0x3eb   : > { %v3302_v50 = vpop.permute.xlu0 %3301  ;;  %v3610_v37 = vsel %vm3602_vm12, %v3577_v21, %v14771_v30  ;;  %v3740_v6 = vsel %vm3733_vm15, %v3707_v0, %v3300_v39 }
 0x3ec   : > { %v3396_v54 = vpop.permute.xlu1 %3395  ;;  %v3643_v9 = vsel %vm3635_vm13, %v3610_v37, %v14772_v48 }
 0x3ed   : > { %3529 = vrot.lane.b32.xlu0 %v11028_v59, %s8263_s25  ;;  %v3675_v4 = vsel %vm1597_vm3, %v3643_v9, %v14773_v63  ;;  %v3773_v59 = vsel %vm3766_vm5, %v3740_v6, %v3396_v54  ;;  %v14782_v9 = vld [vmem:[#allocation62_spill] sm:$0xff] }
 0x3ee   : > { %3339 = vrot.lane.b32.xlu1 %v11036_v38, %s8273_s16  ;;  %v3708_v25 = vsel %vm3700_vm14, %v3675_v4, %v11433_v62  ;;  %v2803_v63 = vrot.slane %v14782_v9, 2 }
 0x3ef   : > { %v3398_v49 = vpop.permute.xlu0 %3397  ;;  %v3741_v55 = vsel %vm3733_vm15, %v3708_v25, %v3302_v50  ;;  %v2802_v25 = vrot.slane %v11082_v23, 2 }
 0x3f0   : > { %v3492_v27 = vpop.permute.xlu1 %3491  ;;  %v3774_v42 = vsel %vm3766_vm5, %v3741_v55, %v3398_v49 }
 0x3f1   : > { %v3805_v47 = vsel %vm1630_vm4, %v3773_v59, %v3492_v27  ;;  %3341 = vrot.lane.b32.xlu0 %v10679_v13, %s8273_s16  ;;  %v14783_v59 = vld [vmem:[#allocation112_spill] sm:$0xff] }
 0x3f2   : > { %3435 = vrot.lane.b32.xlu1 %v11057_v58, %s8274_s21  ;;  %7440 = vmatprep.mubr.msk.f32.mxu0 %vm3843_vm6, %v3805_v47  ;;  %v14775_v58 = vld [vmem:[#allocation104_spill] sm:$0xff]  ;;  %v3580_v27 = vsel %vm3569_vm11, %v14685_v60, %v14783_v59  ;;  %v14787_v60 = vld [vmem:[#allocation111_spill] sm:$0xff] }
 0x3f3   : > { %7498 = vmatprep.mubr.msk.f32.mxu1 %vm3843_vm6, %v3805_v47  ;;  %v3494_v31 = vpop.permute.xlu0 %3493  ;;  %v3611_v39 = vsel %vm3602_vm12, %v3578_v11, %v14775_v58  ;;  %v14784_v47 = vld [vmem:[#allocation113_spill] sm:$0xff]  ;;  %v2804_v11 = vsel %vm832_vm2, %v2802_v25, %v2803_v63  ;;  %v14799_v59 = vld [vmem:[#allocation124_spill] sm:$0xff] }
 0x3f4   : > { %v3806_v20 = vsel %vm1630_vm4, %v3774_v42, %v3494_v31  ;;  %v3304_v62 = vpop.permute.xlu1 %3303  ;;  %v3644_v19 = vsel %vm3635_vm13, %v3611_v39, %v14776_v57  ;;  %v3613_v55 = vsel %vm3602_vm12, %v3580_v27, %v14784_v47  ;;  %v14785_v31 = vld [vmem:[#allocation141_spill] sm:$0xff]  ;;  %v14800_v47 = vld [vmem:[#allocation128_spill] sm:$0xff] }
 0x3f5   : > { %3437 = vrot.lane.b32.xlu0 %v11051_v34, %s8274_s21  ;;  %7441 = vmatmul.mubr.msk.f32.gmra.mxu0 %vm3843_vm6, %v3806_v20  ;;  %v14777_v34 = vld [vmem:[#allocation102_spill] sm:$0xff]  ;;  %v3676_v53 = vsel %vm1597_vm3, %v3644_v19, %v14778_v2  ;;  %v14788_v58 = vld [vmem:[#allocation125_spill] sm:$0xff]  ;;  %v14790_v19 = vld [vmem:[#allocation119_spill] sm:$0xff] }
 0x3f6   : > { %7499 = vmatmul.mubr.msk.f32.gmra.mxu1 %vm3843_vm6, %v3806_v20  ;;  %3531 = vrot.lane.b32.xlu1 %v11067_v10, %s8263_s25  ;;  %v3579_v50 = vsel %vm3569_vm11, %v10376_v36, %v14777_v34  ;;  %v3709_v54 = vsel %vm3700_vm14, %v3676_v53, %v11439_v7  ;;  %v2805_v20 = vrot.slane %v14785_v31, 2 }
 0x3f7   : > { %v3306_v12 = vpop.permute.xlu0 %3305  ;;  %v3612_v10 = vsel %vm3602_vm12, %v3579_v50, %v14779_v1  ;;  %v3742_v36 = vsel %vm3733_vm15, %v3709_v54, %v3304_v62 }
 0x3f8   : > { %v3400_v24 = vpop.permute.xlu1 %3399  ;;  %v3645_v21 = vsel %vm3635_vm13, %v3612_v10, %v14780_v32  ;;  %v2806_v10 = vsel %vm832_vm2, %v2803_v63, %v2805_v20  ;;  %v14797_v63 = vld [vmem:[#allocation120_spill] sm:$0xff]  ;;  %v14801_v20 = vld [vmem:[#allocation134_spill] sm:$0xff] }
 0x3f9   : > { %3533 = vrot.lane.b32.xlu0 %v11072_v29, %s8263_s25  ;;  %v3677_v30 = vsel %vm1597_vm3, %v3645_v21, %v14781_v15  ;;  %v3775_v37 = vsel %vm3766_vm5, %v3742_v36, %v3400_v24 }
 0x3fa   : > { %3249 = vrot.lane.b32.xlu1 %v11072_v29, %s8272_s26  ;;  %v3710_v48 = vsel %vm3700_vm14, %v3677_v30, %v11441_v46  ;;  %v14793_v30 = vld [vmem:[#allocation122_spill] sm:$0xff] }
 0x3fb   : > { %v3402_v8 = vpop.permute.xlu0 %3401  ;;  %v3743_v29 = vsel %vm3733_vm15, %v3710_v48, %v3306_v12  ;;  %v14795_v48 = vld [vmem:[#allocation123_spill] sm:$0xff] }
 0x3fc   : > { %v3496_v0 = vpop.permute.xlu1 %3495  ;;  %v3776_v6 = vsel %vm3766_vm5, %v3743_v29, %v3402_v8 }
 0x3fd   : > { %v3807_v7 = vsel %vm1630_vm4, %v3775_v37, %v3496_v0  ;;  %3343 = vrot.lane.b32.xlu0 %v11082_v23, %s8273_s16  ;;  %v3581_v23 = vsel %vm3569_vm11, %v14688_v41, %v14787_v60  ;;  %v14791_v41 = vld [vmem:[#allocation126_spill] sm:$0xff]  ;;  %v3582_v37 = vsel %vm3569_vm11, %v14695_v26, %v14793_v30  ;;  %v14794_v0 = vld [vmem:[#allocation5_spill] sm:$0xff]  ;;  %v14810_v30 = vld [vmem:[#allocation36_spill] sm:$0xff] }
 0x3fe   : > { %3345 = vrot.lane.b32.xlu1 %v14782_v9, %s8273_s16  ;;  %7443 = vmatprep.mubr.msk.f32.mxu0 %vm3843_vm6, %v3807_v7  ;;  %v14796_v9 = vld [vmem:[#allocation127_spill] sm:$0xff] }
 0x3ff   : > { %7501 = vmatprep.mubr.msk.f32.mxu1 %vm3843_vm6, %v3807_v7  ;;  %v3498_v49 = vpop.permute.xlu0 %3497  ;;  %v3615_v7 = vsel %vm3602_vm12, %v3582_v37, %v14795_v48 }
 0x400   : > { %v3808_v46 = vsel %vm1630_vm4, %v3776_v6, %v3498_v49  ;;  %v3308_v4 = vpop.permute.xlu1 %3307  ;;  %v3648_v6 = vsel %vm3635_vm13, %v3615_v7, %v14796_v9 }
 0x401   : > { %3439 = vrot.lane.b32.xlu0 %v11132_v33, %s8274_s21  ;;  %7444 = vmatmul.mubr.msk.f32.gmra.mxu0 %vm3843_vm6, %v3808_v46  ;;  %v14786_v33 = vld [vmem:[#allocation118_spill] sm:$0xff] }
 0x402   : > { %7502 = vmatmul.mubr.msk.f32.gmra.mxu1 %vm3843_vm6, %v3808_v46  ;;  %3441 = vrot.lane.b32.xlu1 %v11137_v56, %s8274_s21  ;;  %v3646_v62 = vsel %vm3635_vm13, %v3613_v55, %v14786_v33  ;;  %v14789_v56 = vld [vmem:[#allocation115_spill] sm:$0xff]  ;;  %v3583_v46 = vsel %vm3569_vm11, %v14698_v45, %v14797_v63 }
 0x403   : > { %v3310_v42 = vpop.permute.xlu0 %3309  ;;  %v3678_v39 = vsel %vm1597_vm3, %v3646_v62, %v14788_v58  ;;  %v3614_v12 = vsel %vm3602_vm12, %v3581_v23, %v14789_v56  ;;  %v3616_v27 = vsel %vm3602_vm12, %v3583_v46, %v14799_v59  ;;  %v14802_v56 = vld [vmem:[#allocation130_spill] sm:$0xff]  ;;  %v14813_v46 = vld [vmem:[#allocation139_spill] sm:$0xff]  ;;  %v14814_v59 = vld [vmem:[#allocation144_spill] sm:$0xff] }
 0x404   : > { %v3404_v43 = vpop.permute.xlu1 %3403  ;;  %v3711_v57 = vsel %vm3700_vm14, %v3678_v39, %v11447_v28  ;;  %v3647_v24 = vsel %vm3635_vm13, %v3614_v12, %v14790_v19  ;;  %v3649_v55 = vsel %vm3635_vm13, %v3616_v27, %v14800_v47  ;;  %v14803_v12 = vld [vmem:[#allocation131_spill] sm:$0xff]  ;;  %v14815_v47 = vld [vmem:[#allocation137_spill] sm:$0xff] }
 0x405   : > { %3535 = vrot.lane.b32.xlu0 %v2804_v11, %s8263_s25  ;;  %v3744_v34 = vsel %vm3733_vm15, %v3711_v57, %v3308_v4  ;;  %v3679_v2 = vsel %vm1597_vm3, %v3647_v24, %v14791_v41  ;;  %v14798_v4 = vld [vmem:[#allocation133_spill] sm:$0xff]  ;;  %v3681_v33 = vsel %vm1597_vm3, %v3649_v55, %v14801_v20  ;;  %v14804_v24 = vld [vmem:[#allocation135_spill] sm:$0xff]  ;;  %v14816_v55 = vld [vmem:[#allocation54_spill] sm:$0xff] }
 0x406   : > { %3251 = vrot.lane.b32.xlu1 %v2804_v11, %s8272_s26  ;;  %v3777_v53 = vsel %vm3766_vm5, %v3744_v34, %v3404_v43  ;;  %v3712_v54 = vsel %vm3700_vm14, %v3679_v2, %v11449_v17  ;;  %v14792_v17 = vld [vmem:[#allocation70_spill] sm:$0xff]  ;;  %v3680_v26 = vsel %vm1597_vm3, %v3648_v6, %v14798_v4  ;;  %v3714_v43 = vsel %vm3700_vm14, %v3681_v33, %v11457_v61  ;;  %v14805_v41 = vld [vmem:[#allocation129_spill] sm:$0xff]  ;;  %v14818_v33 = vld [vmem:[#allocation140_spill] sm:$0xff] }
 0x407   : > { %v3406_v50 = vpop.permute.xlu0 %3405  ;;  %v3745_v32 = vsel %vm3733_vm15, %v3712_v54, %v3310_v42  ;;  %v3713_v25 = vsel %vm3700_vm14, %v3680_v26, %v11455_v3  ;;  %v3584_v61 = vsel %vm3569_vm11, %v14703_v16, %v14802_v56  ;;  %v3585_v2 = vsel %vm3569_vm11, %v14704_v51, %v14805_v41  ;;  %v14811_v6 = vld [vmem:[#allocation138_spill] sm:$0xff] }
 0x408   : > { %v3500_v1 = vpop.permute.xlu1 %3499  ;;  %v3778_v21 = vsel %vm3766_vm5, %v3745_v32, %v3406_v50  ;;  %v3617_v57 = vsel %vm3602_vm12, %v3584_v61, %v14803_v12  ;;  %v14822_v12 = vld [vmem:[#allocation50_spill] sm:$0xff] }
 0x409   : > { %v3809_v28 = vsel %vm1630_vm4, %v3777_v53, %v3500_v1  ;;  %3537 = vrot.lane.b32.xlu0 %v2806_v10, %s8263_s25  ;;  %v3650_v34 = vsel %vm3635_vm13, %v3617_v57, %v14804_v24  ;;  %v14806_v53 = vld [vmem:[#allocation142_spill] sm:$0xff] }
 0x40a   : > { %3253 = vrot.lane.b32.xlu1 %v2806_v10, %s8272_s26  ;;  %7446 = vmatprep.mubr.msk.f32.mxu0 %vm3843_vm6, %v3809_v28  ;;  %v3682_v1 = vsel %vm1597_vm3, %v3650_v34, %v14806_v53  ;;  %v14807_v10 = vld [vmem:[#allocation132_spill] sm:$0xff]  ;;  %v14823_v53 = vld [vmem:[#allocation147_spill] sm:$0xff] }
 0x40b   : > { %7504 = vmatprep.mubr.msk.f32.mxu1 %vm3843_vm6, %v3809_v28  ;;  %v3502_v36 = vpop.permute.xlu0 %3501  ;;  %v3618_v54 = vsel %vm3602_vm12, %v3585_v2, %v14807_v10  ;;  %v3715_v16 = vsel %vm3700_vm14, %v3682_v1, %v11463_v40  ;;  %v14808_v28 = vld [vmem:[#allocation136_spill] sm:$0xff]  ;;  %v14824_v1 = vld [vmem:[#allocation34_spill] sm:$0xff] }
 0x40c   : > { %v3810_v8 = vsel %vm1630_vm4, %v3778_v21, %v3502_v36  ;;  %v3312_v15 = vpop.permute.xlu1 %3311  ;;  %v3651_v32 = vsel %vm3635_vm13, %v3618_v54, %v14808_v28  ;;  %v3588_v10 = vsel %vm3569_vm11, %v14824_v1, %v14823_v53  ;;  %v14825_v54 = vld [vmem:[#allocation148_spill] sm:$0xff]  ;;  %v14845_v1 = vld [vmem:[#allocation167_spill] sm:$0xff] }
 0x40d   : > { %8241 = vrot.lane.b32.xlu0 %v14792_v17, %s8273_s16  ;;  %7447 = vmatmul.mubr.msk.f32.gmra.mxu0 %vm3843_vm6, %v3810_v8  ;;  %v3746_v42 = vsel %vm3733_vm15, %v3713_v25, %v3312_v15 }
 0x40e   : > { %7505 = vmatmul.mubr.msk.f32.gmra.mxu1 %vm3843_vm6, %v3810_v8  ;;  %8246 = vrot.lane.b32.xlu1 %v14794_v0, %s8274_s21  ;;  %v14809_v8 = vld [vmem:[#allocation143_spill] sm:$0xff] }
 0x40f   : > { %v3314_v29 = vpop.permute.xlu0 %3313  ;;  %v3683_v15 = vsel %vm1597_vm3, %v3651_v32, %v14809_v8  ;;  %v14826_v32 = vld [vmem:[#allocation152_spill] sm:$0xff]  ;;  %v14827_v8 = vld [vmem:[#allocation146_spill] sm:$0xff] }
 0x410   : > { %v3408_v49 = vpop.permute.xlu1 %3407  ;;  %v3747_v60 = vsel %vm3733_vm15, %v3714_v43, %v3314_v29  ;;  %v3716_v37 = vsel %vm3700_vm14, %v3683_v15, %v14810_v30  ;;  %v14828_v15 = vld [vmem:[#allocation32_spill] sm:$0xff] }
 0x411   : > { %v3779_v45 = vsel %vm3766_vm5, %v3746_v42, %v3408_v49  ;;  %v14812_v49 = vld [vmem:[#allocation56_spill] sm:$0xff]  ;;  %v3587_v42 = vsel %vm3569_vm11, %v14816_v55, %v14815_v47 }
 0x412   : > { %v3586_v63 = vsel %vm3569_vm11, %v14812_v49, %v14811_v6  ;;  %v14833_v49 = vld [vmem:[#allocation159_spill] sm:$0xff] }
 0x413   : > { %v3410_v31 = vpop.permute.xlu0 %3409  ;;  %v3619_v4 = vsel %vm3602_vm12, %v3586_v63, %v14813_v46 }
 0x414   : > { %v3504_v62 = vpop.permute.xlu1 %3503  ;;  %v3780_v3 = vsel %vm3766_vm5, %v3747_v60, %v3410_v31  ;;  %v3652_v27 = vsel %vm3635_vm13, %v3619_v4, %v14814_v59  ;;  %v14817_v31 = vld [vmem:[#allocation150_spill] sm:$0xff] }
 0x415   : > { %v3811_v11 = vsel %vm1630_vm4, %v3779_v45, %v3504_v62  ;;  %v3684_v20 = vsel %vm1597_vm3, %v3652_v27, %v14817_v31  ;;  %v3620_v45 = vsel %vm3602_vm12, %v3587_v42, %v14818_v33  ;;  %v14819_v62 = vld [vmem:[#allocation73_spill] sm:$0xff] }
 0x416   : > { %7449 = vmatprep.mubr.msk.f32.mxu0 %vm3843_vm6, %v3811_v11  ;;  %7507 = vmatprep.mubr.msk.f32.mxu1 %vm3843_vm6, %v3811_v11  ;;  %v3717_v43 = vsel %vm3700_vm14, %v3684_v20, %v14819_v62  ;;  %v14820_v11 = vld [vmem:[#allocation145_spill] sm:$0xff]  ;;  %v14835_v20 = vld [vmem:[#allocation155_spill] sm:$0xff]  ;;  %v14837_v62 = vld [vmem:[#allocation156_spill] sm:$0xff] }
 0x417   : > { %v3506_v23 = vpop.permute.xlu0 %3505  ;;  %v3653_v60 = vsel %vm3635_vm13, %v3620_v45, %v14820_v11  ;;  %v14836_v33 = vld [vmem:[#allocation85_spill] sm:$0xff] }
 0x418   : > { %v3812_v58 = vsel %vm1630_vm4, %v3780_v3, %v3506_v23  ;;  %v3316_v39 = vpop.permute.xlu1 %3315  ;;  %v3590_v45 = vsel %vm3569_vm11, %v14836_v33, %v14835_v20  ;;  %v14857_v33 = vld [vmem:[#allocation191_spill] sm:$0xff] }
 0x419   : > { %7450 = vmatmul.mubr.msk.f32.gmra.mxu0 %vm3843_vm6, %v3812_v58  ;;  %7508 = vmatmul.mubr.msk.f32.gmra.mxu1 %vm3843_vm6, %v3812_v58  ;;  %v3748_v21 = vsel %vm3733_vm15, %v3715_v16, %v3316_v39  ;;  %v14821_v58 = vld [vmem:[#allocation151_spill] sm:$0xff]  ;;  %v3621_v16 = vsel %vm3602_vm12, %v3588_v10, %v14825_v54 }
 0x41a   : > { %v3685_v39 = vsel %vm1597_vm3, %v3653_v60, %v14821_v58  ;;  %v14838_v60 = vld [vmem:[#allocation160_spill] sm:$0xff]  ;;  %v14839_v58 = vld [vmem:[#allocation154_spill] sm:$0xff] }
 0x41b   : > { %v3318_v19 = vpop.permute.xlu0 %3317  ;;  %v3718_v57 = vsel %vm3700_vm14, %v3685_v39, %v14822_v12  ;;  %v14840_v39 = vld [vmem:[#allocation16_spill] sm:$0xff] }
 0x41c   : > { %v3412_v50 = vpop.permute.xlu1 %3411  ;;  %v3749_v48 = vsel %vm3733_vm15, %v3716_v37, %v3318_v19  ;;  %v14830_v37 = vld [vmem:[#allocation149_spill] sm:$0xff] }
 0x41d   : > { %v3781_v51 = vsel %vm3766_vm5, %v3748_v21, %v3412_v50  ;;  %v3654_v21 = vsel %vm3635_vm13, %v3621_v16, %v14826_v32 }
 0x41f   : > { %v3414_v36 = vpop.permute.xlu0 %3413 }
 0x420   : > { %v3508_v17 = vpop.permute.xlu1 %3507  ;;  %v3782_v40 = vsel %vm3766_vm5, %v3749_v48, %v3414_v36  ;;  %v14831_v48 = vld [vmem:[#allocation51_spill] sm:$0xff] }
 0x421   : > { %v3813_v0 = vsel %vm1630_vm4, %v3781_v51, %v3508_v17  ;;  %v3589_v51 = vsel %vm3569_vm11, %v14828_v15, %v14827_v8  ;;  %v14829_v17 = vld [vmem:[#allocation158_spill] sm:$0xff] }
 0x422   : > { %7452 = vmatprep.mubr.msk.f32.mxu0 %vm3843_vm6, %v3813_v0  ;;  %7510 = vmatprep.mubr.msk.f32.mxu1 %vm3843_vm6, %v3813_v0  ;;  %v3686_v30 = vsel %vm1597_vm3, %v3654_v21, %v14829_v17  ;;  %v3622_v0 = vsel %vm3602_vm12, %v3589_v51, %v14830_v37  ;;  %v14848_v37 = vld [vmem:[#allocation96_spill] sm:$0xff] }
 0x423   : > { %v3510_v7 = vpop.permute.xlu0 %3509 }
 0x424   : > { %v3814_v29 = vsel %vm1630_vm4, %v3782_v40, %v3510_v7  ;;  %v3320_v9 = vpop.permute.xlu1 %3319  ;;  %v3719_v40 = vsel %vm3700_vm14, %v3686_v30, %v14831_v48  ;;  %v14832_v7 = vld [vmem:[#allocation153_spill] sm:$0xff]  ;;  %v14847_v30 = vld [vmem:[#allocation163_spill] sm:$0xff]  ;;  %v14849_v48 = vld [vmem:[#allocation164_spill] sm:$0xff] }
 0x425   : > { %7453 = vmatmul.mubr.msk.f32.gmra.mxu0 %vm3843_vm6, %v3814_v29  ;;  %7511 = vmatmul.mubr.msk.f32.gmra.mxu1 %vm3843_vm6, %v3814_v29  ;;  %v3750_v3 = vsel %vm3733_vm15, %v3717_v43, %v3320_v9  ;;  %v3655_v29 = vsel %vm3635_vm13, %v3622_v0, %v14832_v7  ;;  %v3623_v43 = vsel %vm3602_vm12, %v3590_v45, %v14837_v62 }
 0x426   : > { %v3687_v63 = vsel %vm1597_vm3, %v3655_v29, %v14833_v49  ;;  %v3592_v0 = vsel %vm3569_vm11, %v14848_v37, %v14847_v30  ;;  %v14850_v29 = vld [vmem:[#allocation168_spill] sm:$0xff]  ;;  %v14851_v49 = vld [vmem:[#allocation162_spill] sm:$0xff] }
 0x427   : > { %v3322_v26 = vpop.permute.xlu0 %3321  ;;  %v14868_v37 = vld [vmem:[#allocation196_spill] sm:$0xff] }
 0x428   : > { %v3416_v25 = vpop.permute.xlu1 %3415  ;;  %v3751_v24 = vsel %vm3733_vm15, %v3718_v57, %v3322_v26  ;;  %v14834_v26 = vld [vmem:[#allocation74_spill] sm:$0xff]  ;;  %v14842_v57 = vld [vmem:[#allocation157_spill] sm:$0xff] }
 0x429   : > { %v3783_v56 = vsel %vm3766_vm5, %v3750_v3, %v3416_v25  ;;  %v3720_v59 = vsel %vm3700_vm14, %v3687_v63, %v14834_v26  ;;  %v3656_v3 = vsel %vm3635_vm13, %v3623_v43, %v14838_v60  ;;  %v14852_v63 = vld [vmem:[#allocation33_spill] sm:$0xff] }
 0x42b   : > { %v3418_v23 = vpop.permute.xlu0 %3417 }
 0x42c   : > { %v3512_v61 = vpop.permute.xlu1 %3511  ;;  %v3784_v34 = vsel %vm3766_vm5, %v3751_v24, %v3418_v23  ;;  %v14843_v24 = vld [vmem:[#allocation79_spill] sm:$0xff] }
 0x42d   : > { %v3815_v19 = vsel %vm1630_vm4, %v3783_v56, %v3512_v61  ;;  %v3591_v56 = vsel %vm3569_vm11, %v14840_v39, %v14839_v58  ;;  %v14841_v61 = vld [vmem:[#allocation166_spill] sm:$0xff] }
 0x42e   : > { %7455 = vmatprep.mubr.msk.f32.mxu0 %vm3843_vm6, %v3815_v19  ;;  %7513 = vmatprep.mubr.msk.f32.mxu1 %vm3843_vm6, %v3815_v19  ;;  %v3688_v12 = vsel %vm1597_vm3, %v3656_v3, %v14841_v61  ;;  %v3624_v19 = vsel %vm3602_vm12, %v3591_v56, %v14842_v57 }
 0x42f   : > { %v3514_v50 = vpop.permute.xlu0 %3513 }
 0x430   : > { %v3816_v41 = vsel %vm1630_vm4, %v3784_v34, %v3514_v50  ;;  %v3324_v2 = vpop.permute.xlu1 %3323  ;;  %v3721_v34 = vsel %vm3700_vm14, %v3688_v12, %v14843_v24  ;;  %v14844_v50 = vld [vmem:[#allocation161_spill] sm:$0xff]  ;;  %v14859_v12 = vld [vmem:[#allocation171_spill] sm:$0xff] }
 0x431   : > { %7456 = vmatmul.mubr.msk.f32.gmra.mxu0 %vm3843_vm6, %v3816_v41  ;;  %7514 = vmatmul.mubr.msk.f32.gmra.mxu1 %vm3843_vm6, %v3816_v41  ;;  %v3752_v9 = vsel %vm3733_vm15, %v3719_v40, %v3324_v2  ;;  %v3657_v41 = vsel %vm3635_vm13, %v3624_v19, %v14844_v50  ;;  %v3625_v40 = vsel %vm3602_vm12, %v3592_v0, %v14849_v48  ;;  %v14860_v19 = vld [vmem:[#allocation172_spill] sm:$0xff]  ;;  %v14861_v50 = vld [vmem:[#allocation174_spill] sm:$0xff] }
 0x432   : > { %v3689_v10 = vsel %vm1597_vm3, %v3657_v41, %v14845_v1  ;;  %v3594_v57 = vsel %vm3569_vm11, %v14740_v14, %v14859_v12 }
 0x433   : > { %v3326_v28 = vpop.permute.xlu0 %3325  ;;  %v3627_v24 = vsel %vm3602_vm12, %v3594_v57, %v14860_v19 }
 0x434   : > { %v3420_v36 = vpop.permute.xlu1 %3419  ;;  %v3753_v25 = vsel %vm3733_vm15, %v3720_v59, %v3326_v28  ;;  %v14846_v28 = vld [vmem:[#allocation78_spill] sm:$0xff]  ;;  %v14854_v59 = vld [vmem:[#allocation165_spill] sm:$0xff]  ;;  %v3660_v41 = vsel %vm3635_vm13, %v3627_v24, %v14861_v50 }
 0x435   : > { %v3785_v46 = vsel %vm3766_vm5, %v3752_v9, %v3420_v36  ;;  %v3722_v32 = vsel %vm3700_vm14, %v3689_v10, %v14846_v28  ;;  %v3658_v9 = vsel %vm3635_vm13, %v3625_v40, %v14850_v29  ;;  %v14863_v10 = vld [vmem:[#allocation67_spill] sm:$0xff] }
 0x437   : > { %v3422_v6 = vpop.permute.xlu0 %3421 }
 0x438   : > { %v3516_v4 = vpop.permute.xlu1 %3515  ;;  %v3786_v47 = vsel %vm3766_vm5, %v3753_v25, %v3422_v6  ;;  %v14855_v25 = vld [vmem:[#allocation90_spill] sm:$0xff] }
 0x439   : > { %v3817_v27 = vsel %vm1630_vm4, %v3785_v46, %v3516_v4  ;;  %v3593_v46 = vsel %vm3569_vm11, %v14852_v63, %v14851_v49  ;;  %v14853_v4 = vld [vmem:[#allocation71_spill] sm:$0xff]  ;;  %v14869_v49 = vld [vmem:[#allocation177_spill] sm:$0xff] }
 0x43a   : > { %7458 = vmatprep.mubr.msk.f32.mxu0 %vm3843_vm6, %v3817_v27  ;;  %7516 = vmatprep.mubr.msk.f32.mxu1 %vm3843_vm6, %v3817_v27  ;;  %v3690_v26 = vsel %vm1597_vm3, %v3658_v9, %v14853_v4  ;;  %v3626_v27 = vsel %vm3602_vm12, %v3593_v46, %v14854_v59  ;;  %v3596_v63 = vsel %vm3569_vm11, %v14752_v18, %v14869_v49  ;;  %v14870_v46 = vld [vmem:[#allocation178_spill] sm:$0xff]  ;;  %v14871_v59 = vld [vmem:[#allocation180_spill] sm:$0xff] }
 0x43b   : > { %v3518_v55 = vpop.permute.xlu0 %3517  ;;  %v3629_v4 = vsel %vm3602_vm12, %v3596_v63, %v14870_v46 }
 0x43c   : > { %v3818_v42 = vsel %vm1630_vm4, %v3786_v47, %v3518_v55  ;;  %v3328_v31 = vpop.permute.xlu1 %3327  ;;  %v3723_v47 = vsel %vm3700_vm14, %v3690_v26, %v14855_v25  ;;  %v14856_v55 = vld [vmem:[#allocation169_spill] sm:$0xff] }
 0x43d   : > { %7459 = vmatmul.mubr.msk.f32.gmra.mxu0 %vm3843_vm6, %v3818_v42  ;;  %7517 = vmatmul.mubr.msk.f32.gmra.mxu1 %vm3843_vm6, %v3818_v42  ;;  %v3754_v2 = vsel %vm3733_vm15, %v3721_v34, %v3328_v31  ;;  %v3659_v42 = vsel %vm3635_vm13, %v3626_v27, %v14856_v55  ;;  %v3662_v27 = vsel %vm3635_vm13, %v3629_v4, %v14871_v59 }
 0x43e   : > { %v3691_v45 = vsel %vm1597_vm3, %v3659_v42, %v14857_v33  ;;  %v14873_v42 = vld [vmem:[#allocation35_spill] sm:$0xff] }
 0x43f   : > { %v3330_v11 = vpop.permute.xlu0 %3329 }
 0x440   : > { %v3424_v23 = vpop.permute.xlu1 %3423  ;;  %v3755_v36 = vsel %vm3733_vm15, %v3722_v32, %v3330_v11  ;;  %v14858_v11 = vld [vmem:[#allocation195_spill] sm:$0xff]  ;;  %v14865_v32 = vld [vmem:[#allocation89_spill] sm:$0xff] }
 0x441   : > { %v3787_v54 = vsel %vm3766_vm5, %v3754_v2, %v3424_v23  ;;  %v3724_v60 = vsel %vm3700_vm14, %v3691_v45, %v14858_v11  ;;  %v14875_v45 = vld [vmem:[#allocation53_spill] sm:$0xff] }
 0x443   : > { %v3426_v53 = vpop.permute.xlu0 %3425 }
 0x444   : > { %v3520_v16 = vpop.permute.xlu1 %3519  ;;  %v3788_v8 = vsel %vm3766_vm5, %v3755_v36, %v3426_v53  ;;  %v14862_v53 = vld [vmem:[#allocation170_spill] sm:$0xff] }
 0x445   : > { %v3819_v21 = vsel %vm1630_vm4, %v3787_v54, %v3520_v16  ;;  %v3595_v1 = vsel %vm3569_vm11, %v14743_v52, %v14862_v53  ;;  %v3692_v54 = vsel %vm1597_vm3, %v3660_v41, %v14863_v10  ;;  %v14864_v16 = vld [vmem:[#allocation173_spill] sm:$0xff] }
 0x446   : > { %7461 = vmatprep.mubr.msk.f32.mxu0 %vm3843_vm6, %v3819_v21  ;;  %7519 = vmatprep.mubr.msk.f32.mxu1 %vm3843_vm6, %v3819_v21  ;;  %v3628_v28 = vsel %vm3602_vm12, %v3595_v1, %v14864_v16  ;;  %v3725_v14 = vsel %vm3700_vm14, %v3692_v54, %v14865_v32  ;;  %v14866_v21 = vld [vmem:[#allocation175_spill] sm:$0xff]  ;;  %v14880_v1 = vld [vmem:[#allocation184_spill] sm:$0xff]  ;;  %v14881_v54 = vld [vmem:[#allocation186_spill] sm:$0xff] }
 0x447   : > { %v3522_v15 = vpop.permute.xlu0 %3521  ;;  %v3661_v36 = vsel %vm3635_vm13, %v3628_v28, %v14866_v21  ;;  %v14882_v32 = vld [vmem:[#allocation72_spill] sm:$0xff] }
 0x448   : > { %v3820_v51 = vsel %vm1630_vm4, %v3788_v8, %v3522_v15  ;;  %v3332_v17 = vpop.permute.xlu1 %3331 }
 0x449   : > { %7462 = vmatmul.mubr.msk.f32.gmra.mxu0 %vm3843_vm6, %v3820_v51  ;;  %7520 = vmatmul.mubr.msk.f32.gmra.mxu1 %vm3843_vm6, %v3820_v51  ;;  %v3756_v31 = vsel %vm3733_vm15, %v3723_v47, %v3332_v17  ;;  %v14867_v51 = vld [vmem:[#allocation47_spill] sm:$0xff]  ;;  %v14872_v47 = vld [vmem:[#allocation176_spill] sm:$0xff] }
 0x44a   : > { %v3693_v17 = vsel %vm1597_vm3, %v3661_v36, %v14867_v51  ;;  %v3597_v55 = vsel %vm3569_vm11, %v14755_v44, %v14872_v47  ;;  %v14883_v36 = vld [vmem:[#allocation182_spill] sm:$0xff]  ;;  %v14890_v47 = vld [vmem:[#allocation45_spill] sm:$0xff] }
 0x44b   : > { %v3334_v7 = vpop.permute.xlu0 %3333  ;;  %v3726_v0 = vsel %vm3700_vm14, %v3693_v17, %v14868_v37  ;;  %v14885_v17 = vld [vmem:[#allocation185_spill] sm:$0xff] }
 0x44c   : > { %v3428_v6 = vpop.permute.xlu1 %3427  ;;  %v3757_v23 = vsel %vm3733_vm15, %v3724_v60, %v3334_v7 }
 0x44d   : > { %v3789_v62 = vsel %vm3766_vm5, %v3756_v31, %v3428_v6  ;;  %v3694_v31 = vsel %vm1597_vm3, %v3662_v27, %v14873_v42  ;;  %v14889_v27 = vld [vmem:[#allocation189_spill] sm:$0xff]  ;;  %v14891_v42 = vld [vmem:[#allocation190_spill] sm:$0xff] }
 0x44e   : > { %v3727_v18 = vsel %vm3700_vm14, %v3694_v31, %v14875_v45  ;;  %v14893_v45 = vld [vmem:[#allocation192_spill] sm:$0xff] }
 0x44f   : > { %v3430_v20 = vpop.permute.xlu0 %3429 }
 0x450   : > { %v3524_v43 = vpop.permute.xlu1 %3523  ;;  %v3790_v58 = vsel %vm3766_vm5, %v3757_v23, %v3430_v20  ;;  %v14874_v20 = vld [vmem:[#allocation179_spill] sm:$0xff] }
 0x451   : > { %v3821_v3 = vsel %vm1630_vm4, %v3789_v62, %v3524_v43  ;;  %v3630_v33 = vsel %vm3602_vm12, %v3597_v55, %v14874_v20  ;;  %v14876_v62 = vld [vmem:[#allocation181_spill] sm:$0xff]  ;;  %v14892_v20 = vld [vmem:[#allocation66_spill] sm:$0xff] }
 0x452   : > { %7464 = vmatprep.mubr.msk.f32.mxu0 %vm3843_vm6, %v3821_v3  ;;  %7522 = vmatprep.mubr.msk.f32.mxu1 %vm3843_vm6, %v3821_v3  ;;  %v3663_v43 = vsel %vm3635_vm13, %v3630_v33, %v14876_v62  ;;  %v14877_v3 = vld [vmem:[#allocation193_spill] sm:$0xff]  ;;  %v14895_v62 = vld [vmem:[#allocation48_spill] sm:$0xff] }
 0x453   : > { %v3526_v39 = vpop.permute.xlu0 %3525  ;;  %v3695_v23 = vsel %vm1597_vm3, %v3663_v43, %v14877_v3  ;;  %v14896_v43 = vld [vmem:[#allocation49_spill] sm:$0xff] }
 0x454   : > { %v3822_v56 = vsel %vm1630_vm4, %v3790_v58, %v3526_v39  ;;  %v3336_v61 = vpop.permute.xlu1 %3335  ;;  %v14878_v39 = vld [vmem:[#allocation197_spill] sm:$0xff] }
 0x455   : > { %7465 = vmatmul.mubr.msk.f32.gmra.mxu0 %vm3843_vm6, %v3822_v56  ;;  %7523 = vmatmul.mubr.msk.f32.gmra.mxu1 %vm3843_vm6, %v3822_v56  ;;  %v3758_v8 = vsel %vm3733_vm15, %v3725_v14, %v3336_v61  ;;  %v3728_v56 = vsel %vm3700_vm14, %v3695_v23, %v14878_v39 }
 0x457   : > { %v3338_v34 = vpop.permute.xlu0 %3337 }
 0x458   : > { %v3432_v2 = vpop.permute.xlu1 %3431  ;;  %v3759_v40 = vsel %vm3733_vm15, %v3726_v0, %v3338_v34 }
 0x459   : > { %v3791_v52 = vsel %vm3766_vm5, %v3758_v8, %v3432_v2  ;;  %v14879_v2 = vld [vmem:[#allocation183_spill] sm:$0xff]  ;;  %v3599_v8 = vsel %vm3569_vm11, %v14765_v5, %v14883_v36 }
 0x45a   : > { %v3598_v53 = vsel %vm3569_vm11, %v14762_v35, %v14879_v2  ;;  %v3632_v35 = vsel %vm3602_vm12, %v3599_v8, %v14885_v17  ;;  %v12134_v2 = vld [vmem:[%s14019_s8] ss:$0 sm:$0xff] }
 0x45b   : > { %v3434_v15 = vpop.permute.xlu0 %3433  ;;  %v3631_v10 = vsel %vm3602_vm12, %v3598_v53, %v14880_v1 }
 0x45c   : > { %v3528_v30 = vpop.permute.xlu1 %3527  ;;  %v3792_v7 = vsel %vm3766_vm5, %v3759_v40, %v3434_v15  ;;  %v3664_v16 = vsel %vm3635_vm13, %v3631_v10, %v14881_v54  ;;  %v14884_v15 = vld [vmem:[#allocation38_spill] sm:$0xff] }
 0x45d   : > { %v3823_v48 = vsel %vm1630_vm4, %v3791_v52, %v3528_v30  ;;  %v3696_v14 = vsel %vm1597_vm3, %v3664_v16, %v14882_v32  ;;  %v14886_v30 = vld [vmem:[#allocation187_spill] sm:$0xff]  ;;  %v14887_v40 = vld [vmem:[#allocation194_spill] sm:$0xff] }
 0x45e   : > { %7467 = vmatprep.mubr.msk.f32.mxu0 %vm3843_vm6, %v3823_v48  ;;  %7525 = vmatprep.mubr.msk.f32.mxu1 %vm3843_vm6, %v3823_v48  ;;  %v3729_v51 = vsel %vm3700_vm14, %v3696_v14, %v14884_v15  ;;  %v3665_v37 = vsel %vm3635_vm13, %v3632_v35, %v14886_v30 }
 0x45f   : > { %v3530_v29 = vpop.permute.xlu0 %3529 }
 0x460   : > { %v3824_v9 = vsel %vm1630_vm4, %v3792_v7, %v3530_v29  ;;  %v3340_v6 = vpop.permute.xlu1 %3339  ;;  %v3697_v7 = vsel %vm1597_vm3, %v3665_v37, %v14887_v40 }
 0x461   : > { %7468 = vmatmul.mubr.msk.f32.gmra.mxu0 %vm3843_vm6, %v3824_v9  ;;  %7526 = vmatmul.mubr.msk.f32.gmra.mxu1 %vm3843_vm6, %v3824_v9  ;;  %v3760_v11 = vsel %vm3733_vm15, %v3727_v18, %v3340_v6 }
 0x463   : > { %v3342_v26 = vpop.permute.xlu0 %3341 }
 0x464   : > { %v3436_v25 = vpop.permute.xlu1 %3435  ;;  %v3761_v12 = vsel %vm3733_vm15, %v3728_v56, %v3342_v26  ;;  %v14888_v26 = vld [vmem:[#allocation188_spill] sm:$0xff] }
 0x465   : > { %v3793_v44 = vsel %vm3766_vm5, %v3760_v11, %v3436_v25  ;;  %v3601_v59 = vsel %vm3569_vm11, %v10679_v13, %v14888_v26  ;;  %v3600_v25 = vsel %vm3569_vm11, %v11036_v38, %v14889_v27 }
 0x466   : > { %v3633_v55 = vsel %vm3602_vm12, %v3600_v25, %v14890_v47  ;;  %v3634_v31 = vsel %vm3602_vm12, %v3601_v59, %v14891_v42 }
 0x467   : > { %v3438_v60 = vpop.permute.xlu0 %3437  ;;  %v3666_v33 = vsel %vm3635_vm13, %v3633_v55, %v14892_v20  ;;  %v3667_v13 = vsel %vm3635_vm13, %v3634_v31, %v14893_v45 }
 0x468   : > { %v3532_v58 = vpop.permute.xlu1 %3531  ;;  %v3794_v57 = vsel %vm3766_vm5, %v3761_v12, %v3438_v60  ;;  %v3698_v38 = vsel %vm1597_vm3, %v3666_v33, %v14895_v62  ;;  %v3699_v11 = vsel %vm1597_vm3, %v3667_v13, %v14896_v43 }
 0x469   : > { %v3825_v61 = vsel %vm1630_vm4, %v3793_v44, %v3532_v58 }
 0x46a   : > { %7470 = vmatprep.mubr.msk.f32.mxu0 %vm3843_vm6, %v3825_v61  ;;  %7528 = vmatprep.mubr.msk.f32.mxu1 %vm3843_vm6, %v3825_v61 }
 0x46b   : > { %v3534_v19 = vpop.permute.xlu0 %3533 }
 0x46c   : > { %v3826_v24 = vsel %vm1630_vm4, %v3794_v57, %v3534_v19  ;;  %v3250_v34 = vpop.permute.xlu1 %3249 }
 0x46d   : > { %7471 = vmatmul.mubr.msk.f32.gmra.mxu0 %vm3843_vm6, %v3826_v24  ;;  %7529 = vmatmul.mubr.msk.f32.gmra.mxu1 %vm3843_vm6, %v3826_v24  ;;  %v3730_v9 = vsel %vm3700_vm14, %v3697_v7, %v3250_v34  ;;  %v14898_v24 = vld [vmem:[#allocation7_spill] sm:$0xff] }
 0x46f   : > { %v3344_v50 = vpop.permute.xlu0 %3343 }
 0x470   : > { %v3346_v41 = vpop.permute.xlu1 %3345  ;;  %v3762_v52 = vsel %vm3733_vm15, %v3729_v51, %v3344_v50  ;;  %v14899_v50 = vld [vmem:[#allocation18_spill] sm:$0xff] }
 0x471   : > { %v3763_v6 = vsel %vm3733_vm15, %v3730_v9, %v3346_v41 }
 0x473   : > { %v3440_v28 = vpop.permute.xlu0 %3439 }
 0x474   : > { %v3442_v21 = vpop.permute.xlu1 %3441  ;;  %v3795_v0 = vsel %vm3766_vm5, %v3762_v52, %v3440_v28 }
 0x475   : > { %v3796_v49 = vsel %vm3766_vm5, %v3763_v6, %v3442_v21 }
 0x477   : > { %v3536_v48 = vpop.permute.xlu0 %3535 }
 0x478   : > { %v3827_v29 = vsel %vm1630_vm4, %v3795_v0, %v3536_v48  ;;  %v3252_v5 = vpop.permute.xlu1 %3251 }
 0x479   : > { %7473 = vmatprep.mubr.msk.f32.mxu0 %vm3843_vm6, %v3827_v29  ;;  %7531 = vmatprep.mubr.msk.f32.mxu1 %vm3843_vm6, %v3827_v29  ;;  %v3731_v44 = vsel %vm3700_vm14, %v3698_v38, %v3252_v5 }
 0x47b   : > { %v3538_v63 = vpop.permute.xlu0 %3537 }
 0x47c   : > { %v3828_v46 = vsel %vm1630_vm4, %v3796_v49, %v3538_v63  ;;  %v3254_v4 = vpop.permute.xlu1 %3253 }
 0x47d   : > { %7474 = vmatmul.mubr.msk.f32.gmra.mxu0 %vm3843_vm6, %v3828_v46  ;;  %7532 = vmatmul.mubr.msk.f32.gmra.mxu1 %vm3843_vm6, %v3828_v46  ;;  %v3732_v58 = vsel %vm3700_vm14, %v3699_v11, %v3254_v4 }
 0x47f   : > { %v12097_v18 = vpop.permute.xlu0 %8241 }
 0x480   : > { %14894 = vst [vmem:[#allocation101_spill] sm:$0xff] %v12097_v18  ;;  %v14240_v60 = vunpack.i.h.bf16 %v12097_v18  ;;  %v14242_v3 = vunpack.i.l.bf16 %v12097_v18  ;;  %v12105_v23 = vpop.permute.xlu1 %8246 }
 0x481   : > { %14897 = vst [vmem:[#allocation2_spill] sm:$0xff] %v12105_v23  ;;  %v14239_v39 = vunpack.i.h.bf16 %v12105_v23  ;;  %v14241_v56 = vunpack.i.l.bf16 %v12105_v23 }
 0x482   : > { %v3764_v61 = vsel %vm3733_vm15, %v3731_v44, %v14242_v3  ;;  %v3765_v12 = vsel %vm3733_vm15, %v3732_v58, %v14240_v60 }
 0x483   : > { %v3797_v57 = vsel %vm3766_vm5, %v3764_v61, %v14241_v56  ;;  %v3798_v19 = vsel %vm3766_vm5, %v3765_v12, %v14239_v39 }
 0x484   : > { %v3829_v34 = vsel %vm1630_vm4, %v3797_v57, %v14898_v24  ;;  %v3830_v41 = vsel %vm1630_vm4, %v3798_v19, %v14899_v50 }
 0x485   : > { %7476 = vmatprep.mubr.msk.f32.mxu0 %vm3843_vm6, %v3829_v34  ;;  %7534 = vmatprep.mubr.msk.f32.mxu1 %vm3843_vm6, %v3829_v34 }
 0x486   : > { %7477 = vmatmul.mubr.msk.f32.gmra.mxu0 %vm3843_vm6, %v3830_v41  ;;  %7535 = vmatmul.mubr.msk.f32.gmra.mxu1 %vm3843_vm6, %v3830_v41 }
 0x492   : > { %v7491_v53 = vpop.f32.mrf.mxu1 }
 0x493   : > { %v4288_v1 = vadd.f32 %v7491_v53, %v12134_v2 }
 0x494   : > { %v4282_v10 = vpop.f32.mrf.mxu1 }
 0x495   : > { %v4474_v54 = vrot.slane %v4288_v1, 7  ;;  %v4283_v16 = vadd.f32 %v12134_v2, %v4282_v10 }
 0x497   : > { %v12139_v28 = vsel %vm585_vm0, %v4474_v54, 0.0  ;;  %v4473_v32 = vrot.slane %v4283_v16, 7 }
 0x498   : > { %v4633_v36 = vrot.slane %v12139_v28, 1 }
 0x499   : > { %v12142_v14 = vsel %vm585_vm0, %v4473_v32, %v4474_v54  ;;  %v12145_v21 = vsel %vm585_vm0, 0.0, %v4473_v32 }
 0x49a   : > { %v4630_v8 = vrot.slane %v12145_v21, 1  ;;  %v4631_v15 = vrot.slane %v12142_v14, 1 }
 0x49c   : > { %v12151_v51 = vsel %vm751_vm1, %v4631_v15, %v4633_v36  ;;  %v12154_v17 = vsel %vm751_vm1, %v4630_v8, %v4631_v15 }
 0x49d   : > { %4794 = vrot.lane.b32.xlu1 %v12151_v51, %s8269_s20  ;;  %4792 = vrot.lane.b32.xlu0 %v12154_v17, %s8269_s20 }
 0x49e   : > { %v7494_v35 = vpop.f32.mrf.mxu1 }
 0x49f   : > { %v4298_v52 = vadd.f32 %v7494_v35, %v12134_v2 }
 0x4a0   : > { %v4292_v30 = vpop.f32.mrf.mxu1 }
 0x4a1   : > { %v4477_v37 = vrot.slane %v4298_v52, 7  ;;  %v4293_v0 = vadd.f32 %v12134_v2, %v4292_v30 }
 0x4a3   : > { %v12163_v48 = vsel %vm585_vm0, %v4477_v37, 0.0  ;;  %v4476_v40 = vrot.slane %v4293_v0, 7 }
 0x4a4   : > { %v4638_v5 = vrot.slane %v12163_v48, 1 }
 0x4a5   : > { %v12166_v7 = vsel %vm585_vm0, %v4476_v40, %v4477_v37  ;;  %v12169_v29 = vsel %vm585_vm0, 0.0, %v4476_v40 }
 0x4a6   : > { %v4636_v9 = vrot.slane %v12166_v7, 1  ;;  %v4635_v6 = vrot.slane %v12169_v29, 1 }
 0x4a8   : > { %v12175_v49 = vsel %vm751_vm1, %v4636_v9, %v4638_v5  ;;  %v12178_v63 = vsel %vm751_vm1, %v4635_v6, %v4636_v9 }
 0x4a9   : > { %4798 = vrot.lane.b32.xlu1 %v12175_v49, %s8269_s20  ;;  %4796 = vrot.lane.b32.xlu0 %v12178_v63, %s8269_s20 }
 0x4aa   : > { %v7497_v46 = vpop.f32.mrf.mxu1 }
 0x4ab   : > { %v4308_v4 = vadd.f32 %v7497_v46, %v12134_v2 }
 0x4ac   : > { %v4302_v26 = vpop.f32.mrf.mxu1 }
 0x4ad   : > { %v4480_v59 = vrot.slane %v4308_v4, 7  ;;  %v4303_v27 = vadd.f32 %v12134_v2, %v4302_v26 }
 0x4af   : > { %v12187_v25 = vsel %vm585_vm0, %v4480_v59, 0.0  ;;  %v4479_v47 = vrot.slane %v4303_v27, 7 }
 0x4b0   : > { %v4643_v31 = vrot.slane %v12187_v25, 1 }
 0x4b1   : > { %v12190_v55 = vsel %vm585_vm0, %v4479_v47, %v4480_v59  ;;  %v12193_v42 = vsel %vm585_vm0, 0.0, %v4479_v47 }
 0x4b2   : > { %v4641_v20 = vrot.slane %v12190_v55, 1  ;;  %v4640_v33 = vrot.slane %v12193_v42, 1 }
 0x4b4   : > { %v12199_v45 = vsel %vm751_vm1, %v4641_v20, %v4643_v31  ;;  %v12202_v13 = vsel %vm751_vm1, %v4640_v33, %v4641_v20 }
 0x4b5   : > { %4802 = vrot.lane.b32.xlu1 %v12199_v45, %s8269_s20  ;;  %4800 = vrot.lane.b32.xlu0 %v12202_v13, %s8269_s20 }
 0x4b6   : > { %v7500_v62 = vpop.f32.mrf.mxu1 }
 0x4b7   : > { %v4318_v38 = vadd.f32 %v7500_v62, %v12134_v2 }
 0x4b8   : > { %v4312_v43 = vpop.f32.mrf.mxu1 }
 0x4b9   : > { %v4483_v11 = vrot.slane %v4318_v38, 7  ;;  %v4313_v44 = vadd.f32 %v12134_v2, %v4312_v43 }
 0x4bb   : > { %v12211_v58 = vsel %vm585_vm0, %v4483_v11, 0.0  ;;  %v4482_v61 = vrot.slane %v4313_v44, 7 }
 0x4bc   : > { %v4648_v19 = vrot.slane %v12211_v58, 1 }
 0x4bd   : > { %v12214_v12 = vsel %vm585_vm0, %v4482_v61, %v4483_v11  ;;  %v12217_v57 = vsel %vm585_vm0, 0.0, %v4482_v61 }
 0x4be   : > { %14900 = vst [vmem:[#allocation100_spill] sm:$0xff] %v12214_v12  ;;  %v4646_v34 = vrot.slane %v12214_v12, 1  ;;  %v4645_v41 = vrot.slane %v12217_v57, 1 }
 0x4c0   : > { %v12223_v53 = vsel %vm751_vm1, %v4646_v34, %v4648_v19  ;;  %v12226_v1 = vsel %vm751_vm1, %v4645_v41, %v4646_v34 }
 0x4c1   : > { %4806 = vrot.lane.b32.xlu1 %v12223_v53, %s8269_s20  ;;  %4804 = vrot.lane.b32.xlu0 %v12226_v1, %s8269_s20 }
 0x4c2   : > { %v7503_v10 = vpop.f32.mrf.mxu1 }
 0x4c3   : > { %v4328_v54 = vadd.f32 %v7503_v10, %v12134_v2 }
 0x4c4   : > { %v4322_v16 = vpop.f32.mrf.mxu1 }
 0x4c5   : > { %v4486_v32 = vrot.slane %v4328_v54, 7  ;;  %v4323_v36 = vadd.f32 %v12134_v2, %v4322_v16 }
 0x4c7   : > { %v12235_v8 = vsel %vm585_vm0, %v4486_v32, 0.0  ;;  %v4485_v15 = vrot.slane %v4323_v36, 7 }
 0x4c8   : > { %v4653_v30 = vrot.slane %v12235_v8, 1 }
 0x4c9   : > { %v12238_v35 = vsel %vm585_vm0, %v4485_v15, %v4486_v32  ;;  %v12241_v52 = vsel %vm585_vm0, 0.0, %v4485_v15 }
 0x4ca   : > { %14901 = vst [vmem:[#allocation58_spill] sm:$0xff] %v12238_v35  ;;  %14902 = vst [vmem:[#allocation65_spill] sm:$0xff] %v12241_v52  ;;  %v4651_v37 = vrot.slane %v12238_v35, 1  ;;  %v4650_v0 = vrot.slane %v12241_v52, 1 }
 0x4cc   : > { %v12247_v40 = vsel %vm751_vm1, %v4651_v37, %v4653_v30  ;;  %v12250_v5 = vsel %vm751_vm1, %v4650_v0, %v4651_v37 }
 0x4cd   : > { %4810 = vrot.lane.b32.xlu1 %v12247_v40, %s8269_s20  ;;  %4808 = vrot.lane.b32.xlu0 %v12250_v5, %s8269_s20 }
 0x4ce   : > { %v7506_v9 = vpop.f32.mrf.mxu1 }
 0x4cf   : > { %v4338_v6 = vadd.f32 %v7506_v9, %v12134_v2 }
 0x4d0   : > { %v4332_v46 = vpop.f32.mrf.mxu1 }
 0x4d1   : > { %v4489_v4 = vrot.slane %v4338_v6, 7  ;;  %v4333_v26 = vadd.f32 %v12134_v2, %v4332_v46 }
 0x4d3   : > { %v12259_v59 = vsel %vm585_vm0, %v4489_v4, 0.0  ;;  %v4488_v27 = vrot.slane %v4333_v26, 7 }
 0x4d4   : > { %v4658_v20 = vrot.slane %v12259_v59, 1 }
 0x4d5   : > { %v12262_v47 = vsel %vm585_vm0, %v4488_v27, %v4489_v4  ;;  %v12265_v31 = vsel %vm585_vm0, 0.0, %v4488_v27 }
 0x4d6   : > { %14903 = vst [vmem:[#allocation107_spill] sm:$0xff] %v12262_v47  ;;  %14904 = vst [vmem:[#allocation59_spill] sm:$0xff] %v12265_v31  ;;  %v4656_v33 = vrot.slane %v12262_v47, 1  ;;  %v4655_v62 = vrot.slane %v12265_v31, 1 }
 0x4d8   : > { %v12271_v38 = vsel %vm751_vm1, %v4656_v33, %v4658_v20  ;;  %v12274_v43 = vsel %vm751_vm1, %v4655_v62, %v4656_v33 }
 0x4d9   : > { %4814 = vrot.lane.b32.xlu1 %v12271_v38, %s8269_s20  ;;  %4812 = vrot.lane.b32.xlu0 %v12274_v43, %s8269_s20  ;;  %v7509_v11 = vpop.f32.mrf.mxu1 }
 0x4da   : > { %v4348_v44 = vadd.f32 %v7509_v11, %v12134_v2 }
 0x4db   : > { %v4342_v61 = vpop.f32.mrf.mxu1 }
 0x4dc   : > { %v4492_v19 = vrot.slane %v4348_v44, 7  ;;  %v4343_v34 = vadd.f32 %v12134_v2, %v4342_v61 }
 0x4de   : > { %v12283_v41 = vsel %vm585_vm0, %v4492_v19, 0.0  ;;  %v4491_v10 = vrot.slane %v4343_v34, 7 }
 0x4df   : > { %v4663_v32 = vrot.slane %v12283_v41, 1 }
 0x4e0   : > { %v12286_v54 = vsel %vm585_vm0, %v4491_v10, %v4492_v19  ;;  %v12289_v16 = vsel %vm585_vm0, 0.0, %v4491_v10 }
 0x4e1   : > { %v4661_v36 = vrot.slane %v12286_v54, 1  ;;  %v4660_v15 = vrot.slane %v12289_v16, 1 }
 0x4e3   : > { %v12295_v30 = vsel %vm751_vm1, %v4661_v36, %v4663_v32  ;;  %v12298_v37 = vsel %vm751_vm1, %v4660_v15, %v4661_v36 }
 0x4e4   : > { %4818 = vrot.lane.b32.xlu1 %v12295_v30, %s8269_s20  ;;  %4816 = vrot.lane.b32.xlu0 %v12298_v37, %s8269_s20 }
 0x4e5   : > { %v7512_v0 = vpop.f32.mrf.mxu1 }
 0x4e6   : > { %v4358_v9 = vadd.f32 %v7512_v0, %v12134_v2 }
 0x4e7   : > { %v4352_v6 = vpop.f32.mrf.mxu1 }
 0x4e8   : > { %v4495_v46 = vrot.slane %v4358_v9, 7  ;;  %v4353_v4 = vadd.f32 %v12134_v2, %v4352_v6 }
 0x4ea   : > { %v12307_v26 = vsel %vm585_vm0, %v4495_v46, 0.0  ;;  %v4494_v27 = vrot.slane %v4353_v4, 7 }
 0x4eb   : > { %v4668_v62 = vrot.slane %v12307_v26, 1 }
 0x4ec   : > { %v12310_v20 = vsel %vm585_vm0, %v4494_v27, %v4495_v46  ;;  %v12313_v33 = vsel %vm585_vm0, 0.0, %v4494_v27 }
 0x4ed   : > { %v4666_v11 = vrot.slane %v12310_v20, 1  ;;  %v4665_v44 = vrot.slane %v12313_v33, 1 }
 0x4ef   : > { %v12319_v61 = vsel %vm751_vm1, %v4666_v11, %v4668_v62  ;;  %v12322_v19 = vsel %vm751_vm1, %v4665_v44, %v4666_v11 }
 0x4f0   : > { %4822 = vrot.lane.b32.xlu1 %v12319_v61, %s8269_s20  ;;  %4820 = vrot.lane.b32.xlu0 %v12322_v19, %s8269_s20 }
 0x4f1   : > { %v7515_v34 = vpop.f32.mrf.mxu1 }
 0x4f2   : > { %v4368_v10 = vadd.f32 %v7515_v34, %v12134_v2 }
 0x4f3   : > { %v4362_v32 = vpop.f32.mrf.mxu1 }
 0x4f4   : > { %v4498_v36 = vrot.slane %v4368_v10, 7  ;;  %v4363_v15 = vadd.f32 %v12134_v2, %v4362_v32 }
 0x4f6   : > { %v12331_v0 = vsel %vm585_vm0, %v4498_v36, 0.0  ;;  %v4497_v9 = vrot.slane %v4363_v15, 7 }
 0x4f7   : > { %v4673_v4 = vrot.slane %v12331_v0, 1 }
 0x4f8   : > { %v12334_v6 = vsel %vm585_vm0, %v4497_v9, %v4498_v36  ;;  %v12337_v46 = vsel %vm585_vm0, 0.0, %v4497_v9 }
 0x4f9   : > { %v4671_v27 = vrot.slane %v12334_v6, 1  ;;  %v4670_v62 = vrot.slane %v12337_v46, 1 }
 0x4fb   : > { %v12343_v11 = vsel %vm751_vm1, %v4671_v27, %v4673_v4  ;;  %v12346_v44 = vsel %vm751_vm1, %v4670_v62, %v4671_v27 }
 0x4fc   : > { %4826 = vrot.lane.b32.xlu1 %v12343_v11, %s8269_s20  ;;  %4824 = vrot.lane.b32.xlu0 %v12346_v44, %s8269_s20 }
 0x4fd   : > { %v7518_v34 = vpop.f32.mrf.mxu1 }
 0x4fe   : > { %v4378_v10 = vadd.f32 %v7518_v34, %v12134_v2 }
 0x4ff   : > { %v4372_v32 = vpop.f32.mrf.mxu1 }
 0x500   : > { %v4501_v36 = vrot.slane %v4378_v10, 7  ;;  %v4373_v15 = vadd.f32 %v12134_v2, %v4372_v32 }
 0x502   : > { %v12355_v9 = vsel %vm585_vm0, %v4501_v36, 0.0  ;;  %v4500_v4 = vrot.slane %v4373_v15, 7 }
 0x503   : > { %14905 = vst [vmem:[#allocation37_spill] sm:$0xff] %v12355_v9  ;;  %v4678_v39 = vrot.slane %v12355_v9, 1 }
 0x504   : > { %v12358_v27 = vsel %vm585_vm0, %v4500_v4, %v4501_v36  ;;  %v12361_v62 = vsel %vm585_vm0, 0.0, %v4500_v4 }
 0x505   : > { %v4676_v60 = vrot.slane %v12358_v27, 1  ;;  %v4675_v34 = vrot.slane %v12361_v62, 1 }
 0x507   : > { %v12367_v10 = vsel %vm751_vm1, %v4676_v60, %v4678_v39  ;;  %v12370_v32 = vsel %vm751_vm1, %v4675_v34, %v4676_v60 }
 0x508   : > { %4830 = vrot.lane.b32.xlu1 %v12367_v10, %s8269_s20  ;;  %4828 = vrot.lane.b32.xlu0 %v12370_v32, %s8269_s20 }
 0x509   : > { %v7521_v36 = vpop.f32.mrf.mxu1 }
 0x50a   : > { %v4388_v15 = vadd.f32 %v7521_v36, %v12134_v2 }
 0x50b   : > { %v4382_v4 = vpop.f32.mrf.mxu1 }
 0x50c   : > { %v4504_v56 = vrot.slane %v4388_v15, 7  ;;  %v4383_v3 = vadd.f32 %v12134_v2, %v4382_v4 }
 0x50e   : > { %v12379_v50 = vsel %vm585_vm0, %v4504_v56, 0.0  ;;  %v4503_v39 = vrot.slane %v4383_v3, 7 }
 0x50f   : > { %14906 = vst [vmem:[#allocation19_spill] sm:$0xff] %v12379_v50  ;;  %v4683_v24 = vrot.slane %v12379_v50, 1 }
 0x510   : > { %v12382_v60 = vsel %vm585_vm0, %v4503_v39, %v4504_v56  ;;  %v12385_v34 = vsel %vm585_vm0, 0.0, %v4503_v39 }
 0x511   : > { %14907 = vst [vmem:[#allocation61_spill] sm:$0xff] %v12382_v60  ;;  %14908 = vst [vmem:[#allocation25_spill] sm:$0xff] %v12385_v34  ;;  %v4681_v23 = vrot.slane %v12382_v60, 1  ;;  %v4680_v36 = vrot.slane %v12385_v34, 1 }
 0x513   : > { %v12391_v15 = vsel %vm751_vm1, %v4681_v23, %v4683_v24  ;;  %v12394_v4 = vsel %vm751_vm1, %v4680_v36, %v4681_v23 }
 0x514   : > { %14909 = vst [vmem:[#allocation63_spill] sm:$0xff] %v12391_v15  ;;  %14910 = vst [vmem:[#allocation4_spill] sm:$0xff] %v12394_v4  ;;  %4834 = vrot.lane.b32.xlu1 %v12391_v15, %s8269_s20  ;;  %4832 = vrot.lane.b32.xlu0 %v12394_v4, %s8269_s20 }
 0x515   : > { %v7524_v3 = vpop.f32.mrf.mxu1 }
 0x516   : > { %v4398_v56 = vadd.f32 %v7524_v3, %v12134_v2 }
 0x517   : > { %v4392_v39 = vpop.f32.mrf.mxu1 }
 0x518   : > { %v4507_v18 = vrot.slane %v4398_v56, 7  ;;  %v4393_v50 = vadd.f32 %v12134_v2, %v4392_v39 }
 0x51a   : > { %v12403_v60 = vsel %vm585_vm0, %v4507_v18, 0.0  ;;  %v4506_v24 = vrot.slane %v4393_v50, 7 }
 0x51b   : > { %14911 = vst [vmem:[#allocation60_spill] sm:$0xff] %v12403_v60  ;;  %v4688_v15 = vrot.slane %v12403_v60, 1 }
 0x51c   : > { %v12406_v23 = vsel %vm585_vm0, %v4506_v24, %v4507_v18  ;;  %v12409_v36 = vsel %vm585_vm0, 0.0, %v4506_v24 }
 0x51d   : > { %14912 = vst [vmem:[#allocation10_spill] sm:$0xff] %v12406_v23  ;;  %14913 = vst [vmem:[#allocation84_spill] sm:$0xff] %v12409_v36  ;;  %v4686_v4 = vrot.slane %v12406_v23, 1  ;;  %v4685_v3 = vrot.slane %v12409_v36, 1 }
 0x51f   : > { %v12415_v56 = vsel %vm751_vm1, %v4686_v4, %v4688_v15  ;;  %v12418_v39 = vsel %vm751_vm1, %v4685_v3, %v4686_v4 }
 0x520   : > { %14914 = vst [vmem:[#allocation64_spill] sm:$0xff] %v12415_v56  ;;  %14915 = vst [vmem:[#allocation114_spill] sm:$0xff] %v12418_v39  ;;  %4838 = vrot.lane.b32.xlu1 %v12415_v56, %s8269_s20  ;;  %4836 = vrot.lane.b32.xlu0 %v12418_v39, %s8269_s20 }
 0x521   : > { %v7527_v18 = vpop.f32.mrf.mxu1 }
 0x522   : > { %v4408_v50 = vadd.f32 %v7527_v18, %v12134_v2 }
 0x523   : > { %v4402_v24 = vpop.f32.mrf.mxu1 }
 0x524   : > { %v4510_v60 = vrot.slane %v4408_v50, 7  ;;  %v4403_v23 = vadd.f32 %v12134_v2, %v4402_v24 }
 0x526   : > { %v12427_v36 = vsel %vm585_vm0, %v4510_v60, 0.0  ;;  %v4509_v15 = vrot.slane %v4403_v23, 7 }
 0x527   : > { %14916 = vst [vmem:[#allocation6_spill] sm:$0xff] %v12427_v36  ;;  %v4693_v56 = vrot.slane %v12427_v36, 1 }
 0x528   : > { %v12430_v4 = vsel %vm585_vm0, %v4509_v15, %v4510_v60  ;;  %v12433_v3 = vsel %vm585_vm0, 0.0, %v4509_v15 }
 0x529   : > { %14917 = vst [vmem:[#allocation86_spill] sm:$0xff] %v12430_v4  ;;  %14918 = vst [vmem:[#allocation29_spill] sm:$0xff] %v12433_v3  ;;  %v4691_v39 = vrot.slane %v12430_v4, 1  ;;  %v4690_v18 = vrot.slane %v12433_v3, 1 }
 0x52b   : > { %v12439_v50 = vsel %vm751_vm1, %v4691_v39, %v4693_v56  ;;  %v12442_v24 = vsel %vm751_vm1, %v4690_v18, %v4691_v39 }
 0x52c   : > { %14919 = vst [vmem:[#allocation81_spill] sm:$0xff] %v12439_v50  ;;  %14920 = vst [vmem:[#allocation82_spill] sm:$0xff] %v12442_v24  ;;  %4842 = vrot.lane.b32.xlu1 %v12439_v50, %s8269_s20  ;;  %4840 = vrot.lane.b32.xlu0 %v12442_v24, %s8269_s20 }
 0x52d   : > { %v7530_v60 = vpop.f32.mrf.mxu1 }
 0x52e   : > { %v4418_v23 = vadd.f32 %v7530_v60, %v12134_v2 }
 0x52f   : > { %v4412_v15 = vpop.f32.mrf.mxu1 }
 0x530   : > { %v4513_v36 = vrot.slane %v4418_v23, 7  ;;  %v4413_v4 = vadd.f32 %v12134_v2, %v4412_v15 }
 0x532   : > { %v12451_v3 = vsel %vm585_vm0, %v4513_v36, 0.0  ;;  %v4512_v56 = vrot.slane %v4413_v4, 7 }
 0x533   : > { %14921 = vst [vmem:[#allocation87_spill] sm:$0xff] %v12451_v3  ;;  %v4698_v50 = vrot.slane %v12451_v3, 1 }
 0x534   : > { %v12454_v39 = vsel %vm585_vm0, %v4512_v56, %v4513_v36  ;;  %v12457_v18 = vsel %vm585_vm0, 0.0, %v4512_v56 }
 0x535   : > { %14922 = vst [vmem:[#allocation80_spill] sm:$0xff] %v12454_v39  ;;  %14923 = vst [vmem:[#allocation95_spill] sm:$0xff] %v12457_v18  ;;  %v4696_v24 = vrot.slane %v12454_v39, 1  ;;  %v4695_v60 = vrot.slane %v12457_v18, 1 }
 0x537   : > { %v12463_v23 = vsel %vm751_vm1, %v4696_v24, %v4698_v50  ;;  %v12466_v15 = vsel %vm751_vm1, %v4695_v60, %v4696_v24 }
 0x538   : > { %14924 = vst [vmem:[#allocation83_spill] sm:$0xff] %v12463_v23  ;;  %14925 = vst [vmem:[#allocation121_spill] sm:$0xff] %v12466_v15  ;;  %4846 = vrot.lane.b32.xlu1 %v12463_v23, %s8269_s20  ;;  %4844 = vrot.lane.b32.xlu0 %v12466_v15, %s8269_s20 }
 0x53d   : > { %v7533_v36 = vpop.f32.mrf.mxu1 }
 0x53e   : > { %v4428_v4 = vadd.f32 %v7533_v36, %v12134_v2 }
 0x53f   : > { %v4422_v3 = vpop.f32.mrf.mxu1 }
 0x540   : > { %v4516_v56 = vrot.slane %v4428_v4, 7  ;;  %v4423_v39 = vadd.f32 %v12134_v2, %v4422_v3  ;;  %v4705_v4 = vrot.slane %v12145_v21, 2 }
 0x542   : > { %v12475_v18 = vsel %vm585_vm0, %v4516_v56, 0.0  ;;  %v4515_v50 = vrot.slane %v4423_v39, 7  ;;  %v4706_v39 = vrot.slane %v12142_v14, 2 }
 0x543   : > { %14926 = vst [vmem:[#allocation88_spill] sm:$0xff] %v12475_v18  ;;  %v4703_v23 = vrot.slane %v12475_v18, 1 }
 0x544   : > { %v12478_v24 = vsel %vm585_vm0, %v4515_v50, %v4516_v56  ;;  %v12481_v60 = vsel %vm585_vm0, 0.0, %v4515_v50  ;;  %v4708_v56 = vrot.slane %v12139_v28, 2  ;;  %v4707_v18 = vsel %vm832_vm2, %v4705_v4, %v4706_v39 }
 0x545   : > { %14927 = vst [vmem:[#allocation97_spill] sm:$0xff] %v12478_v24  ;;  %14928 = vst [vmem:[#allocation22_spill] sm:$0xff] %v12481_v60  ;;  %v4701_v15 = vrot.slane %v12478_v24, 1  ;;  %v4700_v36 = vrot.slane %v12481_v60, 1  ;;  %v4710_v24 = vrot.slane %v12169_v29, 2  ;;  %v4715_v28 = vrot.slane %v12193_v42, 2 }
 0x546   : > { %v4709_v50 = vsel %vm832_vm2, %v4706_v39, %v4708_v56  ;;  %v4716_v56 = vrot.slane %v12190_v55, 2 }
 0x547   : > { %v12488_v2 = vsel %vm751_vm1, %v4701_v15, %v4703_v23  ;;  %v12491_v3 = vsel %vm751_vm1, %v4700_v36, %v4701_v15  ;;  %v4711_v23 = vrot.slane %v12166_v7, 2  ;;  %v4713_v15 = vrot.slane %v12163_v48, 2  ;;  %v5786_v48 = vld [vmem:[%s14020_s9 + $0x20] sm:$0xf] }
 0x548   : > { %14929 = vst [vmem:[#allocation92_spill] sm:$0xff] %v12488_v2  ;;  %14930 = vst [vmem:[#allocation93_spill] sm:$0xff] %v12491_v3  ;;  %4850 = vrot.lane.b32.xlu1 %v12488_v2, %s8269_s20  ;;  %4848 = vrot.lane.b32.xlu0 %v12491_v3, %s8269_s20  ;;  %v4717_v4 = vsel %vm832_vm2, %v4715_v28, %v4716_v56  ;;  %s14931_s20 = smov 16  }
 0x549   : > { %v4714_v36 = vsel %vm832_vm2, %v4711_v23, %v4713_v15  ;;  %v4712_v2 = vsel %vm832_vm2, %v4710_v24, %v4711_v23  ;;  %7537 = vmatprep.subr.msk.mxu0 %vm3940_vm10, %v5786_v48  ;;  %v5782_v24 = vld [vmem:[%s14020_s9] sm:$0xff] }
 0x54a   : > { %7538 = vmatpush3.msk.msra.mxu0 %vm3940_vm10, %v5786_v48 }
 0x54c   : > { %4884 = vrot.lane.b32.xlu1 %v4709_v50, %s8270_s17  ;;  %4882 = vrot.lane.b32.xlu0 %v4707_v18, %s8270_s17 }
 0x550   : > { %4888 = vrot.lane.b32.xlu1 %v4714_v36, %s8270_s17  ;;  %4886 = vrot.lane.b32.xlu0 %v4712_v2, %s8270_s17 }
 0x554   : > { %4972 = vrot.lane.b32.xlu1 %v12145_v21, %s8271_s23  ;;  %4890 = vrot.lane.b32.xlu0 %v4717_v4, %s8270_s17 }
 0x558   : > { %5068 = vrot.lane.b32.xlu1 %v12154_v17, %s14931_s20  ;;  %4974 = vrot.lane.b32.xlu0 %v12142_v14, %s8271_s23  ;;  %v5785_v17 = vld [vmem:[%s14020_s9 + $0x18] sm:$0xff] }
 0x559   : > { %7539 = vmatprep.subr.mxu0 %v5785_v17 }
 0x55a   : > { %7540 = vmatpush3.msra.mxu0 %v5785_v17 }
 0x55c   : > { %5164 = vrot.lane.b32.xlu1 %v4707_v18, %s8272_s26  ;;  %5070 = vrot.lane.b32.xlu0 %v12151_v51, %s14931_s20  ;;  %v5784_v51 = vld [vmem:[%s14020_s9 + $0x10] sm:$0xff]  ;;  %v5783_v18 = vld [vmem:[%s14020_s9 + $0x8] sm:$0xff] }
 0x55d   : > { %7541 = vmatprep.subr.mxu0 %v5784_v51 }
 0x55e   : > { %7542 = vmatpush3.msra.mxu0 %v5784_v51  ;;  %v4720_v51 = vrot.slane %v12217_v57, 2 }
 0x55f   : > { %7543 = vmatprep.subr.mxu0 %v5783_v18 }
 0x560   : > { %5260 = vrot.lane.b32.xlu1 %v12169_v29, %s8273_s16  ;;  %5166 = vrot.lane.b32.xlu0 %v4709_v50, %s8272_s26  ;;  %v4718_v50 = vrot.slane %v12187_v25, 2 }
 0x561   : > { %7544 = vmatpush3.msra.mxu0 %v5783_v18  ;;  %v4721_v18 = vrot.slane %v12214_v12, 2 }
 0x562   : > { %7545 = vmatprep.subr.mxu0 %v5782_v24 }
 0x563   : > { %7546 = vmatpush3.msra.mxu0 %v5782_v24 }
 0x564   : > { %5262 = vrot.lane.b32.xlu1 %v12166_v7, %s8273_s16  ;;  %4976 = vrot.lane.b32.xlu0 %v12169_v29, %s8271_s23 }
 0x568   : > { %4978 = vrot.lane.b32.xlu1 %v12166_v7, %s8271_s23  ;;  %5350 = vrot.lane.b32.xlu0 %v12178_v63, %s8274_s21 }
 0x56c   : > { %5352 = vrot.lane.b32.xlu1 %v12175_v49, %s8274_s21  ;;  %5072 = vrot.lane.b32.xlu0 %v12178_v63, %s14931_s20  ;;  %v12573_v63 = vpop.permute.xlu1 %4794 }
 0x570   : > { %5074 = vrot.lane.b32.xlu1 %v12175_v49, %s14931_s20  ;;  %5440 = vrot.lane.b32.xlu0 %v4712_v2, %s8263_s25  ;;  %v12571_v49 = vpop.permute.xlu0 %4792  ;;  %v12581_v39 = vpop.permute.xlu1 %4798 }
 0x574   : > { %5442 = vrot.lane.b32.xlu1 %v4714_v36, %s8263_s25  ;;  %5168 = vrot.lane.b32.xlu0 %v4712_v2, %s8272_s26  ;;  %v12579_v2 = vpop.permute.xlu0 %4796  ;;  %v12589_v15 = vpop.permute.xlu1 %4802 }
 0x578   : > { %5264 = vrot.lane.b32.xlu1 %v12193_v42, %s8273_s16  ;;  %5170 = vrot.lane.b32.xlu0 %v4714_v36, %s8272_s26  ;;  %v12587_v23 = vpop.permute.xlu0 %4800  ;;  %v4719_v36 = vsel %vm832_vm2, %v4716_v56, %v4718_v50  ;;  %v12596_v28 = vpop.permute.xlu1 %4806 }
 0x579   : > { %14932 = vst [vmem:[#allocation98_spill] sm:$0xff] %v12596_v28 }
 0x57c   : > { %5266 = vrot.lane.b32.xlu1 %v12190_v55, %s8273_s16  ;;  %4980 = vrot.lane.b32.xlu0 %v12193_v42, %s8271_s23 }
 0x580   : > { %4982 = vrot.lane.b32.xlu1 %v12190_v55, %s8271_s23  ;;  %5354 = vrot.lane.b32.xlu0 %v12202_v13, %s8274_s21 }
 0x584   : > { %5356 = vrot.lane.b32.xlu1 %v12199_v45, %s8274_s21  ;;  %5076 = vrot.lane.b32.xlu0 %v12202_v13, %s14931_s20  ;;  %v12594_v13 = vpop.permute.xlu0 %4804 }
 0x588   : > { %5078 = vrot.lane.b32.xlu1 %v12199_v45, %s14931_s20  ;;  %5444 = vrot.lane.b32.xlu0 %v4717_v4, %s8263_s25  ;;  %v12601_v25 = vpop.permute.xlu0 %4808  ;;  %v12603_v45 = vpop.permute.xlu1 %4810 }
 0x589   : > { %14933 = vst [vmem:[#allocation91_spill] sm:$0xff] %v12601_v25  ;;  %14934 = vst [vmem:[#allocation106_spill] sm:$0xff] %v12603_v45 }
 0x58c   : > { %5446 = vrot.lane.b32.xlu1 %v4719_v36, %s8263_s25  ;;  %5172 = vrot.lane.b32.xlu0 %v4717_v4, %s8272_s26  ;;  %v12608_v56 = vpop.permute.xlu0 %4812  ;;  %v12610_v4 = vpop.permute.xlu1 %4814 }
 0x58d   : > { %14935 = vst [vmem:[#allocation94_spill] sm:$0xff] %v12608_v56  ;;  %14936 = vst [vmem:[#allocation99_spill] sm:$0xff] %v12610_v4 }
 0x590   : > { %5268 = vrot.lane.b32.xlu1 %v12217_v57, %s8273_s16  ;;  %5174 = vrot.lane.b32.xlu0 %v4719_v36, %s8272_s26  ;;  %v12616_v48 = vpop.permute.xlu0 %4816  ;;  %v12618_v17 = vpop.permute.xlu1 %4818 }
 0x591   : > { %14937 = vst [vmem:[#allocation108_spill] sm:$0xff] %v12616_v48  ;;  %14938 = vst [vmem:[#allocation103_spill] sm:$0xff] %v12618_v17  ;;  %v4730_v17 = vrot.slane %v12265_v31, 2  ;;  %v4731_v48 = vrot.slane %v12262_v47, 2 }
 0x593   : > { %v4732_v56 = vsel %vm832_vm2, %v4730_v17, %v4731_v48 }
 0x594   : > { %4984 = vrot.lane.b32.xlu1 %v12217_v57, %s8271_s23  ;;  %4892 = vrot.lane.b32.xlu0 %v4719_v36, %s8270_s17  ;;  %v12626_v24 = vpop.permute.xlu0 %4820  ;;  %v12628_v50 = vpop.permute.xlu1 %4822  ;;  %v4722_v36 = vsel %vm832_vm2, %v4720_v51, %v4721_v18 }
 0x595   : > { %14939 = vst [vmem:[#allocation104_spill] sm:$0xff] %v12626_v24  ;;  %14940 = vst [vmem:[#allocation109_spill] sm:$0xff] %v12628_v50 }
 0x598   : > { %5358 = vrot.lane.b32.xlu1 %v12226_v1, %s8274_s21  ;;  %5270 = vrot.lane.b32.xlu0 %v12214_v12, %s8273_s16  ;;  %v12634_v3 = vpop.permute.xlu0 %4824  ;;  %v12636_v60 = vpop.permute.xlu1 %4826 }
 0x599   : > { %14941 = vst [vmem:[#allocation102_spill] sm:$0xff] %v12634_v3  ;;  %14942 = vst [vmem:[#allocation116_spill] sm:$0xff] %v12636_v60 }
 0x59c   : > { %5080 = vrot.lane.b32.xlu1 %v12226_v1, %s14931_s20  ;;  %4986 = vrot.lane.b32.xlu0 %v12214_v12, %s8271_s23  ;;  %v4723_v1 = vrot.slane %v12211_v58, 2  ;;  %v12642_v24 = vpop.permute.xlu0 %4828  ;;  %v12644_v50 = vpop.permute.xlu1 %4830 }
 0x59d   : > { %14943 = vst [vmem:[#allocation105_spill] sm:$0xff] %v12642_v24  ;;  %14944 = vst [vmem:[#allocation110_spill] sm:$0xff] %v12644_v50 }
 0x59e   : > { %v4724_v51 = vsel %vm832_vm2, %v4721_v18, %v4723_v1 }
 0x5a0   : > { %5448 = vrot.lane.b32.xlu1 %v4722_v36, %s8263_s25  ;;  %5360 = vrot.lane.b32.xlu0 %v12223_v53, %s8274_s21  ;;  %v12649_v3 = vpop.permute.xlu0 %4832  ;;  %v12651_v60 = vpop.permute.xlu1 %4834 }
 0x5a1   : > { %14945 = vst [vmem:[#allocation117_spill] sm:$0xff] %v12649_v3  ;;  %14946 = vst [vmem:[#allocation62_spill] sm:$0xff] %v12651_v60  ;;  %v4726_v60 = vrot.slane %v12238_v35, 2 }
 0x5a4   : > { %5176 = vrot.lane.b32.xlu1 %v4722_v36, %s8272_s26  ;;  %5082 = vrot.lane.b32.xlu0 %v12223_v53, %s14931_s20  ;;  %v12656_v58 = vpop.permute.xlu0 %4836  ;;  %v12658_v53 = vpop.permute.xlu1 %4838 }
 0x5a5   : > { %14947 = vst [vmem:[#allocation112_spill] sm:$0xff] %v12656_v58  ;;  %14948 = vst [vmem:[#allocation113_spill] sm:$0xff] %v12658_v53  ;;  %v4725_v53 = vrot.slane %v12241_v52, 2 }
 0x5a8   : > { %4894 = vrot.lane.b32.xlu1 %v4722_v36, %s8270_s17  ;;  %5450 = vrot.lane.b32.xlu0 %v4724_v51, %s8263_s25  ;;  %v12663_v18 = vpop.permute.xlu0 %4840  ;;  %v12665_v36 = vpop.permute.xlu1 %4842 }
 0x5a9   : > { %14949 = vst [vmem:[#allocation141_spill] sm:$0xff] %v12663_v18  ;;  %14950 = vst [vmem:[#allocation118_spill] sm:$0xff] %v12665_v36  ;;  %v4727_v18 = vsel %vm832_vm2, %v4725_v53, %v4726_v60 }
 0x5ac   : > { %5272 = vrot.lane.b32.xlu1 %v12241_v52, %s8273_s16  ;;  %5178 = vrot.lane.b32.xlu0 %v4724_v51, %s8272_s26  ;;  %v12671_v1 = vpop.permute.xlu0 %4844  ;;  %v12673_v58 = vpop.permute.xlu1 %4846 }
 0x5ad   : > { %14951 = vst [vmem:[#allocation111_spill] sm:$0xff] %v12671_v1  ;;  %14952 = vst [vmem:[#allocation125_spill] sm:$0xff] %v12673_v58 }
 0x5b0   : > { %4988 = vrot.lane.b32.xlu1 %v12241_v52, %s8271_s23  ;;  %4896 = vrot.lane.b32.xlu0 %v4724_v51, %s8270_s17 }
 0x5b4   : > { %5362 = vrot.lane.b32.xlu1 %v12250_v5, %s8274_s21  ;;  %5274 = vrot.lane.b32.xlu0 %v12238_v35, %s8273_s16 }
 0x5b8   : > { %5084 = vrot.lane.b32.xlu1 %v12250_v5, %s14931_s20  ;;  %4990 = vrot.lane.b32.xlu0 %v12238_v35, %s8271_s23  ;;  %v4728_v5 = vrot.slane %v12235_v8, 2 }
 0x5ba   : > { %v12681_v51 = vpop.permute.xlu0 %4848  ;;  %v12683_v36 = vpop.permute.xlu1 %4850  ;;  %v4729_v53 = vsel %vm832_vm2, %v4726_v60, %v4728_v5 }
 0x5bb   : > { %14953 = vst [vmem:[#allocation115_spill] sm:$0xff] %v12681_v51  ;;  %14954 = vst [vmem:[#allocation119_spill] sm:$0xff] %v12683_v36 }
 0x5bc   : > { %5452 = vrot.lane.b32.xlu1 %v4727_v18, %s8263_s25  ;;  %5364 = vrot.lane.b32.xlu0 %v12247_v40, %s8274_s21 }
 0x5be   : > { %v12689_v58 = vpop.permute.xlu0 %4882  ;;  %v12691_v1 = vpop.permute.xlu1 %4884 }
 0x5c0   : > { %5180 = vrot.lane.b32.xlu1 %v4727_v18, %s8272_s26  ;;  %5086 = vrot.lane.b32.xlu0 %v12247_v40, %s14931_s20 }
 0x5c2   : > { %v12697_v51 = vpop.permute.xlu0 %4886  ;;  %v12699_v36 = vpop.permute.xlu1 %4888 }
 0x5c4   : > { %4898 = vrot.lane.b32.xlu1 %v4727_v18, %s8270_s17  ;;  %5454 = vrot.lane.b32.xlu0 %v4729_v53, %s8263_s25 }
 0x5c6   : > { %v12704_v3 = vpop.permute.xlu0 %4890  ;;  %v4973_v50 = vpop.permute.xlu1 %4972 }
 0x5c8   : > { %5182 = vrot.lane.b32.xlu0 %v4729_v53, %s8272_s26  ;;  %5276 = vrot.lane.b32.xlu1 %v12265_v31, %s8273_s16 }
 0x5ca   : > { %v4975_v40 = vpop.permute.xlu0 %4974  ;;  %v5069_v8 = vpop.permute.xlu1 %5068 }
 0x5cc   : > { %4900 = vrot.lane.b32.xlu0 %v4729_v53, %s8270_s17  ;;  %4992 = vrot.lane.b32.xlu1 %v12265_v31, %s8271_s23  ;;  %v14955_v31 = vld [vmem:[#allocation3_spill] sm:$0xff] }
 0x5ce   : > { %v5071_v60 = vpop.permute.xlu0 %5070  ;;  %v5165_v5 = vpop.permute.xlu1 %5164 }
 0x5d0   : > { %5278 = vrot.lane.b32.xlu0 %v12262_v47, %s8273_s16  ;;  %5366 = vrot.lane.b32.xlu1 %v12274_v43, %s8274_s21 }
 0x5d2   : > { %v5167_v18 = vpop.permute.xlu0 %5166  ;;  %v5261_v24 = vpop.permute.xlu1 %5260 }
 0x5d4   : > { %4994 = vrot.lane.b32.xlu0 %v12262_v47, %s8271_s23  ;;  %5088 = vrot.lane.b32.xlu1 %v12274_v43, %s14931_s20  ;;  %v4733_v47 = vrot.slane %v12259_v59, 2  ;;  %v5590_v43 = vsel %vm3635_vm13, %v14955_v31, %v4973_v50  ;;  %v5591_v59 = vsel %vm3635_vm13, %v11540_v22, %v4975_v40  ;;  %v4736_v40 = vrot.slane %v12286_v54, 2 }
 0x5d5   : > { %v5622_v17 = vsel %vm1597_vm3, %v5590_v43, %v5069_v8  ;;  %v5623_v28 = vsel %vm1597_vm3, %v5591_v59, %v5071_v60 }
 0x5d6   : > { %v4977_v53 = vpop.permute.xlu0 %4976  ;;  %v5263_v4 = vpop.permute.xlu1 %5262  ;;  %v4734_v34 = vsel %vm832_vm2, %v4731_v48, %v4733_v47  ;;  %v5654_v9 = vsel %vm3700_vm14, %v5622_v17, %v5165_v5  ;;  %v5655_v47 = vsel %vm3700_vm14, %v5623_v28, %v5167_v18  ;;  %v5530_v18 = vsel %vm3569_vm11, %v12145_v21, %v12571_v49 }
 0x5d7   : > { %v5560_v43 = vsel %vm3602_vm12, %v5530_v18, %v12689_v58  ;;  %v4738_v49 = vrot.slane %v12283_v41, 2 }
 0x5d8   : > { %5368 = vrot.lane.b32.xlu0 %v12271_v38, %s8274_s21  ;;  %5456 = vrot.lane.b32.xlu1 %v4732_v56, %s8263_s25  ;;  %v5592_v17 = vsel %vm3635_vm13, %v5560_v43, %v4977_v53 }
 0x5da   : > { %v5351_v35 = vpop.permute.xlu0 %5350  ;;  %v4979_v45 = vpop.permute.xlu1 %4978 }
 0x5dc   : > { %5090 = vrot.lane.b32.xlu0 %v12271_v38, %s14931_s20  ;;  %5184 = vrot.lane.b32.xlu1 %v4732_v56, %s8272_s26  ;;  %v5686_v38 = vsel %vm3733_vm15, %v5654_v9, %v5261_v24  ;;  %v5687_v9 = vsel %vm3733_vm15, %v5655_v47, %v5263_v4  ;;  %v4735_v24 = vrot.slane %v12289_v16, 2 }
 0x5dd   : > { %v5718_v12 = vsel %vm3766_vm5, %v5686_v38, %v5351_v35 }
 0x5de   : > { %v5073_v52 = vpop.permute.xlu0 %5072  ;;  %v5353_v25 = vpop.permute.xlu1 %5352  ;;  %v4737_v5 = vsel %vm832_vm2, %v4735_v24, %v4736_v40 }
 0x5df   : > { %v5719_v22 = vsel %vm3766_vm5, %v5687_v9, %v5353_v25  ;;  %v5624_v59 = vsel %vm1597_vm3, %v5592_v17, %v5073_v52 }
 0x5e0   : > { %5458 = vrot.lane.b32.xlu0 %v4734_v34, %s8263_s25  ;;  %4902 = vrot.lane.b32.xlu1 %v4732_v56, %s8270_s17 }
 0x5e2   : > { %v5441_v31 = vpop.permute.xlu0 %5440  ;;  %v5075_v50 = vpop.permute.xlu1 %5074 }
 0x5e3   : > { %v5750_v8 = vsel %vm1630_vm4, %v5718_v12, %v5441_v31  ;;  %v5531_v31 = vsel %vm3569_vm11, %v12142_v14, %v12573_v63 }
 0x5e4   : > { %5186 = vrot.lane.b32.xlu0 %v4734_v34, %s8272_s26  ;;  %5280 = vrot.lane.b32.xlu1 %v12289_v16, %s8273_s16  ;;  %v5561_v58 = vsel %vm3602_vm12, %v5531_v31, %v12691_v1 }
 0x5e5   : > { %7547 = vmatprep.mubr.msk.f32.mxu0 %vm3843_vm6, %v5750_v8  ;;  %v5593_v52 = vsel %vm3635_vm13, %v5561_v58, %v4979_v45 }
 0x5e6   : > { %v5169_v35 = vpop.permute.xlu0 %5168  ;;  %v5443_v56 = vpop.permute.xlu1 %5442  ;;  %v5625_v63 = vsel %vm1597_vm3, %v5593_v52, %v5075_v50 }
 0x5e7   : > { %v5751_v48 = vsel %vm1630_vm4, %v5719_v22, %v5443_v56  ;;  %v5656_v21 = vsel %vm3700_vm14, %v5624_v59, %v5169_v35 }
 0x5e8   : > { %4904 = vrot.lane.b32.xlu0 %v4734_v34, %s8270_s17  ;;  %4996 = vrot.lane.b32.xlu1 %v12289_v16, %s8271_s23 }
 0x5e9   : > { %7548 = vmatmul.mubr.msk.f32.vlgmr.msra.gmra.mxu0 %vm3843_vm6, %v5751_v48 }
 0x5ea   : > { %v5171_v12 = vpop.permute.xlu0 %5170  ;;  %v5265_v28 = vpop.permute.xlu1 %5264 }
 0x5eb   : > { %v5688_v53 = vsel %vm3733_vm15, %v5656_v21, %v5265_v28  ;;  %v5657_v22 = vsel %vm3700_vm14, %v5625_v63, %v5171_v12 }
 0x5ec   : > { %5282 = vrot.lane.b32.xlu0 %v12286_v54, %s8273_s16  ;;  %5370 = vrot.lane.b32.xlu1 %v12298_v37, %s8274_s21 }
 0x5ee   : > { %v4981_v25 = vpop.permute.xlu0 %4980  ;;  %v5267_v4 = vpop.permute.xlu1 %5266 }
 0x5ef   : > { %v5689_v41 = vsel %vm3733_vm15, %v5657_v22, %v5267_v4 }
 0x5f0   : > { %4998 = vrot.lane.b32.xlu0 %v12286_v54, %s8271_s23  ;;  %5092 = vrot.lane.b32.xlu1 %v12298_v37, %s14931_s20 }
 0x5f2   : > { %v5355_v34 = vpop.permute.xlu0 %5354  ;;  %v12765_v60 = vpop.permute.xlu1 %4982 }
 0x5f3   : > { %v5720_v8 = vsel %vm3766_vm5, %v5688_v53, %v5355_v34  ;;  %v4741_v34 = vrot.slane %v12310_v20, 2 }
 0x5f4   : > { %5372 = vrot.lane.b32.xlu0 %v12295_v30, %s8274_s21  ;;  %5460 = vrot.lane.b32.xlu1 %v4737_v5, %s8263_s25 }
 0x5f6   : > { %v5077_v37 = vpop.permute.xlu0 %5076  ;;  %v5357_v38 = vpop.permute.xlu1 %5356 }
 0x5f7   : > { %v5721_v45 = vsel %vm3766_vm5, %v5689_v41, %v5357_v38 }
 0x5f8   : > { %5094 = vrot.lane.b32.xlu0 %v12295_v30, %s14931_s20  ;;  %5188 = vrot.lane.b32.xlu1 %v4737_v5, %s8272_s26  ;;  %v4739_v30 = vsel %vm832_vm2, %v4736_v40, %v4738_v49  ;;  %v4740_v40 = vrot.slane %v12313_v33, 2  ;;  %v4743_v49 = vrot.slane %v12307_v26, 2 }
 0x5fa   : > { %v5445_v47 = vpop.permute.xlu0 %5444  ;;  %v5079_v14 = vpop.permute.xlu1 %5078  ;;  %v4742_v31 = vsel %vm832_vm2, %v4740_v40, %v4741_v34 }
 0x5fb   : > { %v5752_v9 = vsel %vm1630_vm4, %v5720_v8, %v5445_v47 }
 0x5fc   : > { %5462 = vrot.lane.b32.xlu0 %v4739_v30, %s8263_s25  ;;  %4906 = vrot.lane.b32.xlu1 %v4737_v5, %s8270_s17  ;;  %v5532_v5 = vsel %vm3569_vm11, %v12169_v29, %v12579_v2 }
 0x5fd   : > { %7550 = vmatprep.mubr.msk.f32.mxu0 %vm3843_vm6, %v5752_v9  ;;  %v5562_v18 = vsel %vm3602_vm12, %v5532_v5, %v12697_v51 }
 0x5fe   : > { %v5173_v1 = vpop.permute.xlu0 %5172  ;;  %v5447_v35 = vpop.permute.xlu1 %5446  ;;  %v5594_v43 = vsel %vm3635_vm13, %v5562_v18, %v4981_v25  ;;  %v5535_v18 = vsel %vm3569_vm11, %v12190_v55, %v12589_v15 }
 0x5ff   : > { %v5753_v50 = vsel %vm1630_vm4, %v5721_v45, %v5447_v35  ;;  %v5626_v59 = vsel %vm1597_vm3, %v5594_v43, %v5077_v37  ;;  %v5533_v37 = vsel %vm3569_vm11, %v12166_v7, %v12581_v39  ;;  %v4744_v7 = vsel %vm832_vm2, %v4741_v34, %v4743_v49 }
 0x600   : > { %5190 = vrot.lane.b32.xlu0 %v4739_v30, %s8272_s26  ;;  %5284 = vrot.lane.b32.xlu1 %v12313_v33, %s8273_s16  ;;  %v5658_v29 = vsel %vm3700_vm14, %v5626_v59, %v5173_v1  ;;  %v5563_v58 = vsel %vm3602_vm12, %v5533_v37, %v12699_v36  ;;  %v4745_v1 = vrot.slane %v12337_v46, 2  ;;  %v4746_v35 = vrot.slane %v12334_v6, 2 }
 0x601   : > { %7551 = vmatmul.mubr.msk.f32.gmra.mxu0 %vm3843_vm6, %v5753_v50  ;;  %v5595_v53 = vsel %vm3635_vm13, %v5563_v58, %v12765_v60  ;;  %v5534_v50 = vsel %vm3569_vm11, %v12193_v42, %v12587_v23  ;;  %v4748_v43 = vrot.slane %v12331_v0, 2 }
 0x602   : > { %v5175_v56 = vpop.permute.xlu0 %5174  ;;  %v5269_v48 = vpop.permute.xlu1 %5268  ;;  %v5627_v47 = vsel %vm1597_vm3, %v5595_v53, %v5079_v14  ;;  %v4747_v34 = vsel %vm832_vm2, %v4745_v1, %v4746_v35  ;;  %v4750_v53 = vrot.slane %v12361_v62, 2 }
 0x603   : > { %v4749_v55 = vsel %vm832_vm2, %v4746_v35, %v4748_v43  ;;  %v14960_v43 = vld [vmem:[#allocation61_spill] sm:$0xff] }
 0x604   : > { %4908 = vrot.lane.b32.xlu0 %v4739_v30, %s8270_s17  ;;  %5000 = vrot.lane.b32.xlu1 %v12313_v33, %s8271_s23 }
 0x606   : > { %v12808_v12 = vpop.permute.xlu0 %4892  ;;  %v12810_v28 = vpop.permute.xlu1 %4984 }
 0x608   : > { %5286 = vrot.lane.b32.xlu0 %v12310_v20, %s8273_s16  ;;  %5374 = vrot.lane.b32.xlu1 %v12322_v19, %s8274_s21 }
 0x60a   : > { %v5271_v4 = vpop.permute.xlu0 %5270  ;;  %v5359_v24 = vpop.permute.xlu1 %5358 }
 0x60c   : > { %5002 = vrot.lane.b32.xlu0 %v12310_v20, %s8271_s23  ;;  %5096 = vrot.lane.b32.xlu1 %v12322_v19, %s14931_s20  ;;  %v5690_v19 = vsel %vm3733_vm15, %v5658_v29, %v5269_v48 }
 0x60d   : > { %v5722_v2 = vsel %vm3766_vm5, %v5690_v19, %v5359_v24 }
 0x60e   : > { %v12828_v17 = vpop.permute.xlu0 %4986  ;;  %v5081_v38 = vpop.permute.xlu1 %5080 }
 0x610   : > { %5376 = vrot.lane.b32.xlu0 %v12319_v61, %s8274_s21  ;;  %5464 = vrot.lane.b32.xlu1 %v4742_v31, %s8263_s25 }
 0x612   : > { %v5361_v51 = vpop.permute.xlu0 %5360  ;;  %v5449_v25 = vpop.permute.xlu1 %5448 }
 0x613   : > { %v5754_v21 = vsel %vm1630_vm4, %v5722_v2, %v5449_v25 }
 0x614   : > { %5098 = vrot.lane.b32.xlu0 %v12319_v61, %s14931_s20  ;;  %5192 = vrot.lane.b32.xlu1 %v4742_v31, %s8272_s26  ;;  %v5659_v61 = vsel %vm3700_vm14, %v5627_v47, %v5175_v56  ;;  %v5564_v56 = vsel %vm3602_vm12, %v5534_v50, %v12704_v3 }
 0x615   : > { %7553 = vmatprep.mubr.msk.f32.mxu0 %vm3843_vm6, %v5754_v21  ;;  %v5691_v26 = vsel %vm3733_vm15, %v5659_v61, %v5271_v4  ;;  %v5596_v48 = vsel %vm3635_vm13, %v5564_v56, %v12810_v28 }
 0x616   : > { %v5083_v52 = vpop.permute.xlu0 %5082  ;;  %v5177_v8 = vpop.permute.xlu1 %5176  ;;  %v5723_v39 = vsel %vm3766_vm5, %v5691_v26, %v5361_v51  ;;  %v5628_v40 = vsel %vm1597_vm3, %v5596_v48, %v5081_v38  ;;  %v5565_v38 = vsel %vm3602_vm12, %v5535_v18, %v12808_v12 }
 0x617   : > { %v5660_v42 = vsel %vm3700_vm14, %v5628_v40, %v5177_v8  ;;  %v5597_v59 = vsel %vm3635_vm13, %v5565_v38, %v12828_v17  ;;  %v5536_v8 = vsel %vm3569_vm11, %v12217_v57, %v12594_v13  ;;  %v14961_v38 = vld [vmem:[#allocation4_spill] sm:$0xff] }
 0x618   : > { %5466 = vrot.lane.b32.xlu0 %v4744_v7, %s8263_s25  ;;  %4910 = vrot.lane.b32.xlu1 %v4742_v31, %s8270_s17  ;;  %v5629_v19 = vsel %vm1597_vm3, %v5597_v59, %v5083_v52  ;;  %v4751_v52 = vrot.slane %v12358_v27, 2 }
 0x61a   : > { %v5451_v36 = vpop.permute.xlu0 %5450  ;;  %v12858_v63 = vpop.permute.xlu1 %4894 }
 0x61b   : > { %v5755_v60 = vsel %vm1630_vm4, %v5723_v39, %v5451_v36  ;;  %v5566_v47 = vsel %vm3602_vm12, %v5536_v8, %v12858_v63  ;;  %v4752_v36 = vsel %vm832_vm2, %v4750_v53, %v4751_v52  ;;  %v14964_v53 = vld [vmem:[#allocation63_spill] sm:$0xff] }
 0x61c   : > { %5194 = vrot.lane.b32.xlu0 %v4744_v7, %s8272_s26  ;;  %5288 = vrot.lane.b32.xlu1 %v12337_v46, %s8273_s16 }
 0x61d   : > { %7554 = vmatmul.mubr.msk.f32.gmra.mxu0 %vm3843_vm6, %v5755_v60 }
 0x61e   : > { %v5179_v14 = vpop.permute.xlu0 %5178  ;;  %v5273_v9 = vpop.permute.xlu1 %5272 }
 0x620   : > { %4912 = vrot.lane.b32.xlu0 %v4744_v7, %s8270_s17  ;;  %5004 = vrot.lane.b32.xlu1 %v12337_v46, %s8271_s23 }
 0x622   : > { %v12868_v30 = vpop.permute.xlu0 %4896  ;;  %v12870_v22 = vpop.permute.xlu1 %4988 }
 0x623   : > { %v5598_v7 = vsel %vm3635_vm13, %v5566_v47, %v12870_v22  ;;  %v14957_v22 = vld [vmem:[#allocation100_spill] sm:$0xff] }
 0x624   : > { %5290 = vrot.lane.b32.xlu0 %v12334_v6, %s8273_s16  ;;  %5378 = vrot.lane.b32.xlu1 %v12346_v44, %s8274_s21 }
 0x626   : > { %v5275_v41 = vpop.permute.xlu0 %5274  ;;  %v5363_v45 = vpop.permute.xlu1 %5362 }
 0x628   : > { %5006 = vrot.lane.b32.xlu0 %v12334_v6, %s8271_s23  ;;  %5100 = vrot.lane.b32.xlu1 %v12346_v44, %s14931_s20  ;;  %v5692_v44 = vsel %vm3733_vm15, %v5660_v42, %v5273_v9  ;;  %v14956_v9 = vld [vmem:[#allocation98_spill] sm:$0xff] }
 0x629   : > { %v5724_v3 = vsel %vm3766_vm5, %v5692_v44, %v5363_v45  ;;  %v14958_v45 = vld [vmem:[#allocation37_spill] sm:$0xff] }
 0x62a   : > { %v12889_v4 = vpop.permute.xlu0 %4990  ;;  %v5085_v24 = vpop.permute.xlu1 %5084  ;;  %v4753_v1 = vrot.slane %v14958_v45, 2 }
 0x62b   : > { %v5630_v39 = vsel %vm1597_vm3, %v5598_v7, %v5085_v24  ;;  %v14965_v7 = vld [vmem:[#allocation106_spill] sm:$0xff] }
 0x62c   : > { %5380 = vrot.lane.b32.xlu0 %v12343_v11, %s8274_s21  ;;  %5468 = vrot.lane.b32.xlu1 %v4747_v34, %s8263_s25  ;;  %v4754_v40 = vsel %vm832_vm2, %v4751_v52, %v4753_v1 }
 0x62e   : > { %v5365_v23 = vpop.permute.xlu0 %5364  ;;  %v5453_v28 = vpop.permute.xlu1 %5452 }
 0x62f   : > { %v5756_v5 = vsel %vm1630_vm4, %v5724_v3, %v5453_v28  ;;  %v14959_v3 = vld [vmem:[#allocation25_spill] sm:$0xff] }
 0x630   : > { %5102 = vrot.lane.b32.xlu0 %v12343_v11, %s14931_s20  ;;  %5196 = vrot.lane.b32.xlu1 %v4747_v34, %s8272_s26  ;;  %v5661_v11 = vsel %vm3700_vm14, %v5629_v19, %v5179_v14  ;;  %v4756_v19 = vrot.slane %v14960_v43, 2 }
 0x631   : > { %7556 = vmatprep.mubr.msk.f32.mxu0 %vm3843_vm6, %v5756_v5  ;;  %v5693_v0 = vsel %vm3733_vm15, %v5661_v11, %v5275_v41  ;;  %v5537_v41 = vsel %vm3569_vm11, %v14957_v22, %v14956_v9  ;;  %v14963_v11 = vld [vmem:[#allocation65_spill] sm:$0xff] }
 0x632   : > { %v5087_v31 = vpop.permute.xlu0 %5086  ;;  %v5181_v29 = vpop.permute.xlu1 %5180  ;;  %v5725_v15 = vsel %vm3766_vm5, %v5693_v0, %v5365_v23  ;;  %v5567_v35 = vsel %vm3602_vm12, %v5537_v41, %v12868_v30 }
 0x633   : > { %v5662_v57 = vsel %vm3700_vm14, %v5630_v39, %v5181_v29  ;;  %v5599_v50 = vsel %vm3635_vm13, %v5567_v35, %v12889_v4  ;;  %v4755_v29 = vrot.slane %v14959_v3, 2  ;;  %v14966_v39 = vld [vmem:[#allocation58_spill] sm:$0xff]  ;;  %v14968_v35 = vld [vmem:[#allocation84_spill] sm:$0xff] }
 0x634   : > { %5470 = vrot.lane.b32.xlu0 %v4749_v55, %s8263_s25  ;;  %4914 = vrot.lane.b32.xlu1 %v4747_v34, %s8270_s17  ;;  %v5631_v24 = vsel %vm1597_vm3, %v5599_v50, %v5087_v31 }
 0x636   : > { %v5455_v12 = vpop.permute.xlu0 %5454  ;;  %v12919_v2 = vpop.permute.xlu1 %4898 }
 0x637   : > { %v5757_v17 = vsel %vm1630_vm4, %v5725_v15, %v5455_v12 }
 0x638   : > { %5198 = vrot.lane.b32.xlu0 %v4749_v55, %s8272_s26  ;;  %5292 = vrot.lane.b32.xlu1 %v12361_v62, %s8273_s16 }
 0x639   : > { %7557 = vmatmul.mubr.msk.f32.gmra.mxu0 %vm3843_vm6, %v5757_v17 }
 0x63a   : > { %v5183_v51 = vpop.permute.xlu0 %5182  ;;  %v5277_v25 = vpop.permute.xlu1 %5276 }
 0x63c   : > { %4916 = vrot.lane.b32.xlu0 %v4749_v55, %s8270_s17  ;;  %5008 = vrot.lane.b32.xlu1 %v12361_v62, %s8271_s23  ;;  %v14962_v55 = vld [vmem:[#allocation91_spill] sm:$0xff] }
 0x63d   : > { %v5538_v0 = vsel %vm3569_vm11, %v14963_v11, %v14962_v55 }
 0x63e   : > { %v12929_v21 = vpop.permute.xlu0 %4900  ;;  %v12931_v37 = vpop.permute.xlu1 %4992  ;;  %v5568_v15 = vsel %vm3602_vm12, %v5538_v0, %v12919_v2 }
 0x63f   : > { %v5600_v12 = vsel %vm3635_vm13, %v5568_v15, %v12931_v37  ;;  %v14973_v15 = vld [vmem:[#allocation64_spill] sm:$0xff] }
 0x640   : > { %5294 = vrot.lane.b32.xlu0 %v12358_v27, %s8273_s16  ;;  %5382 = vrot.lane.b32.xlu1 %v12370_v32, %s8274_s21 }
 0x642   : > { %v5279_v49 = vpop.permute.xlu0 %5278  ;;  %v5367_v58 = vpop.permute.xlu1 %5366 }
 0x644   : > { %5010 = vrot.lane.b32.xlu0 %v12358_v27, %s8271_s23  ;;  %5104 = vrot.lane.b32.xlu1 %v12370_v32, %s14931_s20  ;;  %v5694_v32 = vsel %vm3733_vm15, %v5662_v57, %v5277_v25 }
 0x645   : > { %v5726_v13 = vsel %vm3766_vm5, %v5694_v32, %v5367_v58 }
 0x646   : > { %v12950_v61 = vpop.permute.xlu0 %4994  ;;  %v5089_v26 = vpop.permute.xlu1 %5088 }
 0x647   : > { %v5632_v25 = vsel %vm1597_vm3, %v5600_v12, %v5089_v26  ;;  %v5539_v26 = vsel %vm3569_vm11, %v14966_v39, %v14965_v7 }
 0x648   : > { %5384 = vrot.lane.b32.xlu0 %v12367_v10, %s8274_s21  ;;  %5472 = vrot.lane.b32.xlu1 %v4752_v36, %s8263_s25  ;;  %v5569_v32 = vsel %vm3602_vm12, %v5539_v26, %v12929_v21 }
 0x64a   : > { %v5369_v63 = vpop.permute.xlu0 %5368  ;;  %v5457_v60 = vpop.permute.xlu1 %5456 }
 0x64b   : > { %v5758_v14 = vsel %vm1630_vm4, %v5726_v13, %v5457_v60  ;;  %v5601_v13 = vsel %vm3635_vm13, %v5569_v32, %v12950_v61 }
 0x64c   : > { %5106 = vrot.lane.b32.xlu0 %v12367_v10, %s14931_s20  ;;  %5200 = vrot.lane.b32.xlu1 %v4752_v36, %s8272_s26  ;;  %v5663_v10 = vsel %vm3700_vm14, %v5631_v24, %v5183_v51 }
 0x64d   : > { %7559 = vmatprep.mubr.msk.f32.mxu0 %vm3843_vm6, %v5758_v14  ;;  %v5695_v34 = vsel %vm3733_vm15, %v5663_v10, %v5279_v49  ;;  %v4757_v49 = vsel %vm832_vm2, %v4755_v29, %v4756_v19  ;;  %v14970_v10 = vld [vmem:[#allocation114_spill] sm:$0xff] }
 0x64e   : > { %v5091_v56 = vpop.permute.xlu0 %5090  ;;  %v5185_v48 = vpop.permute.xlu1 %5184  ;;  %v5727_v30 = vsel %vm3766_vm5, %v5695_v34, %v5369_v63 }
 0x64f   : > { %v5664_v58 = vsel %vm3700_vm14, %v5632_v25, %v5185_v48  ;;  %v5633_v14 = vsel %vm1597_vm3, %v5601_v13, %v5091_v56 }
 0x650   : > { %5474 = vrot.lane.b32.xlu0 %v4754_v40, %s8263_s25  ;;  %4918 = vrot.lane.b32.xlu1 %v4752_v36, %s8270_s17  ;;  %v14967_v36 = vld [vmem:[#allocation19_spill] sm:$0xff] }
 0x651   : > { %v4758_v57 = vrot.slane %v14967_v36, 2 }
 0x652   : > { %v5459_v42 = vpop.permute.xlu0 %5458  ;;  %v12980_v44 = vpop.permute.xlu1 %4902 }
 0x653   : > { %v5759_v4 = vsel %vm1630_vm4, %v5727_v30, %v5459_v42  ;;  %v4759_v9 = vsel %vm832_vm2, %v4756_v19, %v4758_v57  ;;  %v4760_v42 = vrot.slane %v14968_v35, 2 }
 0x654   : > { %5202 = vrot.lane.b32.xlu0 %v4754_v40, %s8272_s26  ;;  %5296 = vrot.lane.b32.xlu1 %v14959_v3, %s8273_s16 }
 0x655   : > { %7560 = vmatmul.mubr.msk.f32.gmra.mxu0 %vm3843_vm6, %v5759_v4 }
 0x656   : > { %v5187_v23 = vpop.permute.xlu0 %5186  ;;  %v5281_v28 = vpop.permute.xlu1 %5280 }
 0x657   : > { %v5696_v52 = vsel %vm3733_vm15, %v5664_v58, %v5281_v28  ;;  %v5665_v22 = vsel %vm3700_vm14, %v5633_v14, %v5187_v23  ;;  %v14971_v23 = vld [vmem:[#allocation94_spill] sm:$0xff]  ;;  %v14972_v28 = vld [vmem:[#allocation59_spill] sm:$0xff] }
 0x658   : > { %4920 = vrot.lane.b32.xlu0 %v4754_v40, %s8270_s17  ;;  %5012 = vrot.lane.b32.xlu1 %v14959_v3, %s8271_s23  ;;  %v14969_v40 = vld [vmem:[#allocation10_spill] sm:$0xff]  ;;  %v14974_v58 = vld [vmem:[#allocation99_spill] sm:$0xff] }
 0x659   : > { %v4761_v4 = vrot.slane %v14969_v40, 2 }
 0x65a   : > { %v12990_v5 = vpop.permute.xlu0 %4904  ;;  %v12992_v18 = vpop.permute.xlu1 %4996 }
 0x65b   : > { %v4762_v11 = vsel %vm832_vm2, %v4760_v42, %v4761_v4 }
 0x65c   : > { %5298 = vrot.lane.b32.xlu0 %v14960_v43, %s8273_s16  ;;  %5386 = vrot.lane.b32.xlu1 %v14961_v38, %s8274_s21 }
 0x65e   : > { %v5283_v59 = vpop.permute.xlu0 %5282  ;;  %v5371_v31 = vpop.permute.xlu1 %5370 }
 0x65f   : > { %v5728_v2 = vsel %vm3766_vm5, %v5696_v52, %v5371_v31  ;;  %v5697_v41 = vsel %vm3733_vm15, %v5665_v22, %v5283_v59  ;;  %v14976_v52 = vld [vmem:[#allocation60_spill] sm:$0xff] }
 0x660   : > { %5014 = vrot.lane.b32.xlu0 %v14960_v43, %s8271_s23  ;;  %5108 = vrot.lane.b32.xlu1 %v14961_v38, %s14931_s20  ;;  %v5540_v38 = vsel %vm3569_vm11, %v14972_v28, %v14971_v23 }
 0x661   : > { %v5570_v59 = vsel %vm3602_vm12, %v5540_v38, %v12980_v44 }
 0x662   : > { %v13011_v17 = vpop.permute.xlu0 %4998  ;;  %v5093_v51 = vpop.permute.xlu1 %5092  ;;  %v5602_v31 = vsel %vm3635_vm13, %v5570_v59, %v12992_v18 }
 0x663   : > { %v5634_v55 = vsel %vm1597_vm3, %v5602_v31, %v5093_v51 }
 0x664   : > { %5388 = vrot.lane.b32.xlu0 %v14964_v53, %s8274_s21  ;;  %5476 = vrot.lane.b32.xlu1 %v4757_v49, %s8263_s25 }
 0x666   : > { %v5373_v8 = vpop.permute.xlu0 %5372  ;;  %v5461_v37 = vpop.permute.xlu1 %5460 }
 0x667   : > { %v5760_v47 = vsel %vm1630_vm4, %v5728_v2, %v5461_v37  ;;  %v5729_v21 = vsel %vm3766_vm5, %v5697_v41, %v5373_v8  ;;  %v4763_v2 = vrot.slane %v14976_v52, 2  ;;  %v13116_v41 = vpop.f32.mrf.mxu0 }
 0x668   : > { %5110 = vrot.lane.b32.xlu0 %v14964_v53, %s14931_s20  ;;  %5204 = vrot.lane.b32.xlu1 %v4757_v49, %s8272_s26  ;;  %v14975_v53 = vld [vmem:[#allocation107_spill] sm:$0xff] }
 0x669   : > { %7562 = vmatprep.mubr.msk.f32.mxu0 %vm3843_vm6, %v5760_v47  ;;  %v5541_v51 = vsel %vm3569_vm11, %v14975_v53, %v14974_v58  ;;  %v4764_v26 = vsel %vm832_vm2, %v4761_v4, %v4763_v2 }
 0x66a   : > { %v5095_v63 = vpop.permute.xlu0 %5094  ;;  %v5189_v60 = vpop.permute.xlu1 %5188  ;;  %v5571_v8 = vsel %vm3602_vm12, %v5541_v51, %v12990_v5 }
 0x66b   : > { %v5666_v0 = vsel %vm3700_vm14, %v5634_v55, %v5189_v60  ;;  %v5603_v37 = vsel %vm3635_vm13, %v5571_v8, %v13011_v17 }
 0x66c   : > { %5478 = vrot.lane.b32.xlu0 %v4759_v9, %s8263_s25  ;;  %4922 = vrot.lane.b32.xlu1 %v4757_v49, %s8270_s17  ;;  %v5635_v39 = vsel %vm1597_vm3, %v5603_v37, %v5095_v63  ;;  %v14977_v63 = vld [vmem:[#allocation29_spill] sm:$0xff] }
 0x66e   : > { %v5463_v45 = vpop.permute.xlu0 %5462  ;;  %v13041_v1 = vpop.permute.xlu1 %4906 }
 0x66f   : > { %v5761_v61 = vsel %vm1630_vm4, %v5729_v21, %v5463_v45  ;;  %v14978_v21 = vld [vmem:[#allocation86_spill] sm:$0xff] }
 0x670   : > { %5206 = vrot.lane.b32.xlu0 %v4759_v9, %s8272_s26  ;;  %5300 = vrot.lane.b32.xlu1 %v14968_v35, %s8273_s16  ;;  %v14979_v45 = vld [vmem:[#allocation82_spill] sm:$0xff] }
 0x671   : > { %7563 = vmatmul.mubr.msk.f32.gmra.mxu0 %vm3843_vm6, %v5761_v61 }
 0x672   : > { %v5191_v50 = vpop.permute.xlu0 %5190  ;;  %v5285_v56 = vpop.permute.xlu1 %5284 }
 0x673   : > { %v5698_v12 = vsel %vm3733_vm15, %v5666_v0, %v5285_v56  ;;  %v5667_v36 = vsel %vm3700_vm14, %v5635_v39, %v5191_v50  ;;  %v13122_v56 = vpop.f32.mrf.mxu0 }
 0x674   : > { %4924 = vrot.lane.b32.xlu0 %v4759_v9, %s8270_s17  ;;  %5016 = vrot.lane.b32.xlu1 %v14968_v35, %s8271_s23 }
 0x675   : > { %v13133_v4 = vpop.f32.mrf.mxu0 }
 0x676   : > { %v13051_v48 = vpop.permute.xlu0 %4908  ;;  %v13053_v24 = vpop.permute.xlu1 %5000 }
 0x677   : > { %v13149_v0 = vpop.f32.mrf.mxu0 }
 0x678   : > { %5302 = vrot.lane.b32.xlu0 %v14969_v40, %s8273_s16  ;;  %5390 = vrot.lane.b32.xlu1 %v14970_v10, %s8274_s21 }
 0x67a   : > { %v5287_v34 = vpop.permute.xlu0 %5286  ;;  %v5375_v30 = vpop.permute.xlu1 %5374 }
 0x67b   : > { %v5730_v44 = vsel %vm3766_vm5, %v5698_v12, %v5375_v30  ;;  %v5699_v57 = vsel %vm3733_vm15, %v5667_v36, %v5287_v34  ;;  %v4766_v34 = vrot.slane %v14978_v21, 2  ;;  %v14980_v30 = vld [vmem:[#allocation108_spill] sm:$0xff] }
 0x67c   : > { %5018 = vrot.lane.b32.xlu0 %v14969_v40, %s8271_s23  ;;  %5112 = vrot.lane.b32.xlu1 %v14970_v10, %s14931_s20  ;;  %v4765_v10 = vrot.slane %v14977_v63, 2  ;;  %v5542_v42 = vsel %vm3569_vm11, %v12289_v16, %v14980_v30 }
 0x67d   : > { %v5572_v23 = vsel %vm3602_vm12, %v5542_v42, %v13041_v1 }
 0x67e   : > { %v13072_v29 = vpop.permute.xlu0 %5002  ;;  %v5097_v19 = vpop.permute.xlu1 %5096  ;;  %v5604_v28 = vsel %vm3635_vm13, %v5572_v23, %v13053_v24  ;;  %v4767_v31 = vsel %vm832_vm2, %v4765_v10, %v4766_v34  ;;  %v14986_v10 = vld [vmem:[#allocation121_spill] sm:$0xff] }
 0x67f   : > { %v5636_v16 = vsel %vm1597_vm3, %v5604_v28, %v5097_v19 }
 0x680   : > { %5392 = vrot.lane.b32.xlu0 %v14973_v15, %s8274_s21  ;;  %5480 = vrot.lane.b32.xlu1 %v4762_v11, %s8263_s25 }
 0x682   : > { %v5377_v25 = vpop.permute.xlu0 %5376  ;;  %v5465_v18 = vpop.permute.xlu1 %5464 }
 0x683   : > { %v5762_v49 = vsel %vm1630_vm4, %v5730_v44, %v5465_v18  ;;  %v5731_v5 = vsel %vm3766_vm5, %v5699_v57, %v5377_v25  ;;  %v13153_v44 = vpop.f32.mrf.mxu0  ;;  %v14982_v25 = vld [vmem:[#allocation103_spill] sm:$0xff] }
 0x684   : > { %5114 = vrot.lane.b32.xlu0 %v14973_v15, %s14931_s20  ;;  %5208 = vrot.lane.b32.xlu1 %v4762_v11, %s8272_s26  ;;  %v5543_v18 = vsel %vm3569_vm11, %v12286_v54, %v14982_v25 }
 0x685   : > { %7565 = vmatprep.mubr.msk.f32.mxu0 %vm3843_vm6, %v5762_v49  ;;  %v14983_v49 = vld [vmem:[#allocation6_spill] sm:$0xff]  ;;  %v5573_v53 = vsel %vm3602_vm12, %v5543_v18, %v13051_v48  ;;  %v13170_v8 = vpop.f32.mrf.mxu0  ;;  %v14988_v18 = vld [vmem:[#allocation83_spill] sm:$0xff] }
 0x686   : > { %v5099_v47 = vpop.permute.xlu0 %5098  ;;  %v5193_v7 = vpop.permute.xlu1 %5192  ;;  %v4768_v58 = vrot.slane %v14983_v49, 2  ;;  %v5605_v51 = vsel %vm3635_vm13, %v5573_v53, %v13072_v29 }
 0x687   : > { %v5668_v55 = vsel %vm3700_vm14, %v5636_v16, %v5193_v7  ;;  %v5637_v54 = vsel %vm1597_vm3, %v5605_v51, %v5099_v47  ;;  %v13177_v48 = vpop.f32.mrf.mxu0  ;;  %v14984_v47 = vld [vmem:[#allocation95_spill] sm:$0xff]  ;;  %v14987_v16 = vld [vmem:[#allocation104_spill] sm:$0xff] }
 0x688   : > { %5482 = vrot.lane.b32.xlu0 %v4764_v26, %s8263_s25  ;;  %4926 = vrot.lane.b32.xlu1 %v4762_v11, %s8270_s17  ;;  %v14981_v11 = vld [vmem:[#allocation81_spill] sm:$0xff]  ;;  %v4769_v37 = vsel %vm832_vm2, %v4766_v34, %v4768_v58  ;;  %v4770_v23 = vrot.slane %v14984_v47, 2 }
 0x68a   : > { %v5467_v32 = vpop.permute.xlu0 %5466  ;;  %v13102_v13 = vpop.permute.xlu1 %4910 }
 0x68b   : > { %v5763_v17 = vsel %vm1630_vm4, %v5731_v5, %v5467_v32  ;;  %v13187_v5 = vpop.f32.mrf.mxu0 }
 0x68c   : > { %5210 = vrot.lane.b32.xlu0 %v4764_v26, %s8272_s26  ;;  %5304 = vrot.lane.b32.xlu1 %v14977_v63, %s8273_s16 }
 0x68d   : > { %7566 = vmatmul.mubr.msk.f32.gmra.mxu0 %vm3843_vm6, %v5763_v17 }
 0x68e   : > { %v5195_v60 = vpop.permute.xlu0 %5194  ;;  %v5289_v14 = vpop.permute.xlu1 %5288 }
 0x68f   : > { %v5700_v1 = vsel %vm3733_vm15, %v5668_v55, %v5289_v14  ;;  %v5669_v7 = vsel %vm3700_vm14, %v5637_v54, %v5195_v60  ;;  %v13190_v60 = vpop.f32.mrf.mxu0 }
 0x690   : > { %4928 = vrot.lane.b32.xlu0 %v4764_v26, %s8270_s17  ;;  %5020 = vrot.lane.b32.xlu1 %v14977_v63, %s8271_s23 }
 0x692   : > { %v13112_v9 = vpop.permute.xlu0 %4912  ;;  %v13114_v22 = vpop.permute.xlu1 %5004 }
 0x694   : > { %5306 = vrot.lane.b32.xlu0 %v14978_v21, %s8273_s16  ;;  %5394 = vrot.lane.b32.xlu1 %v14979_v45, %s8274_s21 }
 0x696   : > { %v5291_v61 = vpop.permute.xlu0 %5290  ;;  %v5379_v50 = vpop.permute.xlu1 %5378 }
 0x697   : > { %v5732_v24 = vsel %vm3766_vm5, %v5700_v1, %v5379_v50  ;;  %v5701_v39 = vsel %vm3733_vm15, %v5669_v7, %v5291_v61  ;;  %v13199_v61 = vpop.f32.mrf.mxu0  ;;  %v14985_v50 = vld [vmem:[#allocation80_spill] sm:$0xff] }
 0x698   : > { %5022 = vrot.lane.b32.xlu0 %v14978_v21, %s8271_s23  ;;  %5116 = vrot.lane.b32.xlu1 %v14979_v45, %s14931_s20  ;;  %v4771_v28 = vrot.slane %v14985_v50, 2 }
 0x699   : > { %v13205_v34 = vpop.f32.mrf.mxu0 }
 0x69a   : > { %v13139_v38 = vpop.permute.xlu0 %5006  ;;  %v13141_v59 = vpop.permute.xlu1 %5100 }
 0x69b   : > { %v13216_v55 = vpop.f32.mrf.mxu0 }
 0x69c   : > { %5396 = vrot.lane.b32.xlu0 %v14981_v11, %s8274_s21  ;;  %5484 = vrot.lane.b32.xlu1 %v4767_v31, %s8263_s25 }
 0x69e   : > { %v5381_v15 = vpop.permute.xlu0 %5380  ;;  %v5469_v12 = vpop.permute.xlu1 %5468 }
 0x69f   : > { %v5764_v19 = vsel %vm1630_vm4, %v5732_v24, %v5469_v12  ;;  %v5733_v29 = vsel %vm3766_vm5, %v5701_v39, %v5381_v15  ;;  %v13226_v12 = vpop.f32.mrf.mxu0 }
 0x6a0   : > { %5118 = vrot.lane.b32.xlu0 %v14981_v11, %s14931_s20  ;;  %5212 = vrot.lane.b32.xlu1 %v4767_v31, %s8272_s26 }
 0x6a1   : > { %7568 = vmatprep.mubr.msk.f32.mxu0 %vm3843_vm6, %v5764_v19  ;;  %v4772_v19 = vsel %vm832_vm2, %v4770_v23, %v4771_v28  ;;  %v13237_v53 = vpop.f32.mrf.mxu0 }
 0x6a2   : > { %v13168_v52 = vpop.permute.xlu0 %5102  ;;  %v5197_v2 = vpop.permute.xlu1 %5196 }
 0x6a4   : > { %5486 = vrot.lane.b32.xlu0 %v4769_v37, %s8263_s25  ;;  %4930 = vrot.lane.b32.xlu1 %v4767_v31, %s8270_s17  ;;  %v5544_v31 = vsel %vm3569_vm11, %v12313_v33, %v14987_v16 }
 0x6a5   : > { %v5574_v11 = vsel %vm3602_vm12, %v5544_v31, %v13102_v13 }
 0x6a6   : > { %v5471_v26 = vpop.permute.xlu0 %5470  ;;  %v13181_v36 = vpop.permute.xlu1 %4914  ;;  %v5606_v1 = vsel %vm3635_vm13, %v5574_v11, %v13114_v22 }
 0x6a7   : > { %v5765_v57 = vsel %vm1630_vm4, %v5733_v29, %v5471_v26  ;;  %v5638_v33 = vsel %vm1597_vm3, %v5606_v1, %v13141_v59  ;;  %v14989_v59 = vld [vmem:[#allocation109_spill] sm:$0xff] }
 0x6a8   : > { %5214 = vrot.lane.b32.xlu0 %v4769_v37, %s8272_s26  ;;  %5308 = vrot.lane.b32.xlu1 %v14984_v47, %s8273_s16  ;;  %v5670_v25 = vsel %vm3700_vm14, %v5638_v33, %v5197_v2  ;;  %v5545_v54 = vsel %vm3569_vm11, %v12310_v20, %v14989_v59  ;;  %v13246_v2 = vpop.f32.mrf.mxu0 }
 0x6a9   : > { %7569 = vmatmul.mubr.msk.f32.gmra.mxu0 %vm3843_vm6, %v5765_v57  ;;  %v5575_v39 = vsel %vm3602_vm12, %v5545_v54, %v13112_v9  ;;  %v7536_v54 = vpop.f32.mrf.mxu1 }
 0x6aa   : > { %v5199_v32 = vpop.permute.xlu0 %5198  ;;  %v5293_v17 = vpop.permute.xlu1 %5292  ;;  %v5607_v29 = vsel %vm3635_vm13, %v5575_v39, %v13139_v38 }
 0x6ab   : > { %v5702_v13 = vsel %vm3733_vm15, %v5670_v25, %v5293_v17  ;;  %v5639_v57 = vsel %vm1597_vm3, %v5607_v29, %v13168_v52  ;;  %v13262_v9 = vpop.f32.mrf.mxu0  ;;  %v14992_v25 = vld [vmem:[#allocation97_spill] sm:$0xff] }
 0x6ac   : > { %4932 = vrot.lane.b32.xlu0 %v4769_v37, %s8270_s17  ;;  %5024 = vrot.lane.b32.xlu1 %v14984_v47, %s8271_s23  ;;  %v14990_v37 = vld [vmem:[#allocation87_spill] sm:$0xff]  ;;  %v4776_v59 = vrot.slane %v14992_v25, 2 }
 0x6ad   : > { %v4773_v7 = vrot.slane %v14990_v37, 2  ;;  %v13268_v31 = vpop.f32.mrf.mxu0  ;;  %v14994_v37 = vld [vmem:[#allocation102_spill] sm:$0xff] }
 0x6ae   : > { %v13195_v14 = vpop.permute.xlu0 %4916  ;;  %v13197_v45 = vpop.permute.xlu1 %5008 }
 0x6af   : > { %v4774_v17 = vsel %vm832_vm2, %v4771_v28, %v4773_v7  ;;  %v13275_v1 = vpop.f32.mrf.mxu0  ;;  %v5546_v7 = vsel %vm3569_vm11, %v12337_v46, %v14994_v37 }
 0x6b0   : > { %5310 = vrot.lane.b32.xlu0 %v14985_v50, %s8273_s16  ;;  %5398 = vrot.lane.b32.xlu1 %v14986_v10, %s8274_s21  ;;  %v5576_v39 = vsel %vm3602_vm12, %v5546_v7, %v13181_v36 }
 0x6b1   : > { %v5608_v29 = vsel %vm3635_vm13, %v5576_v39, %v13197_v45  ;;  %v14996_v39 = vld [vmem:[#allocation116_spill] sm:$0xff] }
 0x6b2   : > { %v5295_v30 = vpop.permute.xlu0 %5294  ;;  %v5383_v42 = vpop.permute.xlu1 %5382 }
 0x6b3   : > { %v5734_v22 = vsel %vm3766_vm5, %v5702_v13, %v5383_v42 }
 0x6b4   : > { %5026 = vrot.lane.b32.xlu0 %v14985_v50, %s8271_s23  ;;  %5120 = vrot.lane.b32.xlu1 %v14986_v10, %s14931_s20  ;;  %v5671_v10 = vsel %vm3700_vm14, %v5639_v57, %v5199_v32  ;;  %v14991_v32 = vld [vmem:[#allocation22_spill] sm:$0xff] }
 0x6b5   : > { %v5703_v42 = vsel %vm3733_vm15, %v5671_v10, %v5295_v30  ;;  %v13280_v30 = vpop.f32.mrf.mxu0 }
 0x6b6   : > { %v13222_v24 = vpop.permute.xlu0 %5010  ;;  %v13224_v15 = vpop.permute.xlu1 %5104 }
 0x6b7   : > { %v13290_v13 = vpop.f32.mrf.mxu0  ;;  %v5640_v46 = vsel %vm1597_vm3, %v5608_v29, %v13224_v15  ;;  %v8250_v15 = vld [vmem:[%s14019_s8] ss:$0 sm:$0xff]  ;;  %v5547_v29 = vsel %vm3569_vm11, %v12334_v6, %v14996_v39 }
 0x6b8   : > { %5400 = vrot.lane.b32.xlu0 %v14988_v18, %s8274_s21  ;;  %5488 = vrot.lane.b32.xlu1 %v4772_v19, %s8263_s25 }
 0x6ba   : > { %v5385_v49 = vpop.permute.xlu0 %5384  ;;  %v5473_v58 = vpop.permute.xlu1 %5472 }
 0x6bb   : > { %v5766_v51 = vsel %vm1630_vm4, %v5734_v22, %v5473_v58  ;;  %v5735_v38 = vsel %vm3766_vm5, %v5703_v42, %v5385_v49  ;;  %v13292_v58 = vpop.f32.mrf.mxu0 }
 0x6bc   : > { %5122 = vrot.lane.b32.xlu0 %v14988_v18, %s14931_s20  ;;  %5216 = vrot.lane.b32.xlu1 %v4772_v19, %s8272_s26  ;;  %v14993_v18 = vld [vmem:[#allocation93_spill] sm:$0xff] }
 0x6bd   : > { %7571 = vmatprep.mubr.msk.f32.mxu0 %vm3843_vm6, %v5766_v51  ;;  %v4775_v51 = vrot.slane %v14991_v32, 2  ;;  %v13311_v10 = vpop.f32.mrf.mxu0 }
 0x6be   : > { %v13254_v26 = vpop.permute.xlu0 %5106  ;;  %v5201_v20 = vpop.permute.xlu1 %5200 }
 0x6bf   : > { %v4777_v42 = vsel %vm832_vm2, %v4775_v51, %v4776_v59  ;;  %v13320_v36 = vpop.f32.mrf.mxu0 }
 0x6c0   : > { %5490 = vrot.lane.b32.xlu0 %v4774_v17, %s8263_s25  ;;  %4934 = vrot.lane.b32.xlu1 %v4772_v19, %s8270_s17 }
 0x6c2   : > { %v5475_v23 = vpop.permute.xlu0 %5474  ;;  %v13266_v16 = vpop.permute.xlu1 %4918 }
 0x6c3   : > { %v5767_v52 = vsel %vm1630_vm4, %v5735_v38, %v5475_v23  ;;  %v4432_v38 = vpop.f32.mrf.mxu1  ;;  %v5672_v23 = vsel %vm3700_vm14, %v5640_v46, %v5201_v20 }
 0x6c4   : > { %5218 = vrot.lane.b32.xlu0 %v4774_v17, %s8272_s26  ;;  %5312 = vrot.lane.b32.xlu1 %v14991_v32, %s8273_s16  ;;  %v4433_v51 = vadd.f32 %v8250_v15, %v4432_v38  ;;  %v4438_v38 = vadd.f32 %v8250_v15, %v7536_v54 }
 0x6c5   : > { %7572 = vmatmul.mubr.msk.f32.gmra.mxu0 %vm3843_vm6, %v5767_v52  ;;  %v14995_v52 = vld [vmem:[#allocation92_spill] sm:$0xff] }
 0x6c6   : > { %v5203_v28 = vpop.permute.xlu0 %5202  ;;  %v5297_v11 = vpop.permute.xlu1 %5296 }
 0x6c7   : > { %v5704_v45 = vsel %vm3733_vm15, %v5672_v23, %v5297_v11  ;;  %v13334_v11 = vpop.f32.mrf.mxu0  ;;  %v5577_v23 = vsel %vm3602_vm12, %v5547_v29, %v13195_v14 }
 0x6c8   : > { %4936 = vrot.lane.b32.xlu0 %v4774_v17, %s8270_s17  ;;  %5028 = vrot.lane.b32.xlu1 %v14991_v32, %s8271_s23  ;;  %14997 = vst [vmem:[#allocation126_spill] sm:$0xff] %v13334_v11 }
 0x6ca   : > { %v13282_v33 = vpop.permute.xlu0 %4920  ;;  %v13284_v19 = vpop.permute.xlu1 %5012 }
 0x6cc   : > { %5314 = vrot.lane.b32.xlu0 %v14992_v25, %s8273_s16  ;;  %5402 = vrot.lane.b32.xlu1 %v14993_v18, %s8274_s21 }
 0x6ce   : > { %v5299_v22 = vpop.permute.xlu0 %5298  ;;  %v5387_v49 = vpop.permute.xlu1 %5386 }
 0x6d0   : > { %5030 = vrot.lane.b32.xlu0 %v14992_v25, %s8271_s23  ;;  %5124 = vrot.lane.b32.xlu1 %v14993_v18, %s14931_s20  ;;  %v5736_v18 = vsel %vm3766_vm5, %v5704_v45, %v5387_v49  ;;  %v14998_v49 = vld [vmem:[#allocation88_spill] sm:$0xff]  ;;  %v5609_v45 = vsel %vm3635_vm13, %v5577_v23, %v13222_v24  ;;  %v4519_v24 = vrot.slane %v4438_v38, 7 }
 0x6d1   : > { %v4778_v46 = vrot.slane %v14998_v49, 2  ;;  %v5641_v39 = vsel %vm1597_vm3, %v5609_v45, %v13254_v26 }
 0x6d2   : > { %v13307_v57 = vpop.permute.xlu0 %5014  ;;  %v13309_v17 = vpop.permute.xlu1 %5108  ;;  %v5673_v11 = vsel %vm3700_vm14, %v5641_v39, %v5203_v28  ;;  %v4599_v39 = vsel %vm585_vm0, %v4519_v24, 0.0 }
 0x6d3   : > { %v4779_v49 = vsel %vm832_vm2, %v4776_v59, %v4778_v46  ;;  %v5705_v14 = vsel %vm3733_vm15, %v5673_v11, %v5299_v22 }
 0x6d4   : > { %5404 = vrot.lane.b32.xlu0 %v14995_v52, %s8274_s21  ;;  %5492 = vrot.lane.b32.xlu1 %v4777_v42, %s8263_s25 }
 0x6d6   : > { %v5389_v37 = vpop.permute.xlu0 %5388  ;;  %v5477_v7 = vpop.permute.xlu1 %5476 }
 0x6d7   : > { %v5768_v20 = vsel %vm1630_vm4, %v5736_v18, %v5477_v7  ;;  %v13344_v7 = vpop.f32.mrf.mxu0  ;;  %v5737_v54 = vsel %vm3766_vm5, %v5705_v14, %v5389_v37 }
 0x6d8   : > { %5126 = vrot.lane.b32.xlu0 %v14995_v52, %s14931_s20  ;;  %5220 = vrot.lane.b32.xlu1 %v4777_v42, %s8272_s26  ;;  %v4518_v52 = vrot.slane %v4433_v51, 7 }
 0x6d9   : > { %7574 = vmatprep.mubr.msk.f32.mxu0 %vm3843_vm6, %v5768_v20  ;;  %v13356_v51 = vpop.f32.mrf.mxu0 }
 0x6da   : > { %v13342_v18 = vpop.permute.xlu0 %5110  ;;  %v5205_v6 = vpop.permute.xlu1 %5204  ;;  %14999 = vst [vmem:[#allocation70_spill] sm:$0xff] %v13356_v51  ;;  %v4583_v26 = vsel %vm585_vm0, 0.0, %v4518_v52  ;;  %v13363_v28 = vsel %vm585_vm0, %v4518_v52, %v4519_v24 }
 0x6db   : > { %v13365_v22 = vpop.f32.mrf.mxu0  ;;  %v4782_v29 = vrot.slane %v4583_v26, 1  ;;  %v4783_v11 = vrot.slane %v13363_v28, 1 }
 0x6dc   : > { %5494 = vrot.lane.b32.xlu0 %v4779_v49, %s8263_s25  ;;  %4938 = vrot.lane.b32.xlu1 %v4777_v42, %s8270_s17  ;;  %15000 = vst [vmem:[#allocation122_spill] sm:$0xff] %v13365_v22  ;;  %v4785_v22 = vrot.slane %v4599_v39, 1 }
 0x6dd   : > { %v13373_v46 = vpop.f32.mrf.mxu0  ;;  %v4784_v52 = vsel %vm751_vm1, %v4782_v29, %v4783_v11 }
 0x6de   : > { %v5479_v15 = vpop.permute.xlu0 %5478  ;;  %v13354_v20 = vpop.permute.xlu1 %4922  ;;  %15001 = vst [vmem:[#allocation5_spill] sm:$0xff] %v13373_v46  ;;  %v15004_v46 = vld [vmem:[#allocation105_spill] sm:$0xff] }
 0x6df   : > { %v5769_v59 = vsel %vm1630_vm4, %v5737_v54, %v5479_v15  ;;  %v13379_v45 = vpop.f32.mrf.mxu0  ;;  %v4787_v15 = vrot.slane %v4583_v26, 2 }
 0x6e0   : > { %5222 = vrot.lane.b32.xlu0 %v4779_v49, %s8272_s26  ;;  %5316 = vrot.lane.b32.xlu1 %v4583_v26, %s8273_s16  ;;  %15002 = vst [vmem:[#allocation123_spill] sm:$0xff] %v13379_v45  ;;  %v5548_v45 = vsel %vm3569_vm11, %v12361_v62, %v15004_v46 }
 0x6e1   : > { %7575 = vmatmul.mubr.msk.f32.gmra.mxu0 %vm3843_vm6, %v5769_v59  ;;  %v13386_v54 = vpop.f32.mrf.mxu0  ;;  %v4788_v59 = vrot.slane %v13363_v28, 2  ;;  %v5578_v24 = vsel %vm3602_vm12, %v5548_v45, %v13266_v16 }
 0x6e2   : > { %v13368_v42 = vpop.permute.xlu0 %5206  ;;  %v5301_v37 = vpop.permute.xlu1 %5300  ;;  %15003 = vst [vmem:[#allocation127_spill] sm:$0xff] %v13386_v54 }
 0x6e3   : > { %v13395_v29 = vpop.f32.mrf.mxu0  ;;  %v4789_v46 = vsel %vm832_vm2, %v4787_v15, %v4788_v59 }
 0x6e4   : > { %4940 = vrot.lane.b32.xlu0 %v4779_v49, %s8270_s17  ;;  %5032 = vrot.lane.b32.xlu1 %v4583_v26, %s8271_s23  ;;  %15005 = vst [vmem:[#allocation120_spill] sm:$0xff] %v13395_v29  ;;  %v5610_v26 = vsel %vm3635_vm13, %v5578_v24, %v13284_v19 }
 0x6e5   : > { %v5642_v62 = vsel %vm1597_vm3, %v5610_v26, %v13309_v17  ;;  %v13412_v16 = vpop.f32.mrf.mxu0  ;;  %v13419_v17 = vld [vmem:[%s14017_s6] ss:$0 sm:$0xff] }
 0x6e6   : > { %v13375_v23 = vpop.permute.xlu0 %4924  ;;  %v13377_v38 = vpop.permute.xlu1 %5016 }
 0x6e8   : > { %5318 = vrot.lane.b32.xlu0 %v13363_v28, %s8273_s16  ;;  %5406 = vrot.lane.b32.xlu1 %v4784_v52, %s8274_s21  ;;  %s7274_s16 = sshll.u32 %s15065_s19, 3 }
 0x6ea   : > { %v5303_v49 = vpop.permute.xlu0 %5302  ;;  %v5391_v14 = vpop.permute.xlu1 %5390 }
 0x6ec   : > { %5034 = vrot.lane.b32.xlu0 %v13363_v28, %s8271_s23  ;;  %5128 = vrot.lane.b32.xlu1 %v4784_v52, %s14931_s20  ;;  %v4786_v28 = vsel %vm751_vm1, %v4783_v11, %v4785_v22  ;;  %v5674_v52 = vsel %vm3700_vm14, %v5642_v62, %v5205_v6  ;;  %v6503_v6 = vld [vmem:[%s14022_s11 + $0x8] sm:$0xff]  ;;  %v15006_v11 = vld [vmem:[#allocation110_spill] sm:$0xff]  ;;  %v4016_v62 = vadd.f32 %v13116_v41, %v13419_v17 }
 0x6ed   : > { %v5706_v19 = vsel %vm3733_vm15, %v5674_v52, %v5301_v37  ;;  %v5549_v15 = vsel %vm3569_vm11, %v12358_v27, %v15006_v11  ;;  %v7549_v37 = vpop.f32.mrf.mxu0  ;;  %7595 = vmatprep.subr.mxu1 %v6503_v6 }
 0x6ee   : > { %v13401_v54 = vpop.permute.xlu0 %5018  ;;  %v13403_v51 = vpop.permute.xlu1 %5112  ;;  %v5738_v45 = vsel %vm3766_vm5, %v5706_v19, %v5391_v14  ;;  %v4790_v14 = vrot.slane %v4599_v39, 2  ;;  %v5579_v26 = vsel %vm3602_vm12, %v5549_v15, %v13282_v33  ;;  %7596 = vmatpush3.msra.mxu1 %v6503_v6  ;;  %v4011_v33 = vadd.f32 %v13419_v17, %v13122_v56  ;;  %v13449_v39 = vld [vmem:[%s14021_s10] ss:$0 sm:$0xff] }
 0x6ef   : > { %v5611_v27 = vsel %vm3635_vm13, %v5579_v26, %v13307_v57  ;;  %v5959_v57 = vpop.f32.mrf.mxu0 }
 0x6f0   : > { %5408 = vrot.lane.b32.xlu0 %v4786_v28, %s8274_s21  ;;  %5496 = vrot.lane.b32.xlu1 %v4789_v46, %s8263_s25  ;;  %v5643_v52 = vsel %vm1597_vm3, %v5611_v27, %v13342_v18  ;;  %v4791_v41 = vsel %vm832_vm2, %v4788_v59, %v4790_v14  ;;  %v4169_v59 = vmax.f32 %v4011_v33, 0.0  ;;  %v5960_v15 = vadd.f32 %v13449_v39, %v5959_v57 }
 0x6f1   : > { %v5675_v19 = vsel %vm3700_vm14, %v5643_v52, %v13368_v42  ;;  %v7552_v14 = vpop.f32.mrf.mxu0 }
 0x6f2   : > { %v5393_v24 = vpop.permute.xlu0 %5392  ;;  %v5481_v29 = vpop.permute.xlu1 %5480  ;;  %v5707_v56 = vsel %vm3733_vm15, %v5675_v19, %v5303_v49  ;;  %v4026_v49 = vadd.f32 %v13133_v4, %v13419_v17  ;;  %v5975_v52 = vadd.f32 %v7552_v14, %v13449_v39 }
 0x6f3   : > { %v5770_v22 = vsel %vm1630_vm4, %v5738_v45, %v5481_v29  ;;  %v6502_v29 = vld [vmem:[%s14022_s11] sm:$0xff]  ;;  %v4170_v45 = vmax.f32 %v4016_v62, 0.0  ;;  %v5739_v6 = vsel %vm3766_vm5, %v5707_v56, %v5393_v24  ;;  %v6118_v62 = vmax.f32 %v5960_v15, 0.0  ;;  %v5969_v27 = vpop.f32.mrf.mxu0  ;;  %v15007_v15 = vld [vmem:[#allocation117_spill] sm:$0xff] }
 0x6f4   : > { %5130 = vrot.lane.b32.xlu0 %v4786_v28, %s14931_s20  ;;  %5224 = vrot.lane.b32.xlu1 %v4789_v46, %s8272_s26  ;;  %v4172_v33 = vmax.f32 %v4026_v49, 0.0  ;;  %v5970_v19 = vadd.f32 %v13449_v39, %v5969_v27  ;;  %s13976_s20 = scalar_lea.vmem %s14025_s14, %s7275_s29 }
 0x6f5   : > { %7577 = vmatprep.mubr.msk.f32.mxu0 %vm3843_vm6, %v5770_v22  ;;  %7597 = vmatprep.subr.mxu1 %v6502_v29  ;;  %v5965_v22 = vadd.f32 %v7549_v37, %v13449_v39  ;;  %v7555_v56 = vpop.f32.mrf.mxu0 }
 0x6f6   : > { %v13440_v28 = vpop.permute.xlu0 %5114  ;;  %v13442_v46 = vpop.permute.xlu1 %5208  ;;  %7598 = vmatpush3.msra.mxu1 %v6502_v29  ;;  %v4021_v29 = vadd.f32 %v13419_v17, %v13149_v0  ;;  %v4036_v0 = vadd.f32 %v13153_v44, %v13419_v17 }
 0x6f7   : > { %v6119_v37 = vmax.f32 %v5965_v22, 0.0  ;;  %v5979_v14 = vpop.f32.mrf.mxu0 }
 0x6f8   : > { %5498 = vrot.lane.b32.xlu0 %v4791_v41, %s8263_s25  ;;  %5226 = vrot.lane.b32.xlu1 %v4791_v41, %s8272_s26  ;;  %v4171_v4 = vmax.f32 %v4021_v29, 0.0  ;;  %v4174_v44 = vmax.f32 %v4036_v0, 0.0 }
 0x6fa   : > { %v5483_v18 = vpop.permute.xlu0 %5482  ;;  %v13461_v11 = vpop.permute.xlu1 %4926 }
 0x6fb   : > { %v5771_v42 = vsel %vm1630_vm4, %v5739_v6, %v5483_v18  ;;  %v4031_v18 = vadd.f32 %v13419_v17, %v13170_v8 }
 0x6fc   : > { %7578 = vmatmul.mubr.msk.f32.gmra.mxu0 %vm3843_vm6, %v5771_v42  ;;  %6184 = vrot.lane.b32.xlu1 %v4170_v45, %s8270_s17  ;;  %v6121_v45 = vmax.f32 %v5975_v52, 0.0  ;;  %v5550_v42 = vsel %vm3569_vm11, %v14959_v3, %v15007_v15  ;;  %v5980_v3 = vadd.f32 %v13449_v39, %v5979_v14  ;;  %v7558_v52 = vpop.f32.mrf.mxu0 }
 0x6fd   : > { %6182 = vrot.lane.b32.xlu0 %v4169_v59, %s8270_s17  ;;  %v6120_v59 = vmax.f32 %v5970_v19, 0.0  ;;  %v5580_v49 = vsel %vm3602_vm12, %v5550_v42, %v13354_v20  ;;  %v4173_v27 = vmax.f32 %v4031_v18, 0.0  ;;  %v5995_v42 = vadd.f32 %v7558_v52, %v13449_v39 }
 0x6fe   : > { %v13470_v24 = vpop.permute.xlu0 %5210  ;;  %v5305_v26 = vpop.permute.xlu1 %5304  ;;  %v5612_v29 = vsel %vm3635_vm13, %v5580_v49, %v13377_v38  ;;  %v4046_v38 = vadd.f32 %v13177_v48, %v13419_v17  ;;  %v6122_v18 = vmax.f32 %v5980_v3, 0.0  ;;  %v4051_v52 = vadd.f32 %v13419_v17, %v13199_v61 }
 0x6ff   : > { %v5989_v15 = vpop.f32.mrf.mxu0  ;;  %v6125_v3 = vmax.f32 %v5995_v42, 0.0  ;;  %v4066_v61 = vadd.f32 %v13205_v34, %v13419_v17  ;;  %v15009_v42 = vld [vmem:[#allocation112_spill] sm:$0xff] }
 0x700   : > { %6312 = vrot.lane.b32.xlu1 %v6119_v37, %s8271_s23  ;;  %v5985_v37 = vadd.f32 %v7555_v56, %v13449_v39  ;;  %v5552_v34 = vsel %vm3569_vm11, %v14968_v35, %v15009_v42 }
 0x701   : > { %6310 = vrot.lane.b32.xlu0 %v6118_v62, %s8271_s23 }
 0x702   : > { %v13477_v41 = vpop.permute.xlu0 %4928  ;;  %v13479_v57 = vpop.permute.xlu1 %5020  ;;  %v6123_v19 = vmax.f32 %v5985_v37, 0.0  ;;  %v5990_v37 = vadd.f32 %v13449_v39, %v5989_v15  ;;  %v4180_v15 = vmax.f32 %v4066_v61, 0.0 }
 0x704   : > { %6188 = vrot.lane.b32.xlu1 %v4172_v33, %s8270_s17  ;;  %v5644_v33 = vsel %vm1597_vm3, %v5612_v29, %v13403_v51  ;;  %v4041_v51 = vadd.f32 %v13419_v17, %v13187_v5 }
 0x705   : > { %6186 = vrot.lane.b32.xlu0 %v4171_v4, %s8270_s17  ;;  %v5676_v20 = vsel %vm3700_vm14, %v5644_v33, %v13442_v46 }
 0x706   : > { %v5307_v22 = vpop.permute.xlu0 %5306  ;;  %v5395_v6 = vpop.permute.xlu1 %5394  ;;  %v5708_v4 = vsel %vm3733_vm15, %v5676_v20, %v5305_v26 }
 0x707   : > { %v5740_v56 = vsel %vm3766_vm5, %v5708_v4, %v5395_v6  ;;  %v4176_v6 = vmax.f32 %v4046_v38, 0.0 }
 0x708   : > { %6316 = vrot.lane.b32.xlu1 %v6121_v45, %s8271_s23 }
 0x709   : > { %6314 = vrot.lane.b32.xlu0 %v6120_v59, %s8271_s23  ;;  %v15008_v59 = vld [vmem:[#allocation62_spill] sm:$0xff] }
 0x70a   : > { %v13498_v8 = vpop.permute.xlu0 %5022  ;;  %v13500_v62 = vpop.permute.xlu1 %5116  ;;  %v5551_v26 = vsel %vm3569_vm11, %v14960_v43, %v15008_v59  ;;  %v4175_v43 = vmax.f32 %v4041_v51, 0.0  ;;  %v4061_v59 = vadd.f32 %v13419_v17, %v13216_v55 }
 0x70b   : > { %v5581_v48 = vsel %vm3602_vm12, %v5551_v26, %v13375_v23 }
 0x70c   : > { %6192 = vrot.lane.b32.xlu1 %v4174_v44, %s8270_s17  ;;  %v5613_v5 = vsel %vm3635_vm13, %v5581_v48, %v13401_v54  ;;  %v4056_v54 = vadd.f32 %v13190_v60, %v13419_v17 }
 0x70d   : > { %6190 = vrot.lane.b32.xlu0 %v4173_v27, %s8270_s17  ;;  %v5645_v44 = vsel %vm1597_vm3, %v5613_v5, %v13440_v28  ;;  %v4179_v5 = vmax.f32 %v4061_v59, 0.0 }
 0x70e   : > { %v5397_v0 = vpop.permute.xlu0 %5396  ;;  %v5485_v45 = vpop.permute.xlu1 %5484  ;;  %v5677_v23 = vsel %vm3700_vm14, %v5645_v44, %v13470_v24  ;;  %v6124_v24 = vmax.f32 %v5990_v37, 0.0  ;;  %v4178_v60 = vmax.f32 %v4056_v54, 0.0 }
 0x70f   : > { %v5772_v46 = vsel %vm1630_vm4, %v5740_v56, %v5485_v45  ;;  %v5709_v29 = vsel %vm3733_vm15, %v5677_v23, %v5307_v22 }
 0x710   : > { %7580 = vmatprep.mubr.msk.f32.mxu0 %vm3843_vm6, %v5772_v46  ;;  %6320 = vrot.lane.b32.xlu1 %v6123_v19, %s8271_s23  ;;  %v5741_v33 = vsel %vm3766_vm5, %v5709_v29, %v5397_v0  ;;  %v4177_v0 = vmax.f32 %v4051_v52, 0.0 }
 0x711   : > { %6318 = vrot.lane.b32.xlu0 %v6122_v18, %s8271_s23 }
 0x712   : > { %v13527_v14 = vpop.permute.xlu0 %5118  ;;  %v5213_v49 = vpop.permute.xlu1 %5212 }
 0x714   : > { %6196 = vrot.lane.b32.xlu1 %v4176_v6, %s8270_s17 }
 0x715   : > { %v7561_v27 = vpop.f32.mrf.mxu0  ;;  %6194 = vrot.lane.b32.xlu0 %v4175_v43, %s8270_s17  ;;  %v5582_v43 = vsel %vm3602_vm12, %v5552_v34, %v13461_v11  ;;  %v15011_v34 = vld [vmem:[#allocation141_spill] sm:$0xff] }
 0x716   : > { %v5487_v20 = vpop.permute.xlu0 %5486  ;;  %v13540_v28 = vpop.permute.xlu1 %4930  ;;  %v6005_v22 = vadd.f32 %v7561_v27, %v13449_v39  ;;  %v5614_v55 = vsel %vm3635_vm13, %v5582_v43, %v13479_v57 }
 0x717   : > { %v5773_v4 = vsel %vm1630_vm4, %v5741_v33, %v5487_v20  ;;  %v5999_v38 = vpop.f32.mrf.mxu0  ;;  %v5646_v23 = vsel %vm1597_vm3, %v5614_v55, %v13500_v62  ;;  %v15010_v33 = vld [vmem:[#allocation113_spill] sm:$0xff] }
 0x718   : > { %7581 = vmatmul.mubr.msk.f32.gmra.mxu0 %vm3843_vm6, %v5773_v4  ;;  %6324 = vrot.lane.b32.xlu1 %v6125_v3, %s8271_s23  ;;  %v6000_v45 = vadd.f32 %v13449_v39, %v5999_v38  ;;  %v6127_v51 = vmax.f32 %v6005_v22, 0.0  ;;  %v5678_v29 = vsel %vm3700_vm14, %v5646_v23, %v5213_v49  ;;  %v5553_v20 = vsel %vm3569_vm11, %v14969_v40, %v15010_v33 }
 0x719   : > { %6322 = vrot.lane.b32.xlu0 %v6124_v24, %s8271_s23  ;;  %v5583_v57 = vsel %vm3602_vm12, %v5553_v20, %v13477_v41 }
 0x71a   : > { %v5215_v19 = vpop.permute.xlu0 %5214  ;;  %v5309_v56 = vpop.permute.xlu1 %5308  ;;  %v6126_v26 = vmax.f32 %v6000_v45, 0.0  ;;  %v5615_v62 = vsel %vm3635_vm13, %v5583_v57, %v13498_v8  ;;  %v4076_v45 = vadd.f32 %v13226_v12, %v13419_v17 }
 0x71b   : > { %v5710_v27 = vsel %vm3733_vm15, %v5678_v29, %v5309_v56  ;;  %v5647_v24 = vsel %vm1597_vm3, %v5615_v62, %v13527_v14 }
 0x71c   : > { %6200 = vrot.lane.b32.xlu1 %v4178_v60, %s8270_s17  ;;  %v5679_v4 = vsel %vm3700_vm14, %v5647_v24, %v5215_v19  ;;  %v4071_v19 = vadd.f32 %v13419_v17, %v13237_v53  ;;  %v5554_v53 = vsel %vm3569_vm11, %v14977_v63, %v15011_v34  ;;  %v15012_v63 = vld [vmem:[#allocation118_spill] sm:$0xff] }
 0x71d   : > { %6198 = vrot.lane.b32.xlu0 %v4177_v0, %s8270_s17  ;;  %v5584_v43 = vsel %vm3602_vm12, %v5554_v53, %v13540_v28  ;;  %v5555_v28 = vsel %vm3569_vm11, %v14978_v21, %v15012_v63 }
 0x71e   : > { %v13554_v18 = vpop.permute.xlu0 %4932  ;;  %v5025_v46 = vpop.permute.xlu1 %5024 }
 0x71f   : > { %v5616_v55 = vsel %vm3635_vm13, %v5584_v43, %v5025_v46  ;;  %v5585_v46 = vsel %vm3602_vm12, %v5555_v28, %v13554_v18 }
 0x720   : > { %6328 = vrot.lane.b32.xlu1 %v6127_v51, %s8271_s23 }
 0x721   : > { %6326 = vrot.lane.b32.xlu0 %v6126_v26, %s8271_s23 }
 0x722   : > { %v5311_v48 = vpop.permute.xlu0 %5310  ;;  %v5399_v6 = vpop.permute.xlu1 %5398 }
 0x723   : > { %v5742_v35 = vsel %vm3766_vm5, %v5710_v27, %v5399_v6  ;;  %v5711_v38 = vsel %vm3733_vm15, %v5679_v4, %v5311_v48  ;;  %v4181_v48 = vmax.f32 %v4071_v19, 0.0 }
 0x724   : > { %6204 = vrot.lane.b32.xlu1 %v4180_v15, %s8270_s17  ;;  %v4182_v15 = vmax.f32 %v4076_v45, 0.0 }
 0x725   : > { %6202 = vrot.lane.b32.xlu0 %v4179_v5, %s8270_s17 }
 0x726   : > { %v5027_v44 = vpop.permute.xlu0 %5026  ;;  %v5121_v37 = vpop.permute.xlu1 %5120 }
 0x727   : > { %v5648_v27 = vsel %vm1597_vm3, %v5616_v55, %v5121_v37  ;;  %v5617_v37 = vsel %vm3635_vm13, %v5585_v46, %v5027_v44  ;;  %v4086_v44 = vadd.f32 %v13246_v2, %v13419_v17 }
 0x729   : > { %v4184_v19 = vmax.f32 %v4086_v44, 0.0 }
 0x72a   : > { %v5401_v54 = vpop.permute.xlu0 %5400  ;;  %v5489_v3 = vpop.permute.xlu1 %5488 }
 0x72b   : > { %v5774_v11 = vsel %vm1630_vm4, %v5742_v35, %v5489_v3  ;;  %v5743_v40 = vsel %vm3766_vm5, %v5711_v38, %v5401_v54 }
 0x72c   : > { %7583 = vmatprep.mubr.msk.f32.mxu0 %vm3843_vm6, %v5774_v11 }
 0x72e   : > { %v5123_v49 = vpop.permute.xlu0 %5122  ;;  %v5217_v52 = vpop.permute.xlu1 %5216 }
 0x72f   : > { %v5680_v35 = vsel %vm3700_vm14, %v5648_v27, %v5217_v52  ;;  %v5649_v52 = vsel %vm1597_vm3, %v5617_v37, %v5123_v49 }
 0x731   : > { %v7564_v60 = vpop.f32.mrf.mxu0 }
 0x732   : > { %v6015_v22 = vadd.f32 %v7564_v60, %v13449_v39  ;;  %v5491_v56 = vpop.permute.xlu0 %5490  ;;  %v13589_v0 = vpop.permute.xlu1 %4934 }
 0x733   : > { %v5775_v41 = vsel %vm1630_vm4, %v5743_v40, %v5491_v56  ;;  %v6009_v8 = vpop.f32.mrf.mxu0 }
 0x734   : > { %v6129_v61 = vmax.f32 %v6015_v22, 0.0  ;;  %v6010_v14 = vadd.f32 %v13449_v39, %v6009_v8  ;;  %7584 = vmatmul.mubr.msk.f32.gmra.mxu0 %vm3843_vm6, %v5775_v41  ;;  %v4081_v8 = vadd.f32 %v13419_v17, %v13262_v9 }
 0x736   : > { %v6128_v51 = vmax.f32 %v6010_v14, 0.0  ;;  %6332 = vrot.lane.b32.xlu1 %v6129_v61, %s8271_s23  ;;  %v5219_v59 = vpop.permute.xlu0 %5218  ;;  %v5313_v26 = vpop.permute.xlu1 %5312 }
 0x737   : > { %v5712_v54 = vsel %vm3733_vm15, %v5680_v35, %v5313_v26  ;;  %v5681_v24 = vsel %vm3700_vm14, %v5649_v52, %v5219_v59 }
 0x738   : > { %6330 = vrot.lane.b32.xlu0 %v6128_v51, %s8271_s23  ;;  %v4183_v51 = vmax.f32 %v4081_v8, 0.0 }
 0x73a   : > { %6208 = vrot.lane.b32.xlu1 %v4182_v15, %s8270_s17  ;;  %v13601_v12 = vpop.permute.xlu0 %4936  ;;  %v5029_v6 = vpop.permute.xlu1 %5028 }
 0x73c   : > { %6206 = vrot.lane.b32.xlu0 %v4181_v48, %s8270_s17  ;;  %v15013_v48 = vld [vmem:[#allocation111_spill] sm:$0xff] }
 0x73d   : > { %v5556_v9 = vsel %vm3569_vm11, %v14984_v47, %v15013_v48 }
 0x73e   : > { %v5315_v5 = vpop.permute.xlu0 %5314  ;;  %v5403_v42 = vpop.permute.xlu1 %5402 }
 0x73f   : > { %v5744_v3 = vsel %vm3766_vm5, %v5712_v54, %v5403_v42  ;;  %v5713_v4 = vsel %vm3733_vm15, %v5681_v24, %v5315_v5  ;;  %v5586_v5 = vsel %vm3602_vm12, %v5556_v9, %v13589_v0 }
 0x740   : > { %v5618_v42 = vsel %vm3635_vm13, %v5586_v5, %v5029_v6  ;;  %v15023_v5 = vld [vmem:[#allocation7_spill] sm:$0xff] }
 0x742   : > { %v5031_v23 = vpop.permute.xlu0 %5030  ;;  %v5125_v29 = vpop.permute.xlu1 %5124 }
 0x743   : > { %v5650_v43 = vsel %vm1597_vm3, %v5618_v42, %v5125_v29 }
 0x746   : > { %v5405_v11 = vpop.permute.xlu0 %5404  ;;  %v5493_v33 = vpop.permute.xlu1 %5492 }
 0x747   : > { %v5776_v20 = vsel %vm1630_vm4, %v5744_v3, %v5493_v33  ;;  %v5745_v60 = vsel %vm3766_vm5, %v5713_v4, %v5405_v11  ;;  %v15014_v11 = vld [vmem:[#allocation115_spill] sm:$0xff]  ;;  %v15015_v33 = vld [vmem:[#allocation125_spill] sm:$0xff] }
 0x748   : > { %7586 = vmatprep.mubr.msk.f32.mxu0 %vm3843_vm6, %v5776_v20  ;;  %v5558_v47 = vsel %vm3569_vm11, %v14991_v32, %v15014_v11  ;;  %v5557_v6 = vsel %vm3569_vm11, %v14985_v50, %v15015_v33 }
 0x749   : > { %v5587_v20 = vsel %vm3602_vm12, %v5557_v6, %v13601_v12 }
 0x74a   : > { %v5127_v57 = vpop.permute.xlu0 %5126  ;;  %v5221_v62 = vpop.permute.xlu1 %5220  ;;  %v5619_v28 = vsel %vm3635_vm13, %v5587_v20, %v5031_v23 }
 0x74b   : > { %v5682_v55 = vsel %vm3700_vm14, %v5650_v43, %v5221_v62  ;;  %v15016_v62 = vld [vmem:[#allocation119_spill] sm:$0xff]  ;;  %v5651_v50 = vsel %vm1597_vm3, %v5619_v28, %v5127_v57  ;;  %v13680_v57 = vld [vmem:[%s14013_s2] ss:$0 sm:$0xff] }
 0x74c   : > { %v5559_v52 = vsel %vm3569_vm11, %v14992_v25, %v15016_v62 }
 0x74d   : > { %v7567_v38 = vpop.f32.mrf.mxu0 }
 0x74e   : > { %v6025_v21 = vadd.f32 %v7567_v38, %v13449_v39  ;;  %v5495_v40 = vpop.permute.xlu0 %5494  ;;  %v4939_v22 = vpop.permute.xlu1 %4938  ;;  %v15017_v38 = vld [vmem:[#allocation101_spill] sm:$0xff] }
 0x74f   : > { %v5777_v56 = vsel %vm1630_vm4, %v5745_v60, %v5495_v40  ;;  %v6019_v18 = vpop.f32.mrf.mxu0  ;;  %v5588_v29 = vsel %vm3602_vm12, %v5558_v47, %v4939_v22  ;;  %v15018_v60 = vunpack.i.l.bf16 %v15017_v38 }
 0x750   : > { %v6131_v41 = vmax.f32 %v6025_v21, 0.0  ;;  %v6020_v49 = vadd.f32 %v13449_v39, %v6019_v18  ;;  %7587 = vmatmul.mubr.msk.f32.gmra.mxu0 %vm3843_vm6, %v5777_v56  ;;  %v15019_v56 = vld [vmem:[#allocation2_spill] sm:$0xff] }
 0x751   : > { %v15020_v18 = vunpack.i.l.bf16 %v15019_v56 }
 0x752   : > { %v6130_v45 = vmax.f32 %v6020_v49, 0.0  ;;  %6336 = vrot.lane.b32.xlu1 %v6131_v41, %s8271_s23  ;;  %v5223_v61 = vpop.permute.xlu0 %5222  ;;  %v5317_v14 = vpop.permute.xlu1 %5316 }
 0x753   : > { %v5714_v27 = vsel %vm3733_vm15, %v5682_v55, %v5317_v14  ;;  %v5683_v4 = vsel %vm3700_vm14, %v5651_v50, %v5223_v61  ;;  %v15021_v61 = vld [vmem:[#allocation8_spill] sm:$0xff]  ;;  %v4091_v55 = vadd.f32 %v13419_v17, %v13275_v1 }
 0x754   : > { %6334 = vrot.lane.b32.xlu0 %v6130_v45, %s8271_s23  ;;  %v1989_v14 = vadd.f32 %v13680_v57, %v15021_v61 }
 0x755   : > { %v4185_v6 = vmax.f32 %v4091_v55, 0.0 }
 0x756   : > { %6212 = vrot.lane.b32.xlu1 %v4184_v19, %s8270_s17  ;;  %v4941_v2 = vpop.permute.xlu0 %4940  ;;  %v5033_v59 = vpop.permute.xlu1 %5032  ;;  %v4096_v19 = vadd.f32 %v13268_v31, %v13419_v17  ;;  %v2143_v47 = vmax.f32 %v1989_v14, 0.0 }
 0x757   : > { %v5620_v63 = vsel %vm3635_vm13, %v5588_v29, %v5033_v59  ;;  %v5589_v12 = vsel %vm3602_vm12, %v5559_v52, %v4941_v2  ;;  %v15028_v52 = vld [vmem:[#allocation31_spill] sm:$0xff] }
 0x758   : > { %6210 = vrot.lane.b32.xlu0 %v4183_v51, %s8270_s17  ;;  %v1994_v50 = vadd.f32 %v13680_v57, %v15028_v52 }
 0x75a   : > { %v5319_v26 = vpop.permute.xlu0 %5318  ;;  %v5407_v15 = vpop.permute.xlu1 %5406 }
 0x75b   : > { %v5746_v35 = vsel %vm3766_vm5, %v5714_v27, %v5407_v15  ;;  %v5715_v21 = vsel %vm3733_vm15, %v5683_v4, %v5319_v26  ;;  %v15022_v15 = vunpack.i.h.bf16 %v15017_v38 }
 0x75e   : > { %v5035_v34 = vpop.permute.xlu0 %5034  ;;  %v5129_v53 = vpop.permute.xlu1 %5128 }
 0x75f   : > { %v5652_v46 = vsel %vm1597_vm3, %v5620_v63, %v5129_v53  ;;  %v5621_v40 = vsel %vm3635_vm13, %v5589_v12, %v5035_v34  ;;  %v15024_v34 = vld [vmem:[#allocation24_spill] sm:$0xff]  ;;  %v15025_v53 = vunpack.i.h.bf16 %v15019_v56 }
 0x760   : > { %v1984_v31 = vadd.f32 %v13680_v57, %v15024_v34 }
 0x762   : > { %v5409_v54 = vpop.permute.xlu0 %5408  ;;  %v5497_v3 = vpop.permute.xlu1 %5496  ;;  %v2142_v33 = vmax.f32 %v1984_v31, 0.0  ;;  %v15032_v31 = vld [vmem:[#allocation14_spill] sm:$0xff] }
 0x763   : > { %v5778_v0 = vsel %vm1630_vm4, %v5746_v35, %v5497_v3  ;;  %v5747_v44 = vsel %vm3766_vm5, %v5715_v21, %v5409_v54  ;;  %v15026_v54 = vld [vmem:[#allocation18_spill] sm:$0xff] }
 0x764   : > { %7589 = vmatprep.mubr.msk.f32.mxu0 %vm3843_vm6, %v5778_v0  ;;  %v4186_v0 = vmax.f32 %v4096_v19, 0.0 }
 0x766   : > { %v5131_v32 = vpop.permute.xlu0 %5130  ;;  %v5225_v37 = vpop.permute.xlu1 %5224 }
 0x767   : > { %v5684_v24 = vsel %vm3700_vm14, %v5652_v46, %v5225_v37  ;;  %v5653_v41 = vsel %vm1597_vm3, %v5621_v40, %v5131_v32  ;;  %v15027_v46 = vld [vmem:[#allocation9_spill] sm:$0xff] }
 0x768   : > { %v5716_v23 = vsel %vm3733_vm15, %v5684_v24, %v15018_v60  ;;  %v1999_v32 = vadd.f32 %v13680_v57, %v15027_v46  ;;  %v2144_v60 = vmax.f32 %v1994_v50, 0.0 }
 0x769   : > { %v7570_v22 = vpop.f32.mrf.mxu0  ;;  %v5748_v25 = vsel %vm3766_vm5, %v5716_v23, %v15020_v18  ;;  %v15029_v18 = vld [vmem:[#allocation12_spill] sm:$0xff] }
 0x76a   : > { %v6035_v49 = vadd.f32 %v7570_v22, %v13449_v39  ;;  %v5499_v8 = vpop.permute.xlu0 %5498  ;;  %v5227_v45 = vpop.permute.xlu1 %5226  ;;  %v5780_v42 = vsel %vm1630_vm4, %v5748_v25, %v15023_v5  ;;  %v2145_v38 = vmax.f32 %v1999_v32, 0.0  ;;  %v2009_v25 = vadd.f32 %v13680_v57, %v15029_v18  ;;  %v15033_v32 = vld [vmem:[#allocation39_spill] sm:$0xff] }
 0x76b   : > { %v5779_v51 = vsel %vm1630_vm4, %v5747_v44, %v5499_v8  ;;  %v5685_v2 = vsel %vm3700_vm14, %v5653_v41, %v5227_v45  ;;  %v6029_v59 = vpop.f32.mrf.mxu0 }
 0x76c   : > { %v6133_v26 = vmax.f32 %v6035_v49, 0.0  ;;  %v5717_v48 = vsel %vm3733_vm15, %v5685_v2, %v15022_v15  ;;  %v6030_v9 = vadd.f32 %v13449_v39, %v6029_v59  ;;  %7590 = vmatmul.mubr.msk.f32.gmra.mxu0 %vm3843_vm6, %v5779_v51  ;;  %v15030_v49 = vld [vmem:[#allocation11_spill] sm:$0xff]  ;;  %v2147_v19 = vmax.f32 %v2009_v25, 0.0 }
 0x76d   : > { %v5749_v43 = vsel %vm3766_vm5, %v5717_v48, %v15025_v53  ;;  %7592 = vmatprep.mubr.msk.f32.mxu0 %vm3843_vm6, %v5780_v42  ;;  %v2004_v8 = vadd.f32 %v13680_v57, %v15030_v49  ;;  %v2014_v53 = vadd.f32 %v13680_v57, %v15032_v31 }
 0x76e   : > { %v6132_v27 = vmax.f32 %v6030_v9, 0.0  ;;  %6340 = vrot.lane.b32.xlu1 %v6133_v26, %s8271_s23  ;;  %v6185_v35 = vpop.permute.xlu1 %6184  ;;  %v5781_v3 = vsel %vm1630_vm4, %v5749_v43, %v15026_v54  ;;  %v15031_v9 = vld [vmem:[#allocation15_spill] sm:$0xff] }
 0x76f   : > { %v6183_v11 = vpop.permute.xlu0 %6182  ;;  %v6407_v29 = vsel %vm3602_vm12, %v2143_v47, %v6185_v35  ;;  %v2146_v51 = vmax.f32 %v2004_v8, 0.0  ;;  %v2019_v5 = vadd.f32 %v13680_v57, %v15031_v9  ;;  %v4106_v47 = vadd.f32 %v13280_v30, %v13419_v17 }
 0x770   : > { %6338 = vrot.lane.b32.xlu0 %v6132_v27, %s8271_s23  ;;  %7593 = vmatmul.mubr.msk.f32.gmra.mxu0 %vm3843_vm6, %v5781_v3  ;;  %v6406_v20 = vsel %vm3602_vm12, %v2142_v33, %v6183_v11  ;;  %v4111_v9 = vadd.f32 %v13419_v17, %v13311_v10 }
 0x771   : > { %v2149_v11 = vmax.f32 %v2019_v5, 0.0 }
 0x772   : > { %6216 = vrot.lane.b32.xlu1 %v4186_v0, %s8270_s17  ;;  %v6313_v1 = vpop.permute.xlu1 %6312 }
 0x773   : > { %v6439_v63 = vsel %vm3635_vm13, %v6407_v29, %v6313_v1  ;;  %v6311_v28 = vpop.permute.xlu0 %6310  ;;  %v4101_v29 = vadd.f32 %v13419_v17, %v13290_v13  ;;  %v15034_v13 = vld [vmem:[#allocation26_spill] sm:$0xff] }
 0x774   : > { %v6471_v37 = vmax.f32 %v6439_v63, 0.0  ;;  %v6438_v62 = vsel %vm3635_vm13, %v6406_v20, %v6311_v28  ;;  %6214 = vrot.lane.b32.xlu0 %v4185_v6, %s8270_s17  ;;  %v2148_v6 = vmax.f32 %v2014_v53, 0.0 }
 0x775   : > { %v6470_v24 = vmax.f32 %v6438_v62, 0.0  ;;  %v4188_v62 = vmax.f32 %v4106_v47, 0.0 }
 0x776   : > { %v6189_v4 = vpop.permute.xlu1 %6188 }
 0x777   : > { %7599 = vmatprep.mubr.msk.f32.mxu1 %vm1597_vm3, %v6470_v24  ;;  %v6187_v12 = vpop.permute.xlu0 %6186  ;;  %v6409_v23 = vsel %vm3602_vm12, %v2145_v38, %v6189_v4  ;;  %v2024_v24 = vadd.f32 %v13680_v57, %v15034_v13 }
 0x778   : > { %7600 = vmatmul.mubr.msk.f32.vlgmr.msra.gmra.mxu1 %vm1597_vm3, %v6471_v37  ;;  %v6408_v40 = vsel %vm3602_vm12, %v2144_v60, %v6187_v12  ;;  %v2029_v37 = vadd.f32 %v13680_v57, %v15033_v32  ;;  %v4187_v12 = vmax.f32 %v4101_v29, 0.0  ;;  %v15039_v32 = vld [vmem:[#allocation126_spill] sm:$0xff] }
 0x77a   : > { %v6317_v21 = vpop.permute.xlu1 %6316 }
 0x77b   : > { %v6441_v22 = vsel %vm3635_vm13, %v6409_v23, %v6317_v21  ;;  %v6315_v56 = vpop.permute.xlu0 %6314  ;;  %v2151_v23 = vmax.f32 %v2029_v37, 0.0  ;;  %v2150_v21 = vmax.f32 %v2024_v24, 0.0  ;;  %v4121_v37 = vadd.f32 %v13419_v17, %v15039_v32 }
 0x77c   : > { %v6473_v44 = vmax.f32 %v6441_v22, 0.0  ;;  %v6440_v41 = vsel %vm3635_vm13, %v6408_v40, %v6315_v56 }
 0x77d   : > { %v6472_v45 = vmax.f32 %v6440_v41, 0.0 }
 0x77e   : > { %v6193_v61 = vpop.permute.xlu1 %6192 }
 0x77f   : > { %v6191_v14 = vpop.permute.xlu0 %6190  ;;  %7602 = vmatprep.mubr.msk.f32.mxu1 %vm1597_vm3, %v6472_v45  ;;  %v6411_v2 = vsel %vm3602_vm12, %v2147_v19, %v6193_v61  ;;  %v15035_v61 = vld [vmem:[#allocation41_spill] sm:$0xff] }
 0x780   : > { %7603 = vmatmul.mubr.msk.f32.gmra.mxu1 %vm1597_vm3, %v6473_v44  ;;  %v6410_v26 = vsel %vm3602_vm12, %v2146_v51, %v6191_v14  ;;  %v2039_v14 = vadd.f32 %v13680_v57, %v15035_v61  ;;  %v15036_v51 = vld [vmem:[#allocation40_spill] sm:$0xff] }
 0x781   : > { %v15041_v61 = vld [vmem:[#allocation44_spill] sm:$0xff] }
 0x782   : > { %v6321_v59 = vpop.permute.xlu1 %6320 }
 0x783   : > { %v6443_v15 = vsel %vm3635_vm13, %v6411_v2, %v6321_v59  ;;  %v6319_v48 = vpop.permute.xlu0 %6318  ;;  %v2034_v2 = vadd.f32 %v13680_v57, %v15036_v51  ;;  %v4116_v59 = vadd.f32 %v13292_v58, %v13419_v17  ;;  %v4189_v58 = vmax.f32 %v4111_v9, 0.0  ;;  %v15042_v51 = vld [vmem:[#allocation70_spill] sm:$0xff] }
 0x784   : > { %v6475_v42 = vmax.f32 %v6443_v15, 0.0  ;;  %v6442_v34 = vsel %vm3635_vm13, %v6410_v26, %v6319_v48 }
 0x785   : > { %v6474_v43 = vmax.f32 %v6442_v34, 0.0  ;;  %v7573_v55 = vpop.f32.mrf.mxu0  ;;  %v2153_v34 = vmax.f32 %v2039_v14, 0.0  ;;  %v2152_v31 = vmax.f32 %v2034_v2, 0.0  ;;  %v4190_v53 = vmax.f32 %v4116_v59, 0.0 }
 0x786   : > { %v6045_v27 = vadd.f32 %v7573_v55, %v13449_v39  ;;  %v6197_v35 = vpop.permute.xlu1 %6196  ;;  %v2054_v14 = vadd.f32 %v13680_v57, %v15041_v61  ;;  %v4131_v2 = vadd.f32 %v13419_v17, %v15042_v51 }
 0x787   : > { %v6039_v54 = vpop.f32.mrf.mxu0  ;;  %v6195_v3 = vpop.permute.xlu0 %6194  ;;  %7605 = vmatprep.mubr.msk.f32.mxu1 %vm1597_vm3, %v6474_v43  ;;  %v6413_v1 = vsel %vm3602_vm12, %v2149_v11, %v6197_v35 }
 0x788   : > { %v6135_v0 = vmax.f32 %v6045_v27, 0.0  ;;  %v6040_v33 = vadd.f32 %v13449_v39, %v6039_v54  ;;  %7606 = vmatmul.mubr.msk.f32.gmra.mxu1 %vm1597_vm3, %v6475_v42  ;;  %v6412_v28 = vsel %vm3602_vm12, %v2148_v6, %v6195_v3  ;;  %v15037_v6 = vld [vmem:[#allocation43_spill] sm:$0xff]  ;;  %v2156_v9 = vmax.f32 %v2054_v14, 0.0 }
 0x789   : > { %v2049_v29 = vadd.f32 %v13680_v57, %v15037_v6  ;;  %v15045_v6 = vld [vmem:[#allocation75_spill] sm:$0xff] }
 0x78a   : > { %v6134_v20 = vmax.f32 %v6040_v33, 0.0  ;;  %6344 = vrot.lane.b32.xlu1 %v6135_v0, %s8271_s23  ;;  %v6325_v63 = vpop.permute.xlu1 %6324 }
 0x78b   : > { %v6445_v46 = vsel %vm3635_vm13, %v6413_v1, %v6325_v63  ;;  %v6323_v30 = vpop.permute.xlu0 %6322  ;;  %v4126_v1 = vadd.f32 %v13320_v36, %v13419_v17 }
 0x78c   : > { %v6477_v52 = vmax.f32 %v6445_v46, 0.0  ;;  %v6444_v50 = vsel %vm3635_vm13, %v6412_v28, %v6323_v30  ;;  %6342 = vrot.lane.b32.xlu0 %v6134_v20, %s8271_s23  ;;  %v15038_v28 = vld [vmem:[#allocation42_spill] sm:$0xff] }
 0x78d   : > { %v6476_v4 = vmax.f32 %v6444_v50, 0.0  ;;  %v2044_v46 = vadd.f32 %v13680_v57, %v15038_v28  ;;  %v2155_v50 = vmax.f32 %v2049_v29, 0.0  ;;  %v4192_v13 = vmax.f32 %v4126_v1, 0.0 }
 0x78e   : > { %6220 = vrot.lane.b32.xlu1 %v4188_v62, %s8270_s17  ;;  %v6201_v38 = vpop.permute.xlu1 %6200  ;;  %v2064_v29 = vadd.f32 %v13680_v57, %v15045_v6 }
 0x78f   : > { %v6199_v60 = vpop.permute.xlu0 %6198  ;;  %7608 = vmatprep.mubr.msk.f32.mxu1 %vm1597_vm3, %v6476_v4  ;;  %v6415_v40 = vsel %vm3602_vm12, %v2151_v23, %v6201_v38  ;;  %v2154_v24 = vmax.f32 %v2044_v46, 0.0  ;;  %v4191_v4 = vmax.f32 %v4121_v37, 0.0 }
 0x790   : > { %6218 = vrot.lane.b32.xlu0 %v4187_v12, %s8270_s17  ;;  %7609 = vmatmul.mubr.msk.f32.gmra.mxu1 %vm1597_vm3, %v6477_v52  ;;  %v6414_v56 = vsel %vm3602_vm12, %v2150_v21, %v6199_v60  ;;  %v2158_v37 = vmax.f32 %v2064_v29, 0.0 }
 0x792   : > { %v6329_v22 = vpop.permute.xlu1 %6328 }
 0x793   : > { %v6447_v18 = vsel %vm3635_vm13, %v6415_v40, %v6329_v22  ;;  %v6327_v25 = vpop.permute.xlu0 %6326 }
 0x794   : > { %v6479_v44 = vmax.f32 %v6447_v18, 0.0  ;;  %v6446_v41 = vsel %vm3635_vm13, %v6414_v56, %v6327_v25 }
 0x795   : > { %v6478_v49 = vmax.f32 %v6446_v41, 0.0 }
 0x796   : > { %v6205_v26 = vpop.permute.xlu1 %6204 }
 0x797   : > { %7611 = vmatprep.mubr.msk.f32.mxu1 %vm1597_vm3, %v6478_v49  ;;  %v6203_v5 = vpop.permute.xlu0 %6202  ;;  %v6417_v55 = vsel %vm3602_vm12, %v2153_v34, %v6205_v26  ;;  %v4136_v49 = vadd.f32 %v13344_v7, %v13419_v17 }
 0x798   : > { %7612 = vmatmul.mubr.msk.f32.gmra.mxu1 %vm1597_vm3, %v6479_v44  ;;  %v6416_v27 = vsel %vm3602_vm12, %v2152_v31, %v6203_v5  ;;  %v15040_v44 = vld [vmem:[#allocation30_spill] sm:$0xff]  ;;  %v4193_v5 = vmax.f32 %v4131_v2, 0.0 }
 0x799   : > { %v2059_v41 = vadd.f32 %v13680_v57, %v15040_v44 }
 0x7a1   : > { %v7576_v8 = vpop.f32.mrf.mxu0 }
 0x7a2   : > { %v6055_v45 = vadd.f32 %v7576_v8, %v13449_v39 }
 0x7a3   : > { %v6049_v19 = vpop.f32.mrf.mxu0 }
 0x7a4   : > { %v6137_v15 = vmax.f32 %v6055_v45, 0.0  ;;  %v6050_v48 = vadd.f32 %v13449_v39, %v6049_v19 }
 0x7a6   : > { %v6136_v42 = vmax.f32 %v6050_v48, 0.0  ;;  %6348 = vrot.lane.b32.xlu1 %v6137_v15, %s8271_s23  ;;  %v2157_v15 = vmax.f32 %v2059_v41, 0.0  ;;  %v4194_v48 = vmax.f32 %v4136_v49, 0.0  ;;  %v15049_v41 = vld [vmem:[#allocation46_spill] sm:$0xff] }
 0x7a7   : > { %v2074_v49 = vadd.f32 %v13680_v57, %v15049_v41 }
 0x7a8   : > { %v6333_v43 = vpop.permute.xlu1 %6332  ;;  %6346 = vrot.lane.b32.xlu0 %v6136_v42, %s8271_s23 }
 0x7a9   : > { %v6449_v35 = vsel %vm3635_vm13, %v6417_v55, %v6333_v43 }
 0x7aa   : > { %6224 = vrot.lane.b32.xlu1 %v4190_v53, %s8270_s17  ;;  %v6331_v10 = vpop.permute.xlu0 %6330  ;;  %v6481_v11 = vmax.f32 %v6449_v35, 0.0 }
 0x7ab   : > { %v6448_v54 = vsel %vm3635_vm13, %v6416_v27, %v6331_v10 }
 0x7ac   : > { %v6480_v3 = vmax.f32 %v6448_v54, 0.0  ;;  %6222 = vrot.lane.b32.xlu0 %v4189_v58, %s8270_s17  ;;  %v6209_v30 = vpop.permute.xlu1 %6208  ;;  %v15043_v54 = vld [vmem:[#allocation21_spill] sm:$0xff] }
 0x7ad   : > { %v6419_v12 = vsel %vm3602_vm12, %v2155_v50, %v6209_v30 }
 0x7ae   : > { %7614 = vmatprep.mubr.msk.f32.mxu1 %vm1597_vm3, %v6480_v3  ;;  %v6207_v52 = vpop.permute.xlu0 %6206  ;;  %v2069_v3 = vadd.f32 %v13680_v57, %v15043_v54  ;;  %v15053_v54 = vld [vmem:[#allocation120_spill] sm:$0xff] }
 0x7af   : > { %7615 = vmatmul.mubr.msk.f32.gmra.mxu1 %vm1597_vm3, %v6481_v11  ;;  %v6418_v38 = vsel %vm3602_vm12, %v2154_v24, %v6207_v52  ;;  %v15044_v11 = vld [vmem:[#allocation122_spill] sm:$0xff] }
 0x7b0   : > { %v2159_v30 = vmax.f32 %v2069_v3, 0.0 }
 0x7bc   : > { %v7579_v47 = vpop.f32.mrf.mxu0 }
 0x7bd   : > { %v6065_v0 = vadd.f32 %v7579_v47, %v13449_v39  ;;  %v4146_v47 = vadd.f32 %v15044_v11, %v13419_v17 }
 0x7be   : > { %v6059_v33 = vpop.f32.mrf.mxu0 }
 0x7bf   : > { %v6139_v20 = vmax.f32 %v6065_v0, 0.0  ;;  %v6060_v63 = vadd.f32 %v13449_v39, %v6059_v33  ;;  %v4196_v32 = vmax.f32 %v4146_v47, 0.0 }
 0x7c1   : > { %v6138_v62 = vmax.f32 %v6060_v63, 0.0  ;;  %6352 = vrot.lane.b32.xlu1 %v6139_v20, %s8271_s23  ;;  %v15046_v20 = vld [vmem:[#allocation5_spill] sm:$0xff] }
 0x7c2   : > { %v4141_v63 = vadd.f32 %v13419_v17, %v15046_v20 }
 0x7c3   : > { %6350 = vrot.lane.b32.xlu0 %v6138_v62, %s8271_s23 }
 0x7c4   : > { %v6337_v36 = vpop.permute.xlu1 %6336  ;;  %v4195_v52 = vmax.f32 %v4141_v63, 0.0 }
 0x7c5   : > { %6228 = vrot.lane.b32.xlu1 %v4192_v13, %s8270_s17  ;;  %v6451_v60 = vsel %vm3635_vm13, %v6419_v12, %v6337_v36 }
 0x7c6   : > { %v6335_v23 = vpop.permute.xlu0 %6334  ;;  %v6483_v22 = vmax.f32 %v6451_v60, 0.0 }
 0x7c7   : > { %v6450_v21 = vsel %vm3635_vm13, %v6418_v38, %v6335_v23  ;;  %6226 = vrot.lane.b32.xlu0 %v4191_v4, %s8270_s17 }
 0x7c8   : > { %v6482_v40 = vmax.f32 %v6450_v21, 0.0  ;;  %v6213_v19 = vpop.permute.xlu1 %6212  ;;  %v15047_v21 = vld [vmem:[#allocation17_spill] sm:$0xff] }
 0x7c9   : > { %v6421_v42 = vsel %vm3602_vm12, %v2157_v15, %v6213_v19 }
 0x7ca   : > { %7617 = vmatprep.mubr.msk.f32.mxu1 %vm1597_vm3, %v6482_v40  ;;  %v6211_v26 = vpop.permute.xlu0 %6210  ;;  %v2079_v40 = vadd.f32 %v13680_v57, %v15047_v21 }
 0x7cb   : > { %7618 = vmatmul.mubr.msk.f32.gmra.mxu1 %vm1597_vm3, %v6483_v22  ;;  %v6420_v34 = vsel %vm3602_vm12, %v2156_v9, %v6211_v26  ;;  %v8251_v22 = vld [vmem:[%s14017_s6] ss:$0 sm:$0xff] }
 0x7cc   : > { %v2161_v51 = vmax.f32 %v2079_v40, 0.0  ;;  %v4166_v3 = vadd.f32 %v8251_v22, %v15053_v54  ;;  %v4161_v6 = vadd.f32 %v8251_v22, %v13412_v16 }
 0x7d8   : > { %v7582_v56 = vpop.f32.mrf.mxu0 }
 0x7d9   : > { %v6075_v18 = vadd.f32 %v7582_v56, %v13449_v39  ;;  %v15048_v56 = vld [vmem:[#allocation123_spill] sm:$0xff] }
 0x7da   : > { %v6069_v25 = vpop.f32.mrf.mxu0 }
 0x7db   : > { %v6141_v8 = vmax.f32 %v6075_v18, 0.0  ;;  %v6070_v45 = vadd.f32 %v13449_v39, %v6069_v25  ;;  %v4156_v18 = vadd.f32 %v8251_v22, %v15048_v56 }
 0x7dd   : > { %v6140_v59 = vmax.f32 %v6070_v45, 0.0  ;;  %6356 = vrot.lane.b32.xlu1 %v6141_v8, %s8271_s23  ;;  %v15050_v45 = vld [vmem:[#allocation127_spill] sm:$0xff]  ;;  %v4198_v2 = vmax.f32 %v4156_v18, 0.0 }
 0x7de   : > { %v4151_v61 = vadd.f32 %v8251_v22, %v15050_v45 }
 0x7df   : > { %6354 = vrot.lane.b32.xlu0 %v6140_v59, %s8271_s23  ;;  %v2160_v59 = vmax.f32 %v2074_v49, 0.0 }
 0x7e0   : > { %v6341_v7 = vpop.permute.xlu1 %6340  ;;  %v4197_v15 = vmax.f32 %v4151_v61, 0.0 }
 0x7e1   : > { %6232 = vrot.lane.b32.xlu1 %v4194_v48, %s8270_s17  ;;  %v6453_v31 = vsel %vm3635_vm13, %v6421_v42, %v6341_v7 }
 0x7e2   : > { %v6339_v53 = vpop.permute.xlu0 %6338  ;;  %v6485_v58 = vmax.f32 %v6453_v31, 0.0 }
 0x7e3   : > { %v6452_v43 = vsel %vm3635_vm13, %v6420_v34, %v6339_v53  ;;  %6230 = vrot.lane.b32.xlu0 %v4193_v5, %s8270_s17  ;;  %v8252_v53 = vld [vmem:[%s14021_s10] ss:$0 sm:$0xff] }
 0x7e4   : > { %v6484_v55 = vmax.f32 %v6452_v43, 0.0  ;;  %v6217_v1 = vpop.permute.xlu1 %6216 }
 0x7e5   : > { %v6423_v50 = vsel %vm3602_vm12, %v2159_v30, %v6217_v1 }
 0x7e6   : > { %7620 = vmatprep.mubr.msk.f32.mxu1 %vm1597_vm3, %v6484_v55  ;;  %v6215_v46 = vpop.permute.xlu0 %6214  ;;  %v15051_v55 = vld [vmem:[#allocation27_spill] sm:$0xff] }
 0x7e7   : > { %7621 = vmatmul.mubr.msk.f32.gmra.mxu1 %vm1597_vm3, %v6485_v58  ;;  %v6422_v13 = vsel %vm3602_vm12, %v2158_v37, %v6215_v46  ;;  %v2089_v58 = vadd.f32 %v13680_v57, %v15051_v55  ;;  %v4200_v46 = vmax.f32 %v4166_v3, 0.0 }
 0x7e9   : > { %v2163_v20 = vmax.f32 %v2089_v58, 0.0 }
 0x7f4   : > { %v7585_v27 = vpop.f32.mrf.mxu0 }
 0x7f5   : > { %v6085_v35 = vadd.f32 %v7585_v27, %v13449_v39 }
 0x7f6   : > { %v6079_v10 = vpop.f32.mrf.mxu0 }
 0x7f7   : > { %v6143_v0 = vmax.f32 %v6085_v35, 0.0  ;;  %v6080_v33 = vadd.f32 %v13449_v39, %v6079_v10  ;;  %v15052_v35 = vld [vmem:[#allocation76_spill] sm:$0xff] }
 0x7f8   : > { %v2084_v10 = vadd.f32 %v13680_v57, %v15052_v35 }
 0x7f9   : > { %v6142_v28 = vmax.f32 %v6080_v33, 0.0  ;;  %6360 = vrot.lane.b32.xlu1 %v6143_v0, %s8271_s23 }
 0x7fb   : > { %6358 = vrot.lane.b32.xlu0 %v6142_v28, %s8271_s23  ;;  %v2162_v28 = vmax.f32 %v2084_v10, 0.0 }
 0x7fc   : > { %v6345_v62 = vpop.permute.xlu1 %6344 }
 0x7fd   : > { %6236 = vrot.lane.b32.xlu1 %v4196_v32, %s8270_s17  ;;  %v6455_v24 = vsel %vm3635_vm13, %v6423_v50, %v6345_v62  ;;  %v4199_v62 = vmax.f32 %v4161_v6, 0.0 }
 0x7fe   : > { %v6343_v17 = vpop.permute.xlu0 %6342  ;;  %v6487_v12 = vmax.f32 %v6455_v24, 0.0 }
 0x7ff   : > { %v6454_v36 = vsel %vm3635_vm13, %v6422_v13, %v6343_v17  ;;  %6234 = vrot.lane.b32.xlu0 %v4195_v52, %s8270_s17 }
 0x800   : > { %v6486_v4 = vmax.f32 %v6454_v36, 0.0  ;;  %v6221_v8 = vpop.permute.xlu1 %6220 }
 0x801   : > { %v6425_v48 = vsel %vm3602_vm12, %v2161_v51, %v6221_v8 }
 0x802   : > { %7623 = vmatprep.mubr.msk.f32.mxu1 %vm1597_vm3, %v6486_v4  ;;  %v6219_v19 = vpop.permute.xlu0 %6218 }
 0x803   : > { %7624 = vmatmul.mubr.msk.f32.gmra.mxu1 %vm1597_vm3, %v6487_v12 }
 0x810   : > { %v7588_v38 = vpop.f32.mrf.mxu0 }
 0x811   : > { %v6095_v60 = vadd.f32 %v7588_v38, %v13449_v39  ;;  %v15054_v38 = vld [vmem:[#allocation20_spill] sm:$0xff] }
 0x812   : > { %v6089_v23 = vpop.f32.mrf.mxu0 }
 0x813   : > { %v6145_v25 = vmax.f32 %v6095_v60, 0.0  ;;  %v6090_v44 = vadd.f32 %v13449_v39, %v6089_v23  ;;  %v6424_v39 = vsel %vm3602_vm12, %v2160_v59, %v6219_v19  ;;  %v2099_v60 = vadd.f32 %v13680_v57, %v15054_v38  ;;  %v15055_v23 = vld [vmem:[#allocation68_spill] sm:$0xff] }
 0x814   : > { %v2094_v21 = vadd.f32 %v13680_v57, %v15055_v23 }
 0x815   : > { %v6144_v14 = vmax.f32 %v6090_v44, 0.0  ;;  %6364 = vrot.lane.b32.xlu1 %v6145_v25, %s8271_s23  ;;  %v2165_v56 = vmax.f32 %v2099_v60, 0.0 }
 0x816   : > { %v2164_v18 = vmax.f32 %v2094_v21, 0.0 }
 0x817   : > { %6362 = vrot.lane.b32.xlu0 %v6144_v14, %s8271_s23 }
 0x818   : > { %v6349_v26 = vpop.permute.xlu1 %6348 }
 0x819   : > { %6240 = vrot.lane.b32.xlu1 %v4198_v2, %s8270_s17  ;;  %v6457_v9 = vsel %vm3635_vm13, %v6425_v48, %v6349_v26  ;;  %v13903_v2 = vld [vmem:[%s14023_s12] ss:$0 sm:$0xff] }
 0x81a   : > { %v6347_v7 = vpop.permute.xlu0 %6346  ;;  %v6489_v34 = vmax.f32 %v6457_v9, 0.0 }
 0x81b   : > { %v6456_v5 = vsel %vm3635_vm13, %v6424_v39, %v6347_v7  ;;  %6238 = vrot.lane.b32.xlu0 %v4197_v15, %s8270_s17 }
 0x81c   : > { %v6488_v42 = vmax.f32 %v6456_v5, 0.0  ;;  %v6225_v11 = vpop.permute.xlu1 %6224 }
 0x81d   : > { %v6427_v37 = vsel %vm3602_vm12, %v2163_v20, %v6225_v11 }
 0x81e   : > { %7626 = vmatprep.mubr.msk.f32.mxu1 %vm1597_vm3, %v6488_v42  ;;  %v6223_v29 = vpop.permute.xlu0 %6222  ;;  %v15056_v42 = vld [vmem:[#allocation28_spill] sm:$0xff] }
 0x81f   : > { %7627 = vmatmul.mubr.msk.f32.gmra.mxu1 %vm1597_vm3, %v6489_v34  ;;  %v6426_v52 = vsel %vm3602_vm12, %v2162_v28, %v6223_v29  ;;  %v2109_v34 = vadd.f32 %v13680_v57, %v15056_v42 }
 0x821   : > { %v2167_v35 = vmax.f32 %v2109_v34, 0.0  ;;  %v15062_v34 = vld [vmem:[#allocation57_spill] sm:$0xff] }
 0x82c   : > { %v7591_v31 = vpop.f32.mrf.mxu0 }
 0x82d   : > { %v6105_v43 = vadd.f32 %v8252_v53, %v7591_v31  ;;  %v15057_v31 = vld [vmem:[#allocation77_spill] sm:$0xff] }
 0x82e   : > { %v6099_v27 = vpop.f32.mrf.mxu0 }
 0x82f   : > { %v6147_v47 = vmax.f32 %v6105_v43, 0.0  ;;  %v6100_v0 = vadd.f32 %v8252_v53, %v6099_v27 }
 0x830   : > { %v7594_v33 = vpop.f32.mrf.mxu0 }
 0x831   : > { %v6146_v1 = vmax.f32 %v6100_v0, 0.0  ;;  %6368 = vrot.lane.b32.xlu1 %v6147_v47, %s8271_s23  ;;  %v6115_v30 = vadd.f32 %v8252_v53, %v7594_v33 }
 0x832   : > { %v6109_v63 = vpop.f32.mrf.mxu0 }
 0x833   : > { %v6353_v32 = vpop.permute.xlu1 %6352  ;;  %6366 = vrot.lane.b32.xlu0 %v6146_v1, %s8271_s23  ;;  %v6110_v50 = vadd.f32 %v8252_v53, %v6109_v63  ;;  %v6149_v17 = vmax.f32 %v6115_v30, 0.0  ;;  %v2104_v53 = vadd.f32 %v13680_v57, %v15057_v31  ;;  %v2139_v31 = vadd.f32 %v13680_v57, %v15062_v34 }
 0x834   : > { %v6459_v16 = vsel %vm3635_vm13, %v6427_v37, %v6353_v32 }
 0x835   : > { %6244 = vrot.lane.b32.xlu1 %v4200_v46, %s8270_s17  ;;  %v6351_v13 = vpop.permute.xlu0 %6350  ;;  %v6491_v4 = vmax.f32 %v6459_v16, 0.0  ;;  %v6148_v12 = vmax.f32 %v6110_v50, 0.0  ;;  %v2166_v10 = vmax.f32 %v2104_v53, 0.0  ;;  %v15058_v16 = vld [vmem:[#allocation23_spill] sm:$0xff] }
 0x836   : > { %v6458_v24 = vsel %vm3635_vm13, %v6426_v52, %v6351_v13  ;;  %v2119_v13 = vadd.f32 %v13680_v57, %v15058_v16 }
 0x837   : > { %v6490_v36 = vmax.f32 %v6458_v24, 0.0  ;;  %6242 = vrot.lane.b32.xlu0 %v4199_v62, %s8270_s17  ;;  %v6229_v40 = vpop.permute.xlu1 %6228  ;;  %v15059_v24 = vld [vmem:[#allocation69_spill] sm:$0xff]  ;;  %s509_s17 = scalar_lea.vmem %s14024_s13, %s7274_s16 }
 0x838   : > { %v6429_v44 = vsel %vm3602_vm12, %v2165_v56, %v6229_v40  ;;  %v7601_v41 = vpop.f32.mrf.mxu1  ;;  %v2169_v38 = vmax.f32 %v2119_v13, 0.0 }
 0x839   : > { %6372 = vrot.lane.b32.xlu1 %v6149_v17, %s8271_s23  ;;  %7629 = vmatprep.mubr.msk.f32.mxu1 %vm1597_vm3, %v6490_v36  ;;  %v6227_v22 = vpop.permute.xlu0 %6226  ;;  %v6679_v15 = vadd.f32 %v7601_v41, %v13903_v2  ;;  %v2114_v17 = vadd.f32 %v13680_v57, %v15059_v24 }
 0x83a   : > { %7630 = vmatmul.mubr.msk.f32.gmra.mxu1 %vm1597_vm3, %v6491_v4  ;;  %v6428_v49 = vsel %vm3602_vm12, %v2164_v18, %v6227_v22  ;;  %v6673_v19 = vpop.f32.mrf.mxu1 }
 0x83b   : > { %6370 = vrot.lane.b32.xlu0 %v6148_v12, %s8271_s23  ;;  %v6674_v59 = vadd.f32 %v13903_v2, %v6673_v19  ;;  %v2168_v60 = vmax.f32 %v2114_v17, 0.0  ;;  %v15061_v19 = vld [vmem:[#allocation13_spill] sm:$0xff] }
 0x840   : > { %v7604_v26 = vpop.f32.mrf.mxu1 }
 0x841   : > { %v6689_v7 = vadd.f32 %v7604_v26, %v13903_v2 }
 0x842   : > { %v6683_v48 = vpop.f32.mrf.mxu1 }
 0x843   : > { %v6684_v39 = vadd.f32 %v13903_v2, %v6683_v48 }
 0x848   : > { %v7607_v9 = vpop.f32.mrf.mxu1 }
 0x849   : > { %v6699_v54 = vadd.f32 %v7607_v9, %v13903_v2 }
 0x84a   : > { %v6693_v5 = vpop.f32.mrf.mxu1 }
 0x84b   : > { %v6694_v43 = vadd.f32 %v13903_v2, %v6693_v5 }
 0x84f   : > { %v6357_v25 = vpop.permute.xlu1 %6356 }
 0x850   : > { %v6461_v8 = vsel %vm3635_vm13, %v6429_v44, %v6357_v25  ;;  %v7610_v58 = vpop.f32.mrf.mxu1 }
 0x851   : > { %v6355_v45 = vpop.permute.xlu0 %6354  ;;  %v6493_v51 = vmax.f32 %v6461_v8, 0.0  ;;  %v6709_v46 = vadd.f32 %v7610_v58, %v13903_v2 }
 0x852   : > { %v6460_v61 = vsel %vm3635_vm13, %v6428_v49, %v6355_v45  ;;  %v6703_v11 = vpop.f32.mrf.mxu1 }
 0x853   : > { %v6492_v14 = vmax.f32 %v6460_v61, 0.0  ;;  %v6233_v55 = vpop.permute.xlu1 %6232  ;;  %v6704_v1 = vadd.f32 %v13903_v2, %v6703_v11  ;;  %v15060_v61 = vld [vmem:[#allocation52_spill] sm:$0xff]  ;;  %v2173_v11 = vmax.f32 %v2139_v31, 0.0 }
 0x854   : > { %v6431_v47 = vsel %vm3602_vm12, %v2167_v35, %v6233_v55 }
 0x855   : > { %7632 = vmatprep.mubr.msk.f32.mxu1 %vm1597_vm3, %v6492_v14  ;;  %v6231_v27 = vpop.permute.xlu0 %6230  ;;  %v2129_v14 = vadd.f32 %v13680_v57, %v15060_v61 }
 0x856   : > { %7633 = vmatmul.mubr.msk.f32.gmra.mxu1 %vm1597_vm3, %v6493_v51  ;;  %v6430_v0 = vsel %vm3602_vm12, %v2166_v10, %v6231_v27  ;;  %v2124_v51 = vadd.f32 %v13680_v57, %v15061_v19 }
 0x858   : > { %v7613_v63 = vpop.f32.mrf.mxu1  ;;  %v2170_v48 = vmax.f32 %v2124_v51, 0.0 }
 0x859   : > { %6832 = vxpose.xlu0.b32.start [1/16] (narrow) %v6674_v59, 32  ;;  %v6719_v62 = vadd.f32 %v7613_v63, %v13903_v2 }
 0x85a   : > { %v6713_v30 = vpop.f32.mrf.mxu1 }
 0x85b   : > { %v6714_v32 = vadd.f32 %v13903_v2, %v6713_v30 }
 0x85d   : > { %6833 = vxpose.xlu0.b32.cont [2/16] (narrow) %v6679_v15, 32  ;;  %v2171_v15 = vmax.f32 %v2129_v14, 0.0 }
 0x861   : > { %6834 = vxpose.xlu0.b32.cont [3/16] (narrow) %v6684_v39, 32 }
 0x865   : > { %6835 = vxpose.xlu0.b32.cont [4/16] (narrow) %v6689_v7, 32 }
 0x869   : > { %6836 = vxpose.xlu0.b32.cont [5/16] (narrow) %v6694_v43, 32  ;;  %v15063_v43 = vld [vmem:[#allocation55_spill] sm:$0xff] }
 0x86a   : > { %v2134_v55 = vadd.f32 %v13680_v57, %v15063_v43 }
 0x86b   : > { %v6361_v3 = vpop.permute.xlu1 %6360 }
 0x86c   : > { %v6463_v33 = vsel %vm3635_vm13, %v6431_v47, %v6361_v3 }
 0x86d   : > { %v6359_v6 = vpop.permute.xlu0 %6358  ;;  %6837 = vxpose.xlu0.b32.cont [6/16] (narrow) %v6699_v54, 32  ;;  %v6495_v28 = vmax.f32 %v6463_v33, 0.0 }
 0x86e   : > { %v6462_v29 = vsel %vm3635_vm13, %v6430_v0, %v6359_v6  ;;  %v2172_v0 = vmax.f32 %v2134_v55, 0.0 }
 0x86f   : > { %v6494_v20 = vmax.f32 %v6462_v29, 0.0  ;;  %v7616_v37 = vpop.f32.mrf.mxu1  ;;  %v6237_v4 = vpop.permute.xlu1 %6236 }
 0x870   : > { %v6729_v36 = vadd.f32 %v7616_v37, %v13903_v2  ;;  %v6433_v21 = vsel %vm3602_vm12, %v2169_v38, %v6237_v4 }
 0x871   : > { %7635 = vmatprep.mubr.msk.f32.mxu1 %vm1597_vm3, %v6494_v20  ;;  %6838 = vxpose.xlu0.b32.cont [7/16] (narrow) %v6704_v1, 32  ;;  %v6723_v52 = vpop.f32.mrf.mxu1  ;;  %v6235_v12 = vpop.permute.xlu0 %6234 }
 0x872   : > { %7636 = vmatmul.mubr.msk.f32.gmra.mxu1 %vm1597_vm3, %v6495_v28  ;;  %v6724_v50 = vadd.f32 %v13903_v2, %v6723_v52  ;;  %v6432_v40 = vsel %vm3602_vm12, %v2168_v60, %v6235_v12 }
 0x875   : > { %6839 = vxpose.xlu0.b32.cont [8/16] (narrow) %v6709_v46, 32 }
 0x879   : > { %6840 = vxpose.xlu0.b32.cont [9/16] (narrow) %v6714_v32, 32 }
 0x87d   : > { %6841 = vxpose.xlu0.b32.cont [10/16] (narrow) %v6719_v62, 32 }
 0x881   : > { %6842 = vxpose.xlu0.b32.cont [11/16] (narrow) %v6724_v50, 32 }
 0x885   : > { %6843 = vxpose.xlu0.b32.cont [12/16] (narrow) %v6729_v36, 32 }
 0x887   : > { %v6365_v23 = vpop.permute.xlu1 %6364 }
 0x888   : > { %v6465_v22 = vsel %vm3635_vm13, %v6433_v21, %v6365_v23 }
 0x889   : > { %v6363_v56 = vpop.permute.xlu0 %6362  ;;  %v6497_v41 = vmax.f32 %v6465_v22, 0.0 }
 0x88a   : > { %v6464_v18 = vsel %vm3635_vm13, %v6432_v40, %v6363_v56 }
 0x88b   : > { %v6496_v25 = vmax.f32 %v6464_v18, 0.0  ;;  %v7619_v44 = vpop.f32.mrf.mxu1  ;;  %v6241_v59 = vpop.permute.xlu1 %6240 }
 0x88c   : > { %v6739_v45 = vadd.f32 %v7619_v44, %v13903_v2  ;;  %v6435_v9 = vsel %vm3602_vm12, %v2171_v15, %v6241_v59 }
 0x88d   : > { %v6733_v49 = vpop.f32.mrf.mxu1  ;;  %7638 = vmatprep.mubr.msk.f32.mxu1 %vm1597_vm3, %v6496_v25  ;;  %v6239_v26 = vpop.permute.xlu0 %6238 }
 0x88e   : > { %v6734_v8 = vadd.f32 %v13903_v2, %v6733_v49  ;;  %7639 = vmatmul.mubr.msk.f32.gmra.mxu1 %vm1597_vm3, %v6497_v41  ;;  %v6434_v7 = vsel %vm3602_vm12, %v2170_v48, %v6239_v26 }
 0x890   : > { %6844 = vxpose.xlu0.b32.cont [13/16] (narrow) %v6734_v8, 32 }
 0x894   : > { %6845 = vxpose.xlu0.b32.cont [14/16] (narrow) %v6739_v45, 32 }
 0x8a3   : > { %v6369_v39 = vpop.permute.xlu1 %6368 }
 0x8a4   : > { %v6467_v5 = vsel %vm3635_vm13, %v6435_v9, %v6369_v39 }
 0x8a5   : > { %v6367_v42 = vpop.permute.xlu0 %6366  ;;  %v6499_v10 = vmax.f32 %v6467_v5, 0.0 }
 0x8a6   : > { %v6466_v53 = vsel %vm3635_vm13, %v6434_v7, %v6367_v42 }
 0x8a7   : > { %v6498_v58 = vmax.f32 %v6466_v53, 0.0  ;;  %v7622_v27 = vpop.f32.mrf.mxu1  ;;  %v6245_v35 = vpop.permute.xlu1 %6244 }
 0x8a8   : > { %v6437_v6 = vsel %vm3602_vm12, %v2173_v11, %v6245_v35  ;;  %v6749_v20 = vadd.f32 %v7622_v27, %v13903_v2 }
 0x8a9   : > { %v6743_v54 = vpop.f32.mrf.mxu1  ;;  %v6243_v3 = vpop.permute.xlu0 %6242  ;;  %7641 = vmatprep.mubr.msk.f32.mxu1 %vm1597_vm3, %v6498_v58 }
 0x8aa   : > { %v6744_v47 = vadd.f32 %v13903_v2, %v6743_v54  ;;  %7642 = vmatmul.mubr.msk.f32.gmra.mxu1 %vm1597_vm3, %v6499_v10  ;;  %v6436_v57 = vsel %vm3602_vm12, %v2172_v0, %v6243_v3 }
 0x8ab   : > { %v6373_v33 = vpop.permute.xlu1 %6372 }
 0x8ac   : > { %6846 = vxpose.xlu0.b32.cont [15/16] (narrow) %v6744_v47, 32  ;;  %v6469_v29 = vsel %vm3635_vm13, %v6437_v6, %v6373_v33 }
 0x8ad   : > { %v6371_v1 = vpop.permute.xlu0 %6370  ;;  %v6501_v46 = vmax.f32 %v6469_v29, 0.0 }
 0x8ae   : > { %v6468_v63 = vsel %vm3635_vm13, %v6436_v57, %v6371_v1 }
 0x8af   : > { %v6500_v28 = vmax.f32 %v6468_v63, 0.0 }
 0x8b0   : > { %6847 = vxpose.xlu0.b32.end [16/16] (narrow) %v6749_v20, 32 }
 0x8b1   : > { %7644 = vmatprep.mubr.msk.f32.mxu1 %vm1597_vm3, %v6500_v28 }
 0x8b2   : > { %7645 = vmatmul.mubr.msk.f32.gmra.mxu1 %vm1597_vm3, %v6501_v46 }
 0x8c3   : > { %v7625_v30 = vpop.f32.mrf.mxu1 }
 0x8c4   : > { %v6759_v62 = vadd.f32 %v7625_v30, %v13903_v2 }
 0x8c5   : > { %v6753_v32 = vpop.f32.mrf.mxu1 }
 0x8c6   : > { %v6754_v37 = vadd.f32 %v13903_v2, %v6753_v32 }
 0x8c8   : > { %6864 = vxpose.xlu1.b32.start [1/16] (narrow) %v6754_v37, 32 }
 0x8cc   : > { %6865 = vxpose.xlu1.b32.cont [2/16] (narrow) %v6759_v62, 32 }
 0x8df   : > { %v7628_v52 = vpop.f32.mrf.mxu1 }
 0x8e0   : > { %v6769_v13 = vadd.f32 %v7628_v52, %v13903_v2 }
 0x8e1   : > { %v6763_v50 = vpop.f32.mrf.mxu1 }
 0x8e2   : > { %v6764_v16 = vadd.f32 %v13903_v2, %v6763_v50 }
 0x8e4   : > { %6866 = vxpose.xlu1.b32.cont [3/16] (narrow) %v6764_v16, 32 }
 0x8e8   : > { %6867 = vxpose.xlu1.b32.cont [4/16] (narrow) %v6769_v13, 32 }
 0x8f0   : > { %v6848_v56 = vpop.trf.xlu0 }
 0x8f1   : > { %v6903_v25 = vrot.slane %v6848_v56, 4 }
 0x8f4   : > { %v6849_v44 = vpop.trf.xlu0 }
 0x8f5   : > { %v6904_v41 = vrot.slane %v6849_v44, 4 }
 0x8f7   : > { %v6905_v49 = vsel %vm3940_vm10, %v6903_v25, %v6904_v41 }
 0x8f8   : > { %6911 = vst [vmem:[%s13976_s20] sm:$0xff] %v6905_v49  ;;  %v6850_v8 = vpop.trf.xlu0 }
 0x8f9   : > { %v6917_v45 = vrot.slane %v6850_v8, 4 }
 0x8fa   : > { %v7631_v24 = vpop.f32.mrf.mxu1 }
 0x8fb   : > { %v6779_v4 = vadd.f32 %v7631_v24, %v13903_v2  ;;  %v6918_v61 = vsel %vm3940_vm10, %v6904_v41, %v6917_v45 }
 0x8fc   : > { %v6773_v17 = vpop.f32.mrf.mxu1  ;;  %6931 = vst [vmem:[%s13984_s28] sm:$0xff] %v6918_v61  ;;  %v6851_v14 = vpop.trf.xlu0 }
 0x8fd   : > { %v6774_v36 = vadd.f32 %v13903_v2, %v6773_v17  ;;  %v6921_v19 = vrot.slane %v6851_v14, 4 }
 0x8ff   : > { %6868 = vxpose.xlu1.b32.cont [5/16] (narrow) %v6774_v36, 32  ;;  %v6922_v51 = vsel %vm3940_vm10, %v6917_v45, %v6921_v19  ;;  %6935 = vst [vmem:[%s13984_s28 + $0x20] sm:$0xf] %v6921_v19 }
 0x900   : > { %6933 = vst [vmem:[%s13984_s28 + $0x10] sm:$0xff] %v6922_v51 }
 0x903   : > { %6869 = vxpose.xlu1.b32.cont [6/16] (narrow) %v6779_v4, 32 }
 0x916   : > { %v7634_v12 = vpop.f32.mrf.mxu1 }
 0x917   : > { %v6789_v23 = vadd.f32 %v7634_v12, %v13903_v2 }
 0x918   : > { %v6783_v38 = vpop.f32.mrf.mxu1 }
 0x919   : > { %v6784_v60 = vadd.f32 %v13903_v2, %v6783_v38 }
 0x91b   : > { %6870 = vxpose.xlu1.b32.cont [7/16] (narrow) %v6784_v60, 32 }
 0x91f   : > { %6871 = vxpose.xlu1.b32.cont [8/16] (narrow) %v6789_v23, 32 }
 0x932   : > { %v7637_v21 = vpop.f32.mrf.mxu1 }
 0x933   : > { %v6799_v18 = vadd.f32 %v7637_v21, %v13903_v2 }
 0x934   : > { %v6793_v40 = vpop.f32.mrf.mxu1 }
 0x935   : > { %v6794_v22 = vadd.f32 %v13903_v2, %v6793_v40 }
 0x937   : > { %6872 = vxpose.xlu1.b32.cont [9/16] (narrow) %v6794_v22, 32 }
 0x93b   : > { %6873 = vxpose.xlu1.b32.cont [10/16] (narrow) %v6799_v18, 32 }
 0x94e   : > { %v7640_v59 = vpop.f32.mrf.mxu1 }
 0x94f   : > { %v6809_v48 = vadd.f32 %v7640_v59, %v13903_v2 }
 0x950   : > { %v6803_v26 = vpop.f32.mrf.mxu1 }
 0x951   : > { %v6804_v15 = vadd.f32 %v13903_v2, %v6803_v26 }
 0x953   : > { %6874 = vxpose.xlu1.b32.cont [11/16] (narrow) %v6804_v15, 32 }
 0x957   : > { %6875 = vxpose.xlu1.b32.cont [12/16] (narrow) %v6809_v48, 32 }
 0x96a   : > { %v7643_v39 = vpop.f32.mrf.mxu1 }
 0x96b   : > { %v6819_v5 = vadd.f32 %v7643_v39, %v13903_v2 }
 0x96c   : > { %v6813_v9 = vpop.f32.mrf.mxu1 }
 0x96d   : > { %v6814_v7 = vadd.f32 %v13903_v2, %v6813_v9 }
 0x96f   : > { %6876 = vxpose.xlu1.b32.cont [13/16] (narrow) %v6814_v7, 32 }
 0x972   : > { %v7646_v42 = vpop.f32.mrf.mxu1 }
 0x973   : > { %6877 = vxpose.xlu1.b32.cont [14/16] (narrow) %v6819_v5, 32  ;;  %v6829_v53 = vadd.f32 %v7646_v42, %v13903_v2 }
 0x974   : > { %v6823_v34 = vpop.f32.mrf.mxu1 }
 0x975   : > { %v6824_v31 = vadd.f32 %v13903_v2, %v6823_v34 }
 0x977   : > { %6878 = vxpose.xlu1.b32.cont [15/16] (narrow) %v6824_v31, 32 }
 0x97b   : > { %6879 = vxpose.xlu1.b32.end [16/16] (narrow) %v6829_v53, 32 }
 0x9bb   : > { %v6880_v43 = vpop.trf.xlu1 }
 0x9bc   : > { %v6898_v55 = vcombine.low %v6848_v56, %v6880_v43  ;;  %v6906_v27 = vrot.slane %v6880_v43, 4 }
 0x9be   : > { %6900 = vst [vmem:[%s509_s17] sm:$0xff] %v6898_v55 }
 0x9bf   : > { %v6881_v58 = vpop.trf.xlu1 }
 0x9c0   : > { %v6907_v35 = vrot.slane %v6881_v58, 4 }
 0x9c2   : > { %v6908_v10 = vsel %vm3940_vm10, %v6906_v27, %v6907_v35 }
 0x9c3   : > { %6912 = vst [vmem:[%s13976_s20 + $0x8] sm:$0xff] %v6908_v10  ;;  %v6882_v54 = vpop.trf.xlu1 }
 0x9c4   : > { %v6919_v3 = vrot.slane %v6882_v54, 4 }
 0x9c6   : > { %v6920_v2 = vsel %vm3940_vm10, %v6907_v35, %v6919_v3 }
 0x9c7   : > { %6932 = vst [vmem:[%s13984_s28 + $0x8] sm:$0xff] %v6920_v2  ;;  %v6883_v11 = vpop.trf.xlu1 }
 0x9c8   : > { %v6923_v47 = vrot.slane %v6883_v11, 4 }
 0x9ca   : > { %v6924_v0 = vsel %vm3940_vm10, %v6919_v3, %v6923_v47  ;;  %6936 = vst [vmem:[%s13984_s28 + $0x28] sm:$0xf] %v6923_v47 }
 0x9cb   : > { %6934 = vst [vmem:[%s13984_s28 + $0x18] sm:$0xff] %v6924_v0 }
 0x9cc PF: > { %s26_s18 = sadd.s32 1, %s8259_s18  }
 0x9cd   : > { %p23_p4 = scmp.ge.s32.totalorder %s26_s18, 4  }
 0x9cf   :  { %25 = sbr.rel (!%p23_p4) target bundleno = 1 (0x1), region = 126 }

</bundles_post_ra>
